<compile_context>
chip_gen: v7x
topology: tpu7x:2x2x1
jax: 0.10.0
libtpu: 0.0.40
codegen_flags: <defaults>
</compile_context>

<pallas_src>
import math

import jax
import jax.numpy as jnp
from jax.experimental import pallas as pl
from jax.experimental.pallas import tpu as pltpu

BN_EPS = 1e-5
_COMPUTE_DTYPE = jnp.bfloat16          # MXU inputs / stored activations


def _round_up(x, m):
    return ((x + m - 1) // m) * m


# ----------------------------------------------------------------------------
# Generation-aware VMEM budgets (v7x: 64 MiB per TensorCore, v5e/v6e: 128 MiB)
# ----------------------------------------------------------------------------
def _detect_budgets():
    try:
        kind = jax.devices()[0].device_kind.lower()
    except Exception:
        kind = ""
    is_v7 = "v7" in kind
    if is_v7:
        return 48 * 1024 * 1024, 22 * 1024 * 1024, True
    if "v2" in kind or "v3" in kind:
        return 12 * 1024 * 1024, 5 * 1024 * 1024, False
    if "v5" in kind or "v6" in kind:
        return 96 * 1024 * 1024, 48 * 1024 * 1024, False
    return 48 * 1024 * 1024, 20 * 1024 * 1024, False


_VMEM_LIMIT, _VMEM_TILE_BUDGET, _IS_V7 = _detect_budgets()


# ----------------------------------------------------------------------------
# Fused (im2col) matmul + BN scale/bias (+ residual) (+ ReLU)
# ----------------------------------------------------------------------------
def _make_matmul_kernel(relu, has_res):
    def kernel(*refs):
        if has_res:
            x_ref, w_ref, s_ref, b_ref, r_ref, o_ref, acc_ref = refs
        else:
            x_ref, w_ref, s_ref, b_ref, o_ref, acc_ref = refs
            r_ref = None
        k = pl.program_id(1)

        @pl.when(k == 0)
        def _():
            acc_ref[...] = jnp.zeros_like(acc_ref)

        acc_ref[...] += jnp.dot(x_ref[...], w_ref[...],
                                preferred_element_type=jnp.float32)

        @pl.when(k == pl.num_programs(1) - 1)
        def _():
            y = acc_ref[...] * s_ref[...] + b_ref[...]
            if has_res:
                y = y + r_ref[...].astype(jnp.float32)
            if relu:
                y = jnp.maximum(y, 0.0)
            o_ref[...] = y.astype(o_ref.dtype)

    return kernel


def _tile_cost_bytes(tm, tk, cout, has_res, out_bytes):
    c = 2 * tm * tk * 2              # bf16 activation tile, double buffered
    c += 2 * tk * cout * 2           # bf16 weight tile, double buffered
    c += 2 * tm * cout * out_bytes   # output tile, double buffered
    if has_res:
        c += 2 * tm * cout * 2       # residual tile
    c += tm * cout * 4               # f32 accumulator scratch
    return c


_TM_CANDIDATES = (2048, 1024, 512, 256, 128, 64, 32, 16, 8)


def _choose_tm(M, tk, cout, has_res, out_bytes):
    """Largest M tile that fits the per-step VMEM budget; on v7x prefer a tm
    that still yields >= 2 M tiles so both TensorCores get work."""
    m8 = _round_up(M, 8)
    fits = [t for t in _TM_CANDIDATES
            if t <= m8 and _tile_cost_bytes(t, tk, cout, has_res,
                                            out_bytes) <= _VMEM_TILE_BUDGET]
    if not fits:
        return 8
    tm = fits[0]
    if _IS_V7 and -(-M // tm) < 2:
        for t in fits:
            if t >= 128 and -(-M // t) >= 2:
                tm = t
                break
    return tm


def _matmul_bn_fused(x2d, w2d, scale, bias, residual, relu, out_dtype):
    """[M, K] @ [K, Cout] with fused BN scale/bias (+residual) (+ReLU).

    K is padded to a multiple of 128 (lane-dense MXU feed) and tiled along the
    reduction grid axis; accumulation stays in an f32 VMEM scratch.  Padded
    M/K regions are zero and inert (sliced off at the end).
    scale/bias are (1, Cout) float32.
    """
    M, K = x2d.shape
    Cout = w2d.shape[1]
    has_res = residual is not None

    Kp = _round_up(K, 128)
    if Kp <= 4096:                      # single K step
        tk = Kp
    else:
        tk = 2048
        Kp = _round_up(K, tk)
    out_bytes = jnp.dtype(out_dtype).itemsize
    tm = _choose_tm(M, tk, Cout, has_res, out_bytes)
    Mp = _round_up(M, tm)

    if Kp != K:
        x2d = jnp.pad(x2d, ((0, 0), (0, Kp - K)))
        w2d = jnp.pad(w2d, ((0, Kp - K), (0, 0)))
    if Mp != M:
        x2d = jnp.pad(x2d, ((0, Mp - M), (0, 0)))
        if has_res:
            residual = jnp.pad(residual, ((0, Mp - M), (0, 0)))

    in_specs = [
        pl.BlockSpec((tm, tk), lambda i, k: (i, k)),
        pl.BlockSpec((tk, Cout), lambda i, k: (k, 0)),
        pl.BlockSpec((1, Cout), lambda i, k: (0, 0)),
        pl.BlockSpec((1, Cout), lambda i, k: (0, 0)),
    ]
    args = [x2d, w2d, scale, bias]
    if has_res:
        in_specs.append(pl.BlockSpec((tm, Cout), lambda i, k: (i, 0)))
        args.append(residual)

    out = pl.pallas_call(
        _make_matmul_kernel(relu, has_res),
        out_shape=jax.ShapeDtypeStruct((Mp, Cout), out_dtype),
        grid_spec=pltpu.PrefetchScalarGridSpec(
            num_scalar_prefetch=0,
            grid=(Mp // tm, Kp // tk),
            in_specs=in_specs,
            out_specs=pl.BlockSpec((tm, Cout), lambda i, k: (i, 0)),
            scratch_shapes=[pltpu.VMEM((tm, Cout), jnp.float32)]),
        compiler_params=pltpu.CompilerParams(
            dimension_semantics=("parallel", "arbitrary"),
            vmem_limit_bytes=_VMEM_LIMIT),
    )(*args)
    if Mp != M:
        out = out[:M]
    return out


# ----------------------------------------------------------------------------
# Conv glue: im2col with taps folded into the contraction dimension
# (used only for conv1, the 1x1x1 downsamples and the stride-2 3x3x3 convs)
# ----------------------------------------------------------------------------
def _im2col(x, ksize, stride, padding):
    """x: [N,D,H,W,C] -> ([M, kd*kh*kw*C] patches, output spatial dims)."""
    N, D, H, W, C = x.shape
    kd, kh, kw = ksize
    sd, sh, sw = stride
    pd, ph, pw = padding
    xp = jnp.pad(x, ((0, 0), (pd, pd), (ph, ph), (pw, pw), (0, 0)))
    Do = (D + 2 * pd - kd) // sd + 1
    Ho = (H + 2 * ph - kh) // sh + 1
    Wo = (W + 2 * pw - kw) // sw + 1
    M = N * Do * Ho * Wo
    taps = []
    for it in range(kd):
        for ih in range(kh):
            for iw in range(kw):
                sl = xp[:, it:it + sd * Do:sd,
                        ih:ih + sh * Ho:sh,
                        iw:iw + sw * Wo:sw, :]
                taps.append(sl.reshape(M, C))
    patches = taps[0] if len(taps) == 1 else jnp.concatenate(taps, axis=1)
    return patches, (N, Do, Ho, Wo)


def conv3d_bn_im2col(x, w_mat, ksize, bn, stride, padding,
                     relu=False, residual=None):
    """x: [N,D,H,W,Cin] (bf16), w_mat: [K, Cout] bf16, bn = ((1,C), (1,C))."""
    Cout = w_mat.shape[1]
    patches, (N, Do, Ho, Wo) = _im2col(x, ksize, stride, padding)
    scale, bias = bn
    res2d = None
    if residual is not None:
        res2d = residual.reshape(-1, Cout)
    out = _matmul_bn_fused(patches, w_mat, scale, bias, res2d, relu,
                           _COMPUTE_DTYPE)
    return out.reshape(N, Do, Ho, Wo, Cout)


# ----------------------------------------------------------------------------
# Direct stride-1 3x3x3 conv (no HBM im2col): three D-shifted halo planes,
# H/W taps folded into contiguous sublane slices, resident VMEM weights.
# ----------------------------------------------------------------------------
def _make_direct_conv_kernel(kd, kh, kw, Wp, Ho, relu, has_res):
    rows = Ho * Wp

    def kernel(*refs):
        x_refs = refs[:kd]
        w_ref = refs[kd]
        s_ref = refs[kd + 1]
        b_ref = refs[kd + 2]
        if has_res:
            r_ref = refs[kd + 3]
            o_ref = refs[kd + 4]
        else:
            o_ref = refs[kd + 3]

        cout = o_ref.shape[-1]
        acc = jnp.zeros((rows, cout), jnp.float32)
        for dz in range(kd):
            plane = x_refs[dz][0, 0]               # (Hp*Wp, Cin) bf16
            for dy in range(kh):
                for dx in range(kw):
                    start = dy * Wp + dx           # contiguous row window
                    patch = plane[start:start + rows, :]
                    tap = (dz * kh + dy) * kw + dx
                    acc = acc + jnp.dot(patch, w_ref[tap],
                                        preferred_element_type=jnp.float32)
        y = acc * s_ref[...] + b_ref[...]
        if has_res:
            y = y + r_ref[0, 0].astype(jnp.float32)
        if relu:
            y = jnp.maximum(y, 0.0)
        o_ref[0, 0] = y.astype(o_ref.dtype)

    return kernel


def conv3d_bn_direct(x, w_tap, bn, relu=False, residual=None):
    """3x3x3, stride 1, pad 1 conv + BN (+res) (+ReLU) without HBM im2col.

    H and W are padded by (1, 2) and flattened into one row axis so every
    (dy, dx) tap is a contiguous sublane slice of the padded plane; columns
    W..W+2 of each output row are garbage (they use wrapped/pad inputs) and
    are sliced off after the call.  The kd D-taps come from three D-shifted
    BlockSpecs; the [27, Cin, Cout] weight has a constant index_map (resident).
    """
    N, D, H, W, Cin = x.shape
    taps, _, Cout = w_tap.shape
    kd = kh = kw = 3
    xp = jnp.pad(x, ((0, 0), (1, 1), (1, 2), (1, 2), (0, 0)))
    Dp, Hp, Wp = D + 2, H + 3, W + 3
    Ho, Wo = H, W
    rows = Ho * Wp
    xf = xp.reshape(N, Dp, Hp * Wp, Cin)
    scale, bias = bn

    in_specs = [pl.BlockSpec((1, 1, Hp * Wp, Cin),
                             (lambda n, d, _t=t: (n, d + _t, 0, 0)))
                for t in range(kd)]
    args = [xf] * kd
    in_specs.append(pl.BlockSpec((taps, Cin, Cout), lambda n, d: (0, 0, 0)))
    args.append(w_tap)
    in_specs.append(pl.BlockSpec((1, Cout), lambda n, d: (0, 0)))
    args.append(scale)
    in_specs.append(pl.BlockSpec((1, Cout), lambda n, d: (0, 0)))
    args.append(bias)
    has_res = residual is not None
    if has_res:
        rp = jnp.pad(residual.astype(_COMPUTE_DTYPE),
                     ((0, 0), (0, 0), (0, 0), (0, Wp - Wo), (0, 0)))
        rp = rp.reshape(N, D, rows, Cout)
        in_specs.append(pl.BlockSpec((1, 1, rows, Cout),
                                     lambda n, d: (n, d, 0, 0)))
        args.append(rp)

    out = pl.pallas_call(
        _make_direct_conv_kernel(kd, kh, kw, Wp, Ho, relu, has_res),
        out_shape=jax.ShapeDtypeStruct((N, D, rows, Cout), _COMPUTE_DTYPE),
        grid_spec=pltpu.PrefetchScalarGridSpec(
            num_scalar_prefetch=0,
            grid=(N, D),
            in_specs=in_specs,
            out_specs=pl.BlockSpec((1, 1, rows, Cout),
                                   lambda n, d: (n, d, 0, 0))),
        compiler_params=pltpu.CompilerParams(
            dimension_semantics=("parallel", "parallel"),
            vmem_limit_bytes=_VMEM_LIMIT),
    )(*args)
    out = out.reshape(N, D, Ho, Wp, Cout)[:, :, :, :Wo, :]
    return out


def conv3x3x3_s1(x, w_tap, bn, relu=False, residual=None):
    """Dispatch a stride-1 3x3x3 conv to the direct kernel when the resident
    weight + halo planes fit VMEM; otherwise fall back to the im2col matmul."""
    taps, cin, cout = w_tap.shape
    N, D, H, W, _ = x.shape
    Hp, Wp = H + 3, W + 3
    need = (2 * taps * cin * cout * 2            # resident weight (2 buffers)
            + 3 * 2 * Hp * Wp * cin * 2          # three halo planes
            + 4 * H * Wp * cout * 2              # output (+residual) blocks
            + 2 * H * Wp * cout * 4)             # f32 accumulator / temps
    if need <= int(_VMEM_LIMIT * 0.9):
        return conv3d_bn_direct(x, w_tap, bn, relu=relu, residual=residual)
    # TODO(synk): oversized shapes fall back to the HBM im2col path.
    w_mat = w_tap.reshape(taps * cin, cout)
    return conv3d_bn_im2col(x, w_mat, (3, 3, 3), bn, stride=(1, 1, 1),
                            padding=(1, 1, 1), relu=relu, residual=residual)


# ----------------------------------------------------------------------------
# Max pool (1,3,3)/(1,2,2)/(0,1,1): parity split + in-kernel shifted maxima,
# many N*D slices per grid step.
# ----------------------------------------------------------------------------
def _maxpool_hw_kernel(p00_ref, p01_ref, p10_ref, p11_ref, o_ref):
    Ho, Wo = o_ref.shape[1], o_ref.shape[2]
    a00 = p00_ref[...]
    a01 = p01_ref[...]
    a10 = p10_ref[...]
    a11 = p11_ref[...]
    m = a00[:, :Ho, :Wo]
    for t in (a00[:, :Ho, 1:Wo + 1], a00[:, 1:Ho + 1, :Wo],
              a00[:, 1:Ho + 1, 1:Wo + 1],
              a01[:, :Ho, :Wo], a01[:, 1:Ho + 1, :Wo],
              a10[:, :Ho, :Wo], a10[:, :Ho, 1:Wo + 1],
              a11[:, :Ho, :Wo]):
        m = jnp.maximum(m, t)
    o_ref[...] = m


def _pick_block(total, per_item_bytes, budget):
    b = max(1, min(total, budget // max(per_item_bytes, 1)))
    while total % b:
        b -= 1
    return b


def maxpool_hw_3x3_s2(x):
    """MaxPool3d kernel (1,3,3), stride (1,2,2), padding (0,1,1)."""
    N, D, H, W, C = x.shape
    ND = N * D
    xp = jnp.pad(x.reshape(ND, H, W, C),
                 ((0, 0), (1, 1), (1, 1), (0, 0)),
                 constant_values=-jnp.inf)
    Hp, Wp = H + 2, W + 2
    Ho = (Hp - 3) // 2 + 1
    Wo = (Wp - 3) // 2 + 1
    parts = []
    for p in (0, 1):
        for q in (0, 1):
            t = xp[:, p::2, q::2, :]
            t = jnp.pad(t, ((0, 0),
                            (0, (Ho + 1) - t.shape[1]),
                            (0, (Wo + 1) - t.shape[2]),
                            (0, 0)),
                        constant_values=-jnp.inf)
            parts.append(t)
    item_bytes = 2 * (4 * (Ho + 1) * (Wo + 1) + Ho * Wo) * C * x.dtype.itemsize
    bnd = _pick_block(ND, item_bytes, max(_VMEM_TILE_BUDGET // 2, 1 << 20))
    out = pl.pallas_call(
        _maxpool_hw_kernel,
        out_shape=jax.ShapeDtypeStruct((ND, Ho, Wo, C), x.dtype),
        grid_spec=pltpu.PrefetchScalarGridSpec(
            num_scalar_prefetch=0,
            grid=(ND // bnd,),
            in_specs=[pl.BlockSpec((bnd, Ho + 1, Wo + 1, C),
                                   lambda i: (i, 0, 0, 0))] * 4,
            out_specs=pl.BlockSpec((bnd, Ho, Wo, C), lambda i: (i, 0, 0, 0))),
        compiler_params=pltpu.CompilerParams(
            dimension_semantics=("parallel",),
            vmem_limit_bytes=_VMEM_LIMIT),
    )(*parts)
    return out.reshape(N, D, Ho, Wo, C)


# ----------------------------------------------------------------------------
# Max pool (3,1,1)/(2,1,1)/(1,0,0): lane-dense (W*C on the lane axis),
# three D-shifted blocks via index maps.
# ----------------------------------------------------------------------------
def _maxpool_d_kernel(x0_ref, x1_ref, x2_ref, o_ref):
    o_ref[...] = jnp.maximum(jnp.maximum(x0_ref[...], x1_ref[...]),
                             x2_ref[...])


def maxpool_d_3_s2(x):
    """MaxPool3d kernel (3,1,1), stride (2,1,1), padding (1,0,0)."""
    N, D, H, W, C = x.shape
    Do = (D + 2 - 3) // 2 + 1
    xp = jnp.pad(x, ((0, 0), (1, 1), (0, 0), (0, 0), (0, 0)),
                 constant_values=-jnp.inf)
    Dp = D + 2
    L = W * C                              # lane-dense last dim
    xf = xp.reshape(N, Dp, H, L)
    in_specs = [
        pl.BlockSpec((1, 1, H, L),
                     (lambda n, d, _t=t: (n, 2 * d + _t, 0, 0)))
        for t in range(3)
    ]
    out = pl.pallas_call(
        _maxpool_d_kernel,
        out_shape=jax.ShapeDtypeStruct((N, Do, H, L), x.dtype),
        grid_spec=pltpu.PrefetchScalarGridSpec(
            num_scalar_prefetch=0,
            grid=(N, Do),
            in_specs=in_specs,
            out_specs=pl.BlockSpec((1, 1, H, L), lambda n, d: (n, d, 0, 0))),
        compiler_params=pltpu.CompilerParams(
            dimension_semantics=("parallel", "parallel"),
            vmem_limit_bytes=_VMEM_LIMIT),
    )(xf, xf, xf)
    return out.reshape(N, Do, H, W, C)


# ----------------------------------------------------------------------------
# Global average pool: single-pass spatial reduction
# ----------------------------------------------------------------------------
def _make_avgpool_kernel(inv_count):
    def kernel(x_ref, o_ref, acc_ref):
        s = pl.program_id(0)

        @pl.when(s == 0)
        def _():
            acc_ref[...] = jnp.zeros_like(acc_ref)

        acc_ref[...] += jnp.sum(x_ref[...].astype(jnp.float32), axis=1)

        @pl.when(s == pl.num_programs(0) - 1)
        def _():
            o_ref[...] = (acc_ref[...] * inv_count).astype(o_ref.dtype)

    return kernel


def global_avgpool(x):
    """Average over (D, H, W).  Zero padding is inert (sum / true count)."""
    N, D, H, W, C = x.shape
    S = D * H * W
    xs = x.reshape(N, S, C)
    ts = min(512, _round_up(S, 8))
    Sp = _round_up(S, ts)
    if Sp != S:
        xs = jnp.pad(xs, ((0, 0), (0, Sp - S), (0, 0)))
    out = pl.pallas_call(
        _make_avgpool_kernel(1.0 / S),
        out_shape=jax.ShapeDtypeStruct((N, C), x.dtype),
        grid_spec=pltpu.PrefetchScalarGridSpec(
            num_scalar_prefetch=0,
            grid=(Sp // ts,),
            in_specs=[pl.BlockSpec((N, ts, C), lambda s: (0, s, 0))],
            out_specs=pl.BlockSpec((N, C), lambda s: (0, 0)),
            scratch_shapes=[pltpu.VMEM((N, C), jnp.float32)]),
        compiler_params=pltpu.CompilerParams(
            dimension_semantics=("arbitrary",),
            vmem_limit_bytes=_VMEM_LIMIT),
    )(xs)
    return out


def linear(x2d, w, b):
    """x [N, F] @ w [F, O] + b via the same fused Pallas matmul."""
    Cout = w.shape[1]
    ones = jnp.ones((1, Cout), jnp.float32)
    return _matmul_bn_fused(x2d.astype(_COMPUTE_DTYPE), w, ones, b,
                            None, False, jnp.float32)


# ----------------------------------------------------------------------------
# Parameter init (deterministic, mirroring the PyTorch __init__)
# ----------------------------------------------------------------------------
def _init_conv(key, shape):
    kd, kh, kw, cin, cout = shape
    n = kd * kh * cout  # matches PyTorch: kernel_size[0]*kernel_size[1]*out_ch
    return jax.random.normal(key, shape, jnp.float32) * math.sqrt(2.0 / n)


def _init_bn(c):
    # eval-mode BN folded with gamma=1, beta=0, running_mean=0, running_var=1
    # TODO(synk): folding helper does not handle real trained running stats
    # (scale = gamma*rsqrt(var+eps), bias = beta - mean*scale).
    scale = jnp.full((c,), 1.0 / math.sqrt(1.0 + BN_EPS), jnp.float32)
    bias = jnp.zeros((c,), jnp.float32)
    return scale, bias


def init_resnet_params(key, layers, num_classes):
    keys = iter(jax.random.split(key, 128))
    params = {"conv1_w": _init_conv(next(keys), (5, 7, 7, 3, 64)),
              "bn1": _init_bn(64)}
    inplanes = [64]

    def make_layer(planes, blocks, stride):
        blist = []
        for b in range(blocks):
            s = stride if b == 0 else 1
            p = {"stride": s}
            if s != 1 or inplanes[0] != planes:
                p["ds_w"] = _init_conv(next(keys), (1, 1, 1, inplanes[0], planes))
                p["ds_bn"] = _init_bn(planes)
            p["conv1_w"] = _init_conv(next(keys), (3, 3, 3, inplanes[0], planes))
            p["bn1"] = _init_bn(planes)
            p["conv2_w"] = _init_conv(next(keys), (3, 3, 3, planes, planes))
            p["bn2"] = _init_bn(planes)
            blist.append(p)
            inplanes[0] = planes
        return blist

    params["layer1"] = make_layer(64, layers[0], 1)
    params["layer2"] = make_layer(128, layers[1], 2)
    params["layer3"] = make_layer(256, layers[2], 2)
    params["layer4"] = make_layer(512, layers[3], 1)

    fc_in = 512  # 512 * BasicBlock.expansion
    bound = 1.0 / math.sqrt(fc_in)
    params["fc_w"] = jax.random.uniform(next(keys), (fc_in, num_classes),
                                        jnp.float32, -bound, bound)
    params["fc_b"] = jax.random.uniform(next(keys), (num_classes,),
                                        jnp.float32, -bound, bound)
    return params


def prepare_params(raw):
    """One-time inference prep: bf16 casts + kernel-friendly weight layouts."""
    def bn2d(bn):
        s, b = bn
        return (s.reshape(1, -1).astype(jnp.float32),
                b.reshape(1, -1).astype(jnp.float32))

    def conv_mat(w):          # im2col layout: [kd*kh*kw*Cin, Cout]
        kd, kh, kw, cin, cout = w.shape
        return w.reshape(kd * kh * kw * cin, cout).astype(_COMPUTE_DTYPE)

    def conv_tap(w):          # direct-conv layout: [taps, Cin, Cout]
        kd, kh, kw, cin, cout = w.shape
        return w.reshape(kd * kh * kw, cin, cout).astype(_COMPUTE_DTYPE)

    prep = {"conv1_w": conv_mat(raw["conv1_w"]), "bn1": bn2d(raw["bn1"]),
            "fc_w": raw["fc_w"].astype(_COMPUTE_DTYPE),
            "fc_b": raw["fc_b"].reshape(1, -1).astype(jnp.float32)}
    for name in ("layer1", "layer2", "layer3", "layer4"):
        blocks = []
        for b in raw[name]:
            s = b["stride"]
            p = {"stride": s}
            if "ds_w" in b:
                p["ds_w"] = conv_mat(b["ds_w"])
                p["ds_bn"] = bn2d(b["ds_bn"])
            p["conv1_w"] = conv_tap(b["conv1_w"]) if s == 1 else conv_mat(b["conv1_w"])
            p["bn1"] = bn2d(b["bn1"])
            p["conv2_w"] = conv_tap(b["conv2_w"])
            p["bn2"] = bn2d(b["bn2"])
            blocks.append(p)
        prep[name] = blocks
    return prep


# ----------------------------------------------------------------------------
# Forward pass
# ----------------------------------------------------------------------------
def basic_block_forward(p, x):
    s = p["stride"]
    if "ds_w" in p:
        residual = conv3d_bn_im2col(x, p["ds_w"], (1, 1, 1), p["ds_bn"],
                                    stride=(1, s, s), padding=(0, 0, 0))
    else:
        residual = x
    if s == 1:
        out = conv3x3x3_s1(x, p["conv1_w"], p["bn1"], relu=True)
    else:
        out = conv3d_bn_im2col(x, p["conv1_w"], (3, 3, 3), p["bn1"],
                               stride=(1, s, s), padding=(1, 1, 1), relu=True)
    out = conv3x3x3_s1(out, p["conv2_w"], p["bn2"], relu=True,
                       residual=residual)
    return out


def resnet3d_forward(params, x_ncdhw):
    # NCDHW -> NDHWC, bf16 activations
    x = jnp.transpose(x_ncdhw, (0, 2, 3, 4, 1)).astype(_COMPUTE_DTYPE)

    # conv1 + bn1 + relu (fused im2col matmul)
    x = conv3d_bn_im2col(x, params["conv1_w"], (5, 7, 7), params["bn1"],
                         stride=(1, 2, 2), padding=(2, 3, 3), relu=True)
    # maxpool (1,3,3)/(1,2,2)/(0,1,1)
    x = maxpool_hw_3x3_s2(x)

    for blk in params["layer1"]:
        x = basic_block_forward(blk, x)
    # maxpool2 (3,1,1)/(2,1,1)/(1,0,0)
    x = maxpool_d_3_s2(x)
    for blk in params["layer2"]:
        x = basic_block_forward(blk, x)
    for blk in params["layer3"]:
        x = basic_block_forward(blk, x)
    for blk in params["layer4"]:
        x = basic_block_forward(blk, x)

    # avgpool: PyTorch kernel (16,14,14) equals the final feature-map size at
    # the canonical 32x224x224 input; semantically a global average here.
    x = global_avgpool(x)  # [N, 512]

    # TODO(synk): Dropout(p=0.3) is identity in eval mode; training-mode
    # dropout / BatchNorm batch statistics are not implemented.
    logits = linear(x, params["fc_w"], params["fc_b"])
    return logits


# ----------------------------------------------------------------------------
if __name__ == "__main__":
    key = jax.random.PRNGKey(0)
    pkey, xkey = jax.random.split(key)

    num_classes = 10
    raw_params = init_resnet_params(pkey, layers=[1, 1, 1, 1],
                                    num_classes=num_classes)
    params = prepare_params(raw_params)

    # Small input consistent with the module: NCDHW, 3 input channels.
    N, C, D, H, W = 2, 3, 8, 32, 32
    x = jax.random.normal(xkey, (N, C, D, H, W), jnp.float32)

    logits = resnet3d_forward(params, x)
    logits = jax.block_until_ready(logits)

    assert logits.shape == (N, num_classes), logits.shape
    assert bool(jnp.all(jnp.isfinite(logits)))
    print("KERNEL_OK")
</pallas_src>

<mosaic_0001>
module attributes {stable_mosaic.version = 11 : i64} {
  func.func @kernel(%arg0: i32, %arg1: i32, %arg2: memref<2048x768xbf16, #tpu.memory_space<vmem>>, %arg3: memref<768x64xbf16, #tpu.memory_space<vmem>>, %arg4: memref<1x64xf32, #tpu.memory_space<vmem>>, %arg5: memref<1x64xf32, #tpu.memory_space<vmem>>, %arg6: memref<2048x64xbf16, #tpu.memory_space<vmem>>, %arg7: memref<2048x64xf32, #tpu.memory_space<vmem>>) attributes {dimension_semantics = [#tpu.dimension_semantics<parallel>, #tpu.dimension_semantics<arbitrary>], iteration_bounds = array<i64: 2, 1>, scalar_prefetch = 0 : i64, scratch_operands = 1 : i64, tpu.core_type = #tpu.core_type<tc>, window_params = [{transform_indices = @transform_0, window_bounds = array<i64: 2048, 768>}, {transform_indices = @transform_1, window_bounds = array<i64: 768, 64>}, {pipeline_mode = #tpu.pipeline_mode<synchronous>, transform_indices = @transform_2, window_bounds = array<i64: 1, 64>}, {pipeline_mode = #tpu.pipeline_mode<synchronous>, transform_indices = @transform_3, window_bounds = array<i64: 1, 64>}, {transform_indices = @transform_4, window_bounds = array<i64: 2048, 64>}]} {
    %c0_i32 = arith.constant 0 : i32
    %0 = arith.cmpi eq, %arg1, %c0_i32 : i32
    %1 = arith.extui %0 : i1 to i32
    %c0_i32_0 = arith.constant 0 : i32
    %2 = arith.cmpi ne, %1, %c0_i32_0 : i32
    scf.if %2 {
      %cst_10 = arith.constant 0.000000e+00 : f32
      %12 = vector.broadcast %cst_10 : f32 to vector<2048x64xf32>
      %c0_11 = arith.constant 0 : index
      %c0_12 = arith.constant 0 : index
      %13 = vector.load %arg7[%c0_11, %c0_12] : memref<2048x64xf32, #tpu.memory_space<vmem>>, vector<2048x64xf32>
      tpu.vector_store %arg7[%c0_11, %c0_12], %12 {strides = array<i32>} : memref<2048x64xf32, #tpu.memory_space<vmem>>, vector<2048x64xf32>,
    } else {
    }
    %c0 = arith.constant 0 : index
    %c0_1 = arith.constant 0 : index
    %3 = vector.load %arg7[%c0, %c0_1] : memref<2048x64xf32, #tpu.memory_space<vmem>>, vector<2048x64xf32>
    %c0_2 = arith.constant 0 : index
    %c0_3 = arith.constant 0 : index
    %4 = vector.load %arg2[%c0_2, %c0_3] : memref<2048x768xbf16, #tpu.memory_space<vmem>>, vector<2048x768xbf16>
    %c0_4 = arith.constant 0 : index
    %c0_5 = arith.constant 0 : index
    %5 = vector.load %arg3[%c0_4, %c0_5] : memref<768x64xbf16, #tpu.memory_space<vmem>>, vector<768x64xbf16>
    %cst = arith.constant dense<0.000000e+00> : vector<2048x64xf32>
    %6 = tpu.matmul %4, %5, %cst {dimension_numbers = #tpu.dot_dimension_numbers<[1], [0], [0], [1], [0, 0, 1, 1], [], []>} : vector<2048x768xbf16>, vector<768x64xbf16>, vector<2048x64xf32> -> vector<2048x64xf32>
    %7 = arith.addf %3, %6 : vector<2048x64xf32>
    %c0_6 = arith.constant 0 : index
    %c0_7 = arith.constant 0 : index
    %8 = vector.load %arg7[%c0_6, %c0_7] : memref<2048x64xf32, #tpu.memory_space<vmem>>, vector<2048x64xf32>
    tpu.vector_store %arg7[%c0_6, %c0_7], %7 {strides = array<i32>} : memref<2048x64xf32, #tpu.memory_space<vmem>>, vector<2048x64xf32>,
    %c0_i32_8 = arith.constant 0 : i32
    %9 = arith.cmpi eq, %arg1, %c0_i32_8 : i32
    %10 = arith.extui %9 : i1 to i32
    %c0_i32_9 = arith.constant 0 : i32
    %11 = arith.cmpi ne, %10, %c0_i32_9 : i32
    scf.if %11 {
      %c0_10 = arith.constant 0 : index
      %c0_11 = arith.constant 0 : index
      %12 = vector.load %arg7[%c0_10, %c0_11] : memref<2048x64xf32, #tpu.memory_space<vmem>>, vector<2048x64xf32>
      %c0_12 = arith.constant 0 : index
      %c0_13 = arith.constant 0 : index
      %13 = vector.load %arg4[%c0_12, %c0_13] : memref<1x64xf32, #tpu.memory_space<vmem>>, vector<1x64xf32>
      %14 = vector.broadcast %13 : vector<1x64xf32> to vector<2048x64xf32>
      %15 = arith.mulf %12, %14 : vector<2048x64xf32>
      %c0_14 = arith.constant 0 : index
      %c0_15 = arith.constant 0 : index
      %16 = vector.load %arg5[%c0_14, %c0_15] : memref<1x64xf32, #tpu.memory_space<vmem>>, vector<1x64xf32>
      %17 = vector.broadcast %16 : vector<1x64xf32> to vector<2048x64xf32>
      %18 = arith.addf %15, %17 : vector<2048x64xf32>
      %cst_16 = arith.constant 0.000000e+00 : f32
      %19 = vector.broadcast %cst_16 : f32 to vector<2048x64xf32>
      %20 = arith.maximumf %18, %19 : vector<2048x64xf32>
      %21 = arith.truncf %20 : vector<2048x64xf32> to vector<2048x64xbf16>
      %c0_17 = arith.constant 0 : index
      %c0_18 = arith.constant 0 : index
      %22 = vector.load %arg6[%c0_17, %c0_18] : memref<2048x64xbf16, #tpu.memory_space<vmem>>, vector<2048x64xbf16>
      tpu.vector_store %arg6[%c0_17, %c0_18], %21 {strides = array<i32>} : memref<2048x64xbf16, #tpu.memory_space<vmem>>, vector<2048x64xbf16>,
    } else {
    }
    return
  }
  func.func @transform_0(%arg0: i32, %arg1: i32) -> (i32, i32) {
    %c0_i32 = arith.constant 0 : i32
    return %arg0, %arg1 : i32, i32
  }
  func.func @transform_1(%arg0: i32, %arg1: i32) -> (i32, i32) {
    %c0_i32 = arith.constant 0 : i32
    %c0_i32_0 = arith.constant 0 : i32
    return %arg1, %c0_i32 : i32, i32
  }
  func.func @transform_2(%arg0: i32, %arg1: i32) -> (i32, i32) {
    %c0_i32 = arith.constant 0 : i32
    %c0_i32_0 = arith.constant 0 : i32
    %c0_i32_1 = arith.constant 0 : i32
    return %c0_i32, %c0_i32_0 : i32, i32
  }
  func.func @transform_3(%arg0: i32, %arg1: i32) -> (i32, i32) {
    %c0_i32 = arith.constant 0 : i32
    %c0_i32_0 = arith.constant 0 : i32
    %c0_i32_1 = arith.constant 0 : i32
    return %c0_i32, %c0_i32_0 : i32, i32
  }
  func.func @transform_4(%arg0: i32, %arg1: i32) -> (i32, i32) {
    %c0_i32 = arith.constant 0 : i32
    %c0_i32_0 = arith.constant 0 : i32
    return %arg0, %c0_i32 : i32, i32
  }
}

</mosaic_0001>

<bundles_post_ra>
// kernel: tpu_custom_call.1
= control target key start
LH: loop header
LB: loop body
LE: loop exit
PB: predicated region body
PF: predicated region fallthrough
CT: control target
= control target key end

     0   :  { %9 = vsyncpa [#allocation4], 0  ;;  %s18542_s0 = inlined_call_operand.hbm [shape: bf16[4096,768], index: 0, kind: input, shape index: {}]   ;;  %s18543_s1 = inlined_call_operand.vmem [shape: bf16[768,64], index: 1, kind: input, shape index: {}]   ;;  %s18544_s2 = inlined_call_operand.hbm [shape: f32[1,64], index: 2, kind: input, shape index: {}]   ;;  %s18545_s3 = inlined_call_operand.hbm [shape: f32[1,64], index: 3, kind: input, shape index: {}]   ;;  %s18546_s4 = inlined_call_operand.vmem [shape: bf16[4096,64], index: 4, kind: output, shape index: {}]  }
   0x1   :  { %11 = vsyncpa [#allocation4 + $0x1], 0 }
   0x2   :  { %12 = vsyncpa [#allocation6], 0  ;;  %s14766_s15 = smov 0   ;;  %s14768_s16 = smov 0  }
   0x3   :  { %s14770_s17 = smov 0   ;;  %s14772_s18 = smov 0  }
   0x4   :  { %s14774_s19 = smov 0   ;;  %s14776_s20 = smov 0  }
   0x5 LB: > { %s11914_s21 = sadd.s32 4294967295, %s14732_s20   ;;  %s39_s22 = sadd.s32 1, %s14720_s17  ;;  %s14732_s20 = sphi %s14776_s20, %s18_s20   ;;  %s14728_s19 = sphi %s14774_s19, %s18991_s19   ;;  %s14724_s18 = sphi %s14772_s18, %s18990_s18   ;;  %s14720_s17 = sphi %s14770_s17, %s18989_s17   ;;  %s14716_s16 = sphi %s14768_s16, %s18988_s16   ;;  %s14712_s15 = sphi %s14766_s15, %s18987_s15  }
   0x6   : > { %p46_p0 = scmp.ne.s32.totalorder %s14720_s17, %s14716_s16  ;;  %p47_p1 = scmp.eq.s32.totalorder %s14732_s20, 0 }
   0x7   : > { %p52_p2 = scmp.ne.s32.totalorder %s14716_s16, %s14712_s15  ;;  %p14800_p3 = scmp.eq.s32.totalorder %s11914_s21, 0 }
   0x8   : > { %p48_p4 = por %p47_p1, %p46_p0  ;;  %p11916_p5 = scmp.ge.s32.totalorder %s14732_s20, 1 }
   0x9   : > { %s18554_s23 = scalar_select %p14800_p3, 1, 0 }
   0xa   : > { %p14807_p6 = por %p14800_p3, %p52_p2  ;;  %p157_p7 = scmp.lt.s32.totalorder %s14732_s20, 3 }
   0xb   : > { %s14734_s26 = smov [#allocation5]   ;;  %p13319_p10 = scmp.lt.s32.totalorder %s14732_s20, 2 }
   0xc   : > { %s18555_s24 = scalar_select %p14807_p6, 1, 0 }
   0xd   : > { %p14812_p8 = pnand %p11916_p5, %p157_p7  ;;  %s179_s27 = sshll.u32 %s14734_s26, 4  ;;  %s180_s27 = int_to_ptr.vmem [resolvable:$true] %s179_s27 }
   0xe   : > { %p14825_p12 = pnand %p13319_p10, %p48_p4  ;;  %s14735_s30 = smov [#allocation7]  }
   0xf   : > { %s18556_s25 = scalar_select %p14812_p8, 1, 0 }
  0x10   : > { %p13306_p9 = pneg %p14812_p8  ;;  %s190_s5 = sshll.u32 %s14735_s30, 4  ;;  %s191_s5 = int_to_ptr.vmem [resolvable:$true] %s190_s5 }
  0x11   : > { %s18558_s29 = scalar_select %p14825_p12, 1, 0 }
  0x12   : > { %p14821_p11 = pnand %p13306_p9, %p14800_p3  ;;  %s14592_s8 = scalar_lea.hbm %s18544_s2, 16 }
  0x13   : > { %p14593_p13 = scmp.ne.s32.totalorder %s18544_s2, %s14592_s8  ;;  %p14599_p4 = scmp.lt.u32.totalorder %s14592_s8, %s18544_s2 }
  0x14   : > { %p14594_p0 = pneg %p14821_p11 }
  0x16   : > { %p14595_p1 = pnand %p14594_p0, %p14593_p13 }
  0x18   : > { %p14596_p2 = pneg %p14595_p1 }
  0x1a   : > { %p14601_p5 = pnand %p14599_p4, %p14596_p2 }
  0x1c   : > { %14604 = shalt.err (!%p14601_p5)
}
  0x1d   : > { %s14605_s13 = scalar_lea.vmem %s180_s27, 16  ;;  %s14612_s14 = scalar_lea.vmem %s180_s27, 32 }
  0x1e   : > { %p14606_p7 = scmp.ne.s32.totalorder %s180_s27, %s14605_s13  ;;  %p14613_p3 = scmp.lt.s32.totalorder %s180_s27, %s180_s27 }
  0x1f   : > { %p14614_p6 = scmp.lt.s32.totalorder %s14612_s14, %s14605_s13 }
  0x20   : > { %p14608_p9 = pnand %p14606_p7, %p14594_p0 }
  0x21   : > { %p14615_p8 = por %p14614_p6, %p14613_p3 }
  0x22   : > { %p14609_p10 = pneg %p14608_p9 }
  0x24   : > { %p14616_p12 = pnand %p14615_p8, %p14609_p10 }
  0x26   : > { %14619 = shalt.err (!%p14616_p12)
}
  0x27   : > { %13309 = dma.hbm_to_vmem [thread:$0]  (!%p14821_p11), %s18544_s2, 16, %s180_s27, [#allocation6]  }
  0x28   : > { %s30_s26 = sadd.s32 1, %s14728_s19  ;;  %s14620_s7 = scalar_lea.hbm %s18545_s3, 16 }
  0x29   : > { %p14621_p3 = scmp.ne.s32.totalorder %s18545_s3, %s14620_s7  ;;  %p14627_p12 = scmp.lt.u32.totalorder %s14620_s7, %s18545_s3 }
  0x2b   : > { %p14623_p6 = pnand %p14621_p3, %p14594_p0 }
  0x2d   : > { %p14624_p8 = pneg %p14623_p6 }
  0x2f   : > { %p14629_p13 = pnand %p14627_p12, %p14624_p8 }
  0x31   : > { %14632 = shalt.err (!%p14629_p13)
}
  0x32   : > { %s14633_s27 = scalar_lea.vmem %s191_s5, 16  ;;  %s14640_s12 = scalar_lea.vmem %s191_s5, 32 }
  0x33   : > { %p14634_p1 = scmp.ne.s32.totalorder %s191_s5, %s14633_s27  ;;  %p14641_p5 = scmp.lt.s32.totalorder %s191_s5, %s191_s5 }
  0x34   : > { %p14642_p7 = scmp.lt.s32.totalorder %s14640_s12, %s14633_s27 }
  0x35   : > { %p14636_p2 = pnand %p14634_p1, %p14594_p0 }
  0x36   : > { %p14643_p9 = por %p14642_p7, %p14641_p5 }
  0x37   : > { %p14637_p4 = pneg %p14636_p2 }
  0x39   : > { %p14644_p10 = pnand %p14643_p9, %p14637_p4 }
  0x3b   : > { %14647 = shalt.err (!%p14644_p10)
}
  0x3c   : > { %13312 = dma.hbm_to_vmem [thread:$0]  (!%p14821_p11), %s18545_s3, 16, %s191_s5, [#allocation6]  }
  0x3d   : > { %p32_p0 = scmp.ge.s32.totalorder %s30_s26, 2  ;;  %s201_s15 = sand.u32 1, %s14720_s17  }
  0x3e   : > { %s13293_s21 = smul.u32 6144, %s201_s15  ;;  %s14890_s11 = scalar_lea.sflag [#allocation4], %s201_s15 }
  0x3f   : > { %s18993_s26 = smov (%p32_p0, %s30_s26), 0  ;;  %s13294_s30 = smul.u32 98304, %s14728_s19 }
  0x40   : > { %s34_s6 = ssub.s32 %s14728_s19, %s18993_s26  ;;  %s205_s28 = scalar_lea.vmem [#allocation3], %s13293_s21 }
  0x41   : > { %s215_s7 = sshll.u32 %s205_s28, 4  ;;  %p37_p3 = scmp.eq.s32.totalorder %s34_s6, 0  ;;  %s14883_s7 = int_to_ptr.vmem [resolvable:$true] %s215_s7 }
  0x42   : > { %s14881_s10 = scalar_lea.hbm %s18542_s0, %s13294_s30  ;;  %p18559_p6 = scmp.ne.s32.totalorder %s18558_s29, 0 }
  0x43   : > { %s14888_s5 = scalar_select %p37_p3, %s14720_s17, %s39_s22  }
  0x44   : > { %s14648_s27 = scalar_lea.hbm %s14881_s10, 98304  ;;  %p14650_p8 = pneg %p18559_p6 }
  0x45   : > { %p14649_p11 = scmp.ne.s32.totalorder %s14881_s10, %s14648_s27  ;;  %s14653_s14 = scalar_lea.hbm %s18542_s0, 196608 }
  0x46   : > { %p14654_p1 = scmp.lt.u32.totalorder %s14881_s10, %s18542_s0  ;;  %p14655_p2 = scmp.lt.u32.totalorder %s14653_s14, %s14648_s27 }
  0x47   : > { %p14651_p12 = pnand %p14650_p8, %p14649_p11  ;;  %p14657_p5 = scmp.lt.u32.totalorder %s14648_s27, %s14881_s10 }
  0x48   : > { %p14656_p4 = por %p14655_p2, %p14654_p1 }
  0x49   : > { %p14652_p13 = pneg %p14651_p12 }
  0x4a   : > { %p14658_p7 = por %p14657_p5, %p14656_p4 }
  0x4c   : > { %p14659_p9 = pnand %p14658_p7, %p14652_p13 }
  0x4e   : > { %14662 = shalt.err (!%p14659_p9)
}
  0x4f   : > { %s14663_s22 = scalar_lea.vmem %s14883_s7, 98304  ;;  %s14736_s15 = smov [#allocation3]  }
  0x50   : > { %p14664_p10 = scmp.ne.s32.totalorder %s14883_s7, %s14663_s22  ;;  %s14668_s6 = sshll.u32 %s14736_s15, 4  ;;  %s14669_s6 = int_to_ptr.vmem [resolvable:$false] %s14668_s6 }
  0x51   : > { %s14670_s28 = scalar_lea.vmem %s14669_s6, 196608  ;;  %p14671_p11 = scmp.lt.s32.totalorder %s14883_s7, %s14669_s6 }
  0x52   : > { %p14666_p0 = pnand %p14664_p10, %p14650_p8  ;;  %p14672_p12 = scmp.lt.s32.totalorder %s14670_s28, %s14663_s22 }
  0x54   : > { %p14667_p3 = pneg %p14666_p0  ;;  %p14673_p1 = por %p14672_p12, %p14671_p11 }
  0x56   : > { %p14674_p2 = pnand %p14673_p1, %p14667_p3 }
  0x58   : > { %14677 = shalt.err (!%p14674_p2)
}
  0x59   : > { %s14737_s8 = smov 384   ;;  %s14738_s9 = smov 24  }
  0x5a   : > { %13316 = dma.hbm_to_vmem [thread:$0]  (!%p18559_p6), %s14881_s10, 98304, %s14883_s7, %s14890_s11, %s14737_s8, %s14737_s8, %s14738_s9  }
  0x5b   : > { %p18560_p8 = scmp.ne.s32.totalorder %s18556_s25, 0 }
  0x5d   : > { %227 = sbr.rel (%p18560_p8) target bundleno = 2048 (0x800), region = 36 }
  0x64   : > { %s229_s27 = sand.u32 1, %s14716_s16   ;;  %p18561_p13 = scmp.ne.s32.totalorder %s18555_s24, 0 }
  0x65   : > { %s13295_s12 = smul.u32 6144, %s229_s27  ;;  %s230_s13 = scalar_lea.sflag [#allocation4], %s229_s27 }
  0x67   : > { %s14921_s14 = scalar_lea.vmem [#allocation3], %s13295_s12 }
  0x68   : > { %14703 = dma.done.wait (%p18561_p13), %s230_s13, 98304  }
  0x69   : > { %14705 = vsyncadd (%p18561_p13), %s230_s13, 4294868992  ;;  %p18562_p4 = scmp.ne.s32.totalorder %s18554_s23, 0 }
  0x6b   : > { %14707 = dma.done.wait (%p18562_p4), [#allocation6], 32  }
  0x6c   : > { %14709 = vsyncadd (%p18562_p4), [#allocation6], 4294967264  ;;  %v18552_v0 = vmov 0   ;;  %v13376_v1 = vld [vmem:[%s18543_s1] sm:$0xff]   ;;  %v13377_v2 = vld [vmem:[%s18543_s1 + $0x8] sm:$0xff]   ;;  %vm290_vm0 = vcmask 523264  }
  0x6d   : > { %5795 = vmatprep.subr.bf16.mxu0 %v18552_v0  ;;  %13261 = vmatprep.subr.bf16.mxu1 %v18552_v0  ;;  %v13378_v3 = vld [vmem:[%s18543_s1 + $0x10] sm:$0xff]   ;;  %v13379_v4 = vld [vmem:[%s18543_s1 + $0x18] sm:$0xff]   ;;  %v13380_v5 = vld [vmem:[%s18543_s1 + $0x20] sm:$0xff]   ;;  %s11927_s11 = sshll.u32 %s14724_s18, 8  ;;  %vm11544_vm1 = vcmask 519168  }
  0x6e   : > { %5796 = vmatpush1.bf16.msra.mxu0 %v13376_v1  ;;  %13277 = vmatpush1.bf16.msra.mxu1 %v13376_v1  ;;  %v13394_v6 = vld [vmem:[%s14921_s14 + $0x4] ss:$24 sps:$4 sm:$0xff]   ;;  %v13381_v7 = vld [vmem:[%s18543_s1 + $0x28] sm:$0xff]   ;;  %v13382_v9 = vld [vmem:[%s18543_s1 + $0x30] sm:$0xff]   ;;  %p16544_p6 = scmp.lt.s32.totalorder %s11927_s11, 511 }
  0x6f   : > { %5797 = vmatprep.subr.bf16.mxu0 %v18552_v0  ;;  %13262 = vmatprep.subr.bf16.mxu1 %v18552_v0  ;;  %v13397_v8 = vld [vmem:[%s14921_s14 + $0xc04] ss:$24 sps:$4 sm:$0xff]   ;;  %v13385_v12 = vld [vmem:[%s18543_s1 + $0x48] sm:$0xff]   ;;  %v13386_v13 = vld [vmem:[%s18543_s1 + $0x50] sm:$0xff]  }
  0x70   : > { %5827 = vmatprep.mubr.bf16.mxu0 %v13394_v6  ;;  %6339 = vmatprep.mubr.bf16.mxu1 %v13397_v8  ;;  %v13383_v10 = vld [vmem:[%s18543_s1 + $0x38] sm:$0xff]   ;;  %v13384_v11 = vld [vmem:[%s18543_s1 + $0x40] sm:$0xff]   ;;  %v13389_v16 = vld [vmem:[%s18543_s1 + $0x68] sm:$0xff]   ;;  %s18995_s11 = smov (!%p16544_p6, %s11927_s11), 511 }
  0x71   : > { %v13387_v14 = vld [vmem:[%s18543_s1 + $0x58] sm:$0xff]   ;;  %v13388_v15 = vld [vmem:[%s18543_s1 + $0x60] sm:$0xff]   ;;  %v13390_v17 = vld [vmem:[%s18543_s1 + $0x70] sm:$0xff]   ;;  %s11928_s18 = sshll.u32 %s18995_s11, 2 }
  0x72   : > { %5798 = vmatpush1.bf16.msra.mxu0 %v13377_v2  ;;  %13278 = vmatpush1.bf16.msra.mxu1 %v13377_v2  ;;  %v13391_v18 = vld [vmem:[%s18543_s1 + $0x78] sm:$0xff]   ;;  %v13398_v21 = vld [vmem:[%s18543_s1 + $0x80] sm:$0xff]   ;;  %v13400_v23 = vld [vmem:[%s14921_s14 + $0x34] ss:$24 sps:$4 sm:$0xff]   ;;  %s16578_s15 = scalar_lea.vmem %s18546_s4, %s11928_s18 }
  0x73   : > { %5799 = vmatprep.subr.bf16.mxu0 %v18552_v0  ;;  %13263 = vmatprep.subr.bf16.mxu1 %v18552_v0  ;;  %v13392_v19 = vld [vmem:[%s14921_s14] ss:$24 sps:$4 sm:$0xff]   ;;  %v13402_v24 = vld [vmem:[%s14921_s14 + $0xc34] ss:$24 sps:$4 sm:$0xff]   ;;  %v13404_v27 = vld [vmem:[%s14921_s14 + $0x30] ss:$24 sps:$4 sm:$0xff]  }
  0x74   : > { %v13395_v20 = vld [vmem:[%s14921_s14 + $0xc00] ss:$24 sps:$4 sm:$0xff]   ;;  %v13424_v25 = vld [vmem:[%s18543_s1 + $0x88] sm:$0xff]   ;;  %v13406_v29 = vld [vmem:[%s14921_s14 + $0x64] ss:$24 sps:$4 sm:$0xff]  }
  0x75   : > { %v13399_v22 = vld [vmem:[%s18543_s1 + $0x100] sm:$0xff]   ;;  %v13425_v26 = vld [vmem:[%s18543_s1 + $0x108] sm:$0xff]   ;;  %v13450_v31 = vld [vmem:[%s18543_s1 + $0x90] sm:$0xff]  }
  0x76   : > { %5800 = vmatpush1.bf16.msra.mxu0 %v13378_v3  ;;  %13279 = vmatpush1.bf16.msra.mxu1 %v13378_v3  ;;  %v13405_v28 = vld [vmem:[%s14921_s14 + $0xc30] ss:$24 sps:$4 sm:$0xff]   ;;  %v13408_v30 = vld [vmem:[%s14921_s14 + $0xc64] ss:$24 sps:$4 sm:$0xff]   ;;  %v13410_v34 = vld [vmem:[%s14921_s14 + $0x60] ss:$24 sps:$4 sm:$0xff]  }
  0x77   : > { %5801 = vmatprep.subr.bf16.mxu0 %v18552_v0  ;;  %13264 = vmatprep.subr.bf16.mxu1 %v18552_v0  ;;  %v13451_v32 = vld [vmem:[%s18543_s1 + $0x110] sm:$0xff]   ;;  %v13476_v33 = vld [vmem:[%s18543_s1 + $0x98] sm:$0xff]   ;;  %v13502_v39 = vld [vmem:[%s18543_s1 + $0xa0] sm:$0xff]  }
  0x78   : > { %v13411_v35 = vld [vmem:[%s14921_s14 + $0xc60] ss:$24 sps:$4 sm:$0xff]   ;;  %v13412_v37 = vld [vmem:[%s14921_s14 + $0x94] ss:$24 sps:$4 sm:$0xff]   ;;  %v13416_v41 = vld [vmem:[%s14921_s14 + $0x90] ss:$24 sps:$4 sm:$0xff]  }
  0x79   : > { %v13477_v36 = vld [vmem:[%s18543_s1 + $0x118] sm:$0xff]   ;;  %v13414_v38 = vld [vmem:[%s14921_s14 + $0xc94] ss:$24 sps:$4 sm:$0xff]   ;;  %v13503_v40 = vld [vmem:[%s18543_s1 + $0x120] sm:$0xff]  }
  0x7a   : > { %5802 = vmatpush1.bf16.msra.mxu0 %v13379_v4  ;;  %13280 = vmatpush1.bf16.msra.mxu1 %v13379_v4  ;;  %v13417_v42 = vld [vmem:[%s14921_s14 + $0xc90] ss:$24 sps:$4 sm:$0xff]   ;;  %v13418_v43 = vld [vmem:[%s14921_s14 + $0xc4] ss:$24 sps:$4 sm:$0xff]   ;;  %v13422_v45 = vld [vmem:[%s14921_s14 + $0xc0] ss:$24 sps:$4 sm:$0xff]  }
  0x7b   : > { %5803 = vmatprep.subr.bf16.mxu0 %v18552_v0  ;;  %13265 = vmatprep.subr.bf16.mxu1 %v18552_v0  ;;  %v13420_v44 = vld [vmem:[%s14921_s14 + $0xcc4] ss:$24 sps:$4 sm:$0xff]   ;;  %v13423_v46 = vld [vmem:[%s14921_s14 + $0xcc0] ss:$24 sps:$4 sm:$0xff]   ;;  %v13426_v47 = vld [vmem:[%s14921_s14 + $0xf4] ss:$24 sps:$4 sm:$0xff]  }
  0x7c   : > { %v13428_v48 = vld [vmem:[%s14921_s14 + $0xcf4] ss:$24 sps:$4 sm:$0xff]   ;;  %v13430_v51 = vld [vmem:[%s14921_s14 + $0xf0] ss:$24 sps:$4 sm:$0xff]   ;;  %v13432_v53 = vld [vmem:[%s14921_s14 + $0x124] ss:$24 sps:$4 sm:$0xff]  }
  0x7d   : > { %v13528_v49 = vld [vmem:[%s18543_s1 + $0xa8] sm:$0xff]   ;;  %v13434_v54 = vld [vmem:[%s14921_s14 + $0xd24] ss:$24 sps:$4 sm:$0xff]   ;;  %v13436_v55 = vld [vmem:[%s14921_s14 + $0x120] ss:$24 sps:$4 sm:$0xff]  }
  0x7e   : > { %5804 = vmatpush1.bf16.msra.mxu0 %v13380_v5  ;;  %13281 = vmatpush1.bf16.msra.mxu1 %v13380_v5  ;;  %v13529_v50 = vld [vmem:[%s18543_s1 + $0x128] sm:$0xff]   ;;  %v13437_v56 = vld [vmem:[%s14921_s14 + $0xd20] ss:$24 sps:$4 sm:$0xff]   ;;  %v13444_v61 = vld [vmem:[%s14921_s14 + $0x184] ss:$24 sps:$4 sm:$0xff]  }
  0x7f   : > { %5805 = vmatprep.subr.bf16.mxu0 %v18552_v0  ;;  %13266 = vmatprep.subr.bf16.mxu1 %v18552_v0  ;;  %v13431_v52 = vld [vmem:[%s14921_s14 + $0xcf0] ss:$24 sps:$4 sm:$0xff]   ;;  %v13438_v57 = vld [vmem:[%s14921_s14 + $0x154] ss:$24 sps:$4 sm:$0xff]   ;;  %v13446_v62 = vld [vmem:[%s14921_s14 + $0xd84] ss:$24 sps:$4 sm:$0xff]  }
  0x80   : > { %v13440_v58 = vld [vmem:[%s14921_s14 + $0xd54] ss:$24 sps:$4 sm:$0xff]   ;;  %v13442_v59 = vld [vmem:[%s14921_s14 + $0x150] ss:$24 sps:$4 sm:$0xff]   ;;  %v13448_v63 = vld [vmem:[%s14921_s14 + $0x180] ss:$24 sps:$4 sm:$0xff]  }
  0x81   : > { %v13443_v60 = vld [vmem:[%s14921_s14 + $0xd50] ss:$24 sps:$4 sm:$0xff]   ;;  %v13449_v1 = vld [vmem:[%s14921_s14 + $0xd80] ss:$24 sps:$4 sm:$0xff]   ;;  %v13452_v2 = vld [vmem:[%s14921_s14 + $0x1b4] ss:$24 sps:$4 sm:$0xff]  }
  0x82   : > { %5806 = vmatpush1.bf16.msra.mxu0 %v13381_v7  ;;  %13282 = vmatpush1.bf16.msra.mxu1 %v13381_v7  ;;  %v13454_v3 = vld [vmem:[%s14921_s14 + $0xdb4] ss:$24 sps:$4 sm:$0xff]   ;;  %v13456_v6 = vld [vmem:[%s14921_s14 + $0x1b0] ss:$24 sps:$4 sm:$0xff]   ;;  %v13458_v8 = vld [vmem:[%s14921_s14 + $0x1e4] ss:$24 sps:$4 sm:$0xff]  }
  0x83   : > { %5807 = vmatprep.subr.bf16.mxu0 %v18552_v0  ;;  %13267 = vmatprep.subr.bf16.mxu1 %v18552_v0  ;;  %v13554_v4 = vld [vmem:[%s18543_s1 + $0xb0] sm:$0xff]  }
  0x84   : > { %v13555_v5 = vld [vmem:[%s18543_s1 + $0x130] sm:$0xff]  }
  0x85   : > { %v13457_v7 = vld [vmem:[%s14921_s14 + $0xdb0] ss:$24 sps:$4 sm:$0xff]  }
  0x86   : > { %5808 = vmatpush1.bf16.msra.mxu0 %v13382_v9  ;;  %13283 = vmatpush1.bf16.msra.mxu1 %v13382_v9  ;;  %v13460_v9 = vld [vmem:[%s14921_s14 + $0xde4] ss:$24 sps:$4 sm:$0xff]  }
  0x87   : > { %5809 = vmatprep.subr.bf16.mxu0 %v18552_v0  ;;  %13268 = vmatprep.subr.bf16.mxu1 %v18552_v0 }
  0x8a   : > { %5810 = vmatpush1.bf16.msra.mxu0 %v13383_v10  ;;  %13284 = vmatpush1.bf16.msra.mxu1 %v13383_v10  ;;  %v13462_v10 = vld [vmem:[%s14921_s14 + $0x1e0] ss:$24 sps:$4 sm:$0xff]  }
  0x8b   : > { %5811 = vmatprep.subr.bf16.mxu0 %v18552_v0  ;;  %13269 = vmatprep.subr.bf16.mxu1 %v18552_v0 }
  0x8e   : > { %5812 = vmatpush1.bf16.msra.mxu0 %v13384_v11  ;;  %13285 = vmatpush1.bf16.msra.mxu1 %v13384_v11  ;;  %v13463_v11 = vld [vmem:[%s14921_s14 + $0xde0] ss:$24 sps:$4 sm:$0xff]  }
  0x8f   : > { %5813 = vmatprep.subr.bf16.mxu0 %v18552_v0  ;;  %13270 = vmatprep.subr.bf16.mxu1 %v18552_v0 }
  0x92   : > { %5814 = vmatpush1.bf16.msra.mxu0 %v13385_v12  ;;  %13286 = vmatpush1.bf16.msra.mxu1 %v13385_v12  ;;  %v13464_v12 = vld [vmem:[%s14921_s14 + $0x214] ss:$24 sps:$4 sm:$0xff]  }
  0x93   : > { %5815 = vmatprep.subr.bf16.mxu0 %v18552_v0  ;;  %13271 = vmatprep.subr.bf16.mxu1 %v18552_v0 }
  0x96   : > { %5816 = vmatpush1.bf16.msra.mxu0 %v13386_v13  ;;  %13287 = vmatpush1.bf16.msra.mxu1 %v13386_v13  ;;  %v13466_v13 = vld [vmem:[%s14921_s14 + $0xe14] ss:$24 sps:$4 sm:$0xff]  }
  0x97   : > { %5817 = vmatprep.subr.bf16.mxu0 %v18552_v0  ;;  %13272 = vmatprep.subr.bf16.mxu1 %v18552_v0 }
  0x9a   : > { %5818 = vmatpush1.bf16.msra.mxu0 %v13387_v14  ;;  %13288 = vmatpush1.bf16.msra.mxu1 %v13387_v14  ;;  %v13468_v14 = vld [vmem:[%s14921_s14 + $0x210] ss:$24 sps:$4 sm:$0xff]  }
  0x9b   : > { %5819 = vmatprep.subr.bf16.mxu0 %v18552_v0  ;;  %13273 = vmatprep.subr.bf16.mxu1 %v18552_v0 }
  0x9e   : > { %5820 = vmatpush1.bf16.msra.mxu0 %v13388_v15  ;;  %13289 = vmatpush1.bf16.msra.mxu1 %v13388_v15  ;;  %v13469_v15 = vld [vmem:[%s14921_s14 + $0xe10] ss:$24 sps:$4 sm:$0xff]  }
  0x9f   : > { %5821 = vmatprep.subr.bf16.mxu0 %v18552_v0  ;;  %13274 = vmatprep.subr.bf16.mxu1 %v18552_v0 }
  0xa2   : > { %5822 = vmatpush1.bf16.msra.mxu0 %v13389_v16  ;;  %13290 = vmatpush1.bf16.msra.mxu1 %v13389_v16  ;;  %v13470_v16 = vld [vmem:[%s14921_s14 + $0x244] ss:$24 sps:$4 sm:$0xff]  }
  0xa3   : > { %5823 = vmatprep.subr.bf16.mxu0 %v18552_v0  ;;  %13275 = vmatprep.subr.bf16.mxu1 %v18552_v0 }
  0xa6   : > { %5824 = vmatpush1.bf16.msra.mxu0 %v13390_v17  ;;  %13291 = vmatpush1.bf16.msra.mxu1 %v13390_v17  ;;  %v13472_v17 = vld [vmem:[%s14921_s14 + $0xe44] ss:$24 sps:$4 sm:$0xff]  }
  0xa7   : > { %5825 = vmatprep.subr.bf16.mxu0 %v18552_v0  ;;  %13276 = vmatprep.subr.bf16.mxu1 %v18552_v0 }
  0xaa   : > { %5826 = vmatpush1.bf16.msra.mxu0 %v13391_v18  ;;  %13292 = vmatpush1.bf16.msra.mxu1 %v13391_v18  ;;  %v13474_v18 = vld [vmem:[%s14921_s14 + $0x240] ss:$24 sps:$4 sm:$0xff]  }
  0xab   : > { %6852 = vmatprep.subr.bf16.mxu1 %v18552_v0  ;;  %7909 = vmatprep.subr.bf16.mxu0 %v18552_v0 }
  0xad   : > { %5828 = vmatmul.mubr.bf16.vlgmr.msra.gmra.mrb[0].mxu0 %v13392_v19  ;;  %6340 = vmatmul.mubr.bf16.vlgmr.msra.gmra.mrb[0].mxu1 %v13395_v20  ;;  %v13475_v19 = vld [vmem:[%s14921_s14 + $0xe40] ss:$24 sps:$4 sm:$0xff]   ;;  %v13478_v20 = vld [vmem:[%s14921_s14 + $0x274] ss:$24 sps:$4 sm:$0xff]  }
  0xae   : > { %6853 = vmatpush1.bf16.msra.mxu1 %v13398_v21  ;;  %7910 = vmatpush1.bf16.msra.mxu0 %v13399_v22  ;;  %v13480_v21 = vld [vmem:[%s14921_s14 + $0xe74] ss:$24 sps:$4 sm:$0xff]   ;;  %v13580_v22 = vld [vmem:[%s18543_s1 + $0xb8] sm:$0xff]  }
  0xaf   : > { %5835 = vmatprep.mubr.bf16.mxu0 %v13400_v23  ;;  %6347 = vmatprep.mubr.bf16.mxu1 %v13402_v24  ;;  %v13482_v23 = vld [vmem:[%s14921_s14 + $0x270] ss:$24 sps:$4 sm:$0xff]  }
  0xb0   : > { %6854 = vmatprep.subr.bf16.mxu1 %v18552_v0  ;;  %7911 = vmatprep.subr.bf16.mxu0 %v18552_v0  ;;  %v13483_v24 = vld [vmem:[%s14921_s14 + $0xe70] ss:$24 sps:$4 sm:$0xff]  }
  0xb2   : > { %6855 = vmatpush1.bf16.msra.mxu1 %v13424_v25  ;;  %7912 = vmatpush1.bf16.msra.mxu0 %v13425_v26  ;;  %v13581_v25 = vld [vmem:[%s18543_s1 + $0x138] sm:$0xff]  }
  0xb3   : > { %6856 = vmatprep.subr.bf16.mxu1 %v18552_v0  ;;  %7913 = vmatprep.subr.bf16.mxu0 %v18552_v0  ;;  %v13484_v26 = vld [vmem:[%s14921_s14 + $0x2a4] ss:$24 sps:$4 sm:$0xff]  }
  0xb5   : > { %5836 = vmatmul.mubr.bf16.gmra.mrb[4].mxu0 %v13404_v27  ;;  %6348 = vmatmul.mubr.bf16.gmra.mrb[4].mxu1 %v13405_v28  ;;  %v13486_v27 = vld [vmem:[%s14921_s14 + $0xea4] ss:$24 sps:$4 sm:$0xff]   ;;  %v13488_v28 = vld [vmem:[%s14921_s14 + $0x2a0] ss:$24 sps:$4 sm:$0xff]  }
  0xb6   : > { %5843 = vmatprep.mubr.bf16.mxu0 %v13406_v29  ;;  %6355 = vmatprep.mubr.bf16.mxu1 %v13408_v30  ;;  %v13489_v29 = vld [vmem:[%s14921_s14 + $0xea0] ss:$24 sps:$4 sm:$0xff]   ;;  %v13490_v30 = vld [vmem:[%s14921_s14 + $0x2d4] ss:$24 sps:$4 sm:$0xff]  }
  0xb7   : > { %6857 = vmatpush1.bf16.msra.mxu1 %v13450_v31  ;;  %7914 = vmatpush1.bf16.msra.mxu0 %v13451_v32  ;;  %v13492_v31 = vld [vmem:[%s14921_s14 + $0xed4] ss:$24 sps:$4 sm:$0xff]   ;;  %v13494_v32 = vld [vmem:[%s14921_s14 + $0x2d0] ss:$24 sps:$4 sm:$0xff]  }
  0xb8   : > { %6858 = vmatprep.subr.bf16.mxu1 %v18552_v0  ;;  %7915 = vmatprep.subr.bf16.mxu0 %v18552_v0 }
  0xbb   : > { %6859 = vmatpush1.bf16.msra.mxu1 %v13476_v33  ;;  %7916 = vmatpush1.bf16.msra.mxu0 %v13477_v36  ;;  %v13495_v33 = vld [vmem:[%s14921_s14 + $0xed0] ss:$24 sps:$4 sm:$0xff]   ;;  %v13500_v36 = vld [vmem:[%s14921_s14 + $0x300] ss:$24 sps:$4 sm:$0xff]  }
  0xbc   : > { %6860 = vmatprep.subr.bf16.mxu1 %v18552_v0  ;;  %7917 = vmatprep.subr.bf16.mxu0 %v18552_v0 }
  0xbd   : > { %5844 = vmatmul.mubr.bf16.gmra.mrb[8].mxu0 %v13410_v34  ;;  %6356 = vmatmul.mubr.bf16.gmra.mrb[8].mxu1 %v13411_v35  ;;  %v13496_v34 = vld [vmem:[%s14921_s14 + $0x304] ss:$24 sps:$4 sm:$0xff]  }
  0xbe   : > { %5851 = vmatprep.mubr.bf16.mxu0 %v13412_v37  ;;  %6363 = vmatprep.mubr.bf16.mxu1 %v13414_v38  ;;  %v13498_v35 = vld [vmem:[%s14921_s14 + $0xf04] ss:$24 sps:$4 sm:$0xff]   ;;  %v13501_v37 = vld [vmem:[%s14921_s14 + $0xf00] ss:$24 sps:$4 sm:$0xff]   ;;  %v13504_v38 = vld [vmem:[%s14921_s14 + $0x334] ss:$24 sps:$4 sm:$0xff]  }
  0xbf   : > { %6861 = vmatpush1.bf16.msra.mxu1 %v13502_v39  ;;  %7918 = vmatpush1.bf16.msra.mxu0 %v13503_v40  ;;  %v13506_v39 = vld [vmem:[%s14921_s14 + $0xf34] ss:$24 sps:$4 sm:$0xff]   ;;  %v13606_v40 = vld [vmem:[%s18543_s1 + $0xc0] sm:$0xff]  }
  0xc0   : > { %6862 = vmatprep.subr.bf16.mxu1 %v18552_v0  ;;  %7919 = vmatprep.subr.bf16.mxu0 %v18552_v0 }
  0xc3   : > { %6863 = vmatpush1.bf16.msra.mxu1 %v13528_v49  ;;  %7920 = vmatpush1.bf16.msra.mxu0 %v13529_v50  ;;  %v13518_v49 = vld [vmem:[%s14921_s14 + $0xf94] ss:$24 sps:$4 sm:$0xff]   ;;  %v13520_v50 = vld [vmem:[%s14921_s14 + $0x390] ss:$24 sps:$4 sm:$0xff]  }
  0xc4   : > { %6864 = vmatprep.subr.bf16.mxu1 %v18552_v0  ;;  %7921 = vmatprep.subr.bf16.mxu0 %v18552_v0 }
  0xc5   : > { %5852 = vmatmul.mubr.bf16.gmra.mrb[12].mxu0 %v13416_v41  ;;  %6364 = vmatmul.mubr.bf16.gmra.mrb[12].mxu1 %v13417_v42  ;;  %v13508_v41 = vld [vmem:[%s14921_s14 + $0x330] ss:$24 sps:$4 sm:$0xff]  }
  0xc6   : > { %5859 = vmatprep.mubr.bf16.mxu0 %v13418_v43  ;;  %6371 = vmatprep.mubr.bf16.mxu1 %v13420_v44  ;;  %v13509_v42 = vld [vmem:[%s14921_s14 + $0xf30] ss:$24 sps:$4 sm:$0xff]   ;;  %v13607_v43 = vld [vmem:[%s18543_s1 + $0x140] sm:$0xff]  }
  0xc7   : > { %6865 = vmatpush1.bf16.msra.mxu1 %v13554_v4  ;;  %7922 = vmatpush1.bf16.msra.mxu0 %v13555_v5  ;;  %v13510_v44 = vld [vmem:[%s14921_s14 + $0x364] ss:$24 sps:$4 sm:$0xff]   ;;  %v13544_v4 = vld [vmem:[%s14921_s14 + $0x1054] ss:$24 sps:$4 sm:$0xff]   ;;  %v13546_v5 = vld [vmem:[%s14921_s14 + $0x450] ss:$24 sps:$4 sm:$0xff]  }
  0xc8   : > { %6866 = vmatprep.subr.bf16.mxu1 %v18552_v0  ;;  %7923 = vmatprep.subr.bf16.mxu0 %v18552_v0 }
  0xcb   : > { %6867 = vmatpush1.bf16.msra.mxu1 %v13580_v22  ;;  %7924 = vmatpush1.bf16.msra.mxu0 %v13581_v25  ;;  %v13570_v22 = vld [vmem:[%s14921_s14 + $0x1114] ss:$24 sps:$4 sm:$0xff]  }
  0xcc   : > { %6868 = vmatprep.subr.bf16.mxu1 %v18552_v0  ;;  %7925 = vmatprep.subr.bf16.mxu0 %v18552_v0 }
  0xcd   : > { %5860 = vmatmul.mubr.bf16.gmra.mrb[16].mxu0 %v13422_v45  ;;  %6372 = vmatmul.mubr.bf16.gmra.mrb[16].mxu1 %v13423_v46  ;;  %v13512_v45 = vld [vmem:[%s14921_s14 + $0xf64] ss:$24 sps:$4 sm:$0xff]   ;;  %v13514_v46 = vld [vmem:[%s14921_s14 + $0x360] ss:$24 sps:$4 sm:$0xff]  }
  0xce   : > { %5867 = vmatprep.mubr.bf16.mxu0 %v13426_v47  ;;  %6379 = vmatprep.mubr.bf16.mxu1 %v13428_v48  ;;  %v13515_v47 = vld [vmem:[%s14921_s14 + $0xf60] ss:$24 sps:$4 sm:$0xff]   ;;  %v13516_v48 = vld [vmem:[%s14921_s14 + $0x394] ss:$24 sps:$4 sm:$0xff]  }
  0xcf   : > { %6869 = vmatpush1.bf16.msra.mxu1 %v13606_v40  ;;  %7926 = vmatpush1.bf16.msra.mxu0 %v13607_v43  ;;  %v13582_v43 = vld [vmem:[%s14921_s14 + $0x574] ss:$24 sps:$4 sm:$0xff]  }
  0xd0   : > { %6870 = vmatprep.subr.bf16.mxu1 %v18552_v0  ;;  %7927 = vmatprep.subr.bf16.mxu0 %v18552_v0 }
  0xd5   : > { %5868 = vmatmul.mubr.bf16.gmra.mrb[20].mxu0 %v13430_v51  ;;  %6380 = vmatmul.mubr.bf16.gmra.mrb[20].mxu1 %v13431_v52  ;;  %v13521_v51 = vld [vmem:[%s14921_s14 + $0xf90] ss:$24 sps:$4 sm:$0xff]   ;;  %v13522_v52 = vld [vmem:[%s14921_s14 + $0x3c4] ss:$24 sps:$4 sm:$0xff]  }
  0xd6   : > { %5875 = vmatprep.mubr.bf16.mxu0 %v13432_v53  ;;  %6387 = vmatprep.mubr.bf16.mxu1 %v13434_v54  ;;  %v13524_v53 = vld [vmem:[%s14921_s14 + $0xfc4] ss:$24 sps:$4 sm:$0xff]   ;;  %v13526_v54 = vld [vmem:[%s14921_s14 + $0x3c0] ss:$24 sps:$4 sm:$0xff]  }
  0xdd   : > { %5876 = vmatmul.mubr.bf16.gmra.mrb[24].mxu0 %v13436_v55  ;;  %6388 = vmatmul.mubr.bf16.gmra.mrb[24].mxu1 %v13437_v56  ;;  %v13527_v55 = vld [vmem:[%s14921_s14 + $0xfc0] ss:$24 sps:$4 sm:$0xff]   ;;  %v13530_v56 = vld [vmem:[%s14921_s14 + $0x3f4] ss:$24 sps:$4 sm:$0xff]  }
  0xde   : > { %5883 = vmatprep.mubr.bf16.mxu0 %v13438_v57  ;;  %6395 = vmatprep.mubr.bf16.mxu1 %v13440_v58  ;;  %v13532_v57 = vld [vmem:[%s14921_s14 + $0xff4] ss:$24 sps:$4 sm:$0xff]  }
  0xdf   : > { %v13632_v58 = vld [vmem:[%s18543_s1 + $0xc8] sm:$0xff]  }
  0xe0   : > { %6871 = vmatpush1.bf16.msra.mxu1 %v13632_v58  ;;  %v13590_v58 = vld [vmem:[%s14921_s14 + $0x11a4] ss:$24 sps:$4 sm:$0xff]  }
  0xe1   : > { %6872 = vmatprep.subr.bf16.mxu1 %v18552_v0 }
  0xe5   : > { %5884 = vmatmul.mubr.bf16.gmra.mrb[28].mxu0 %v13442_v59  ;;  %6396 = vmatmul.mubr.bf16.gmra.mrb[28].mxu1 %v13443_v60  ;;  %v13534_v59 = vld [vmem:[%s14921_s14 + $0x3f0] ss:$24 sps:$4 sm:$0xff]  }
  0xe6   : > { %5891 = vmatprep.mubr.bf16.mxu0 %v13444_v61  ;;  %6403 = vmatprep.mubr.bf16.mxu1 %v13446_v62  ;;  %v13535_v60 = vld [vmem:[%s14921_s14 + $0xff0] ss:$24 sps:$4 sm:$0xff]   ;;  %v13536_v62 = vld [vmem:[%s14921_s14 + $0x424] ss:$24 sps:$4 sm:$0xff]  }
  0xe7   : > { %v13633_v61 = vld [vmem:[%s18543_s1 + $0x148] sm:$0xff]  }
  0xe8   : > { %7928 = vmatpush1.bf16.msra.mxu0 %v13633_v61  ;;  %v13592_v61 = vld [vmem:[%s14921_s14 + $0x5a0] ss:$24 sps:$4 sm:$0xff]  }
  0xe9   : > { %7929 = vmatprep.subr.bf16.mxu0 %v18552_v0 }
  0xed   : > { %5892 = vmatmul.mubr.bf16.gmra.mrb[32].mxu0 %v13448_v63  ;;  %6404 = vmatmul.mubr.bf16.gmra.mrb[32].mxu1 %v13449_v1  ;;  %v13538_v63 = vld [vmem:[%s14921_s14 + $0x1024] ss:$24 sps:$4 sm:$0xff]   ;;  %v13540_v1 = vld [vmem:[%s14921_s14 + $0x420] ss:$24 sps:$4 sm:$0xff]  }
  0xee   : > { %5899 = vmatprep.mubr.bf16.mxu0 %v13452_v2  ;;  %6411 = vmatprep.mubr.bf16.mxu1 %v13454_v3  ;;  %v13541_v2 = vld [vmem:[%s14921_s14 + $0x1020] ss:$24 sps:$4 sm:$0xff]   ;;  %v13542_v3 = vld [vmem:[%s14921_s14 + $0x454] ss:$24 sps:$4 sm:$0xff]  }
  0xf5   : > { %5900 = vmatmul.mubr.bf16.gmra.mrb[36].mxu0 %v13456_v6  ;;  %6412 = vmatmul.mubr.bf16.gmra.mrb[36].mxu1 %v13457_v7  ;;  %v13547_v6 = vld [vmem:[%s14921_s14 + $0x1050] ss:$24 sps:$4 sm:$0xff]   ;;  %v13548_v7 = vld [vmem:[%s14921_s14 + $0x484] ss:$24 sps:$4 sm:$0xff]  }
  0xf6   : > { %5907 = vmatprep.mubr.bf16.mxu0 %v13458_v8  ;;  %6419 = vmatprep.mubr.bf16.mxu1 %v13460_v9  ;;  %v13550_v8 = vld [vmem:[%s14921_s14 + $0x1084] ss:$24 sps:$4 sm:$0xff]   ;;  %v13552_v9 = vld [vmem:[%s14921_s14 + $0x480] ss:$24 sps:$4 sm:$0xff]  }
  0xfd   : > { %5908 = vmatmul.mubr.bf16.gmra.mrb[40].mxu0 %v13462_v10  ;;  %6420 = vmatmul.mubr.bf16.gmra.mrb[40].mxu1 %v13463_v11  ;;  %v13553_v10 = vld [vmem:[%s14921_s14 + $0x1080] ss:$24 sps:$4 sm:$0xff]   ;;  %v13556_v11 = vld [vmem:[%s14921_s14 + $0x4b4] ss:$24 sps:$4 sm:$0xff]  }
  0xfe   : > { %5915 = vmatprep.mubr.bf16.mxu0 %v13464_v12  ;;  %6427 = vmatprep.mubr.bf16.mxu1 %v13466_v13  ;;  %v13558_v12 = vld [vmem:[%s14921_s14 + $0x10b4] ss:$24 sps:$4 sm:$0xff]  }
  0xff   : > { %v13658_v13 = vld [vmem:[%s18543_s1 + $0xd0] sm:$0xff]  }
 0x100   : > { %6873 = vmatpush1.bf16.msra.mxu1 %v13658_v13 }
 0x101   : > { %6874 = vmatprep.subr.bf16.mxu1 %v18552_v0 }
 0x105   : > { %5916 = vmatmul.mubr.bf16.gmra.mrb[44].mxu0 %v13468_v14  ;;  %6428 = vmatmul.mubr.bf16.gmra.mrb[44].mxu1 %v13469_v15  ;;  %v13560_v14 = vld [vmem:[%s14921_s14 + $0x4b0] ss:$24 sps:$4 sm:$0xff]  }
 0x106   : > { %5923 = vmatprep.mubr.bf16.mxu0 %v13470_v16  ;;  %6435 = vmatprep.mubr.bf16.mxu1 %v13472_v17  ;;  %v13561_v15 = vld [vmem:[%s14921_s14 + $0x10b0] ss:$24 sps:$4 sm:$0xff]   ;;  %v13562_v17 = vld [vmem:[%s14921_s14 + $0x4e4] ss:$24 sps:$4 sm:$0xff]  }
 0x107   : > { %v13659_v16 = vld [vmem:[%s18543_s1 + $0x150] sm:$0xff]  }
 0x108   : > { %7930 = vmatpush1.bf16.msra.mxu0 %v13659_v16 }
 0x109   : > { %7931 = vmatprep.subr.bf16.mxu0 %v18552_v0 }
 0x10d   : > { %5924 = vmatmul.mubr.bf16.gmra.mrb[48].mxu0 %v13474_v18  ;;  %6436 = vmatmul.mubr.bf16.gmra.mrb[48].mxu1 %v13475_v19  ;;  %v13564_v18 = vld [vmem:[%s14921_s14 + $0x10e4] ss:$24 sps:$4 sm:$0xff]   ;;  %v13566_v19 = vld [vmem:[%s14921_s14 + $0x4e0] ss:$24 sps:$4 sm:$0xff]  }
 0x10e   : > { %5931 = vmatprep.mubr.bf16.mxu0 %v13478_v20  ;;  %6443 = vmatprep.mubr.bf16.mxu1 %v13480_v21  ;;  %v13567_v20 = vld [vmem:[%s14921_s14 + $0x10e0] ss:$24 sps:$4 sm:$0xff]   ;;  %v13568_v21 = vld [vmem:[%s14921_s14 + $0x514] ss:$24 sps:$4 sm:$0xff]  }
 0x115   : > { %5932 = vmatmul.mubr.bf16.gmra.mrb[52].mxu0 %v13482_v23  ;;  %6444 = vmatmul.mubr.bf16.gmra.mrb[52].mxu1 %v13483_v24  ;;  %v13572_v23 = vld [vmem:[%s14921_s14 + $0x510] ss:$24 sps:$4 sm:$0xff]  }
 0x116   : > { %5939 = vmatprep.mubr.bf16.mxu0 %v13484_v26  ;;  %6451 = vmatprep.mubr.bf16.mxu1 %v13486_v27  ;;  %v13573_v24 = vld [vmem:[%s14921_s14 + $0x1110] ss:$24 sps:$4 sm:$0xff]  }
 0x11d   : > { %5940 = vmatmul.mubr.bf16.gmra.mrb[56].mxu0 %v13488_v28  ;;  %6452 = vmatmul.mubr.bf16.gmra.mrb[56].mxu1 %v13489_v29 }
 0x11e   : > { %5947 = vmatprep.mubr.bf16.mxu0 %v13490_v30  ;;  %6459 = vmatprep.mubr.bf16.mxu1 %v13492_v31  ;;  %v13574_v31 = vld [vmem:[%s14921_s14 + $0x544] ss:$24 sps:$4 sm:$0xff]  }
 0x125   : > { %5948 = vmatmul.mubr.bf16.gmra.mrb[60].mxu0 %v13494_v32  ;;  %6460 = vmatmul.mubr.bf16.gmra.mrb[60].mxu1 %v13495_v33  ;;  %v13576_v32 = vld [vmem:[%s14921_s14 + $0x1144] ss:$24 sps:$4 sm:$0xff]  }
 0x126   : > { %5955 = vmatprep.mubr.bf16.mxu0 %v13496_v34  ;;  %6467 = vmatprep.mubr.bf16.mxu1 %v13498_v35  ;;  %v13578_v35 = vld [vmem:[%s14921_s14 + $0x540] ss:$24 sps:$4 sm:$0xff]  }
 0x12d   : > { %5956 = vmatmul.mubr.bf16.gmra.mrb[64].mxu0 %v13500_v36  ;;  %6468 = vmatmul.mubr.bf16.gmra.mrb[64].mxu1 %v13501_v37  ;;  %v13579_v36 = vld [vmem:[%s14921_s14 + $0x1140] ss:$24 sps:$4 sm:$0xff]  }
 0x12e   : > { %5963 = vmatprep.mubr.bf16.mxu0 %v13504_v38  ;;  %6475 = vmatprep.mubr.bf16.mxu1 %v13506_v39 }
 0x135   : > { %5964 = vmatmul.mubr.bf16.gmra.mrb[68].mxu0 %v13508_v41  ;;  %6476 = vmatmul.mubr.bf16.gmra.mrb[68].mxu1 %v13509_v42 }
 0x136   : > { %5971 = vmatprep.mubr.bf16.mxu0 %v13510_v44  ;;  %6483 = vmatprep.mubr.bf16.mxu1 %v13512_v45  ;;  %v13584_v44 = vld [vmem:[%s14921_s14 + $0x1174] ss:$24 sps:$4 sm:$0xff]  }
 0x13d   : > { %5972 = vmatmul.mubr.bf16.gmra.mrb[72].mxu0 %v13514_v46  ;;  %6484 = vmatmul.mubr.bf16.gmra.mrb[72].mxu1 %v13515_v47  ;;  %v13684_v47 = vld [vmem:[%s18543_s1 + $0xd8] sm:$0xff]  }
 0x13e   : > { %5979 = vmatprep.mubr.bf16.mxu0 %v13516_v48  ;;  %6491 = vmatprep.mubr.bf16.mxu1 %v13518_v49  ;;  %v13586_v48 = vld [vmem:[%s14921_s14 + $0x570] ss:$24 sps:$4 sm:$0xff]  }
 0x13f   : > { %v13587_v49 = vld [vmem:[%s14921_s14 + $0x1170] ss:$24 sps:$4 sm:$0xff]   ;;  %6875 = vmatpush1.bf16.msra.mxu1 %v13684_v47  ;;  %v13711_v47 = vld [vmem:[%s18543_s1 + $0x160] sm:$0xff]  }
 0x140   : > { %6876 = vmatprep.subr.bf16.mxu1 %v18552_v0 }
 0x145   : > { %5980 = vmatmul.mubr.bf16.gmra.mrb[76].mxu0 %v13520_v50  ;;  %6492 = vmatmul.mubr.bf16.gmra.mrb[76].mxu1 %v13521_v51 }
 0x146   : > { %5987 = vmatprep.mubr.bf16.mxu0 %v13522_v52  ;;  %6499 = vmatprep.mubr.bf16.mxu1 %v13524_v53  ;;  %v13685_v52 = vld [vmem:[%s18543_s1 + $0x158] sm:$0xff]  }
 0x147   : > { %7932 = vmatpush1.bf16.msra.mxu0 %v13685_v52 }
 0x148   : > { %7933 = vmatprep.subr.bf16.mxu0 %v18552_v0 }
 0x14b   : > { %7934 = vmatpush1.bf16.msra.mxu0 %v13711_v47 }
 0x14c   : > { %7935 = vmatprep.subr.bf16.mxu0 %v18552_v0 }
 0x14d   : > { %5988 = vmatmul.mubr.bf16.gmra.mrb[80].mxu0 %v13526_v54  ;;  %6500 = vmatmul.mubr.bf16.gmra.mrb[80].mxu1 %v13527_v55 }
 0x14e   : > { %5995 = vmatprep.mubr.bf16.mxu0 %v13530_v56  ;;  %6507 = vmatprep.mubr.bf16.mxu1 %v13532_v57  ;;  %v13588_v57 = vld [vmem:[%s14921_s14 + $0x5a4] ss:$24 sps:$4 sm:$0xff]  }
 0x155   : > { %5996 = vmatmul.mubr.bf16.gmra.mrb[84].mxu0 %v13534_v59  ;;  %6508 = vmatmul.mubr.bf16.gmra.mrb[84].mxu1 %v13535_v60 }
 0x156   : > { %6003 = vmatprep.mubr.bf16.mxu0 %v13536_v62  ;;  %6515 = vmatprep.mubr.bf16.mxu1 %v13538_v63  ;;  %v13593_v62 = vld [vmem:[%s14921_s14 + $0x11a0] ss:$24 sps:$4 sm:$0xff]  }
 0x15d   : > { %6004 = vmatmul.mubr.bf16.gmra.mrb[88].mxu0 %v13540_v1  ;;  %6516 = vmatmul.mubr.bf16.gmra.mrb[88].mxu1 %v13541_v2 }
 0x15e   : > { %6011 = vmatprep.mubr.bf16.mxu0 %v13542_v3  ;;  %6523 = vmatprep.mubr.bf16.mxu1 %v13544_v4 }
 0x165   : > { %6012 = vmatmul.mubr.bf16.gmra.mrb[92].mxu0 %v13546_v5  ;;  %6524 = vmatmul.mubr.bf16.gmra.mrb[92].mxu1 %v13547_v6  ;;  %v13594_v6 = vld [vmem:[%s14921_s14 + $0x5d4] ss:$24 sps:$4 sm:$0xff]  }
 0x166   : > { %6019 = vmatprep.mubr.bf16.mxu0 %v13548_v7  ;;  %6531 = vmatprep.mubr.bf16.mxu1 %v13550_v8  ;;  %v13596_v7 = vld [vmem:[%s14921_s14 + $0x11d4] ss:$24 sps:$4 sm:$0xff]  }
 0x16d   : > { %6020 = vmatmul.mubr.bf16.gmra.mrb[96].mxu0 %v13552_v9  ;;  %6532 = vmatmul.mubr.bf16.gmra.mrb[96].mxu1 %v13553_v10  ;;  %v13598_v10 = vld [vmem:[%s14921_s14 + $0x5d0] ss:$24 sps:$4 sm:$0xff]  }
 0x16e   : > { %6027 = vmatprep.mubr.bf16.mxu0 %v13556_v11  ;;  %6539 = vmatprep.mubr.bf16.mxu1 %v13558_v12  ;;  %v13599_v11 = vld [vmem:[%s14921_s14 + $0x11d0] ss:$24 sps:$4 sm:$0xff]  }
 0x175   : > { %6028 = vmatmul.mubr.bf16.gmra.mrb[100].mxu0 %v13560_v14  ;;  %6540 = vmatmul.mubr.bf16.gmra.mrb[100].mxu1 %v13561_v15 }
 0x176   : > { %6035 = vmatprep.mubr.bf16.mxu0 %v13562_v17  ;;  %6547 = vmatprep.mubr.bf16.mxu1 %v13564_v18  ;;  %v13600_v18 = vld [vmem:[%s14921_s14 + $0x604] ss:$24 sps:$4 sm:$0xff]  }
 0x17d   : > { %6036 = vmatmul.mubr.bf16.gmra.mrb[104].mxu0 %v13566_v19  ;;  %6548 = vmatmul.mubr.bf16.gmra.mrb[104].mxu1 %v13567_v20  ;;  %v13602_v19 = vld [vmem:[%s14921_s14 + $0x1204] ss:$24 sps:$4 sm:$0xff]  }
 0x17e   : > { %6043 = vmatprep.mubr.bf16.mxu0 %v13568_v21  ;;  %6555 = vmatprep.mubr.bf16.mxu1 %v13570_v22  ;;  %v13604_v22 = vld [vmem:[%s14921_s14 + $0x600] ss:$24 sps:$4 sm:$0xff]  }
 0x180   : > { %v15213_v25 = vpop.f32.mrb[0].mxu0  ;;  %v15215_v26 = vpop.f32.mrb[0].mxu1 }
 0x181   : > { %18563 = vst [vmem:[#allocation10_spill] sm:$0xff] %v15215_v26  ;;  %v5831_v27 = vpop.f32.mrb[1].mxu0  ;;  %v6343_v28 = vpop.f32.mrb[1].mxu1 }
 0x182   : > { %v15217_v29 = vpop.f32.mrb[2].mxu0  ;;  %v15219_v30 = vpop.f32.mrb[2].mxu1 }
 0x183   : > { %18564 = vst [vmem:[#allocation11_spill] sm:$0xff] %v15219_v30  ;;  %v5834_v33 = vpop.f32.mrb[3].mxu0  ;;  %v6346_v34 = vpop.f32.mrb[3].mxu1  ;;  %v13735_v30 = vld [vmem:[%s14921_s14 + $0x15c0] ss:$24 sps:$4 sm:$0xff]  }
 0x184   : > { %v13608_v34 = vld [vmem:[%s14921_s14 + $0x634] ss:$24 sps:$4 sm:$0xff]  }
 0x185   : > { %6044 = vmatmul.mubr.bf16.gmra.mrb[108].mxu0 %v13572_v23  ;;  %6556 = vmatmul.mubr.bf16.gmra.mrb[108].mxu1 %v13573_v24  ;;  %v13605_v23 = vld [vmem:[%s14921_s14 + $0x1200] ss:$24 sps:$4 sm:$0xff]  }
 0x186   : > { %6051 = vmatprep.mubr.bf16.mxu0 %v13574_v31  ;;  %6563 = vmatprep.mubr.bf16.mxu1 %v13576_v32 }
 0x188   : > { %v15225_v37 = vpop.f32.mrb[4].mxu0  ;;  %v15227_v38 = vpop.f32.mrb[4].mxu1 }
 0x189   : > { %18565 = vst [vmem:[#allocation12_spill] sm:$0xff] %v15227_v38  ;;  %v5839_v39 = vpop.f32.mrb[5].mxu0  ;;  %v6351_v40 = vpop.f32.mrb[5].mxu1 }
 0x18a   : > { %v15229_v41 = vpop.f32.mrb[6].mxu0  ;;  %v15231_v42 = vpop.f32.mrb[6].mxu1  ;;  %v13710_v40 = vld [vmem:[%s18543_s1 + $0xe0] sm:$0xff]  }
 0x18b   : > { %18566 = vst [vmem:[#allocation13_spill] sm:$0xff] %v15231_v42  ;;  %v5842_v45 = vpop.f32.mrb[7].mxu0  ;;  %v6354_v46 = vpop.f32.mrb[7].mxu1  ;;  %6877 = vmatpush1.bf16.msra.mxu1 %v13710_v40  ;;  %v13631_v40 = vld [vmem:[%s14921_s14 + $0x12c0] ss:$24 sps:$4 sm:$0xff]  }
 0x18c   : > { %6878 = vmatprep.subr.bf16.mxu1 %v18552_v0  ;;  %v13729_v42 = vld [vmem:[%s14921_s14 + $0x1590] ss:$24 sps:$4 sm:$0xff]  }
 0x18d   : > { %6052 = vmatmul.mubr.bf16.gmra.mrb[112].mxu0 %v13578_v35  ;;  %6564 = vmatmul.mubr.bf16.gmra.mrb[112].mxu1 %v13579_v36  ;;  %v13610_v35 = vld [vmem:[%s14921_s14 + $0x1234] ss:$24 sps:$4 sm:$0xff]  }
 0x18e   : > { %6059 = vmatprep.mubr.bf16.mxu0 %v13582_v43  ;;  %6571 = vmatprep.mubr.bf16.mxu1 %v13584_v44  ;;  %v13612_v43 = vld [vmem:[%s14921_s14 + $0x630] ss:$24 sps:$4 sm:$0xff]  }
 0x18f   : > { %v13613_v44 = vld [vmem:[%s14921_s14 + $0x1230] ss:$24 sps:$4 sm:$0xff]  }
 0x190   : > { %v15240_v50 = vpop.f32.mrb[8].mxu0  ;;  %v15242_v51 = vpop.f32.mrb[8].mxu1 }
 0x191   : > { %18567 = vst [vmem:[#allocation14_spill] sm:$0xff] %v15242_v51  ;;  %v5847_v53 = vpop.f32.mrb[9].mxu0  ;;  %v6359_v54 = vpop.f32.mrb[9].mxu1 }
 0x192   : > { %v15248_v55 = vpop.f32.mrb[10].mxu0  ;;  %v15250_v56 = vpop.f32.mrb[10].mxu1  ;;  %v13614_v54 = vld [vmem:[%s14921_s14 + $0x664] ss:$24 sps:$4 sm:$0xff]  }
 0x193   : > { %18568 = vst [vmem:[#allocation15_spill] sm:$0xff] %v15250_v56  ;;  %v5850_v59 = vpop.f32.mrb[11].mxu0  ;;  %v6362_v60 = vpop.f32.mrb[11].mxu1  ;;  %v13723_v56 = vld [vmem:[%s14921_s14 + $0x1560] ss:$24 sps:$4 sm:$0xff]  }
 0x194   : > { %v13618_v60 = vld [vmem:[%s14921_s14 + $0x660] ss:$24 sps:$4 sm:$0xff]  }
 0x195   : > { %6060 = vmatmul.mubr.bf16.gmra.mrb[116].mxu0 %v13586_v48  ;;  %6572 = vmatmul.mubr.bf16.gmra.mrb[116].mxu1 %v13587_v49 }
 0x196   : > { %6067 = vmatprep.mubr.bf16.mxu0 %v13588_v57  ;;  %6579 = vmatprep.mubr.bf16.mxu1 %v13590_v58  ;;  %v13616_v57 = vld [vmem:[%s14921_s14 + $0x1264] ss:$24 sps:$4 sm:$0xff]  }
 0x198   : > { %v15257_v63 = vpop.f32.mrb[12].mxu0  ;;  %v15259_v1 = vpop.f32.mrb[12].mxu1 }
 0x199   : > { %18569 = vst [vmem:[#allocation16_spill] sm:$0xff] %v15259_v1  ;;  %v5855_v2 = vpop.f32.mrb[13].mxu0  ;;  %v6367_v3 = vpop.f32.mrb[13].mxu1 }
 0x19a   : > { %v15261_v4 = vpop.f32.mrb[14].mxu0  ;;  %v15263_v5 = vpop.f32.mrb[14].mxu1 }
 0x19b   : > { %18570 = vst [vmem:[#allocation17_spill] sm:$0xff] %v15263_v5  ;;  %v5858_v8 = vpop.f32.mrb[15].mxu0  ;;  %v6370_v9 = vpop.f32.mrb[15].mxu1  ;;  %v13717_v5 = vld [vmem:[%s14921_s14 + $0x1530] ss:$24 sps:$4 sm:$0xff]  }
 0x19c   : > { %v13620_v9 = vld [vmem:[%s14921_s14 + $0x694] ss:$24 sps:$4 sm:$0xff]  }
 0x19d   : > { %6068 = vmatmul.mubr.bf16.gmra.mrb[120].mxu0 %v13592_v61  ;;  %6580 = vmatmul.mubr.bf16.gmra.mrb[120].mxu1 %v13593_v62  ;;  %v13619_v61 = vld [vmem:[%s14921_s14 + $0x1260] ss:$24 sps:$4 sm:$0xff]  }
 0x19e   : > { %6075 = vmatprep.mubr.bf16.mxu0 %v13594_v6  ;;  %6587 = vmatprep.mubr.bf16.mxu1 %v13596_v7 }
 0x1a0   : > { %v15269_v12 = vpop.f32.mrb[16].mxu0  ;;  %v15271_v13 = vpop.f32.mrb[16].mxu1 }
 0x1a1   : > { %18571 = vst [vmem:[#allocation18_spill] sm:$0xff] %v15271_v13  ;;  %v5863_v14 = vpop.f32.mrb[17].mxu0  ;;  %v6375_v15 = vpop.f32.mrb[17].mxu1 }
 0x1a2   : > { %v15273_v16 = vpop.f32.mrb[18].mxu0  ;;  %v15275_v17 = vpop.f32.mrb[18].mxu1  ;;  %v13624_v15 = vld [vmem:[%s14921_s14 + $0x690] ss:$24 sps:$4 sm:$0xff]  }
 0x1a3   : > { %18572 = vst [vmem:[#allocation19_spill] sm:$0xff] %v15275_v17  ;;  %v5866_v20 = vpop.f32.mrb[19].mxu0  ;;  %v6378_v21 = vpop.f32.mrb[19].mxu1  ;;  %v13709_v17 = vld [vmem:[%s14921_s14 + $0x1500] ss:$24 sps:$4 sm:$0xff]  }
 0x1a5   : > { %6076 = vmatmul.mubr.bf16.gmra.mrb[124].mxu0 %v13598_v10  ;;  %6588 = vmatmul.mubr.bf16.gmra.mrb[124].mxu1 %v13599_v11  ;;  %v13622_v10 = vld [vmem:[%s14921_s14 + $0x1294] ss:$24 sps:$4 sm:$0xff]  }
 0x1a6   : > { %6083 = vmatprep.mubr.bf16.mxu0 %v13600_v18  ;;  %6595 = vmatprep.mubr.bf16.mxu1 %v13602_v19  ;;  %v13625_v18 = vld [vmem:[%s14921_s14 + $0x1290] ss:$24 sps:$4 sm:$0xff]  }
 0x1a8   : > { %v15281_v24 = vpop.f32.mrb[20].mxu0  ;;  %v15283_v27 = vpop.f32.mrb[20].mxu1 }
 0x1a9   : > { %18573 = vst [vmem:[#allocation20_spill] sm:$0xff] %v15283_v27  ;;  %v5871_v28 = vpop.f32.mrb[21].mxu0  ;;  %v6383_v31 = vpop.f32.mrb[21].mxu1 }
 0x1aa   : > { %v15285_v32 = vpop.f32.mrb[22].mxu0  ;;  %v15287_v33 = vpop.f32.mrb[22].mxu1  ;;  %v13626_v31 = vld [vmem:[%s14921_s14 + $0x6c4] ss:$24 sps:$4 sm:$0xff]  }
 0x1ab   : > { %18574 = vst [vmem:[#allocation21_spill] sm:$0xff] %v15287_v33  ;;  %v5874_v36 = vpop.f32.mrb[23].mxu0  ;;  %v6386_v39 = vpop.f32.mrb[23].mxu1  ;;  %v13703_v33 = vld [vmem:[%s14921_s14 + $0x14d0] ss:$24 sps:$4 sm:$0xff]  }
 0x1ac   : > { %v13630_v39 = vld [vmem:[%s14921_s14 + $0x6c0] ss:$24 sps:$4 sm:$0xff]  }
 0x1ad   : > { %6084 = vmatmul.mubr.bf16.gmra.mrb[128].mxu0 %v13604_v22  ;;  %6596 = vmatmul.mubr.bf16.gmra.mrb[128].mxu1 %v13605_v23 }
 0x1ae   : > { %6091 = vmatprep.mubr.bf16.mxu0 %v13608_v34  ;;  %6603 = vmatprep.mubr.bf16.mxu1 %v13610_v35  ;;  %v13628_v34 = vld [vmem:[%s14921_s14 + $0x12c4] ss:$24 sps:$4 sm:$0xff]  }
 0x1b0   : > { %v15296_v45 = vpop.f32.mrb[24].mxu0  ;;  %v15298_v46 = vpop.f32.mrb[24].mxu1 }
 0x1b1   : > { %18575 = vst [vmem:[#allocation22_spill] sm:$0xff] %v15298_v46  ;;  %v5879_v48 = vpop.f32.mrb[25].mxu0  ;;  %v6391_v49 = vpop.f32.mrb[25].mxu1 }
 0x1b2   : > { %v15304_v52 = vpop.f32.mrb[26].mxu0  ;;  %v15306_v53 = vpop.f32.mrb[26].mxu1 }
 0x1b3   : > { %18576 = vst [vmem:[#allocation23_spill] sm:$0xff] %v15306_v53  ;;  %v5882_v58 = vpop.f32.mrb[27].mxu0  ;;  %v6394_v59 = vpop.f32.mrb[27].mxu1  ;;  %v13696_v53 = vld [vmem:[%s14921_s14 + $0x8a0] ss:$24 sps:$4 sm:$0xff]  }
 0x1b4   : > { %v13636_v58 = vld [vmem:[%s14921_s14 + $0x12f4] ss:$24 sps:$4 sm:$0xff]  }
 0x1b5   : > { %6092 = vmatmul.mubr.bf16.gmra.mrb[132].mxu0 %v13612_v43  ;;  %6604 = vmatmul.mubr.bf16.gmra.mrb[132].mxu1 %v13613_v44 }
 0x1b6   : > { %6099 = vmatprep.mubr.bf16.mxu0 %v13614_v54  ;;  %6611 = vmatprep.mubr.bf16.mxu1 %v13616_v57  ;;  %v13634_v57 = vld [vmem:[%s14921_s14 + $0x6f4] ss:$24 sps:$4 sm:$0xff]  }
 0x1b8   : > { %v15313_v62 = vpop.f32.mrb[28].mxu0  ;;  %v15315_v2 = vpop.f32.mrb[28].mxu1 }
 0x1b9   : > { %18577 = vst [vmem:[#allocation24_spill] sm:$0xff] %v15315_v2  ;;  %v5887_v3 = vpop.f32.mrb[29].mxu0  ;;  %v6399_v6 = vpop.f32.mrb[29].mxu1 }
 0x1ba   : > { %v15317_v7 = vpop.f32.mrb[30].mxu0  ;;  %v15319_v8 = vpop.f32.mrb[30].mxu1  ;;  %v13638_v3 = vld [vmem:[%s14921_s14 + $0x6f0] ss:$24 sps:$4 sm:$0xff]  }
 0x1bb   : > { %18578 = vst [vmem:[#allocation25_spill] sm:$0xff] %v15319_v8  ;;  %v5890_v11 = vpop.f32.mrb[31].mxu0  ;;  %v6402_v14 = vpop.f32.mrb[31].mxu1  ;;  %v13639_v6 = vld [vmem:[%s14921_s14 + $0x12f0] ss:$24 sps:$4 sm:$0xff]  }
 0x1bc   : > { %v13737_v11 = vld [vmem:[%s18543_s1 + $0x168] sm:$0xff]  }
 0x1bd   : > { %6100 = vmatmul.mubr.bf16.gmra.mrb[136].mxu0 %v13618_v60  ;;  %6612 = vmatmul.mubr.bf16.gmra.mrb[136].mxu1 %v13619_v61  ;;  %v13736_v61 = vld [vmem:[%s18543_s1 + $0xe8] sm:$0xff]  }
 0x1be   : > { %6107 = vmatprep.mubr.bf16.mxu0 %v13620_v9  ;;  %6619 = vmatprep.mubr.bf16.mxu1 %v13622_v10  ;;  %v13686_v8 = vld [vmem:[%s14921_s14 + $0x874] ss:$24 sps:$4 sm:$0xff]  }
 0x1bf   : > { %6879 = vmatpush1.bf16.msra.mxu1 %v13736_v61  ;;  %7936 = vmatpush1.bf16.msra.mxu0 %v13737_v11  ;;  %v13648_v61 = vld [vmem:[%s14921_s14 + $0x1354] ss:$24 sps:$4 sm:$0xff]   ;;  %v13650_v11 = vld [vmem:[%s14921_s14 + $0x750] ss:$24 sps:$4 sm:$0xff]  }
 0x1c0   : > { %v15325_v19 = vpop.f32.mrb[32].mxu0  ;;  %v15327_v20 = vpop.f32.mrb[32].mxu1  ;;  %6880 = vmatprep.subr.bf16.mxu1 %v18552_v0  ;;  %7937 = vmatprep.subr.bf16.mxu0 %v18552_v0 }
 0x1c1   : > { %18579 = vst [vmem:[#allocation26_spill] sm:$0xff] %v15327_v20  ;;  %v5895_v21 = vpop.f32.mrb[33].mxu0  ;;  %v6407_v22 = vpop.f32.mrb[33].mxu1 }
 0x1c2   : > { %v15329_v23 = vpop.f32.mrb[34].mxu0  ;;  %v15331_v28 = vpop.f32.mrb[34].mxu1  ;;  %v13640_v22 = vld [vmem:[%s14921_s14 + $0x724] ss:$24 sps:$4 sm:$0xff]  }
 0x1c3   : > { %18580 = vst [vmem:[#allocation27_spill] sm:$0xff] %v15331_v28  ;;  %v5898_v35 = vpop.f32.mrb[35].mxu0  ;;  %v6410_v36 = vpop.f32.mrb[35].mxu1  ;;  %v13683_v28 = vld [vmem:[%s14921_s14 + $0x1440] ss:$24 sps:$4 sm:$0xff]  }
 0x1c4   : > { %v13644_v36 = vld [vmem:[%s14921_s14 + $0x720] ss:$24 sps:$4 sm:$0xff]  }
 0x1c5   : > { %6108 = vmatmul.mubr.bf16.gmra.mrb[140].mxu0 %v13624_v15  ;;  %6620 = vmatmul.mubr.bf16.gmra.mrb[140].mxu1 %v13625_v18 }
 0x1c6   : > { %6115 = vmatprep.mubr.bf16.mxu0 %v13626_v31  ;;  %6627 = vmatprep.mubr.bf16.mxu1 %v13628_v34  ;;  %v13642_v31 = vld [vmem:[%s14921_s14 + $0x1324] ss:$24 sps:$4 sm:$0xff]  }
 0x1c8   : > { %v15337_v43 = vpop.f32.mrb[36].mxu0  ;;  %v15339_v44 = vpop.f32.mrb[36].mxu1 }
 0x1c9   : > { %18581 = vst [vmem:[#allocation28_spill] sm:$0xff] %v15339_v44  ;;  %v5903_v47 = vpop.f32.mrb[37].mxu0  ;;  %v6415_v48 = vpop.f32.mrb[37].mxu1 }
 0x1ca   : > { %v15341_v49 = vpop.f32.mrb[38].mxu0  ;;  %v15343_v54 = vpop.f32.mrb[38].mxu1 }
 0x1cb   : > { %18582 = vst [vmem:[#allocation29_spill] sm:$0xff] %v15343_v54  ;;  %v5906_v59 = vpop.f32.mrb[39].mxu0  ;;  %v6418_v60 = vpop.f32.mrb[39].mxu1  ;;  %v13677_v54 = vld [vmem:[%s14921_s14 + $0x1410] ss:$24 sps:$4 sm:$0xff]  }
 0x1cc   : > { %v13646_v60 = vld [vmem:[%s14921_s14 + $0x754] ss:$24 sps:$4 sm:$0xff]  }
 0x1cd   : > { %6116 = vmatmul.mubr.bf16.gmra.mrb[144].mxu0 %v13630_v39  ;;  %6628 = vmatmul.mubr.bf16.gmra.mrb[144].mxu1 %v13631_v40  ;;  %v13645_v39 = vld [vmem:[%s14921_s14 + $0x1320] ss:$24 sps:$4 sm:$0xff]  }
 0x1ce   : > { %6123 = vmatprep.mubr.bf16.mxu0 %v13634_v57  ;;  %6635 = vmatprep.mubr.bf16.mxu1 %v13636_v58 }
 0x1d0   : > { %v15352_v9 = vpop.f32.mrb[40].mxu0  ;;  %v15354_v10 = vpop.f32.mrb[40].mxu1 }
 0x1d1   : > { %18583 = vst [vmem:[#allocation30_spill] sm:$0xff] %v15354_v10  ;;  %v5911_v14 = vpop.f32.mrb[41].mxu0  ;;  %v6423_v15 = vpop.f32.mrb[41].mxu1  ;;  %v13671_v10 = vld [vmem:[%s14921_s14 + $0x13e0] ss:$24 sps:$4 sm:$0xff]  }
 0x1d2   : > { %v15360_v18 = vpop.f32.mrb[42].mxu0  ;;  %v15362_v21 = vpop.f32.mrb[42].mxu1  ;;  %v13651_v14 = vld [vmem:[%s14921_s14 + $0x1350] ss:$24 sps:$4 sm:$0xff]  }
 0x1d3   : > { %18584 = vst [vmem:[#allocation31_spill] sm:$0xff] %v15362_v21  ;;  %v5914_v34 = vpop.f32.mrb[43].mxu0  ;;  %v6426_v35 = vpop.f32.mrb[43].mxu1  ;;  %v13670_v21 = vld [vmem:[%s14921_s14 + $0x7e0] ss:$24 sps:$4 sm:$0xff]  }
 0x1d5   : > { %6124 = vmatmul.mubr.bf16.gmra.mrb[148].mxu0 %v13638_v3  ;;  %6636 = vmatmul.mubr.bf16.gmra.mrb[148].mxu1 %v13639_v6 }
 0x1d6   : > { %6131 = vmatprep.mubr.bf16.mxu0 %v13640_v22  ;;  %6643 = vmatprep.mubr.bf16.mxu1 %v13642_v31 }
 0x1d8   : > { %v15369_v40 = vpop.f32.mrb[44].mxu0  ;;  %v15371_v47 = vpop.f32.mrb[44].mxu1 }
 0x1d9   : > { %18585 = vst [vmem:[#allocation32_spill] sm:$0xff] %v15371_v47  ;;  %v5919_v48 = vpop.f32.mrb[45].mxu0  ;;  %v6431_v57 = vpop.f32.mrb[45].mxu1 }
 0x1da   : > { %v15373_v58 = vpop.f32.mrb[46].mxu0  ;;  %v15375_v59 = vpop.f32.mrb[46].mxu1  ;;  %v13652_v57 = vld [vmem:[%s14921_s14 + $0x784] ss:$24 sps:$4 sm:$0xff]  }
 0x1db   : > { %18586 = vst [vmem:[#allocation33_spill] sm:$0xff] %v15375_v59  ;;  %v5922_v3 = vpop.f32.mrb[47].mxu0  ;;  %v6434_v6 = vpop.f32.mrb[47].mxu1  ;;  %v13660_v59 = vld [vmem:[%s14921_s14 + $0x7b4] ss:$24 sps:$4 sm:$0xff]  }
 0x1dc   : > { %v13657_v3 = vld [vmem:[%s14921_s14 + $0x1380] ss:$24 sps:$4 sm:$0xff]  }
 0x1dd   : > { %6132 = vmatmul.mubr.bf16.gmra.mrb[152].mxu0 %v13644_v36  ;;  %6644 = vmatmul.mubr.bf16.gmra.mrb[152].mxu1 %v13645_v39  ;;  %v13654_v36 = vld [vmem:[%s14921_s14 + $0x1384] ss:$24 sps:$4 sm:$0xff]  }
 0x1de   : > { %6139 = vmatprep.mubr.bf16.mxu0 %v13646_v60  ;;  %6651 = vmatprep.mubr.bf16.mxu1 %v13648_v61  ;;  %v13656_v61 = vld [vmem:[%s14921_s14 + $0x780] ss:$24 sps:$4 sm:$0xff]  }
 0x1e0   : > { %v15381_v15 = vpop.f32.mrb[48].mxu0  ;;  %v15383_v22 = vpop.f32.mrb[48].mxu1 }
 0x1e1   : > { %18587 = vst [vmem:[#allocation34_spill] sm:$0xff] %v15383_v22  ;;  %v5927_v31 = vpop.f32.mrb[49].mxu0  ;;  %v6439_v34 = vpop.f32.mrb[49].mxu1 }
 0x1e2   : > { %v15385_v35 = vpop.f32.mrb[50].mxu0  ;;  %v15387_v48 = vpop.f32.mrb[50].mxu1 }
 0x1e3   : > { %18588 = vst [vmem:[#allocation35_spill] sm:$0xff] %v15387_v48  ;;  %v5930_v39 = vpop.f32.mrb[51].mxu0  ;;  %v6442_v60 = vpop.f32.mrb[51].mxu1 }
 0x1e4   : > { %v13662_v39 = vld [vmem:[%s14921_s14 + $0x13b4] ss:$24 sps:$4 sm:$0xff]  }
 0x1e5   : > { %6140 = vmatmul.mubr.bf16.gmra.mrb[156].mxu0 %v13650_v11  ;;  %6652 = vmatmul.mubr.bf16.gmra.mrb[156].mxu1 %v13651_v14  ;;  %v13763_v60 = vld [vmem:[%s18543_s1 + $0x170] sm:$0xff]  }
 0x1e6   : > { %6147 = vmatprep.mubr.bf16.mxu0 %v13652_v57  ;;  %6659 = vmatprep.mubr.bf16.mxu1 %v13654_v36  ;;  %v13762_v57 = vld [vmem:[%s18543_s1 + $0xf0] sm:$0xff]  }
 0x1e7   : > { %6881 = vmatpush1.bf16.msra.mxu1 %v13762_v57  ;;  %v13668_v57 = vld [vmem:[%s14921_s14 + $0x13e4] ss:$24 sps:$4 sm:$0xff]   ;;  %7938 = vmatpush1.bf16.msra.mxu0 %v13763_v60 }
 0x1e8   : > { %v15393_v6 = vpop.f32.mrb[52].mxu0  ;;  %v15395_v31 = vpop.f32.mrb[52].mxu1 }
 0x1e9   : > { %18589 = vst [vmem:[#allocation36_spill] sm:$0xff] %v15395_v31  ;;  %v5935_v34 = vpop.f32.mrb[53].mxu0  ;;  %v6447_v0 = vpop.f32.mrb[53].mxu1 }
 0x1ea   : > { %v15397_v22 = vpop.f32.mrb[54].mxu0  ;;  %v15399_v48 = vpop.f32.mrb[54].mxu1  ;;  %v18592_v34 = vmov 0  }
 0x1eb   : > { %18590 = vst [vmem:[#allocation37_spill] sm:$0xff] %v15399_v48  ;;  %v5938_v11 = vpop.f32.mrb[55].mxu0  ;;  %v6450_v14 = vpop.f32.mrb[55].mxu1  ;;  %6882 = vmatprep.subr.bf16.mxu1 %v18592_v34  ;;  %7939 = vmatprep.subr.bf16.mxu0 %v18592_v34  ;;  %v13674_v34 = vld [vmem:[%s14921_s14 + $0x1414] ss:$24 sps:$4 sm:$0xff]  }
 0x1ec   : > { %v13664_v11 = vld [vmem:[%s14921_s14 + $0x7b0] ss:$24 sps:$4 sm:$0xff]  }
 0x1ed   : > { %6148 = vmatmul.mubr.bf16.gmra.mrb[160].mxu0 %v13656_v61  ;;  %6660 = vmatmul.mubr.bf16.gmra.mrb[160].mxu1 %v13657_v3  ;;  %v13665_v14 = vld [vmem:[%s14921_s14 + $0x13b0] ss:$24 sps:$4 sm:$0xff]  }
 0x1ee   : > { %6155 = vmatprep.mubr.bf16.mxu0 %v13660_v59  ;;  %6667 = vmatprep.mubr.bf16.mxu1 %v13662_v39  ;;  %v13666_v39 = vld [vmem:[%s14921_s14 + $0x7e4] ss:$24 sps:$4 sm:$0xff]  }
 0x1f0   : > { %v15406_v0 = vpop.f32.mrb[56].mxu0  ;;  %v15408_v36 = vpop.f32.mrb[56].mxu1 }
 0x1f1   : > { %18591 = vst [vmem:[#allocation38_spill] sm:$0xff] %v15408_v36  ;;  %v5943_v61 = vpop.f32.mrb[57].mxu0  ;;  %v6455_v3 = vpop.f32.mrb[57].mxu1 }
 0x1f2   : > { %v15416_v48 = vpop.f32.mrb[58].mxu0  ;;  %v15418_v59 = vpop.f32.mrb[58].mxu1 }
 0x1f3   : > { %18593 = vst [vmem:[#allocation39_spill] sm:$0xff] %v15418_v59  ;;  %v5946_v36 = vpop.f32.mrb[59].mxu0  ;;  %v6458_v31 = vpop.f32.mrb[59].mxu1 }
 0x1f4   : > { %v13672_v31 = vld [vmem:[%s14921_s14 + $0x814] ss:$24 sps:$4 sm:$0xff]  }
 0x1f5   : > { %6156 = vmatmul.mubr.bf16.gmra.mrb[164].mxu0 %v13664_v11  ;;  %6668 = vmatmul.mubr.bf16.gmra.mrb[164].mxu1 %v13665_v14 }
 0x1f6   : > { %6163 = vmatprep.mubr.bf16.mxu0 %v13666_v39  ;;  %6675 = vmatprep.mubr.bf16.mxu1 %v13668_v57 }
 0x1f8   : > { %v15423_v61 = vpop.f32.mrb[60].mxu0  ;;  %v15425_v3 = vpop.f32.mrb[60].mxu1 }
 0x1f9   : > { %18594 = vst [vmem:[#allocation40_spill] sm:$0xff] %v15425_v3  ;;  %v5951_v47 = vpop.f32.mrb[61].mxu0  ;;  %v6463_v59 = vpop.f32.mrb[61].mxu1  ;;  %v13676_v3 = vld [vmem:[%s14921_s14 + $0x810] ss:$24 sps:$4 sm:$0xff]  }
 0x1fa   : > { %v15429_v60 = vpop.f32.mrb[62].mxu0  ;;  %v15431_v36 = vpop.f32.mrb[62].mxu1 }
 0x1fb   : > { %18595 = vst [vmem:[#allocation41_spill] sm:$0xff] %v15431_v36  ;;  %v5954_v11 = vpop.f32.mrb[63].mxu0  ;;  %v6466_v14 = vpop.f32.mrb[63].mxu1 }
 0x1fc   : > { %v13678_v11 = vld [vmem:[%s14921_s14 + $0x844] ss:$24 sps:$4 sm:$0xff]  }
 0x1fd   : > { %6164 = vmatmul.mubr.bf16.gmra.mrb[168].mxu0 %v13670_v21  ;;  %6676 = vmatmul.mubr.bf16.gmra.mrb[168].mxu1 %v13671_v10  ;;  %v13680_v21 = vld [vmem:[%s14921_s14 + $0x1444] ss:$24 sps:$4 sm:$0xff]  }
 0x1fe   : > { %6171 = vmatprep.mubr.bf16.mxu0 %v13672_v31  ;;  %6683 = vmatprep.mubr.bf16.mxu1 %v13674_v34 }
 0x200   : > { %v15435_v47 = vpop.f32.mrb[64].mxu0  ;;  %v15437_v59 = vpop.f32.mrb[64].mxu1 }
 0x201   : > { %18596 = vst [vmem:[#allocation42_spill] sm:$0xff] %v15437_v59  ;;  %v5959_v39 = vpop.f32.mrb[65].mxu0  ;;  %v6471_v57 = vpop.f32.mrb[65].mxu1  ;;  %v13682_v59 = vld [vmem:[%s14921_s14 + $0x840] ss:$24 sps:$4 sm:$0xff]  }
 0x202   : > { %v15441_v36 = vpop.f32.mrb[66].mxu0  ;;  %v15443_v44 = vpop.f32.mrb[66].mxu1 }
 0x203   : > { %18597 = vst [vmem:[#allocation43_spill] sm:$0xff] %v15443_v44  ;;  %v5962_v10 = vpop.f32.mrb[67].mxu0  ;;  %v6474_v31 = vpop.f32.mrb[67].mxu1 }
 0x204   : > { %v13688_v10 = vld [vmem:[%s14921_s14 + $0x1474] ss:$24 sps:$4 sm:$0xff]  }
 0x205   : > { %6172 = vmatmul.mubr.bf16.gmra.mrb[172].mxu0 %v13676_v3  ;;  %6684 = vmatmul.mubr.bf16.gmra.mrb[172].mxu1 %v13677_v54 }
 0x206   : > { %6179 = vmatprep.mubr.bf16.mxu0 %v13678_v11  ;;  %6691 = vmatprep.mubr.bf16.mxu1 %v13680_v21  ;;  %v13788_v11 = vld [vmem:[%s18543_s1 + $0xf8] sm:$0xff]  }
 0x207   : > { %6883 = vmatpush1.bf16.msra.mxu1 %v13788_v11 }
 0x208   : > { %v15447_v34 = vpop.f32.mrb[68].mxu0  ;;  %v15449_v14 = vpop.f32.mrb[68].mxu1 }
 0x209   : > { %18598 = vst [vmem:[#allocation44_spill] sm:$0xff] %v15449_v14  ;;  %v5967_v39 = vpop.f32.mrb[69].mxu0  ;;  %v6479_v57 = vpop.f32.mrb[69].mxu1 }
 0x20a   : > { %v15453_v20 = vpop.f32.mrb[70].mxu0  ;;  %v15455_v44 = vpop.f32.mrb[70].mxu1  ;;  %v13789_v39 = vld [vmem:[%s18543_s1 + $0x178] sm:$0xff]  }
 0x20b   : > { %18599 = vst [vmem:[#allocation45_spill] sm:$0xff] %v15455_v44  ;;  %v5970_v3 = vpop.f32.mrb[71].mxu0  ;;  %v6482_v54 = vpop.f32.mrb[71].mxu1  ;;  %7940 = vmatpush1.bf16.msra.mxu0 %v13789_v39 }
 0x20c   : > { %v13691_v54 = vld [vmem:[%s14921_s14 + $0x1470] ss:$24 sps:$4 sm:$0xff]  }
 0x20d   : > { %6180 = vmatmul.mubr.bf16.gmra.mrb[176].mxu0 %v13682_v59  ;;  %6692 = vmatmul.mubr.bf16.gmra.mrb[176].mxu1 %v13683_v28  ;;  %v13690_v59 = vld [vmem:[%s14921_s14 + $0x870] ss:$24 sps:$4 sm:$0xff]  }
 0x20e   : > { %6187 = vmatprep.mubr.bf16.mxu0 %v13686_v8  ;;  %6699 = vmatprep.mubr.bf16.mxu1 %v13688_v10  ;;  %v13692_v8 = vld [vmem:[%s14921_s14 + $0x8a4] ss:$24 sps:$4 sm:$0xff]  }
 0x20f   : > { %v13694_v10 = vld [vmem:[%s14921_s14 + $0x14a4] ss:$24 sps:$4 sm:$0xff]  }
 0x210   : > { %v15462_v21 = vpop.f32.mrb[72].mxu0  ;;  %v15464_v31 = vpop.f32.mrb[72].mxu1 }
 0x211   : > { %18600 = vst [vmem:[#allocation46_spill] sm:$0xff] %v15464_v31  ;;  %v5975_v57 = vpop.f32.mrb[73].mxu0  ;;  %v6487_v3 = vpop.f32.mrb[73].mxu1 }
 0x212   : > { %v15471_v28 = vpop.f32.mrb[74].mxu0  ;;  %v15473_v44 = vpop.f32.mrb[74].mxu1 }
 0x213   : > { %18601 = vst [vmem:[#allocation47_spill] sm:$0xff] %v15473_v44  ;;  %v5978_v11 = vpop.f32.mrb[75].mxu0  ;;  %v6490_v31 = vpop.f32.mrb[75].mxu1  ;;  %v13697_v44 = vld [vmem:[%s14921_s14 + $0x14a0] ss:$24 sps:$4 sm:$0xff]  }
 0x214   : > { %v13698_v11 = vld [vmem:[%s14921_s14 + $0x8d4] ss:$24 sps:$4 sm:$0xff]  }
 0x215   : > { %6188 = vmatmul.mubr.bf16.gmra.mrb[180].mxu0 %v13690_v59  ;;  %6700 = vmatmul.mubr.bf16.gmra.mrb[180].mxu1 %v13691_v54  ;;  %v13700_v31 = vld [vmem:[%s14921_s14 + $0x14d4] ss:$24 sps:$4 sm:$0xff]  }
 0x216   : > { %6195 = vmatprep.mubr.bf16.mxu0 %v13692_v8  ;;  %6707 = vmatprep.mubr.bf16.mxu1 %v13694_v10 }
 0x218   : > { %v15477_v57 = vpop.f32.mrb[76].mxu0  ;;  %v15479_v3 = vpop.f32.mrb[76].mxu1 }
 0x219   : > { %18602 = vst [vmem:[#allocation48_spill] sm:$0xff] %v15479_v3  ;;  %v5983_v14 = vpop.f32.mrb[77].mxu0  ;;  %v6495_v2 = vpop.f32.mrb[77].mxu1  ;;  %v13702_v3 = vld [vmem:[%s14921_s14 + $0x8d0] ss:$24 sps:$4 sm:$0xff]  }
 0x21a   : > { %v15483_v46 = vpop.f32.mrb[78].mxu0  ;;  %v15485_v39 = vpop.f32.mrb[78].mxu1 }
 0x21b   : > { %18603 = vst [vmem:[#allocation49_spill] sm:$0xff] %v15485_v39  ;;  %v5986_v59 = vpop.f32.mrb[79].mxu0  ;;  %v6498_v54 = vpop.f32.mrb[79].mxu1 }
 0x21c   : > { %v13704_v59 = vld [vmem:[%s14921_s14 + $0x904] ss:$24 sps:$4 sm:$0xff]  }
 0x21d   : > { %6196 = vmatmul.mubr.bf16.gmra.mrb[184].mxu0 %v13696_v53  ;;  %6708 = vmatmul.mubr.bf16.gmra.mrb[184].mxu1 %v13697_v44  ;;  %v13706_v53 = vld [vmem:[%s14921_s14 + $0x1504] ss:$24 sps:$4 sm:$0xff]  }
 0x21e   : > { %6203 = vmatprep.mubr.bf16.mxu0 %v13698_v11  ;;  %6715 = vmatprep.mubr.bf16.mxu1 %v13700_v31 }
 0x220   : > { %v15489_v14 = vpop.f32.mrb[80].mxu0  ;;  %v15491_v2 = vpop.f32.mrb[80].mxu1 }
 0x221   : > { %18604 = vst [vmem:[#allocation50_spill] sm:$0xff] %v15491_v2  ;;  %v5991_v8 = vpop.f32.mrb[81].mxu0  ;;  %v6503_v10 = vpop.f32.mrb[81].mxu1  ;;  %v13708_v2 = vld [vmem:[%s14921_s14 + $0x900] ss:$24 sps:$4 sm:$0xff]  }
 0x222   : > { %v15495_v39 = vpop.f32.mrb[82].mxu0  ;;  %v15497_v27 = vpop.f32.mrb[82].mxu1 }
 0x223   : > { %18605 = vst [vmem:[#allocation51_spill] sm:$0xff] %v15497_v27  ;;  %v5994_v44 = vpop.f32.mrb[83].mxu0  ;;  %v6506_v11 = vpop.f32.mrb[83].mxu1 }
 0x224   : > { %v13712_v44 = vld [vmem:[%s14921_s14 + $0x934] ss:$24 sps:$4 sm:$0xff]  }
 0x225   : > { %6204 = vmatmul.mubr.bf16.gmra.mrb[188].mxu0 %v13702_v3  ;;  %6716 = vmatmul.mubr.bf16.gmra.mrb[188].mxu1 %v13703_v33  ;;  %v13714_v3 = vld [vmem:[%s14921_s14 + $0x1534] ss:$24 sps:$4 sm:$0xff]  }
 0x226   : > { %6211 = vmatprep.mubr.bf16.mxu0 %v13704_v59  ;;  %6723 = vmatprep.mubr.bf16.mxu1 %v13706_v53 }
 0x228   : > { %v15501_v31 = vpop.f32.mrb[84].mxu0  ;;  %v15503_v54 = vpop.f32.mrb[84].mxu1 }
 0x229   : > { %18606 = vst [vmem:[#allocation52_spill] sm:$0xff] %v15503_v54  ;;  %v5999_v8 = vpop.f32.mrb[85].mxu0  ;;  %v6511_v10 = vpop.f32.mrb[85].mxu1  ;;  %v13716_v54 = vld [vmem:[%s14921_s14 + $0x930] ss:$24 sps:$4 sm:$0xff]  }
 0x22a   : > { %v15507_v27 = vpop.f32.mrb[86].mxu0  ;;  %v15509_v13 = vpop.f32.mrb[86].mxu1 }
 0x22b   : > { %18607 = vst [vmem:[#allocation53_spill] sm:$0xff] %v15509_v13  ;;  %v6002_v33 = vpop.f32.mrb[87].mxu0  ;;  %v6514_v59 = vpop.f32.mrb[87].mxu1 }
 0x22c   : > { %v13718_v33 = vld [vmem:[%s14921_s14 + $0x964] ss:$24 sps:$4 sm:$0xff]  }
 0x22d   : > { %6212 = vmatmul.mubr.bf16.gmra.mrb[192].mxu0 %v13708_v2  ;;  %6724 = vmatmul.mubr.bf16.gmra.mrb[192].mxu1 %v13709_v17  ;;  %v13720_v2 = vld [vmem:[%s14921_s14 + $0x1564] ss:$24 sps:$4 sm:$0xff]  }
 0x22e   : > { %6219 = vmatprep.mubr.bf16.mxu0 %v13712_v44  ;;  %6731 = vmatprep.mubr.bf16.mxu1 %v13714_v3 }
 0x230   : > { %v15513_v53 = vpop.f32.mrb[88].mxu0  ;;  %v15515_v11 = vpop.f32.mrb[88].mxu1 }
 0x231   : > { %18608 = vst [vmem:[#allocation54_spill] sm:$0xff] %v15515_v11  ;;  %v6007_v8 = vpop.f32.mrb[89].mxu0  ;;  %v6519_v10 = vpop.f32.mrb[89].mxu1  ;;  %v13722_v11 = vld [vmem:[%s14921_s14 + $0x960] ss:$24 sps:$4 sm:$0xff]  }
 0x232   : > { %v15519_v13 = vpop.f32.mrb[90].mxu0  ;;  %v15521_v1 = vpop.f32.mrb[90].mxu1 }
 0x233   : > { %18609 = vst [vmem:[#allocation55_spill] sm:$0xff] %v15519_v13  ;;  %18610 = vst [vmem:[#allocation56_spill] sm:$0xff] %v15521_v1  ;;  %v6010_v17 = vpop.f32.mrb[91].mxu0  ;;  %v6522_v44 = vpop.f32.mrb[91].mxu1 }
 0x234   : > { %v13724_v17 = vld [vmem:[%s14921_s14 + $0x994] ss:$24 sps:$4 sm:$0xff]  }
 0x235   : > { %6220 = vmatmul.mubr.bf16.gmra.mrb[196].mxu0 %v13716_v54  ;;  %6732 = vmatmul.mubr.bf16.gmra.mrb[196].mxu1 %v13717_v5  ;;  %v13726_v54 = vld [vmem:[%s14921_s14 + $0x1594] ss:$24 sps:$4 sm:$0xff]  }
 0x236   : > { %6227 = vmatprep.mubr.bf16.mxu0 %v13718_v33  ;;  %6739 = vmatprep.mubr.bf16.mxu1 %v13720_v2 }
 0x238   : > { %v15525_v3 = vpop.f32.mrb[92].mxu0  ;;  %v15527_v59 = vpop.f32.mrb[92].mxu1 }
 0x239   : > { %18611 = vst [vmem:[#allocation57_spill] sm:$0xff] %v15525_v3  ;;  %18612 = vst [vmem:[#allocation58_spill] sm:$0xff] %v15527_v59  ;;  %v6015_v8 = vpop.f32.mrb[93].mxu0  ;;  %v6527_v10 = vpop.f32.mrb[93].mxu1  ;;  %v13728_v59 = vld [vmem:[%s14921_s14 + $0x990] ss:$24 sps:$4 sm:$0xff]  }
 0x23a   : > { %v15531_v1 = vpop.f32.mrb[94].mxu0  ;;  %v15533_v51 = vpop.f32.mrb[94].mxu1 }
 0x23b   : > { %18613 = vst [vmem:[#allocation59_spill] sm:$0xff] %v15531_v1  ;;  %18614 = vst [vmem:[#allocation60_spill] sm:$0xff] %v15533_v51  ;;  %v6018_v5 = vpop.f32.mrb[95].mxu0  ;;  %v6530_v33 = vpop.f32.mrb[95].mxu1  ;;  %v13981_v1 = vld [vmem:[%s14921_s14 + $0x554] ss:$24 sps:$4 sm:$0xff]  }
 0x23c   : > { %v13730_v5 = vld [vmem:[%s14921_s14 + $0x9c4] ss:$24 sps:$4 sm:$0xff]  }
 0x23d   : > { %6228 = vmatmul.mubr.bf16.gmra.mrb[200].mxu0 %v13722_v11  ;;  %6740 = vmatmul.mubr.bf16.gmra.mrb[200].mxu1 %v13723_v56  ;;  %v13732_v11 = vld [vmem:[%s14921_s14 + $0x15c4] ss:$24 sps:$4 sm:$0xff]  }
 0x23e   : > { %6235 = vmatprep.mubr.bf16.mxu0 %v13724_v17  ;;  %6747 = vmatprep.mubr.bf16.mxu1 %v13726_v54 }
 0x240   : > { %v15537_v2 = vpop.f32.mrb[96].mxu0  ;;  %v15539_v44 = vpop.f32.mrb[96].mxu1 }
 0x241   : > { %18615 = vst [vmem:[#allocation61_spill] sm:$0xff] %v15537_v2  ;;  %18616 = vst [vmem:[#allocation62_spill] sm:$0xff] %v15539_v44  ;;  %v6023_v8 = vpop.f32.mrb[97].mxu0  ;;  %v6535_v10 = vpop.f32.mrb[97].mxu1  ;;  %v13734_v44 = vld [vmem:[%s14921_s14 + $0x9c0] ss:$24 sps:$4 sm:$0xff]  }
 0x242   : > { %v15543_v51 = vpop.f32.mrb[98].mxu0  ;;  %v15545_v38 = vpop.f32.mrb[98].mxu1 }
 0x243   : > { %18617 = vst [vmem:[#allocation63_spill] sm:$0xff] %v15543_v51  ;;  %18618 = vst [vmem:[#allocation64_spill] sm:$0xff] %v15545_v38  ;;  %v6026_v56 = vpop.f32.mrb[99].mxu0  ;;  %v6538_v17 = vpop.f32.mrb[99].mxu1  ;;  %v15824_v51 = vld [vmem:[%s14921_s14 + $0x21c] ss:$24 sps:$4 sm:$0xff]  }
 0x244   : > { %v13738_v56 = vld [vmem:[%s14921_s14 + $0x9f4] ss:$24 sps:$4 sm:$0xff]  }
 0x245   : > { %6236 = vmatmul.mubr.bf16.gmra.mrb[204].mxu0 %v13728_v59  ;;  %6748 = vmatmul.mubr.bf16.gmra.mrb[204].mxu1 %v13729_v42  ;;  %v13740_v59 = vld [vmem:[%s14921_s14 + $0x15f4] ss:$24 sps:$4 sm:$0xff]  }
 0x246   : > { %6243 = vmatprep.mubr.bf16.mxu0 %v13730_v5  ;;  %6755 = vmatprep.mubr.bf16.mxu1 %v13732_v11 }
 0x248   : > { %v15549_v54 = vpop.f32.mrb[100].mxu0  ;;  %v15551_v33 = vpop.f32.mrb[100].mxu1 }
 0x249   : > { %18619 = vst [vmem:[#allocation65_spill] sm:$0xff] %v15549_v54  ;;  %18620 = vst [vmem:[#allocation66_spill] sm:$0xff] %v15551_v33  ;;  %v6031_v8 = vpop.f32.mrb[101].mxu0  ;;  %v6543_v10 = vpop.f32.mrb[101].mxu1  ;;  %v13742_v33 = vld [vmem:[%s14921_s14 + $0x9f0] ss:$24 sps:$4 sm:$0xff]  }
 0x24a   : > { %v15555_v38 = vpop.f32.mrb[102].mxu0  ;;  %v15557_v26 = vpop.f32.mrb[102].mxu1 }
 0x24b   : > { %18621 = vst [vmem:[#allocation67_spill] sm:$0xff] %v15555_v38  ;;  %18622 = vst [vmem:[#allocation68_spill] sm:$0xff] %v15557_v26  ;;  %v6034_v42 = vpop.f32.mrb[103].mxu0  ;;  %v6546_v5 = vpop.f32.mrb[103].mxu1  ;;  %v13743_v38 = vld [vmem:[%s14921_s14 + $0x15f0] ss:$24 sps:$4 sm:$0xff]  }
 0x24c   : > { %v13744_v42 = vld [vmem:[%s14921_s14 + $0xa24] ss:$24 sps:$4 sm:$0xff]  }
 0x24d   : > { %6244 = vmatmul.mubr.bf16.gmra.mrb[208].mxu0 %v13734_v44  ;;  %6756 = vmatmul.mubr.bf16.gmra.mrb[208].mxu1 %v13735_v30  ;;  %v13746_v44 = vld [vmem:[%s14921_s14 + $0x1624] ss:$24 sps:$4 sm:$0xff]  }
 0x24e   : > { %6251 = vmatprep.mubr.bf16.mxu0 %v13738_v56  ;;  %6763 = vmatprep.mubr.bf16.mxu1 %v13740_v59 }
 0x250   : > { %v15561_v11 = vpop.f32.mrb[104].mxu0  ;;  %v15563_v17 = vpop.f32.mrb[104].mxu1 }
 0x251   : > { %18623 = vst [vmem:[#allocation69_spill] sm:$0xff] %v15561_v11  ;;  %18624 = vst [vmem:[#allocation70_spill] sm:$0xff] %v15563_v17  ;;  %v6039_v8 = vpop.f32.mrb[105].mxu0  ;;  %v6551_v10 = vpop.f32.mrb[105].mxu1  ;;  %v13748_v17 = vld [vmem:[%s14921_s14 + $0xa20] ss:$24 sps:$4 sm:$0xff]  }
 0x252   : > { %v15567_v26 = vpop.f32.mrb[106].mxu0  ;;  %v15569_v54 = vpop.f32.mrb[106].mxu1 }
 0x253   : > { %18625 = vst [vmem:[#allocation71_spill] sm:$0xff] %v15567_v26  ;;  %18626 = vst [vmem:[#allocation72_spill] sm:$0xff] %v15569_v54  ;;  %v6042_v30 = vpop.f32.mrb[107].mxu0  ;;  %v6554_v56 = vpop.f32.mrb[107].mxu1  ;;  %v13749_v26 = vld [vmem:[%s14921_s14 + $0x1620] ss:$24 sps:$4 sm:$0xff]  }
 0x254   : > { %v13750_v30 = vld [vmem:[%s14921_s14 + $0xa54] ss:$24 sps:$4 sm:$0xff]  }
 0x255   : > { %6252 = vmatmul.mubr.bf16.gmra.mrb[212].mxu0 %v13742_v33  ;;  %6764 = vmatmul.mubr.bf16.gmra.mrb[212].mxu1 %v13743_v38  ;;  %v13752_v33 = vld [vmem:[%s14921_s14 + $0x1654] ss:$24 sps:$4 sm:$0xff]  }
 0x256   : > { %6259 = vmatprep.mubr.bf16.mxu0 %v13744_v42  ;;  %6771 = vmatprep.mubr.bf16.mxu1 %v13746_v44 }
 0x258   : > { %v15573_v59 = vpop.f32.mrb[108].mxu0  ;;  %v15575_v5 = vpop.f32.mrb[108].mxu1 }
 0x259   : > { %18627 = vst [vmem:[#allocation73_spill] sm:$0xff] %v15573_v59  ;;  %18628 = vst [vmem:[#allocation74_spill] sm:$0xff] %v15575_v5  ;;  %v6047_v8 = vpop.f32.mrb[109].mxu0  ;;  %v6559_v10 = vpop.f32.mrb[109].mxu1  ;;  %v13754_v5 = vld [vmem:[%s14921_s14 + $0xa50] ss:$24 sps:$4 sm:$0xff]  }
 0x25a   : > { %v15579_v54 = vpop.f32.mrb[110].mxu0  ;;  %v15581_v11 = vpop.f32.mrb[110].mxu1 }
 0x25b   : > { %18629 = vst [vmem:[#allocation75_spill] sm:$0xff] %v15579_v54  ;;  %18630 = vst [vmem:[#allocation76_spill] sm:$0xff] %v15581_v11  ;;  %v6050_v38 = vpop.f32.mrb[111].mxu0  ;;  %v6562_v42 = vpop.f32.mrb[111].mxu1  ;;  %v13755_v54 = vld [vmem:[%s14921_s14 + $0x1650] ss:$24 sps:$4 sm:$0xff]  }
 0x25c   : > { %v13756_v38 = vld [vmem:[%s14921_s14 + $0xa84] ss:$24 sps:$4 sm:$0xff]  }
 0x25d   : > { %6260 = vmatmul.mubr.bf16.gmra.mrb[216].mxu0 %v13748_v17  ;;  %6772 = vmatmul.mubr.bf16.gmra.mrb[216].mxu1 %v13749_v26  ;;  %v13758_v17 = vld [vmem:[%s14921_s14 + $0x1684] ss:$24 sps:$4 sm:$0xff]  }
 0x25e   : > { %6267 = vmatprep.mubr.bf16.mxu0 %v13750_v30  ;;  %6779 = vmatprep.mubr.bf16.mxu1 %v13752_v33 }
 0x260   : > { %v15585_v44 = vpop.f32.mrb[112].mxu0  ;;  %v15587_v56 = vpop.f32.mrb[112].mxu1 }
 0x261   : > { %18631 = vst [vmem:[#allocation77_spill] sm:$0xff] %v15585_v44  ;;  %18632 = vst [vmem:[#allocation78_spill] sm:$0xff] %v15587_v56  ;;  %v6055_v8 = vpop.f32.mrb[113].mxu0  ;;  %v6567_v10 = vpop.f32.mrb[113].mxu1  ;;  %v13760_v56 = vld [vmem:[%s14921_s14 + $0xa80] ss:$24 sps:$4 sm:$0xff]  }
 0x262   : > { %v15591_v11 = vpop.f32.mrb[114].mxu0  ;;  %v15593_v59 = vpop.f32.mrb[114].mxu1 }
 0x263   : > { %18633 = vst [vmem:[#allocation79_spill] sm:$0xff] %v15591_v11  ;;  %18634 = vst [vmem:[#allocation80_spill] sm:$0xff] %v15593_v59  ;;  %v6058_v26 = vpop.f32.mrb[115].mxu0  ;;  %v6570_v30 = vpop.f32.mrb[115].mxu1  ;;  %v13761_v11 = vld [vmem:[%s14921_s14 + $0x1680] ss:$24 sps:$4 sm:$0xff]  }
 0x264   : > { %v13764_v26 = vld [vmem:[%s14921_s14 + $0xab4] ss:$24 sps:$4 sm:$0xff]  }
 0x265   : > { %6268 = vmatmul.mubr.bf16.gmra.mrb[220].mxu0 %v13754_v5  ;;  %6780 = vmatmul.mubr.bf16.gmra.mrb[220].mxu1 %v13755_v54  ;;  %v13766_v5 = vld [vmem:[%s14921_s14 + $0x16b4] ss:$24 sps:$4 sm:$0xff]  }
 0x266   : > { %6275 = vmatprep.mubr.bf16.mxu0 %v13756_v38  ;;  %6787 = vmatprep.mubr.bf16.mxu1 %v13758_v17 }
 0x268   : > { %v15597_v33 = vpop.f32.mrb[116].mxu0  ;;  %v15599_v42 = vpop.f32.mrb[116].mxu1 }
 0x269   : > { %18635 = vst [vmem:[#allocation81_spill] sm:$0xff] %v15597_v33  ;;  %18636 = vst [vmem:[#allocation82_spill] sm:$0xff] %v15599_v42  ;;  %v6063_v8 = vpop.f32.mrb[117].mxu0  ;;  %v6575_v10 = vpop.f32.mrb[117].mxu1  ;;  %v13768_v42 = vld [vmem:[%s14921_s14 + $0xab0] ss:$24 sps:$4 sm:$0xff]  }
 0x26a   : > { %v15603_v59 = vpop.f32.mrb[118].mxu0  ;;  %v15605_v44 = vpop.f32.mrb[118].mxu1 }
 0x26b   : > { %18637 = vst [vmem:[#allocation83_spill] sm:$0xff] %v15603_v59  ;;  %18638 = vst [vmem:[#allocation84_spill] sm:$0xff] %v15605_v44  ;;  %v6066_v54 = vpop.f32.mrb[119].mxu0  ;;  %v6578_v38 = vpop.f32.mrb[119].mxu1  ;;  %v13769_v59 = vld [vmem:[%s14921_s14 + $0x16b0] ss:$24 sps:$4 sm:$0xff]  }
 0x26c   : > { %v13770_v54 = vld [vmem:[%s14921_s14 + $0xae4] ss:$24 sps:$4 sm:$0xff]  }
 0x26d   : > { %6276 = vmatmul.mubr.bf16.gmra.mrb[224].mxu0 %v13760_v56  ;;  %6788 = vmatmul.mubr.bf16.gmra.mrb[224].mxu1 %v13761_v11  ;;  %v13772_v56 = vld [vmem:[%s14921_s14 + $0x16e4] ss:$24 sps:$4 sm:$0xff]  }
 0x26e   : > { %6283 = vmatprep.mubr.bf16.mxu0 %v13764_v26  ;;  %6795 = vmatprep.mubr.bf16.mxu1 %v13766_v5 }
 0x270   : > { %v15609_v17 = vpop.f32.mrb[120].mxu0  ;;  %v15611_v30 = vpop.f32.mrb[120].mxu1 }
 0x271   : > { %18639 = vst [vmem:[#allocation85_spill] sm:$0xff] %v15609_v17  ;;  %18640 = vst [vmem:[#allocation86_spill] sm:$0xff] %v15611_v30  ;;  %v6071_v8 = vpop.f32.mrb[121].mxu0  ;;  %v6583_v10 = vpop.f32.mrb[121].mxu1  ;;  %v13774_v30 = vld [vmem:[%s14921_s14 + $0xae0] ss:$24 sps:$4 sm:$0xff]  }
 0x272   : > { %v15615_v44 = vpop.f32.mrb[122].mxu0  ;;  %v15617_v33 = vpop.f32.mrb[122].mxu1 }
 0x273   : > { %18641 = vst [vmem:[#allocation87_spill] sm:$0xff] %v15615_v44  ;;  %18642 = vst [vmem:[#allocation88_spill] sm:$0xff] %v15617_v33  ;;  %v6074_v11 = vpop.f32.mrb[123].mxu0  ;;  %v6586_v26 = vpop.f32.mrb[123].mxu1  ;;  %v13775_v44 = vld [vmem:[%s14921_s14 + $0x16e0] ss:$24 sps:$4 sm:$0xff]  }
 0x274   : > { %v13776_v11 = vld [vmem:[%s14921_s14 + $0xb14] ss:$24 sps:$4 sm:$0xff]  }
 0x275   : > { %6284 = vmatmul.mubr.bf16.gmra.mrb[228].mxu0 %v13768_v42  ;;  %6796 = vmatmul.mubr.bf16.gmra.mrb[228].mxu1 %v13769_v59  ;;  %v13778_v42 = vld [vmem:[%s14921_s14 + $0x1714] ss:$24 sps:$4 sm:$0xff]  }
 0x276   : > { %6291 = vmatprep.mubr.bf16.mxu0 %v13770_v54  ;;  %6803 = vmatprep.mubr.bf16.mxu1 %v13772_v56 }
 0x278   : > { %v15621_v5 = vpop.f32.mrb[124].mxu0  ;;  %v15623_v38 = vpop.f32.mrb[124].mxu1 }
 0x279   : > { %18643 = vst [vmem:[#allocation89_spill] sm:$0xff] %v15621_v5  ;;  %18644 = vst [vmem:[#allocation90_spill] sm:$0xff] %v15623_v38  ;;  %v6079_v8 = vpop.f32.mrb[125].mxu0  ;;  %v6591_v10 = vpop.f32.mrb[125].mxu1  ;;  %v13780_v38 = vld [vmem:[%s14921_s14 + $0xb10] ss:$24 sps:$4 sm:$0xff]  }
 0x27a   : > { %v15627_v33 = vpop.f32.mrb[126].mxu0  ;;  %v15629_v17 = vpop.f32.mrb[126].mxu1 }
 0x27b   : > { %18645 = vst [vmem:[#allocation91_spill] sm:$0xff] %v15627_v33  ;;  %18646 = vst [vmem:[#allocation92_spill] sm:$0xff] %v15629_v17  ;;  %v6082_v59 = vpop.f32.mrb[127].mxu0  ;;  %v6594_v54 = vpop.f32.mrb[127].mxu1  ;;  %v13781_v33 = vld [vmem:[%s14921_s14 + $0x1710] ss:$24 sps:$4 sm:$0xff]  }
 0x27c   : > { %v13782_v59 = vld [vmem:[%s14921_s14 + $0xb44] ss:$24 sps:$4 sm:$0xff]  }
 0x27d   : > { %6292 = vmatmul.mubr.bf16.gmra.mrb[232].mxu0 %v13774_v30  ;;  %6804 = vmatmul.mubr.bf16.gmra.mrb[232].mxu1 %v13775_v44  ;;  %v13784_v30 = vld [vmem:[%s14921_s14 + $0x1744] ss:$24 sps:$4 sm:$0xff]  }
 0x27e   : > { %6299 = vmatprep.mubr.bf16.mxu0 %v13776_v11  ;;  %6811 = vmatprep.mubr.bf16.mxu1 %v13778_v42 }
 0x280   : > { %v15633_v56 = vpop.f32.mrb[128].mxu0  ;;  %v15635_v26 = vpop.f32.mrb[128].mxu1 }
 0x281   : > { %18647 = vst [vmem:[#allocation93_spill] sm:$0xff] %v15633_v56  ;;  %18648 = vst [vmem:[#allocation94_spill] sm:$0xff] %v15635_v26  ;;  %v6087_v8 = vpop.f32.mrb[129].mxu0  ;;  %v6599_v10 = vpop.f32.mrb[129].mxu1  ;;  %v13786_v26 = vld [vmem:[%s14921_s14 + $0xb40] ss:$24 sps:$4 sm:$0xff]  }
 0x282   : > { %v15639_v17 = vpop.f32.mrb[130].mxu0  ;;  %v15641_v5 = vpop.f32.mrb[130].mxu1 }
 0x283   : > { %18649 = vst [vmem:[#allocation95_spill] sm:$0xff] %v15639_v17  ;;  %18650 = vst [vmem:[#allocation96_spill] sm:$0xff] %v15641_v5  ;;  %v6090_v44 = vpop.f32.mrb[131].mxu0  ;;  %v6602_v11 = vpop.f32.mrb[131].mxu1  ;;  %v13787_v17 = vld [vmem:[%s14921_s14 + $0x1740] ss:$24 sps:$4 sm:$0xff]  }
 0x284   : > { %v13790_v44 = vld [vmem:[%s14921_s14 + $0xb74] ss:$24 sps:$4 sm:$0xff]  }
 0x285   : > { %6300 = vmatmul.mubr.bf16.gmra.mrb[236].mxu0 %v13780_v38  ;;  %6812 = vmatmul.mubr.bf16.gmra.mrb[236].mxu1 %v13781_v33  ;;  %v13792_v38 = vld [vmem:[%s14921_s14 + $0x1774] ss:$24 sps:$4 sm:$0xff]  }
 0x286   : > { %6307 = vmatprep.mubr.bf16.mxu0 %v13782_v59  ;;  %6819 = vmatprep.mubr.bf16.mxu1 %v13784_v30 }
 0x288   : > { %v15645_v42 = vpop.f32.mrb[132].mxu0  ;;  %v15647_v54 = vpop.f32.mrb[132].mxu1 }
 0x289   : > { %18651 = vst [vmem:[#allocation97_spill] sm:$0xff] %v15645_v42  ;;  %18652 = vst [vmem:[#allocation98_spill] sm:$0xff] %v15647_v54  ;;  %v6095_v8 = vpop.f32.mrb[133].mxu0  ;;  %v6607_v10 = vpop.f32.mrb[133].mxu1  ;;  %v13794_v54 = vld [vmem:[%s14921_s14 + $0xb70] ss:$24 sps:$4 sm:$0xff]  }
 0x28a   : > { %v15651_v5 = vpop.f32.mrb[134].mxu0  ;;  %v15653_v56 = vpop.f32.mrb[134].mxu1 }
 0x28b   : > { %18653 = vst [vmem:[#allocation99_spill] sm:$0xff] %v15651_v5  ;;  %18654 = vst [vmem:[#allocation100_spill] sm:$0xff] %v15653_v56  ;;  %v6098_v33 = vpop.f32.mrb[135].mxu0  ;;  %v6610_v59 = vpop.f32.mrb[135].mxu1  ;;  %v13795_v5 = vld [vmem:[%s14921_s14 + $0x1770] ss:$24 sps:$4 sm:$0xff]  }
 0x28c   : > { %v13796_v33 = vld [vmem:[%s14921_s14 + $0xba4] ss:$24 sps:$4 sm:$0xff]  }
 0x28d   : > { %6308 = vmatmul.mubr.bf16.gmra.mrb[240].mxu0 %v13786_v26  ;;  %6820 = vmatmul.mubr.bf16.gmra.mrb[240].mxu1 %v13787_v17  ;;  %v13798_v26 = vld [vmem:[%s14921_s14 + $0x17a4] ss:$24 sps:$4 sm:$0xff]  }
 0x28e   : > { %6315 = vmatprep.mubr.bf16.mxu0 %v13790_v44  ;;  %6827 = vmatprep.mubr.bf16.mxu1 %v13792_v38 }
 0x290   : > { %v15657_v30 = vpop.f32.mrb[136].mxu0  ;;  %v15659_v11 = vpop.f32.mrb[136].mxu1 }
 0x291   : > { %18655 = vst [vmem:[#allocation101_spill] sm:$0xff] %v15657_v30  ;;  %18656 = vst [vmem:[#allocation102_spill] sm:$0xff] %v15659_v11  ;;  %v6103_v8 = vpop.f32.mrb[137].mxu0  ;;  %v6615_v10 = vpop.f32.mrb[137].mxu1  ;;  %v13800_v11 = vld [vmem:[%s14921_s14 + $0xba0] ss:$24 sps:$4 sm:$0xff]  }
 0x292   : > { %v15663_v56 = vpop.f32.mrb[138].mxu0  ;;  %v15665_v42 = vpop.f32.mrb[138].mxu1 }
 0x293   : > { %18657 = vst [vmem:[#allocation103_spill] sm:$0xff] %v15663_v56  ;;  %18658 = vst [vmem:[#allocation104_spill] sm:$0xff] %v15665_v42  ;;  %v6106_v17 = vpop.f32.mrb[139].mxu0  ;;  %v6618_v44 = vpop.f32.mrb[139].mxu1  ;;  %v13801_v56 = vld [vmem:[%s14921_s14 + $0x17a0] ss:$24 sps:$4 sm:$0xff]  }
 0x294   : > { %v13802_v17 = vld [vmem:[%s14921_s14 + $0xbd4] ss:$24 sps:$4 sm:$0xff]  }
 0x295   : > { %6316 = vmatmul.mubr.bf16.gmra.mrb[244].mxu0 %v13794_v54  ;;  %6828 = vmatmul.mubr.bf16.gmra.mrb[244].mxu1 %v13795_v5  ;;  %v13804_v54 = vld [vmem:[%s14921_s14 + $0x17d4] ss:$24 sps:$4 sm:$0xff]  }
 0x296   : > { %6323 = vmatprep.mubr.bf16.mxu0 %v13796_v33  ;;  %6835 = vmatprep.mubr.bf16.mxu1 %v13798_v26 }
 0x298   : > { %v15669_v38 = vpop.f32.mrb[140].mxu0  ;;  %v15671_v59 = vpop.f32.mrb[140].mxu1 }
 0x299   : > { %18659 = vst [vmem:[#allocation105_spill] sm:$0xff] %v15669_v38  ;;  %18660 = vst [vmem:[#allocation106_spill] sm:$0xff] %v15671_v59  ;;  %v6111_v8 = vpop.f32.mrb[141].mxu0  ;;  %v6623_v10 = vpop.f32.mrb[141].mxu1  ;;  %v13806_v59 = vld [vmem:[%s14921_s14 + $0xbd0] ss:$24 sps:$4 sm:$0xff]  }
 0x29a   : > { %v15675_v42 = vpop.f32.mrb[142].mxu0  ;;  %v15677_v30 = vpop.f32.mrb[142].mxu1 }
 0x29b   : > { %18661 = vst [vmem:[#allocation107_spill] sm:$0xff] %v15675_v42  ;;  %18662 = vst [vmem:[#allocation108_spill] sm:$0xff] %v15677_v30  ;;  %v6114_v5 = vpop.f32.mrb[143].mxu0  ;;  %v6626_v33 = vpop.f32.mrb[143].mxu1  ;;  %v13807_v42 = vld [vmem:[%s14921_s14 + $0x17d0] ss:$24 sps:$4 sm:$0xff]  }
 0x29c   : > { %v13810_v5 = vld [vmem:[%s14921_s14 + $0xc] ss:$24 sps:$4 sm:$0xff]  }
 0x29d   : > { %6324 = vmatmul.mubr.bf16.gmra.mrb[248].mxu0 %v13800_v11  ;;  %6836 = vmatmul.mubr.bf16.gmra.mrb[248].mxu1 %v13801_v56  ;;  %v13813_v11 = vld [vmem:[%s14921_s14 + $0x14] ss:$24 sps:$4 sm:$0xff]  }
 0x29e   : > { %6331 = vmatprep.mubr.bf16.mxu0 %v13802_v17  ;;  %6843 = vmatprep.mubr.bf16.mxu1 %v13804_v54 }
 0x2a0   : > { %v15681_v26 = vpop.f32.mrb[144].mxu0  ;;  %v15683_v44 = vpop.f32.mrb[144].mxu1 }
 0x2a1   : > { %18663 = vst [vmem:[#allocation109_spill] sm:$0xff] %v15681_v26  ;;  %18664 = vst [vmem:[#allocation110_spill] sm:$0xff] %v15683_v44  ;;  %v6119_v8 = vpop.f32.mrb[145].mxu0  ;;  %v6631_v10 = vpop.f32.mrb[145].mxu1  ;;  %v13808_v44 = vld [vmem:[%s14921_s14 + $0x8] ss:$24 sps:$4 sm:$0xff]  }
 0x2a2   : > { %v15687_v30 = vpop.f32.mrb[146].mxu0  ;;  %v15689_v38 = vpop.f32.mrb[146].mxu1 }
 0x2a3   : > { %18665 = vst [vmem:[#allocation111_spill] sm:$0xff] %v15687_v30  ;;  %18666 = vst [vmem:[#allocation112_spill] sm:$0xff] %v15689_v38  ;;  %v6122_v56 = vpop.f32.mrb[147].mxu0  ;;  %v6634_v17 = vpop.f32.mrb[147].mxu1  ;;  %v13811_v30 = vld [vmem:[%s14921_s14 + $0x10] ss:$24 sps:$4 sm:$0xff]  }
 0x2a4   : > { %v13816_v56 = vld [vmem:[%s14921_s14 + $0x3c] ss:$24 sps:$4 sm:$0xff]  }
 0x2a5   : > { %6332 = vmatmul.mubr.bf16.gmra.mrb[252].mxu0 %v13806_v59  ;;  %6844 = vmatmul.mubr.bf16.gmra.mrb[252].mxu1 %v13807_v42  ;;  %v13819_v59 = vld [vmem:[%s14921_s14 + $0x44] ss:$24 sps:$4 sm:$0xff]  }
 0x2a6   : > { %6884 = vmatprep.mubr.bf16.mxu1 %v13810_v5  ;;  %7941 = vmatprep.mubr.bf16.mxu0 %v13813_v11 }
 0x2a8   : > { %v15693_v54 = vpop.f32.mrb[148].mxu0  ;;  %v15695_v33 = vpop.f32.mrb[148].mxu1 }
 0x2a9   : > { %18667 = vst [vmem:[#allocation113_spill] sm:$0xff] %v15693_v54  ;;  %18668 = vst [vmem:[#allocation114_spill] sm:$0xff] %v15695_v33  ;;  %v6127_v8 = vpop.f32.mrb[149].mxu0  ;;  %v6639_v10 = vpop.f32.mrb[149].mxu1  ;;  %v13814_v33 = vld [vmem:[%s14921_s14 + $0x38] ss:$24 sps:$4 sm:$0xff]  }
 0x2aa   : > { %v15699_v38 = vpop.f32.mrb[150].mxu0  ;;  %v15701_v26 = vpop.f32.mrb[150].mxu1 }
 0x2ab   : > { %18669 = vst [vmem:[#allocation115_spill] sm:$0xff] %v15699_v38  ;;  %18670 = vst [vmem:[#allocation116_spill] sm:$0xff] %v15701_v26  ;;  %v6130_v42 = vpop.f32.mrb[151].mxu0  ;;  %v6642_v5 = vpop.f32.mrb[151].mxu1  ;;  %v13817_v38 = vld [vmem:[%s14921_s14 + $0x40] ss:$24 sps:$4 sm:$0xff]  }
 0x2ac   : > { %v13822_v42 = vld [vmem:[%s14921_s14 + $0x6c] ss:$24 sps:$4 sm:$0xff]  }
 0x2ad   : > { %6885 = vmatmul.mubr.bf16.vlgmr.msra.gmra.mrb[0].mxu1 %v13808_v44  ;;  %7942 = vmatmul.mubr.bf16.vlgmr.msra.gmra.mrb[0].mxu0 %v13811_v30  ;;  %v13825_v44 = vld [vmem:[%s14921_s14 + $0x74] ss:$24 sps:$4 sm:$0xff]  }
 0x2ae   : > { %6892 = vmatprep.mubr.bf16.mxu1 %v13816_v56  ;;  %7949 = vmatprep.mubr.bf16.mxu0 %v13819_v59 }
 0x2b0   : > { %v15705_v11 = vpop.f32.mrb[152].mxu0  ;;  %v15707_v17 = vpop.f32.mrb[152].mxu1 }
 0x2b1   : > { %18671 = vst [vmem:[#allocation117_spill] sm:$0xff] %v15705_v11  ;;  %18672 = vst [vmem:[#allocation118_spill] sm:$0xff] %v15707_v17  ;;  %v6135_v8 = vpop.f32.mrb[153].mxu0  ;;  %v6647_v10 = vpop.f32.mrb[153].mxu1  ;;  %v13820_v17 = vld [vmem:[%s14921_s14 + $0x68] ss:$24 sps:$4 sm:$0xff]  }
 0x2b2   : > { %v15711_v26 = vpop.f32.mrb[154].mxu0  ;;  %v15713_v54 = vpop.f32.mrb[154].mxu1 }
 0x2b3   : > { %18673 = vst [vmem:[#allocation119_spill] sm:$0xff] %v15711_v26  ;;  %18674 = vst [vmem:[#allocation120_spill] sm:$0xff] %v15713_v54  ;;  %v6138_v30 = vpop.f32.mrb[155].mxu0  ;;  %v6650_v56 = vpop.f32.mrb[155].mxu1  ;;  %v13823_v26 = vld [vmem:[%s14921_s14 + $0x70] ss:$24 sps:$4 sm:$0xff]  }
 0x2b4   : > { %v13828_v30 = vld [vmem:[%s14921_s14 + $0x9c] ss:$24 sps:$4 sm:$0xff]  }
 0x2b5   : > { %6893 = vmatmul.mubr.bf16.gmra.mrb[4].mxu1 %v13814_v33  ;;  %7950 = vmatmul.mubr.bf16.gmra.mrb[4].mxu0 %v13817_v38  ;;  %v13831_v33 = vld [vmem:[%s14921_s14 + $0xa4] ss:$24 sps:$4 sm:$0xff]  }
 0x2b6   : > { %6900 = vmatprep.mubr.bf16.mxu1 %v13822_v42  ;;  %7957 = vmatprep.mubr.bf16.mxu0 %v13825_v44 }
 0x2b8   : > { %v15717_v59 = vpop.f32.mrb[156].mxu0  ;;  %v15719_v5 = vpop.f32.mrb[156].mxu1 }
 0x2b9   : > { %18675 = vst [vmem:[#allocation121_spill] sm:$0xff] %v15717_v59  ;;  %18676 = vst [vmem:[#allocation122_spill] sm:$0xff] %v15719_v5  ;;  %v6143_v8 = vpop.f32.mrb[157].mxu0  ;;  %v6655_v10 = vpop.f32.mrb[157].mxu1  ;;  %v13826_v5 = vld [vmem:[%s14921_s14 + $0x98] ss:$24 sps:$4 sm:$0xff]  }
 0x2ba   : > { %v15723_v54 = vpop.f32.mrb[158].mxu0  ;;  %v15725_v11 = vpop.f32.mrb[158].mxu1 }
 0x2bb   : > { %18677 = vst [vmem:[#allocation123_spill] sm:$0xff] %v15723_v54  ;;  %18678 = vst [vmem:[#allocation124_spill] sm:$0xff] %v15725_v11  ;;  %v6146_v38 = vpop.f32.mrb[159].mxu0  ;;  %v6658_v42 = vpop.f32.mrb[159].mxu1  ;;  %v13829_v54 = vld [vmem:[%s14921_s14 + $0xa0] ss:$24 sps:$4 sm:$0xff]  }
 0x2bc   : > { %v13834_v38 = vld [vmem:[%s14921_s14 + $0xcc] ss:$24 sps:$4 sm:$0xff]  }
 0x2bd   : > { %6901 = vmatmul.mubr.bf16.gmra.mrb[8].mxu1 %v13820_v17  ;;  %7958 = vmatmul.mubr.bf16.gmra.mrb[8].mxu0 %v13823_v26  ;;  %v13837_v17 = vld [vmem:[%s14921_s14 + $0xd4] ss:$24 sps:$4 sm:$0xff]  }
 0x2be   : > { %6908 = vmatprep.mubr.bf16.mxu1 %v13828_v30  ;;  %7965 = vmatprep.mubr.bf16.mxu0 %v13831_v33 }
 0x2c0   : > { %v15729_v44 = vpop.f32.mrb[160].mxu0  ;;  %v15731_v56 = vpop.f32.mrb[160].mxu1 }
 0x2c1   : > { %18679 = vst [vmem:[#allocation125_spill] sm:$0xff] %v15729_v44  ;;  %18680 = vst [vmem:[#allocation126_spill] sm:$0xff] %v15731_v56  ;;  %v6151_v8 = vpop.f32.mrb[161].mxu0  ;;  %v6663_v10 = vpop.f32.mrb[161].mxu1  ;;  %v13832_v56 = vld [vmem:[%s14921_s14 + $0xc8] ss:$24 sps:$4 sm:$0xff]  }
 0x2c2   : > { %v15735_v11 = vpop.f32.mrb[162].mxu0  ;;  %v15737_v59 = vpop.f32.mrb[162].mxu1 }
 0x2c3   : > { %18681 = vst [vmem:[#allocation127_spill] sm:$0xff] %v15735_v11  ;;  %18682 = vst [vmem:[#allocation128_spill] sm:$0xff] %v15737_v59  ;;  %v6154_v26 = vpop.f32.mrb[163].mxu0  ;;  %v6666_v30 = vpop.f32.mrb[163].mxu1  ;;  %v13835_v11 = vld [vmem:[%s14921_s14 + $0xd0] ss:$24 sps:$4 sm:$0xff]  }
 0x2c4   : > { %v13840_v26 = vld [vmem:[%s14921_s14 + $0xfc] ss:$24 sps:$4 sm:$0xff]  }
 0x2c5   : > { %6909 = vmatmul.mubr.bf16.gmra.mrb[12].mxu1 %v13826_v5  ;;  %7966 = vmatmul.mubr.bf16.gmra.mrb[12].mxu0 %v13829_v54  ;;  %v13843_v5 = vld [vmem:[%s14921_s14 + $0x104] ss:$24 sps:$4 sm:$0xff]  }
 0x2c6   : > { %6916 = vmatprep.mubr.bf16.mxu1 %v13834_v38  ;;  %7973 = vmatprep.mubr.bf16.mxu0 %v13837_v17 }
 0x2c8   : > { %v15741_v33 = vpop.f32.mrb[164].mxu0  ;;  %v15743_v42 = vpop.f32.mrb[164].mxu1 }
 0x2c9   : > { %18683 = vst [vmem:[#allocation129_spill] sm:$0xff] %v15741_v33  ;;  %18684 = vst [vmem:[#allocation130_spill] sm:$0xff] %v15743_v42  ;;  %v6159_v8 = vpop.f32.mrb[165].mxu0  ;;  %v6671_v10 = vpop.f32.mrb[165].mxu1  ;;  %v13838_v42 = vld [vmem:[%s14921_s14 + $0xf8] ss:$24 sps:$4 sm:$0xff]  }
 0x2ca   : > { %v15747_v59 = vpop.f32.mrb[166].mxu0  ;;  %v15749_v44 = vpop.f32.mrb[166].mxu1 }
 0x2cb   : > { %18685 = vst [vmem:[#allocation131_spill] sm:$0xff] %v15747_v59  ;;  %18686 = vst [vmem:[#allocation132_spill] sm:$0xff] %v15749_v44  ;;  %v6162_v54 = vpop.f32.mrb[167].mxu0  ;;  %v6674_v38 = vpop.f32.mrb[167].mxu1  ;;  %v13841_v59 = vld [vmem:[%s14921_s14 + $0x100] ss:$24 sps:$4 sm:$0xff]  }
 0x2cc   : > { %v13846_v54 = vld [vmem:[%s14921_s14 + $0x12c] ss:$24 sps:$4 sm:$0xff]  }
 0x2cd   : > { %6917 = vmatmul.mubr.bf16.gmra.mrb[16].mxu1 %v13832_v56  ;;  %7974 = vmatmul.mubr.bf16.gmra.mrb[16].mxu0 %v13835_v11  ;;  %v13849_v56 = vld [vmem:[%s14921_s14 + $0x134] ss:$24 sps:$4 sm:$0xff]  }
 0x2ce   : > { %6924 = vmatprep.mubr.bf16.mxu1 %v13840_v26  ;;  %7981 = vmatprep.mubr.bf16.mxu0 %v13843_v5 }
 0x2d0   : > { %v15753_v17 = vpop.f32.mrb[168].mxu0  ;;  %v15755_v30 = vpop.f32.mrb[168].mxu1 }
 0x2d1   : > { %18687 = vst [vmem:[#allocation133_spill] sm:$0xff] %v15753_v17  ;;  %18688 = vst [vmem:[#allocation134_spill] sm:$0xff] %v15755_v30  ;;  %v6167_v8 = vpop.f32.mrb[169].mxu0  ;;  %v6679_v10 = vpop.f32.mrb[169].mxu1  ;;  %v13844_v30 = vld [vmem:[%s14921_s14 + $0x128] ss:$24 sps:$4 sm:$0xff]  }
 0x2d2   : > { %v15759_v44 = vpop.f32.mrb[170].mxu0  ;;  %v15761_v33 = vpop.f32.mrb[170].mxu1 }
 0x2d3   : > { %18689 = vst [vmem:[#allocation135_spill] sm:$0xff] %v15759_v44  ;;  %18690 = vst [vmem:[#allocation136_spill] sm:$0xff] %v15761_v33  ;;  %v6170_v11 = vpop.f32.mrb[171].mxu0  ;;  %v6682_v26 = vpop.f32.mrb[171].mxu1  ;;  %v13847_v44 = vld [vmem:[%s14921_s14 + $0x130] ss:$24 sps:$4 sm:$0xff]  }
 0x2d4   : > { %v13852_v11 = vld [vmem:[%s14921_s14 + $0x15c] ss:$24 sps:$4 sm:$0xff]  }
 0x2d5   : > { %6925 = vmatmul.mubr.bf16.gmra.mrb[20].mxu1 %v13838_v42  ;;  %7982 = vmatmul.mubr.bf16.gmra.mrb[20].mxu0 %v13841_v59  ;;  %v13855_v42 = vld [vmem:[%s14921_s14 + $0x164] ss:$24 sps:$4 sm:$0xff]  }
 0x2d6   : > { %6932 = vmatprep.mubr.bf16.mxu1 %v13846_v54  ;;  %7989 = vmatprep.mubr.bf16.mxu0 %v13849_v56 }
 0x2d8   : > { %v15765_v5 = vpop.f32.mrb[172].mxu0  ;;  %v15767_v38 = vpop.f32.mrb[172].mxu1 }
 0x2d9   : > { %18691 = vst [vmem:[#allocation137_spill] sm:$0xff] %v15765_v5  ;;  %18692 = vst [vmem:[#allocation138_spill] sm:$0xff] %v15767_v38  ;;  %v6175_v8 = vpop.f32.mrb[173].mxu0  ;;  %v6687_v10 = vpop.f32.mrb[173].mxu1  ;;  %v13850_v38 = vld [vmem:[%s14921_s14 + $0x158] ss:$24 sps:$4 sm:$0xff]  }
 0x2da   : > { %v15771_v33 = vpop.f32.mrb[174].mxu0  ;;  %v15773_v17 = vpop.f32.mrb[174].mxu1 }
 0x2db   : > { %18693 = vst [vmem:[#allocation139_spill] sm:$0xff] %v15771_v33  ;;  %18694 = vst [vmem:[#allocation140_spill] sm:$0xff] %v15773_v17  ;;  %v6178_v59 = vpop.f32.mrb[175].mxu0  ;;  %v6690_v54 = vpop.f32.mrb[175].mxu1  ;;  %v13853_v33 = vld [vmem:[%s14921_s14 + $0x160] ss:$24 sps:$4 sm:$0xff]  }
 0x2dc   : > { %v13858_v59 = vld [vmem:[%s14921_s14 + $0x18c] ss:$24 sps:$4 sm:$0xff]  }
 0x2dd   : > { %6933 = vmatmul.mubr.bf16.gmra.mrb[24].mxu1 %v13844_v30  ;;  %7990 = vmatmul.mubr.bf16.gmra.mrb[24].mxu0 %v13847_v44  ;;  %v13861_v30 = vld [vmem:[%s14921_s14 + $0x194] ss:$24 sps:$4 sm:$0xff]  }
 0x2de   : > { %6940 = vmatprep.mubr.bf16.mxu1 %v13852_v11  ;;  %7997 = vmatprep.mubr.bf16.mxu0 %v13855_v42 }
 0x2e0   : > { %v15777_v56 = vpop.f32.mrb[176].mxu0  ;;  %v15779_v26 = vpop.f32.mrb[176].mxu1 }
 0x2e1   : > { %18695 = vst [vmem:[#allocation141_spill] sm:$0xff] %v15777_v56  ;;  %18696 = vst [vmem:[#allocation142_spill] sm:$0xff] %v15779_v26  ;;  %v6183_v8 = vpop.f32.mrb[177].mxu0  ;;  %v6695_v10 = vpop.f32.mrb[177].mxu1  ;;  %v13856_v26 = vld [vmem:[%s14921_s14 + $0x188] ss:$24 sps:$4 sm:$0xff]  }
 0x2e2   : > { %v15783_v17 = vpop.f32.mrb[178].mxu0  ;;  %v15785_v5 = vpop.f32.mrb[178].mxu1 }
 0x2e3   : > { %18697 = vst [vmem:[#allocation143_spill] sm:$0xff] %v15783_v17  ;;  %18698 = vst [vmem:[#allocation144_spill] sm:$0xff] %v15785_v5  ;;  %v6186_v44 = vpop.f32.mrb[179].mxu0  ;;  %v6698_v11 = vpop.f32.mrb[179].mxu1  ;;  %v13859_v17 = vld [vmem:[%s14921_s14 + $0x190] ss:$24 sps:$4 sm:$0xff]  }
 0x2e4   : > { %v13864_v44 = vld [vmem:[%s14921_s14 + $0x1bc] ss:$24 sps:$4 sm:$0xff]  }
 0x2e5   : > { %6941 = vmatmul.mubr.bf16.gmra.mrb[28].mxu1 %v13850_v38  ;;  %7998 = vmatmul.mubr.bf16.gmra.mrb[28].mxu0 %v13853_v33  ;;  %v13867_v38 = vld [vmem:[%s14921_s14 + $0x1c4] ss:$24 sps:$4 sm:$0xff]  }
 0x2e6   : > { %6948 = vmatprep.mubr.bf16.mxu1 %v13858_v59  ;;  %8005 = vmatprep.mubr.bf16.mxu0 %v13861_v30 }
 0x2e8   : > { %v15789_v42 = vpop.f32.mrb[180].mxu0  ;;  %v15791_v54 = vpop.f32.mrb[180].mxu1 }
 0x2e9   : > { %18699 = vst [vmem:[#allocation145_spill] sm:$0xff] %v15789_v42  ;;  %18700 = vst [vmem:[#allocation146_spill] sm:$0xff] %v15791_v54  ;;  %v6191_v8 = vpop.f32.mrb[181].mxu0  ;;  %v6703_v10 = vpop.f32.mrb[181].mxu1  ;;  %v13862_v54 = vld [vmem:[%s14921_s14 + $0x1b8] ss:$24 sps:$4 sm:$0xff]  }
 0x2ea   : > { %v15795_v5 = vpop.f32.mrb[182].mxu0  ;;  %v15797_v56 = vpop.f32.mrb[182].mxu1 }
 0x2eb   : > { %18701 = vst [vmem:[#allocation147_spill] sm:$0xff] %v15795_v5  ;;  %18702 = vst [vmem:[#allocation148_spill] sm:$0xff] %v15797_v56  ;;  %v6194_v33 = vpop.f32.mrb[183].mxu0  ;;  %v6706_v59 = vpop.f32.mrb[183].mxu1  ;;  %v13865_v5 = vld [vmem:[%s14921_s14 + $0x1c0] ss:$24 sps:$4 sm:$0xff]  }
 0x2ec   : > { %v13870_v33 = vld [vmem:[%s14921_s14 + $0x1ec] ss:$24 sps:$4 sm:$0xff]  }
 0x2ed   : > { %6949 = vmatmul.mubr.bf16.gmra.mrb[32].mxu1 %v13856_v26  ;;  %8006 = vmatmul.mubr.bf16.gmra.mrb[32].mxu0 %v13859_v17  ;;  %v13873_v26 = vld [vmem:[%s14921_s14 + $0x1f4] ss:$24 sps:$4 sm:$0xff]  }
 0x2ee   : > { %6956 = vmatprep.mubr.bf16.mxu1 %v13864_v44  ;;  %8013 = vmatprep.mubr.bf16.mxu0 %v13867_v38 }
 0x2f0   : > { %v15801_v30 = vpop.f32.mrb[184].mxu0  ;;  %v15803_v11 = vpop.f32.mrb[184].mxu1 }
 0x2f1   : > { %18703 = vst [vmem:[#allocation149_spill] sm:$0xff] %v15801_v30  ;;  %18704 = vst [vmem:[#allocation150_spill] sm:$0xff] %v15803_v11  ;;  %v6199_v8 = vpop.f32.mrb[185].mxu0  ;;  %v6711_v10 = vpop.f32.mrb[185].mxu1  ;;  %v13868_v11 = vld [vmem:[%s14921_s14 + $0x1e8] ss:$24 sps:$4 sm:$0xff]  }
 0x2f2   : > { %v15807_v56 = vpop.f32.mrb[186].mxu0  ;;  %v15809_v42 = vpop.f32.mrb[186].mxu1 }
 0x2f3   : > { %18705 = vst [vmem:[#allocation151_spill] sm:$0xff] %v15807_v56  ;;  %18706 = vst [vmem:[#allocation152_spill] sm:$0xff] %v15809_v42  ;;  %v6202_v17 = vpop.f32.mrb[187].mxu0  ;;  %v6714_v44 = vpop.f32.mrb[187].mxu1  ;;  %v13871_v56 = vld [vmem:[%s14921_s14 + $0x1f0] ss:$24 sps:$4 sm:$0xff]  }
 0x2f4   : > { %v15827_v17 = vld [vmem:[%s14921_s14 + $0x224] ss:$24 sps:$4 sm:$0xff]  }
 0x2f5   : > { %6957 = vmatmul.mubr.bf16.gmra.mrb[36].mxu1 %v13862_v54  ;;  %8014 = vmatmul.mubr.bf16.gmra.mrb[36].mxu0 %v13865_v5 }
 0x2f6   : > { %6964 = vmatprep.mubr.bf16.mxu1 %v13870_v33  ;;  %8021 = vmatprep.mubr.bf16.mxu0 %v13873_v26  ;;  %v14740_v33 = vmov 0.0  }
 0x2f7   : > { %291 = vst.msk [vmem:[#allocation2] sm:$0xff] %vm290_vm0, %v14740_v33  ;;  %292 = vst.msk [vmem:[#allocation2 + $0x8] sm:$0xff] %vm290_vm0, %v14740_v33 }
 0x2f8   : > { %v15813_v38 = vpop.f32.mrb[188].mxu0  ;;  %v15815_v59 = vpop.f32.mrb[188].mxu1  ;;  %293 = vst.msk [vmem:[#allocation2 + $0x10] sm:$0xff] %vm290_vm0, %v14740_v33  ;;  %294 = vst.msk [vmem:[#allocation2 + $0x18] sm:$0xff] %vm290_vm0, %v14740_v33 }
 0x2f9   : > { %18707 = vst [vmem:[#allocation153_spill] sm:$0xff] %v15813_v38  ;;  %18708 = vst [vmem:[#allocation154_spill] sm:$0xff] %v15815_v59  ;;  %v6207_v8 = vpop.f32.mrb[189].mxu0  ;;  %v6719_v10 = vpop.f32.mrb[189].mxu1 }
 0x2fa   : > { %v15819_v30 = vpop.f32.mrb[190].mxu0  ;;  %v15821_v42 = vpop.f32.mrb[190].mxu1  ;;  %295 = vst.msk [vmem:[#allocation2 + $0x20] sm:$0xff] %vm290_vm0, %v14740_v33  ;;  %296 = vst.msk [vmem:[#allocation2 + $0x28] sm:$0xff] %vm290_vm0, %v14740_v33  ;;  %v13874_v8 = vld [vmem:[%s14921_s14 + $0x218] ss:$24 sps:$4 sm:$0xff]  }
 0x2fb   : > { %18709 = vst [vmem:[#allocation155_spill] sm:$0xff] %v15819_v30  ;;  %18710 = vst [vmem:[#allocation156_spill] sm:$0xff] %v15821_v42  ;;  %v6210_v54 = vpop.f32.mrb[191].mxu0  ;;  %v6722_v5 = vpop.f32.mrb[191].mxu1  ;;  %v13877_v10 = vld [vmem:[%s14921_s14 + $0x220] ss:$24 sps:$4 sm:$0xff]  }
 0x2fc   : > { %297 = vst.msk [vmem:[#allocation2 + $0x30] sm:$0xff] %vm290_vm0, %v14740_v33  ;;  %298 = vst.msk [vmem:[#allocation2 + $0x38] sm:$0xff] %vm290_vm0, %v14740_v33  ;;  %v13882_v42 = vld [vmem:[%s14921_s14 + $0x24c] ss:$24 sps:$4 sm:$0xff]  }
 0x2fd   : > { %6965 = vmatmul.mubr.bf16.gmra.mrb[40].mxu1 %v13868_v11  ;;  %8022 = vmatmul.mubr.bf16.gmra.mrb[40].mxu0 %v13871_v56  ;;  %299 = vst.msk [vmem:[#allocation2 + $0x40] sm:$0xff] %vm290_vm0, %v14740_v33  ;;  %300 = vst.msk [vmem:[#allocation2 + $0x48] sm:$0xff] %vm290_vm0, %v14740_v33 }
 0x2fe   : > { %301 = vst.msk [vmem:[#allocation2 + $0x50] sm:$0xff] %vm290_vm0, %v14740_v33  ;;  %302 = vst.msk [vmem:[#allocation2 + $0x58] sm:$0xff] %vm290_vm0, %v14740_v33  ;;  %6972 = vmatprep.mubr.bf16.mxu1 %v15824_v51  ;;  %8029 = vmatprep.mubr.bf16.mxu0 %v15827_v17 }
 0x2ff   : > { %303 = vst.msk [vmem:[#allocation2 + $0x60] sm:$0xff] %vm290_vm0, %v14740_v33  ;;  %304 = vst.msk [vmem:[#allocation2 + $0x68] sm:$0xff] %vm290_vm0, %v14740_v33 }
 0x300   : > { %305 = vst.msk [vmem:[#allocation2 + $0x70] sm:$0xff] %vm290_vm0, %v14740_v33  ;;  %306 = vst.msk [vmem:[#allocation2 + $0x78] sm:$0xff] %vm290_vm0, %v14740_v33  ;;  %v16343_v56 = vpop.f32.mrb[192].mxu0  ;;  %v16345_v11 = vpop.f32.mrb[192].mxu1 }
 0x301   : > { %307 = vst.msk [vmem:[#allocation2 + $0x80] sm:$0xff] %vm290_vm0, %v14740_v33  ;;  %308 = vst.msk [vmem:[#allocation2 + $0x88] sm:$0xff] %vm290_vm0, %v14740_v33  ;;  %v6215_v26 = vpop.f32.mrb[193].mxu0  ;;  %v6727_v44 = vpop.f32.mrb[193].mxu1 }
 0x302   : > { %309 = vst.msk [vmem:[#allocation2 + $0x90] sm:$0xff] %vm290_vm0, %v14740_v33  ;;  %310 = vst.msk [vmem:[#allocation2 + $0x98] sm:$0xff] %vm290_vm0, %v14740_v33  ;;  %v16349_v54 = vpop.f32.mrb[194].mxu0  ;;  %v16351_v5 = vpop.f32.mrb[194].mxu1 }
 0x303   : > { %311 = vst.msk [vmem:[#allocation2 + $0xa0] sm:$0xff] %vm290_vm0, %v14740_v33  ;;  %312 = vst.msk [vmem:[#allocation2 + $0xa8] sm:$0xff] %vm290_vm0, %v14740_v33  ;;  %v6218_v51 = vpop.f32.mrb[195].mxu0  ;;  %v6730_v17 = vpop.f32.mrb[195].mxu1 }
 0x304   : > { %313 = vst.msk [vmem:[#allocation2 + $0xb0] sm:$0xff] %vm290_vm0, %v14740_v33  ;;  %314 = vst.msk [vmem:[#allocation2 + $0xb8] sm:$0xff] %vm290_vm0, %v14740_v33  ;;  %v13888_v51 = vld [vmem:[%s14921_s14 + $0x27c] ss:$24 sps:$4 sm:$0xff]  }
 0x305   : > { %315 = vst.msk [vmem:[#allocation2 + $0xc0] sm:$0xff] %vm290_vm0, %v14740_v33  ;;  %316 = vst.msk [vmem:[#allocation2 + $0xc8] sm:$0xff] %vm290_vm0, %v14740_v33  ;;  %6973 = vmatmul.mubr.bf16.gmra.mrb[44].mxu1 %v13874_v8  ;;  %8030 = vmatmul.mubr.bf16.gmra.mrb[44].mxu0 %v13877_v10  ;;  %v13891_v8 = vld [vmem:[%s14921_s14 + $0x284] ss:$24 sps:$4 sm:$0xff]  }
 0x306   : > { %317 = vst.msk [vmem:[#allocation2 + $0xd0] sm:$0xff] %vm290_vm0, %v14740_v33  ;;  %318 = vst.msk [vmem:[#allocation2 + $0xd8] sm:$0xff] %vm290_vm0, %v14740_v33  ;;  %6980 = vmatprep.mubr.bf16.mxu1 %v13882_v42 }
 0x307   : > { %319 = vst.msk [vmem:[#allocation2 + $0xe0] sm:$0xff] %vm290_vm0, %v14740_v33  ;;  %320 = vst.msk [vmem:[#allocation2 + $0xe8] sm:$0xff] %vm290_vm0, %v14740_v33 }
 0x308   : > { %321 = vst.msk [vmem:[#allocation2 + $0xf0] sm:$0xff] %vm290_vm0, %v14740_v33  ;;  %322 = vst.msk [vmem:[#allocation2 + $0xf8] sm:$0xff] %vm290_vm0, %v14740_v33  ;;  %v16355_v26 = vpop.f32.mrb[196].mxu0  ;;  %v16357_v44 = vpop.f32.mrb[196].mxu1 }
 0x309   : > { %323 = vst.msk [vmem:[#allocation2 + $0x100] sm:$0xff] %vm290_vm0, %v14740_v33  ;;  %324 = vst.msk [vmem:[#allocation2 + $0x108] sm:$0xff] %vm290_vm0, %v14740_v33  ;;  %v6735_v59 = vpop.f32.mrb[197].mxu1 }
 0x30a   : > { %325 = vst.msk [vmem:[#allocation2 + $0x110] sm:$0xff] %vm290_vm0, %v14740_v33  ;;  %326 = vst.msk [vmem:[#allocation2 + $0x118] sm:$0xff] %vm290_vm0, %v14740_v33  ;;  %v16363_v30 = vpop.f32.mrb[198].mxu1 }
 0x30b   : > { %327 = vst.msk [vmem:[#allocation2 + $0x120] sm:$0xff] %vm290_vm0, %v14740_v33  ;;  %328 = vst.msk [vmem:[#allocation2 + $0x128] sm:$0xff] %vm290_vm0, %v14740_v33  ;;  %v6738_v10 = vpop.f32.mrb[199].mxu1 }
 0x30c   : > { %329 = vst.msk [vmem:[#allocation2 + $0x130] sm:$0xff] %vm290_vm0, %v14740_v33  ;;  %330 = vst.msk [vmem:[#allocation2 + $0x138] sm:$0xff] %vm290_vm0, %v14740_v33 }
 0x30d   : > { %331 = vst.msk [vmem:[#allocation2 + $0x140] sm:$0xff] %vm290_vm0, %v14740_v33  ;;  %332 = vst.msk [vmem:[#allocation2 + $0x148] sm:$0xff] %vm290_vm0, %v14740_v33 }
 0x30e   : > { %333 = vst.msk [vmem:[#allocation2 + $0x150] sm:$0xff] %vm290_vm0, %v14740_v33  ;;  %334 = vst.msk [vmem:[#allocation2 + $0x158] sm:$0xff] %vm290_vm0, %v14740_v33 }
 0x30f   : > { %335 = vst.msk [vmem:[#allocation2 + $0x160] sm:$0xff] %vm290_vm0, %v14740_v33  ;;  %336 = vst.msk [vmem:[#allocation2 + $0x168] sm:$0xff] %vm290_vm0, %v14740_v33 }
 0x310   : > { %337 = vst.msk [vmem:[#allocation2 + $0x170] sm:$0xff] %vm290_vm0, %v14740_v33  ;;  %338 = vst.msk [vmem:[#allocation2 + $0x178] sm:$0xff] %vm290_vm0, %v14740_v33  ;;  %v16369_v59 = vpop.f32.mrb[200].mxu1 }
 0x311   : > { %339 = vst.msk [vmem:[#allocation2 + $0x180] sm:$0xff] %vm290_vm0, %v14740_v33  ;;  %340 = vst.msk [vmem:[#allocation2 + $0x188] sm:$0xff] %vm290_vm0, %v14740_v33  ;;  %v6743_v17 = vpop.f32.mrb[201].mxu1 }
 0x312   : > { %341 = vst.msk [vmem:[#allocation2 + $0x190] sm:$0xff] %vm290_vm0, %v14740_v33  ;;  %342 = vst.msk [vmem:[#allocation2 + $0x198] sm:$0xff] %vm290_vm0, %v14740_v33 }
 0x313   : > { %343 = vst.msk [vmem:[#allocation2 + $0x1a0] sm:$0xff] %vm290_vm0, %v14740_v33  ;;  %344 = vst.msk [vmem:[#allocation2 + $0x1a8] sm:$0xff] %vm290_vm0, %v14740_v33 }
 0x314   : > { %345 = vst.msk [vmem:[#allocation2 + $0x1b0] sm:$0xff] %vm290_vm0, %v14740_v33  ;;  %346 = vst.msk [vmem:[#allocation2 + $0x1b8] sm:$0xff] %vm290_vm0, %v14740_v33 }
 0x315   : > { %347 = vst.msk [vmem:[#allocation2 + $0x1c0] sm:$0xff] %vm290_vm0, %v14740_v33  ;;  %348 = vst.msk [vmem:[#allocation2 + $0x1c8] sm:$0xff] %vm290_vm0, %v14740_v33 }
 0x316   : > { %349 = vst.msk [vmem:[#allocation2 + $0x1d0] sm:$0xff] %vm290_vm0, %v14740_v33  ;;  %350 = vst.msk [vmem:[#allocation2 + $0x1d8] sm:$0xff] %vm290_vm0, %v14740_v33 }
 0x317   : > { %351 = vst.msk [vmem:[#allocation2 + $0x1e0] sm:$0xff] %vm290_vm0, %v14740_v33  ;;  %352 = vst.msk [vmem:[#allocation2 + $0x1e8] sm:$0xff] %vm290_vm0, %v14740_v33 }
 0x318   : > { %353 = vst.msk [vmem:[#allocation2 + $0x1f0] sm:$0xff] %vm290_vm0, %v14740_v33  ;;  %354 = vst.msk [vmem:[#allocation2 + $0x1f8] sm:$0xff] %vm290_vm0, %v14740_v33 }
 0x319   : > { %355 = vst.msk [vmem:[#allocation2 + $0x200] sm:$0xff] %vm290_vm0, %v14740_v33  ;;  %356 = vst.msk [vmem:[#allocation2 + $0x208] sm:$0xff] %vm290_vm0, %v14740_v33 }
 0x31a   : > { %357 = vst.msk [vmem:[#allocation2 + $0x210] sm:$0xff] %vm290_vm0, %v14740_v33  ;;  %358 = vst.msk [vmem:[#allocation2 + $0x218] sm:$0xff] %vm290_vm0, %v14740_v33 }
 0x31b   : > { %359 = vst.msk [vmem:[#allocation2 + $0x220] sm:$0xff] %vm290_vm0, %v14740_v33  ;;  %360 = vst.msk [vmem:[#allocation2 + $0x228] sm:$0xff] %vm290_vm0, %v14740_v33 }
 0x31c   : > { %361 = vst.msk [vmem:[#allocation2 + $0x230] sm:$0xff] %vm290_vm0, %v14740_v33  ;;  %362 = vst.msk [vmem:[#allocation2 + $0x238] sm:$0xff] %vm290_vm0, %v14740_v33 }
 0x31d   : > { %363 = vst.msk [vmem:[#allocation2 + $0x240] sm:$0xff] %vm290_vm0, %v14740_v33  ;;  %364 = vst.msk [vmem:[#allocation2 + $0x248] sm:$0xff] %vm290_vm0, %v14740_v33 }
 0x31e   : > { %365 = vst.msk [vmem:[#allocation2 + $0x250] sm:$0xff] %vm290_vm0, %v14740_v33  ;;  %366 = vst.msk [vmem:[#allocation2 + $0x258] sm:$0xff] %vm290_vm0, %v14740_v33 }
 0x31f   : > { %367 = vst.msk [vmem:[#allocation2 + $0x260] sm:$0xff] %vm290_vm0, %v14740_v33  ;;  %368 = vst.msk [vmem:[#allocation2 + $0x268] sm:$0xff] %vm290_vm0, %v14740_v33 }
 0x320   : > { %369 = vst.msk [vmem:[#allocation2 + $0x270] sm:$0xff] %vm290_vm0, %v14740_v33  ;;  %370 = vst.msk [vmem:[#allocation2 + $0x278] sm:$0xff] %vm290_vm0, %v14740_v33 }
 0x321   : > { %371 = vst.msk [vmem:[#allocation2 + $0x280] sm:$0xff] %vm290_vm0, %v14740_v33  ;;  %372 = vst.msk [vmem:[#allocation2 + $0x288] sm:$0xff] %vm290_vm0, %v14740_v33 }
 0x322   : > { %373 = vst.msk [vmem:[#allocation2 + $0x290] sm:$0xff] %vm290_vm0, %v14740_v33  ;;  %374 = vst.msk [vmem:[#allocation2 + $0x298] sm:$0xff] %vm290_vm0, %v14740_v33 }
 0x323   : > { %375 = vst.msk [vmem:[#allocation2 + $0x2a0] sm:$0xff] %vm290_vm0, %v14740_v33  ;;  %376 = vst.msk [vmem:[#allocation2 + $0x2a8] sm:$0xff] %vm290_vm0, %v14740_v33 }
 0x324   : > { %377 = vst.msk [vmem:[#allocation2 + $0x2b0] sm:$0xff] %vm290_vm0, %v14740_v33  ;;  %378 = vst.msk [vmem:[#allocation2 + $0x2b8] sm:$0xff] %vm290_vm0, %v14740_v33 }
 0x325   : > { %379 = vst.msk [vmem:[#allocation2 + $0x2c0] sm:$0xff] %vm290_vm0, %v14740_v33  ;;  %380 = vst.msk [vmem:[#allocation2 + $0x2c8] sm:$0xff] %vm290_vm0, %v14740_v33 }
 0x326   : > { %381 = vst.msk [vmem:[#allocation2 + $0x2d0] sm:$0xff] %vm290_vm0, %v14740_v33  ;;  %382 = vst.msk [vmem:[#allocation2 + $0x2d8] sm:$0xff] %vm290_vm0, %v14740_v33 }
 0x327   : > { %383 = vst.msk [vmem:[#allocation2 + $0x2e0] sm:$0xff] %vm290_vm0, %v14740_v33  ;;  %384 = vst.msk [vmem:[#allocation2 + $0x2e8] sm:$0xff] %vm290_vm0, %v14740_v33 }
 0x328   : > { %385 = vst.msk [vmem:[#allocation2 + $0x2f0] sm:$0xff] %vm290_vm0, %v14740_v33  ;;  %386 = vst.msk [vmem:[#allocation2 + $0x2f8] sm:$0xff] %vm290_vm0, %v14740_v33 }
 0x329   : > { %387 = vst.msk [vmem:[#allocation2 + $0x300] sm:$0xff] %vm290_vm0, %v14740_v33  ;;  %388 = vst.msk [vmem:[#allocation2 + $0x308] sm:$0xff] %vm290_vm0, %v14740_v33 }
 0x32a   : > { %389 = vst.msk [vmem:[#allocation2 + $0x310] sm:$0xff] %vm290_vm0, %v14740_v33  ;;  %390 = vst.msk [vmem:[#allocation2 + $0x318] sm:$0xff] %vm290_vm0, %v14740_v33 }
 0x32b   : > { %391 = vst.msk [vmem:[#allocation2 + $0x320] sm:$0xff] %vm290_vm0, %v14740_v33  ;;  %392 = vst.msk [vmem:[#allocation2 + $0x328] sm:$0xff] %vm290_vm0, %v14740_v33 }
 0x32c   : > { %393 = vst.msk [vmem:[#allocation2 + $0x330] sm:$0xff] %vm290_vm0, %v14740_v33  ;;  %394 = vst.msk [vmem:[#allocation2 + $0x338] sm:$0xff] %vm290_vm0, %v14740_v33 }
 0x32d   : > { %395 = vst.msk [vmem:[#allocation2 + $0x340] sm:$0xff] %vm290_vm0, %v14740_v33  ;;  %396 = vst.msk [vmem:[#allocation2 + $0x348] sm:$0xff] %vm290_vm0, %v14740_v33 }
 0x32e   : > { %397 = vst.msk [vmem:[#allocation2 + $0x350] sm:$0xff] %vm290_vm0, %v14740_v33  ;;  %398 = vst.msk [vmem:[#allocation2 + $0x358] sm:$0xff] %vm290_vm0, %v14740_v33 }
 0x32f   : > { %399 = vst.msk [vmem:[#allocation2 + $0x360] sm:$0xff] %vm290_vm0, %v14740_v33  ;;  %400 = vst.msk [vmem:[#allocation2 + $0x368] sm:$0xff] %vm290_vm0, %v14740_v33 }
 0x330   : > { %401 = vst.msk [vmem:[#allocation2 + $0x370] sm:$0xff] %vm290_vm0, %v14740_v33  ;;  %402 = vst.msk [vmem:[#allocation2 + $0x378] sm:$0xff] %vm290_vm0, %v14740_v33 }
 0x331   : > { %403 = vst.msk [vmem:[#allocation2 + $0x380] sm:$0xff] %vm290_vm0, %v14740_v33  ;;  %404 = vst.msk [vmem:[#allocation2 + $0x388] sm:$0xff] %vm290_vm0, %v14740_v33 }
 0x332   : > { %405 = vst.msk [vmem:[#allocation2 + $0x390] sm:$0xff] %vm290_vm0, %v14740_v33  ;;  %406 = vst.msk [vmem:[#allocation2 + $0x398] sm:$0xff] %vm290_vm0, %v14740_v33 }
 0x333   : > { %407 = vst.msk [vmem:[#allocation2 + $0x3a0] sm:$0xff] %vm290_vm0, %v14740_v33  ;;  %408 = vst.msk [vmem:[#allocation2 + $0x3a8] sm:$0xff] %vm290_vm0, %v14740_v33 }
 0x334   : > { %409 = vst.msk [vmem:[#allocation2 + $0x3b0] sm:$0xff] %vm290_vm0, %v14740_v33  ;;  %410 = vst.msk [vmem:[#allocation2 + $0x3b8] sm:$0xff] %vm290_vm0, %v14740_v33 }
 0x335   : > { %411 = vst.msk [vmem:[#allocation2 + $0x3c0] sm:$0xff] %vm290_vm0, %v14740_v33  ;;  %412 = vst.msk [vmem:[#allocation2 + $0x3c8] sm:$0xff] %vm290_vm0, %v14740_v33 }
 0x336   : > { %413 = vst.msk [vmem:[#allocation2 + $0x3d0] sm:$0xff] %vm290_vm0, %v14740_v33  ;;  %414 = vst.msk [vmem:[#allocation2 + $0x3d8] sm:$0xff] %vm290_vm0, %v14740_v33 }
 0x337   : > { %415 = vst.msk [vmem:[#allocation2 + $0x3e0] sm:$0xff] %vm290_vm0, %v14740_v33  ;;  %416 = vst.msk [vmem:[#allocation2 + $0x3e8] sm:$0xff] %vm290_vm0, %v14740_v33 }
 0x338   : > { %417 = vst.msk [vmem:[#allocation2 + $0x3f0] sm:$0xff] %vm290_vm0, %v14740_v33  ;;  %418 = vst.msk [vmem:[#allocation2 + $0x3f8] sm:$0xff] %vm290_vm0, %v14740_v33 }
 0x339   : > { %419 = vst.msk [vmem:[#allocation2 + $0x400] sm:$0xff] %vm290_vm0, %v14740_v33  ;;  %420 = vst.msk [vmem:[#allocation2 + $0x408] sm:$0xff] %vm290_vm0, %v14740_v33 }
 0x33a   : > { %421 = vst.msk [vmem:[#allocation2 + $0x410] sm:$0xff] %vm290_vm0, %v14740_v33  ;;  %422 = vst.msk [vmem:[#allocation2 + $0x418] sm:$0xff] %vm290_vm0, %v14740_v33 }
 0x33b   : > { %423 = vst.msk [vmem:[#allocation2 + $0x420] sm:$0xff] %vm290_vm0, %v14740_v33  ;;  %424 = vst.msk [vmem:[#allocation2 + $0x428] sm:$0xff] %vm290_vm0, %v14740_v33 }
 0x33c   : > { %425 = vst.msk [vmem:[#allocation2 + $0x430] sm:$0xff] %vm290_vm0, %v14740_v33  ;;  %426 = vst.msk [vmem:[#allocation2 + $0x438] sm:$0xff] %vm290_vm0, %v14740_v33 }
 0x33d   : > { %427 = vst.msk [vmem:[#allocation2 + $0x440] sm:$0xff] %vm290_vm0, %v14740_v33  ;;  %428 = vst.msk [vmem:[#allocation2 + $0x448] sm:$0xff] %vm290_vm0, %v14740_v33 }
 0x33e   : > { %429 = vst.msk [vmem:[#allocation2 + $0x450] sm:$0xff] %vm290_vm0, %v14740_v33  ;;  %430 = vst.msk [vmem:[#allocation2 + $0x458] sm:$0xff] %vm290_vm0, %v14740_v33 }
 0x33f   : > { %431 = vst.msk [vmem:[#allocation2 + $0x460] sm:$0xff] %vm290_vm0, %v14740_v33  ;;  %432 = vst.msk [vmem:[#allocation2 + $0x468] sm:$0xff] %vm290_vm0, %v14740_v33 }
 0x340   : > { %433 = vst.msk [vmem:[#allocation2 + $0x470] sm:$0xff] %vm290_vm0, %v14740_v33  ;;  %434 = vst.msk [vmem:[#allocation2 + $0x478] sm:$0xff] %vm290_vm0, %v14740_v33 }
 0x341   : > { %435 = vst.msk [vmem:[#allocation2 + $0x480] sm:$0xff] %vm290_vm0, %v14740_v33  ;;  %436 = vst.msk [vmem:[#allocation2 + $0x488] sm:$0xff] %vm290_vm0, %v14740_v33 }
 0x342   : > { %437 = vst.msk [vmem:[#allocation2 + $0x490] sm:$0xff] %vm290_vm0, %v14740_v33  ;;  %438 = vst.msk [vmem:[#allocation2 + $0x498] sm:$0xff] %vm290_vm0, %v14740_v33 }
 0x343   : > { %439 = vst.msk [vmem:[#allocation2 + $0x4a0] sm:$0xff] %vm290_vm0, %v14740_v33  ;;  %440 = vst.msk [vmem:[#allocation2 + $0x4a8] sm:$0xff] %vm290_vm0, %v14740_v33 }
 0x344   : > { %441 = vst.msk [vmem:[#allocation2 + $0x4b0] sm:$0xff] %vm290_vm0, %v14740_v33  ;;  %442 = vst.msk [vmem:[#allocation2 + $0x4b8] sm:$0xff] %vm290_vm0, %v14740_v33 }
 0x345   : > { %443 = vst.msk [vmem:[#allocation2 + $0x4c0] sm:$0xff] %vm290_vm0, %v14740_v33  ;;  %444 = vst.msk [vmem:[#allocation2 + $0x4c8] sm:$0xff] %vm290_vm0, %v14740_v33 }
 0x346   : > { %445 = vst.msk [vmem:[#allocation2 + $0x4d0] sm:$0xff] %vm290_vm0, %v14740_v33  ;;  %446 = vst.msk [vmem:[#allocation2 + $0x4d8] sm:$0xff] %vm290_vm0, %v14740_v33 }
 0x347   : > { %447 = vst.msk [vmem:[#allocation2 + $0x4e0] sm:$0xff] %vm290_vm0, %v14740_v33  ;;  %448 = vst.msk [vmem:[#allocation2 + $0x4e8] sm:$0xff] %vm290_vm0, %v14740_v33 }
 0x348   : > { %449 = vst.msk [vmem:[#allocation2 + $0x4f0] sm:$0xff] %vm290_vm0, %v14740_v33  ;;  %450 = vst.msk [vmem:[#allocation2 + $0x4f8] sm:$0xff] %vm290_vm0, %v14740_v33 }
 0x349   : > { %451 = vst.msk [vmem:[#allocation2 + $0x500] sm:$0xff] %vm290_vm0, %v14740_v33  ;;  %452 = vst.msk [vmem:[#allocation2 + $0x508] sm:$0xff] %vm290_vm0, %v14740_v33 }
 0x34a   : > { %453 = vst.msk [vmem:[#allocation2 + $0x510] sm:$0xff] %vm290_vm0, %v14740_v33  ;;  %454 = vst.msk [vmem:[#allocation2 + $0x518] sm:$0xff] %vm290_vm0, %v14740_v33 }
 0x34b   : > { %455 = vst.msk [vmem:[#allocation2 + $0x520] sm:$0xff] %vm290_vm0, %v14740_v33  ;;  %456 = vst.msk [vmem:[#allocation2 + $0x528] sm:$0xff] %vm290_vm0, %v14740_v33 }
 0x34c   : > { %457 = vst.msk [vmem:[#allocation2 + $0x530] sm:$0xff] %vm290_vm0, %v14740_v33  ;;  %458 = vst.msk [vmem:[#allocation2 + $0x538] sm:$0xff] %vm290_vm0, %v14740_v33 }
 0x34d   : > { %459 = vst.msk [vmem:[#allocation2 + $0x540] sm:$0xff] %vm290_vm0, %v14740_v33  ;;  %460 = vst.msk [vmem:[#allocation2 + $0x548] sm:$0xff] %vm290_vm0, %v14740_v33 }
 0x34e   : > { %461 = vst.msk [vmem:[#allocation2 + $0x550] sm:$0xff] %vm290_vm0, %v14740_v33  ;;  %462 = vst.msk [vmem:[#allocation2 + $0x558] sm:$0xff] %vm290_vm0, %v14740_v33 }
 0x34f   : > { %463 = vst.msk [vmem:[#allocation2 + $0x560] sm:$0xff] %vm290_vm0, %v14740_v33  ;;  %464 = vst.msk [vmem:[#allocation2 + $0x568] sm:$0xff] %vm290_vm0, %v14740_v33 }
 0x350   : > { %465 = vst.msk [vmem:[#allocation2 + $0x570] sm:$0xff] %vm290_vm0, %v14740_v33  ;;  %466 = vst.msk [vmem:[#allocation2 + $0x578] sm:$0xff] %vm290_vm0, %v14740_v33 }
 0x351   : > { %467 = vst.msk [vmem:[#allocation2 + $0x580] sm:$0xff] %vm290_vm0, %v14740_v33  ;;  %468 = vst.msk [vmem:[#allocation2 + $0x588] sm:$0xff] %vm290_vm0, %v14740_v33 }
 0x352   : > { %469 = vst.msk [vmem:[#allocation2 + $0x590] sm:$0xff] %vm290_vm0, %v14740_v33  ;;  %470 = vst.msk [vmem:[#allocation2 + $0x598] sm:$0xff] %vm290_vm0, %v14740_v33 }
 0x353   : > { %471 = vst.msk [vmem:[#allocation2 + $0x5a0] sm:$0xff] %vm290_vm0, %v14740_v33  ;;  %472 = vst.msk [vmem:[#allocation2 + $0x5a8] sm:$0xff] %vm290_vm0, %v14740_v33 }
 0x354   : > { %473 = vst.msk [vmem:[#allocation2 + $0x5b0] sm:$0xff] %vm290_vm0, %v14740_v33  ;;  %474 = vst.msk [vmem:[#allocation2 + $0x5b8] sm:$0xff] %vm290_vm0, %v14740_v33 }
 0x355   : > { %475 = vst.msk [vmem:[#allocation2 + $0x5c0] sm:$0xff] %vm290_vm0, %v14740_v33  ;;  %476 = vst.msk [vmem:[#allocation2 + $0x5c8] sm:$0xff] %vm290_vm0, %v14740_v33 }
 0x356   : > { %477 = vst.msk [vmem:[#allocation2 + $0x5d0] sm:$0xff] %vm290_vm0, %v14740_v33  ;;  %478 = vst.msk [vmem:[#allocation2 + $0x5d8] sm:$0xff] %vm290_vm0, %v14740_v33 }
 0x357   : > { %479 = vst.msk [vmem:[#allocation2 + $0x5e0] sm:$0xff] %vm290_vm0, %v14740_v33  ;;  %480 = vst.msk [vmem:[#allocation2 + $0x5e8] sm:$0xff] %vm290_vm0, %v14740_v33 }
 0x358   : > { %481 = vst.msk [vmem:[#allocation2 + $0x5f0] sm:$0xff] %vm290_vm0, %v14740_v33  ;;  %482 = vst.msk [vmem:[#allocation2 + $0x5f8] sm:$0xff] %vm290_vm0, %v14740_v33 }
 0x359   : > { %483 = vst.msk [vmem:[#allocation2 + $0x600] sm:$0xff] %vm290_vm0, %v14740_v33  ;;  %484 = vst.msk [vmem:[#allocation2 + $0x608] sm:$0xff] %vm290_vm0, %v14740_v33 }
 0x35a   : > { %485 = vst.msk [vmem:[#allocation2 + $0x610] sm:$0xff] %vm290_vm0, %v14740_v33  ;;  %486 = vst.msk [vmem:[#allocation2 + $0x618] sm:$0xff] %vm290_vm0, %v14740_v33 }
 0x35b   : > { %487 = vst.msk [vmem:[#allocation2 + $0x620] sm:$0xff] %vm290_vm0, %v14740_v33  ;;  %488 = vst.msk [vmem:[#allocation2 + $0x628] sm:$0xff] %vm290_vm0, %v14740_v33 }
 0x35c   : > { %489 = vst.msk [vmem:[#allocation2 + $0x630] sm:$0xff] %vm290_vm0, %v14740_v33  ;;  %490 = vst.msk [vmem:[#allocation2 + $0x638] sm:$0xff] %vm290_vm0, %v14740_v33 }
 0x35d   : > { %491 = vst.msk [vmem:[#allocation2 + $0x640] sm:$0xff] %vm290_vm0, %v14740_v33  ;;  %492 = vst.msk [vmem:[#allocation2 + $0x648] sm:$0xff] %vm290_vm0, %v14740_v33 }
 0x35e   : > { %493 = vst.msk [vmem:[#allocation2 + $0x650] sm:$0xff] %vm290_vm0, %v14740_v33  ;;  %494 = vst.msk [vmem:[#allocation2 + $0x658] sm:$0xff] %vm290_vm0, %v14740_v33 }
 0x35f   : > { %495 = vst.msk [vmem:[#allocation2 + $0x660] sm:$0xff] %vm290_vm0, %v14740_v33  ;;  %496 = vst.msk [vmem:[#allocation2 + $0x668] sm:$0xff] %vm290_vm0, %v14740_v33 }
 0x360   : > { %497 = vst.msk [vmem:[#allocation2 + $0x670] sm:$0xff] %vm290_vm0, %v14740_v33  ;;  %498 = vst.msk [vmem:[#allocation2 + $0x678] sm:$0xff] %vm290_vm0, %v14740_v33 }
 0x361   : > { %499 = vst.msk [vmem:[#allocation2 + $0x680] sm:$0xff] %vm290_vm0, %v14740_v33  ;;  %500 = vst.msk [vmem:[#allocation2 + $0x688] sm:$0xff] %vm290_vm0, %v14740_v33 }
 0x362   : > { %501 = vst.msk [vmem:[#allocation2 + $0x690] sm:$0xff] %vm290_vm0, %v14740_v33  ;;  %502 = vst.msk [vmem:[#allocation2 + $0x698] sm:$0xff] %vm290_vm0, %v14740_v33 }
 0x363   : > { %503 = vst.msk [vmem:[#allocation2 + $0x6a0] sm:$0xff] %vm290_vm0, %v14740_v33  ;;  %504 = vst.msk [vmem:[#allocation2 + $0x6a8] sm:$0xff] %vm290_vm0, %v14740_v33 }
 0x364   : > { %505 = vst.msk [vmem:[#allocation2 + $0x6b0] sm:$0xff] %vm290_vm0, %v14740_v33  ;;  %506 = vst.msk [vmem:[#allocation2 + $0x6b8] sm:$0xff] %vm290_vm0, %v14740_v33 }
 0x365   : > { %507 = vst.msk [vmem:[#allocation2 + $0x6c0] sm:$0xff] %vm290_vm0, %v14740_v33  ;;  %508 = vst.msk [vmem:[#allocation2 + $0x6c8] sm:$0xff] %vm290_vm0, %v14740_v33 }
 0x366   : > { %509 = vst.msk [vmem:[#allocation2 + $0x6d0] sm:$0xff] %vm290_vm0, %v14740_v33  ;;  %510 = vst.msk [vmem:[#allocation2 + $0x6d8] sm:$0xff] %vm290_vm0, %v14740_v33 }
 0x367   : > { %511 = vst.msk [vmem:[#allocation2 + $0x6e0] sm:$0xff] %vm290_vm0, %v14740_v33  ;;  %512 = vst.msk [vmem:[#allocation2 + $0x6e8] sm:$0xff] %vm290_vm0, %v14740_v33 }
 0x368   : > { %513 = vst.msk [vmem:[#allocation2 + $0x6f0] sm:$0xff] %vm290_vm0, %v14740_v33  ;;  %514 = vst.msk [vmem:[#allocation2 + $0x6f8] sm:$0xff] %vm290_vm0, %v14740_v33 }
 0x369   : > { %515 = vst.msk [vmem:[#allocation2 + $0x700] sm:$0xff] %vm290_vm0, %v14740_v33  ;;  %516 = vst.msk [vmem:[#allocation2 + $0x708] sm:$0xff] %vm290_vm0, %v14740_v33 }
 0x36a   : > { %517 = vst.msk [vmem:[#allocation2 + $0x710] sm:$0xff] %vm290_vm0, %v14740_v33  ;;  %518 = vst.msk [vmem:[#allocation2 + $0x718] sm:$0xff] %vm290_vm0, %v14740_v33 }
 0x36b   : > { %519 = vst.msk [vmem:[#allocation2 + $0x720] sm:$0xff] %vm290_vm0, %v14740_v33  ;;  %520 = vst.msk [vmem:[#allocation2 + $0x728] sm:$0xff] %vm290_vm0, %v14740_v33 }
 0x36c   : > { %521 = vst.msk [vmem:[#allocation2 + $0x730] sm:$0xff] %vm290_vm0, %v14740_v33  ;;  %522 = vst.msk [vmem:[#allocation2 + $0x738] sm:$0xff] %vm290_vm0, %v14740_v33 }
 0x36d   : > { %523 = vst.msk [vmem:[#allocation2 + $0x740] sm:$0xff] %vm290_vm0, %v14740_v33  ;;  %524 = vst.msk [vmem:[#allocation2 + $0x748] sm:$0xff] %vm290_vm0, %v14740_v33 }
 0x36e   : > { %525 = vst.msk [vmem:[#allocation2 + $0x750] sm:$0xff] %vm290_vm0, %v14740_v33  ;;  %526 = vst.msk [vmem:[#allocation2 + $0x758] sm:$0xff] %vm290_vm0, %v14740_v33 }
 0x36f   : > { %527 = vst.msk [vmem:[#allocation2 + $0x760] sm:$0xff] %vm290_vm0, %v14740_v33  ;;  %528 = vst.msk [vmem:[#allocation2 + $0x768] sm:$0xff] %vm290_vm0, %v14740_v33 }
 0x370   : > { %529 = vst.msk [vmem:[#allocation2 + $0x770] sm:$0xff] %vm290_vm0, %v14740_v33  ;;  %530 = vst.msk [vmem:[#allocation2 + $0x778] sm:$0xff] %vm290_vm0, %v14740_v33 }
 0x371   : > { %531 = vst.msk [vmem:[#allocation2 + $0x780] sm:$0xff] %vm290_vm0, %v14740_v33  ;;  %532 = vst.msk [vmem:[#allocation2 + $0x788] sm:$0xff] %vm290_vm0, %v14740_v33 }
 0x372   : > { %533 = vst.msk [vmem:[#allocation2 + $0x790] sm:$0xff] %vm290_vm0, %v14740_v33  ;;  %534 = vst.msk [vmem:[#allocation2 + $0x798] sm:$0xff] %vm290_vm0, %v14740_v33 }
 0x373   : > { %535 = vst.msk [vmem:[#allocation2 + $0x7a0] sm:$0xff] %vm290_vm0, %v14740_v33  ;;  %536 = vst.msk [vmem:[#allocation2 + $0x7a8] sm:$0xff] %vm290_vm0, %v14740_v33 }
 0x374   : > { %537 = vst.msk [vmem:[#allocation2 + $0x7b0] sm:$0xff] %vm290_vm0, %v14740_v33  ;;  %538 = vst.msk [vmem:[#allocation2 + $0x7b8] sm:$0xff] %vm290_vm0, %v14740_v33 }
 0x375   : > { %539 = vst.msk [vmem:[#allocation2 + $0x7c0] sm:$0xff] %vm290_vm0, %v14740_v33  ;;  %540 = vst.msk [vmem:[#allocation2 + $0x7c8] sm:$0xff] %vm290_vm0, %v14740_v33 }
 0x376   : > { %541 = vst.msk [vmem:[#allocation2 + $0x7d0] sm:$0xff] %vm290_vm0, %v14740_v33  ;;  %542 = vst.msk [vmem:[#allocation2 + $0x7d8] sm:$0xff] %vm290_vm0, %v14740_v33 }
 0x377   : > { %543 = vst.msk [vmem:[#allocation2 + $0x7e0] sm:$0xff] %vm290_vm0, %v14740_v33  ;;  %544 = vst.msk [vmem:[#allocation2 + $0x7e8] sm:$0xff] %vm290_vm0, %v14740_v33 }
 0x378   : > { %545 = vst.msk [vmem:[#allocation2 + $0x7f0] sm:$0xff] %vm290_vm0, %v14740_v33  ;;  %546 = vst.msk [vmem:[#allocation2 + $0x7f8] sm:$0xff] %vm290_vm0, %v14740_v33  ;;  %v13885_v33 = vld [vmem:[%s14921_s14 + $0x254] ss:$24 sps:$4 sm:$0xff]  }
 0x379   : > { %18711 = vst [vmem:[#allocation157_spill] sm:$0xff] %v16343_v56  ;;  %18712 = vst [vmem:[#allocation158_spill] sm:$0xff] %v16345_v11  ;;  %8037 = vmatprep.mubr.bf16.mxu0 %v13885_v33  ;;  %v6223_v11 = vpop.f32.mrb[197].mxu0  ;;  %v13880_v56 = vld [vmem:[%s14921_s14 + $0x248] ss:$24 sps:$4 sm:$0xff]  }
 0x37a   : > { %18713 = vst [vmem:[#allocation159_spill] sm:$0xff] %v16349_v54  ;;  %18714 = vst [vmem:[#allocation160_spill] sm:$0xff] %v16351_v5  ;;  %v13883_v54 = vld [vmem:[%s14921_s14 + $0x250] ss:$24 sps:$4 sm:$0xff]   ;;  %v16361_v5 = vpop.f32.mrb[198].mxu0  ;;  %6981 = vmatmul.mubr.bf16.gmra.mrb[48].mxu1 %v13880_v56 }
 0x37b   : > { %18715 = vst [vmem:[#allocation161_spill] sm:$0xff] %v16355_v26  ;;  %18716 = vst [vmem:[#allocation162_spill] sm:$0xff] %v16357_v44  ;;  %v6226_v42 = vpop.f32.mrb[199].mxu0  ;;  %8038 = vmatmul.mubr.bf16.gmra.mrb[48].mxu0 %v13883_v54  ;;  %6988 = vmatprep.mubr.bf16.mxu1 %v13888_v51  ;;  %v13886_v44 = vld [vmem:[%s14921_s14 + $0x278] ss:$24 sps:$4 sm:$0xff]   ;;  %v16375_v26 = vpop.f32.mrb[202].mxu1 }
 0x37c   : > { %18717 = vst [vmem:[#allocation163_spill] sm:$0xff] %v16361_v5  ;;  %18718 = vst [vmem:[#allocation164_spill] sm:$0xff] %v16363_v30  ;;  %8045 = vmatprep.mubr.bf16.mxu0 %v13891_v8  ;;  %v16367_v11 = vpop.f32.mrb[200].mxu0  ;;  %v13889_v5 = vld [vmem:[%s14921_s14 + $0x280] ss:$24 sps:$4 sm:$0xff]   ;;  %v6746_v51 = vpop.f32.mrb[203].mxu1 }
 0x37d   : > { %18719 = vst [vmem:[#allocation165_spill] sm:$0xff] %v16367_v11  ;;  %18720 = vst [vmem:[#allocation166_spill] sm:$0xff] %v16369_v59  ;;  %v6231_v33 = vpop.f32.mrb[201].mxu0  ;;  %v13894_v42 = vld [vmem:[%s14921_s14 + $0x2ac] ss:$24 sps:$4 sm:$0xff]   ;;  %v16381_v10 = vpop.f32.mrb[204].mxu1 }
 0x37e   : > { %v16373_v30 = vpop.f32.mrb[202].mxu0  ;;  %18722 = vst [vmem:[#allocation168_spill] sm:$0xff] %v16375_v26  ;;  %v13897_v56 = vld [vmem:[%s14921_s14 + $0x2b4] ss:$24 sps:$4 sm:$0xff]   ;;  %18724 = vst [vmem:[#allocation170_spill] sm:$0xff] %v16381_v10  ;;  %v6751_v17 = vpop.f32.mrb[205].mxu1 }
 0x37f   : > { %18721 = vst [vmem:[#allocation167_spill] sm:$0xff] %v16373_v30  ;;  %v6234_v54 = vpop.f32.mrb[203].mxu0  ;;  %v13892_v59 = vld [vmem:[%s14921_s14 + $0x2a8] ss:$24 sps:$4 sm:$0xff]   ;;  %v16387_v11 = vpop.f32.mrb[206].mxu1 }
 0x380   : > { %v16379_v8 = vpop.f32.mrb[204].mxu0  ;;  %v13895_v30 = vld [vmem:[%s14921_s14 + $0x2b0] ss:$24 sps:$4 sm:$0xff]   ;;  %18726 = vst [vmem:[#allocation172_spill] sm:$0xff] %v16387_v11  ;;  %v13900_v54 = vld [vmem:[%s14921_s14 + $0x2dc] ss:$24 sps:$4 sm:$0xff]  }
 0x381   : > { %18723 = vst [vmem:[#allocation169_spill] sm:$0xff] %v16379_v8  ;;  %v6239_v33 = vpop.f32.mrb[205].mxu0  ;;  %v13898_v10 = vld [vmem:[%s14921_s14 + $0x2d8] ss:$24 sps:$4 sm:$0xff]  }
 0x382   : > { %6989 = vmatmul.mubr.bf16.gmra.mrb[52].mxu1 %v13886_v44  ;;  %v16385_v26 = vpop.f32.mrb[206].mxu0  ;;  %v13903_v44 = vld [vmem:[%s14921_s14 + $0x2e4] ss:$24 sps:$4 sm:$0xff]  }
 0x383   : > { %8046 = vmatmul.mubr.bf16.gmra.mrb[52].mxu0 %v13889_v5  ;;  %6996 = vmatprep.mubr.bf16.mxu1 %v13894_v42  ;;  %18725 = vst [vmem:[#allocation171_spill] sm:$0xff] %v16385_v26  ;;  %v6242_v5 = vpop.f32.mrb[207].mxu0  ;;  %v6754_v42 = vpop.f32.mrb[207].mxu1  ;;  %v13901_v26 = vld [vmem:[%s14921_s14 + $0x2e0] ss:$24 sps:$4 sm:$0xff]  }
 0x384   : > { %8053 = vmatprep.mubr.bf16.mxu0 %v13897_v56  ;;  %v16391_v56 = vpop.f32.mrb[208].mxu0  ;;  %v16393_v51 = vpop.f32.mrb[208].mxu1  ;;  %v13906_v5 = vld [vmem:[%s14921_s14 + $0x30c] ss:$24 sps:$4 sm:$0xff]  }
 0x385   : > { %18727 = vst [vmem:[#allocation173_spill] sm:$0xff] %v16391_v56  ;;  %18728 = vst [vmem:[#allocation174_spill] sm:$0xff] %v16393_v51  ;;  %v6247_v33 = vpop.f32.mrb[209].mxu0  ;;  %v6759_v17 = vpop.f32.mrb[209].mxu1  ;;  %v13904_v51 = vld [vmem:[%s14921_s14 + $0x308] ss:$24 sps:$4 sm:$0xff]  }
 0x386   : > { %v16397_v11 = vpop.f32.mrb[210].mxu0  ;;  %v16399_v8 = vpop.f32.mrb[210].mxu1 }
 0x387   : > { %18729 = vst [vmem:[#allocation175_spill] sm:$0xff] %v16397_v11  ;;  %18730 = vst [vmem:[#allocation176_spill] sm:$0xff] %v16399_v8  ;;  %v13907_v11 = vld [vmem:[%s14921_s14 + $0x310] ss:$24 sps:$4 sm:$0xff]  }
 0x38a   : > { %6997 = vmatmul.mubr.bf16.gmra.mrb[56].mxu1 %v13892_v59  ;;  %v13909_v59 = vld [vmem:[%s14921_s14 + $0x314] ss:$24 sps:$4 sm:$0xff]  }
 0x38b   : > { %8054 = vmatmul.mubr.bf16.gmra.mrb[56].mxu0 %v13895_v30  ;;  %7004 = vmatprep.mubr.bf16.mxu1 %v13900_v54  ;;  %v6250_v30 = vpop.f32.mrb[211].mxu0  ;;  %v6762_v54 = vpop.f32.mrb[211].mxu1 }
 0x38c   : > { %8061 = vmatprep.mubr.bf16.mxu0 %v13903_v44  ;;  %v16403_v44 = vpop.f32.mrb[212].mxu0  ;;  %v16405_v42 = vpop.f32.mrb[212].mxu1  ;;  %v13912_v30 = vld [vmem:[%s14921_s14 + $0x33c] ss:$24 sps:$4 sm:$0xff]  }
 0x38d   : > { %18731 = vst [vmem:[#allocation177_spill] sm:$0xff] %v16403_v44  ;;  %18732 = vst [vmem:[#allocation178_spill] sm:$0xff] %v16405_v42  ;;  %v6255_v33 = vpop.f32.mrb[213].mxu0  ;;  %v6767_v17 = vpop.f32.mrb[213].mxu1  ;;  %v13910_v42 = vld [vmem:[%s14921_s14 + $0x338] ss:$24 sps:$4 sm:$0xff]  }
 0x38e   : > { %v16409_v8 = vpop.f32.mrb[214].mxu0  ;;  %v16411_v56 = vpop.f32.mrb[214].mxu1 }
 0x38f   : > { %18733 = vst [vmem:[#allocation179_spill] sm:$0xff] %v16409_v8  ;;  %18734 = vst [vmem:[#allocation180_spill] sm:$0xff] %v16411_v56  ;;  %v13913_v8 = vld [vmem:[%s14921_s14 + $0x340] ss:$24 sps:$4 sm:$0xff]  }
 0x392   : > { %7005 = vmatmul.mubr.bf16.gmra.mrb[60].mxu1 %v13898_v10  ;;  %v13915_v10 = vld [vmem:[%s14921_s14 + $0x344] ss:$24 sps:$4 sm:$0xff]  }
 0x393   : > { %8062 = vmatmul.mubr.bf16.gmra.mrb[60].mxu0 %v13901_v26  ;;  %7012 = vmatprep.mubr.bf16.mxu1 %v13906_v5  ;;  %v6258_v26 = vpop.f32.mrb[215].mxu0  ;;  %v6770_v5 = vpop.f32.mrb[215].mxu1 }
 0x394   : > { %8069 = vmatprep.mubr.bf16.mxu0 %v13909_v59  ;;  %v16415_v59 = vpop.f32.mrb[216].mxu0  ;;  %v16417_v54 = vpop.f32.mrb[216].mxu1  ;;  %v13918_v26 = vld [vmem:[%s14921_s14 + $0x36c] ss:$24 sps:$4 sm:$0xff]  }
 0x395   : > { %18735 = vst [vmem:[#allocation181_spill] sm:$0xff] %v16415_v59  ;;  %18736 = vst [vmem:[#allocation182_spill] sm:$0xff] %v16417_v54  ;;  %v6263_v33 = vpop.f32.mrb[217].mxu0  ;;  %v6775_v17 = vpop.f32.mrb[217].mxu1  ;;  %v13916_v54 = vld [vmem:[%s14921_s14 + $0x368] ss:$24 sps:$4 sm:$0xff]  }
 0x396   : > { %v16421_v56 = vpop.f32.mrb[218].mxu0  ;;  %v16423_v44 = vpop.f32.mrb[218].mxu1 }
 0x397   : > { %18737 = vst [vmem:[#allocation183_spill] sm:$0xff] %v16421_v56  ;;  %18738 = vst [vmem:[#allocation184_spill] sm:$0xff] %v16423_v44  ;;  %v13919_v56 = vld [vmem:[%s14921_s14 + $0x370] ss:$24 sps:$4 sm:$0xff]  }
 0x39a   : > { %7013 = vmatmul.mubr.bf16.gmra.mrb[64].mxu1 %v13904_v51  ;;  %v13921_v51 = vld [vmem:[%s14921_s14 + $0x374] ss:$24 sps:$4 sm:$0xff]  }
 0x39b   : > { %8070 = vmatmul.mubr.bf16.gmra.mrb[64].mxu0 %v13907_v11  ;;  %7020 = vmatprep.mubr.bf16.mxu1 %v13912_v30  ;;  %v6266_v11 = vpop.f32.mrb[219].mxu0  ;;  %v6778_v30 = vpop.f32.mrb[219].mxu1 }
 0x39c   : > { %8077 = vmatprep.mubr.bf16.mxu0 %v13915_v10  ;;  %v16427_v10 = vpop.f32.mrb[220].mxu0  ;;  %v16429_v5 = vpop.f32.mrb[220].mxu1  ;;  %v13924_v11 = vld [vmem:[%s14921_s14 + $0x39c] ss:$24 sps:$4 sm:$0xff]  }
 0x39d   : > { %18739 = vst [vmem:[#allocation185_spill] sm:$0xff] %v16427_v10  ;;  %18740 = vst [vmem:[#allocation186_spill] sm:$0xff] %v16429_v5  ;;  %v6271_v33 = vpop.f32.mrb[221].mxu0  ;;  %v6783_v17 = vpop.f32.mrb[221].mxu1  ;;  %v13922_v5 = vld [vmem:[%s14921_s14 + $0x398] ss:$24 sps:$4 sm:$0xff]  }
 0x39e   : > { %v16433_v44 = vpop.f32.mrb[222].mxu0  ;;  %v16435_v59 = vpop.f32.mrb[222].mxu1 }
 0x39f   : > { %18741 = vst [vmem:[#allocation187_spill] sm:$0xff] %v16433_v44  ;;  %18742 = vst [vmem:[#allocation188_spill] sm:$0xff] %v16435_v59  ;;  %v13925_v44 = vld [vmem:[%s14921_s14 + $0x3a0] ss:$24 sps:$4 sm:$0xff]  }
 0x3a2   : > { %7021 = vmatmul.mubr.bf16.gmra.mrb[68].mxu1 %v13910_v42  ;;  %v13927_v42 = vld [vmem:[%s14921_s14 + $0x3a4] ss:$24 sps:$4 sm:$0xff]  }
 0x3a3   : > { %8078 = vmatmul.mubr.bf16.gmra.mrb[68].mxu0 %v13913_v8  ;;  %7028 = vmatprep.mubr.bf16.mxu1 %v13918_v26  ;;  %v6274_v8 = vpop.f32.mrb[223].mxu0  ;;  %v6786_v26 = vpop.f32.mrb[223].mxu1 }
 0x3a4   : > { %8085 = vmatprep.mubr.bf16.mxu0 %v13921_v51  ;;  %v16439_v51 = vpop.f32.mrb[224].mxu0  ;;  %v16441_v30 = vpop.f32.mrb[224].mxu1  ;;  %v13930_v8 = vld [vmem:[%s14921_s14 + $0x3cc] ss:$24 sps:$4 sm:$0xff]  }
 0x3a5   : > { %18743 = vst [vmem:[#allocation189_spill] sm:$0xff] %v16439_v51  ;;  %18744 = vst [vmem:[#allocation190_spill] sm:$0xff] %v16441_v30  ;;  %v6279_v33 = vpop.f32.mrb[225].mxu0  ;;  %v6791_v17 = vpop.f32.mrb[225].mxu1  ;;  %v13928_v30 = vld [vmem:[%s14921_s14 + $0x3c8] ss:$24 sps:$4 sm:$0xff]  }
 0x3a6   : > { %v16445_v59 = vpop.f32.mrb[226].mxu0  ;;  %v16447_v10 = vpop.f32.mrb[226].mxu1 }
 0x3a7   : > { %18745 = vst [vmem:[#allocation191_spill] sm:$0xff] %v16445_v59  ;;  %18746 = vst [vmem:[#allocation192_spill] sm:$0xff] %v16447_v10  ;;  %v13931_v59 = vld [vmem:[%s14921_s14 + $0x3d0] ss:$24 sps:$4 sm:$0xff]  }
 0x3aa   : > { %7029 = vmatmul.mubr.bf16.gmra.mrb[72].mxu1 %v13916_v54  ;;  %v13933_v54 = vld [vmem:[%s14921_s14 + $0x3d4] ss:$24 sps:$4 sm:$0xff]  }
 0x3ab   : > { %8086 = vmatmul.mubr.bf16.gmra.mrb[72].mxu0 %v13919_v56  ;;  %7036 = vmatprep.mubr.bf16.mxu1 %v13924_v11  ;;  %v6282_v56 = vpop.f32.mrb[227].mxu0  ;;  %v6794_v11 = vpop.f32.mrb[227].mxu1 }
 0x3ac   : > { %8093 = vmatprep.mubr.bf16.mxu0 %v13927_v42  ;;  %v16451_v42 = vpop.f32.mrb[228].mxu0  ;;  %v16453_v26 = vpop.f32.mrb[228].mxu1  ;;  %v13936_v56 = vld [vmem:[%s14921_s14 + $0x3fc] ss:$24 sps:$4 sm:$0xff]  }
 0x3ad   : > { %18747 = vst [vmem:[#allocation193_spill] sm:$0xff] %v16451_v42  ;;  %18748 = vst [vmem:[#allocation194_spill] sm:$0xff] %v16453_v26  ;;  %v6287_v33 = vpop.f32.mrb[229].mxu0  ;;  %v6799_v17 = vpop.f32.mrb[229].mxu1  ;;  %v13934_v26 = vld [vmem:[%s14921_s14 + $0x3f8] ss:$24 sps:$4 sm:$0xff]  }
 0x3ae   : > { %v16457_v10 = vpop.f32.mrb[230].mxu0  ;;  %v16459_v51 = vpop.f32.mrb[230].mxu1 }
 0x3af   : > { %18749 = vst [vmem:[#allocation195_spill] sm:$0xff] %v16457_v10  ;;  %18750 = vst [vmem:[#allocation196_spill] sm:$0xff] %v16459_v51  ;;  %v13937_v10 = vld [vmem:[%s14921_s14 + $0x400] ss:$24 sps:$4 sm:$0xff]  }
 0x3b2   : > { %7037 = vmatmul.mubr.bf16.gmra.mrb[76].mxu1 %v13922_v5  ;;  %v13939_v5 = vld [vmem:[%s14921_s14 + $0x404] ss:$24 sps:$4 sm:$0xff]  }
 0x3b3   : > { %8094 = vmatmul.mubr.bf16.gmra.mrb[76].mxu0 %v13925_v44  ;;  %7044 = vmatprep.mubr.bf16.mxu1 %v13930_v8  ;;  %v6290_v44 = vpop.f32.mrb[231].mxu0  ;;  %v6802_v8 = vpop.f32.mrb[231].mxu1 }
 0x3b4   : > { %8101 = vmatprep.mubr.bf16.mxu0 %v13933_v54  ;;  %v16463_v54 = vpop.f32.mrb[232].mxu0  ;;  %v16465_v11 = vpop.f32.mrb[232].mxu1  ;;  %v13942_v44 = vld [vmem:[%s14921_s14 + $0x42c] ss:$24 sps:$4 sm:$0xff]  }
 0x3b5   : > { %18751 = vst [vmem:[#allocation197_spill] sm:$0xff] %v16463_v54  ;;  %18752 = vst [vmem:[#allocation198_spill] sm:$0xff] %v16465_v11  ;;  %v6295_v33 = vpop.f32.mrb[233].mxu0  ;;  %v6807_v17 = vpop.f32.mrb[233].mxu1  ;;  %v13940_v11 = vld [vmem:[%s14921_s14 + $0x428] ss:$24 sps:$4 sm:$0xff]  }
 0x3b6   : > { %v16469_v51 = vpop.f32.mrb[234].mxu0  ;;  %v16471_v42 = vpop.f32.mrb[234].mxu1 }
 0x3b7   : > { %18753 = vst [vmem:[#allocation199_spill] sm:$0xff] %v16469_v51  ;;  %18754 = vst [vmem:[#allocation200_spill] sm:$0xff] %v16471_v42  ;;  %v13943_v51 = vld [vmem:[%s14921_s14 + $0x430] ss:$24 sps:$4 sm:$0xff]  }
 0x3ba   : > { %7045 = vmatmul.mubr.bf16.gmra.mrb[80].mxu1 %v13928_v30  ;;  %v13945_v30 = vld [vmem:[%s14921_s14 + $0x434] ss:$24 sps:$4 sm:$0xff]  }
 0x3bb   : > { %8102 = vmatmul.mubr.bf16.gmra.mrb[80].mxu0 %v13931_v59  ;;  %7052 = vmatprep.mubr.bf16.mxu1 %v13936_v56  ;;  %v6298_v59 = vpop.f32.mrb[235].mxu0  ;;  %v6810_v56 = vpop.f32.mrb[235].mxu1 }
 0x3bc   : > { %8109 = vmatprep.mubr.bf16.mxu0 %v13939_v5  ;;  %v16475_v5 = vpop.f32.mrb[236].mxu0  ;;  %v16477_v8 = vpop.f32.mrb[236].mxu1  ;;  %v13948_v59 = vld [vmem:[%s14921_s14 + $0x45c] ss:$24 sps:$4 sm:$0xff]  }
 0x3bd   : > { %18755 = vst [vmem:[#allocation201_spill] sm:$0xff] %v16475_v5  ;;  %18756 = vst [vmem:[#allocation202_spill] sm:$0xff] %v16477_v8  ;;  %v6303_v33 = vpop.f32.mrb[237].mxu0  ;;  %v6815_v17 = vpop.f32.mrb[237].mxu1  ;;  %v13946_v8 = vld [vmem:[%s14921_s14 + $0x458] ss:$24 sps:$4 sm:$0xff]  }
 0x3be   : > { %v16481_v42 = vpop.f32.mrb[238].mxu0  ;;  %v16483_v54 = vpop.f32.mrb[238].mxu1 }
 0x3bf   : > { %18757 = vst [vmem:[#allocation203_spill] sm:$0xff] %v16481_v42  ;;  %18758 = vst [vmem:[#allocation204_spill] sm:$0xff] %v16483_v54  ;;  %v13949_v42 = vld [vmem:[%s14921_s14 + $0x460] ss:$24 sps:$4 sm:$0xff]  }
 0x3c2   : > { %7053 = vmatmul.mubr.bf16.gmra.mrb[84].mxu1 %v13934_v26  ;;  %v13951_v26 = vld [vmem:[%s14921_s14 + $0x464] ss:$24 sps:$4 sm:$0xff]  }
 0x3c3   : > { %8110 = vmatmul.mubr.bf16.gmra.mrb[84].mxu0 %v13937_v10  ;;  %7060 = vmatprep.mubr.bf16.mxu1 %v13942_v44  ;;  %v6306_v10 = vpop.f32.mrb[239].mxu0  ;;  %v6818_v44 = vpop.f32.mrb[239].mxu1 }
 0x3c4   : > { %8117 = vmatprep.mubr.bf16.mxu0 %v13945_v30  ;;  %v16487_v30 = vpop.f32.mrb[240].mxu0  ;;  %v16489_v56 = vpop.f32.mrb[240].mxu1  ;;  %v13954_v10 = vld [vmem:[%s14921_s14 + $0x48c] ss:$24 sps:$4 sm:$0xff]  }
 0x3c5   : > { %18759 = vst [vmem:[#allocation205_spill] sm:$0xff] %v16487_v30  ;;  %18760 = vst [vmem:[#allocation206_spill] sm:$0xff] %v16489_v56  ;;  %v6311_v33 = vpop.f32.mrb[241].mxu0  ;;  %v6823_v17 = vpop.f32.mrb[241].mxu1  ;;  %v13952_v56 = vld [vmem:[%s14921_s14 + $0x488] ss:$24 sps:$4 sm:$0xff]  }
 0x3c6   : > { %v16493_v54 = vpop.f32.mrb[242].mxu0  ;;  %v16495_v5 = vpop.f32.mrb[242].mxu1 }
 0x3c7   : > { %18761 = vst [vmem:[#allocation207_spill] sm:$0xff] %v16493_v54  ;;  %18762 = vst [vmem:[#allocation208_spill] sm:$0xff] %v16495_v5  ;;  %v13955_v54 = vld [vmem:[%s14921_s14 + $0x490] ss:$24 sps:$4 sm:$0xff]  }
 0x3ca   : > { %7061 = vmatmul.mubr.bf16.gmra.mrb[88].mxu1 %v13940_v11  ;;  %v13957_v11 = vld [vmem:[%s14921_s14 + $0x494] ss:$24 sps:$4 sm:$0xff]  }
 0x3cb   : > { %8118 = vmatmul.mubr.bf16.gmra.mrb[88].mxu0 %v13943_v51  ;;  %7068 = vmatprep.mubr.bf16.mxu1 %v13948_v59  ;;  %v6314_v51 = vpop.f32.mrb[243].mxu0  ;;  %v6826_v59 = vpop.f32.mrb[243].mxu1 }
 0x3cc   : > { %8125 = vmatprep.mubr.bf16.mxu0 %v13951_v26  ;;  %v16499_v26 = vpop.f32.mrb[244].mxu0  ;;  %v16501_v44 = vpop.f32.mrb[244].mxu1  ;;  %v13960_v51 = vld [vmem:[%s14921_s14 + $0x4bc] ss:$24 sps:$4 sm:$0xff]  }
 0x3cd   : > { %18763 = vst [vmem:[#allocation209_spill] sm:$0xff] %v16499_v26  ;;  %18764 = vst [vmem:[#allocation210_spill] sm:$0xff] %v16501_v44  ;;  %v6319_v33 = vpop.f32.mrb[245].mxu0  ;;  %v6831_v17 = vpop.f32.mrb[245].mxu1  ;;  %v13958_v44 = vld [vmem:[%s14921_s14 + $0x4b8] ss:$24 sps:$4 sm:$0xff]  }
 0x3ce   : > { %v16505_v5 = vpop.f32.mrb[246].mxu0  ;;  %v16507_v30 = vpop.f32.mrb[246].mxu1 }
 0x3cf   : > { %18765 = vst [vmem:[#allocation211_spill] sm:$0xff] %v16505_v5  ;;  %18766 = vst [vmem:[#allocation212_spill] sm:$0xff] %v16507_v30  ;;  %v13961_v5 = vld [vmem:[%s14921_s14 + $0x4c0] ss:$24 sps:$4 sm:$0xff]  }
 0x3d2   : > { %7069 = vmatmul.mubr.bf16.gmra.mrb[92].mxu1 %v13946_v8  ;;  %v13963_v8 = vld [vmem:[%s14921_s14 + $0x4c4] ss:$24 sps:$4 sm:$0xff]  }
 0x3d3   : > { %8126 = vmatmul.mubr.bf16.gmra.mrb[92].mxu0 %v13949_v42  ;;  %7076 = vmatprep.mubr.bf16.mxu1 %v13954_v10  ;;  %v6322_v42 = vpop.f32.mrb[247].mxu0  ;;  %v6834_v10 = vpop.f32.mrb[247].mxu1 }
 0x3d4   : > { %8133 = vmatprep.mubr.bf16.mxu0 %v13957_v11  ;;  %v16511_v11 = vpop.f32.mrb[248].mxu0  ;;  %v16513_v59 = vpop.f32.mrb[248].mxu1  ;;  %v13966_v42 = vld [vmem:[%s14921_s14 + $0x4ec] ss:$24 sps:$4 sm:$0xff]  }
 0x3d5   : > { %18767 = vst [vmem:[#allocation213_spill] sm:$0xff] %v16511_v11  ;;  %18768 = vst [vmem:[#allocation214_spill] sm:$0xff] %v16513_v59  ;;  %v6327_v33 = vpop.f32.mrb[249].mxu0  ;;  %v6839_v17 = vpop.f32.mrb[249].mxu1  ;;  %v13964_v59 = vld [vmem:[%s14921_s14 + $0x4e8] ss:$24 sps:$4 sm:$0xff]  }
 0x3d6   : > { %v16517_v30 = vpop.f32.mrb[250].mxu0  ;;  %v16519_v26 = vpop.f32.mrb[250].mxu1 }
 0x3d7   : > { %18769 = vst [vmem:[#allocation215_spill] sm:$0xff] %v16517_v30  ;;  %18770 = vst [vmem:[#allocation216_spill] sm:$0xff] %v16519_v26  ;;  %v13967_v30 = vld [vmem:[%s14921_s14 + $0x4f0] ss:$24 sps:$4 sm:$0xff]  }
 0x3da   : > { %7077 = vmatmul.mubr.bf16.gmra.mrb[96].mxu1 %v13952_v56  ;;  %v13969_v56 = vld [vmem:[%s14921_s14 + $0x4f4] ss:$24 sps:$4 sm:$0xff]  }
 0x3db   : > { %8134 = vmatmul.mubr.bf16.gmra.mrb[96].mxu0 %v13955_v54  ;;  %7084 = vmatprep.mubr.bf16.mxu1 %v13960_v51  ;;  %v6330_v54 = vpop.f32.mrb[251].mxu0  ;;  %v6842_v51 = vpop.f32.mrb[251].mxu1 }
 0x3dc   : > { %8141 = vmatprep.mubr.bf16.mxu0 %v13963_v8  ;;  %v16523_v8 = vpop.f32.mrb[252].mxu0  ;;  %v16525_v10 = vpop.f32.mrb[252].mxu1  ;;  %v13972_v54 = vld [vmem:[%s14921_s14 + $0x51c] ss:$24 sps:$4 sm:$0xff]  }
 0x3dd   : > { %18771 = vst [vmem:[#allocation217_spill] sm:$0xff] %v16523_v8  ;;  %18772 = vst [vmem:[#allocation218_spill] sm:$0xff] %v16525_v10  ;;  %v6335_v33 = vpop.f32.mrb[253].mxu0  ;;  %v6847_v17 = vpop.f32.mrb[253].mxu1  ;;  %v13975_v51 = vld [vmem:[%s14921_s14 + $0x524] ss:$24 sps:$4 sm:$0xff]  }
 0x3de   : > { %v16529_v26 = vpop.f32.mrb[254].mxu0  ;;  %v16531_v11 = vpop.f32.mrb[254].mxu1  ;;  %v13970_v33 = vld [vmem:[%s14921_s14 + $0x518] ss:$24 sps:$4 sm:$0xff]   ;;  %v547_v10 = vld [vmem:[#allocation2] sm:$0xff] }
 0x3df   : > { %18773 = vst [vmem:[#allocation219_spill] sm:$0xff] %v16529_v26  ;;  %18774 = vst [vmem:[#allocation220_spill] sm:$0xff] %v16531_v11  ;;  %v13973_v8 = vld [vmem:[%s14921_s14 + $0x520] ss:$24 sps:$4 sm:$0xff]  }
 0x3e2   : > { %7085 = vmatmul.mubr.bf16.gmra.mrb[100].mxu1 %v13958_v44  ;;  %v6338_v44 = vpop.f32.mrb[255].mxu0 }
 0x3e3   : > { %8142 = vmatmul.mubr.bf16.gmra.mrb[100].mxu0 %v13961_v5  ;;  %7092 = vmatprep.mubr.bf16.mxu1 %v13966_v42  ;;  %v6850_v5 = vpop.f32.mrb[255].mxu1  ;;  %v13978_v44 = vld [vmem:[%s14921_s14 + $0x54c] ss:$24 sps:$4 sm:$0xff]  }
 0x3e4   : > { %8149 = vmatprep.mubr.bf16.mxu0 %v13969_v56  ;;  %v6886_v42 = vpop.f32.mrb[0].mxu1  ;;  %v7943_v56 = vpop.f32.mrb[0].mxu0 }
 0x3e5   : > { %v6887_v17 = vadd.f32 %v6886_v42, %v15213_v25  ;;  %v6888_v26 = vpop.f32.mrb[1].mxu1  ;;  %v7945_v11 = vpop.f32.mrb[1].mxu0  ;;  %v13976_v42 = vld [vmem:[%s14921_s14 + $0x548] ss:$24 sps:$4 sm:$0xff]  }
 0x3e6   : > { %v6889_v38 = vpop.f32.mrb[2].mxu1  ;;  %v7946_v2 = vpop.f32.mrb[2].mxu0 }
 0x3e7   : > { %v7944_v5 = vadd.f32 %v7943_v56, %v6887_v17 }
 0x3e9   : > { %v8966_v3 = vadd.f32 %v7944_v5, %v547_v10 }
 0x3ea   : > { %7093 = vmatmul.mubr.bf16.gmra.mrb[104].mxu1 %v13964_v59  ;;  %v6891_v59 = vpop.f32.mrb[3].mxu1 }
 0x3eb   : > { %8150 = vmatmul.mubr.bf16.gmra.mrb[104].mxu0 %v13967_v30  ;;  %7100 = vmatprep.mubr.bf16.mxu1 %v13972_v54  ;;  %v6890_v30 = vadd.f32 %v6889_v38, %v15217_v29  ;;  %v7948_v54 = vpop.f32.mrb[3].mxu0  ;;  %9223 = vst.msk [vmem:[#allocation2] sm:$0xff] %vm290_vm0, %v8966_v3  ;;  %v6894_v26 = vpop.f32.mrb[4].mxu1  ;;  %v13984_v3 = vld [vmem:[%s14921_s14 + $0x57c] ss:$24 sps:$4 sm:$0xff]  }
 0x3ec   : > { %8157 = vmatprep.mubr.bf16.mxu0 %v13975_v51  ;;  %v548_v51 = vld [vmem:[#allocation2 + $0x8] sm:$0xff]  ;;  %v7951_v11 = vpop.f32.mrb[4].mxu0  ;;  %v6895_v29 = vadd.f32 %v6894_v26, %v15225_v37  ;;  %v6896_v38 = vpop.f32.mrb[5].mxu1  ;;  %v550_v59 = vld [vmem:[#allocation2 + $0x18] sm:$0xff] }
 0x3ed   : > { %v7947_v13 = vadd.f32 %v7946_v2, %v6890_v30  ;;  %v549_v2 = vld [vmem:[#allocation2 + $0x10] sm:$0xff]  ;;  %v6897_v10 = vpop.f32.mrb[6].mxu1  ;;  %v16554_v30 = vld [vmem:[#allocation5] ss:$0 sm:$0xff] }
 0x3ee   : > { %v6898_v17 = vadd.f32 %v6897_v10, %v15229_v41  ;;  %v551_v10 = vld [vmem:[#allocation2 + $0x20] sm:$0xff] }
 0x3ef   : > { %v8967_v25 = vadd.f32 %v7947_v13, %v548_v51  ;;  %v13987_v13 = vld [vmem:[%s14921_s14 + $0x584] ss:$24 sps:$4 sm:$0xff]  }
 0x3f1   : > { %9224 = vst.msk [vmem:[#allocation2 + $0x8] sm:$0xff] %vm290_vm0, %v8967_v25  ;;  %v16560_v25 = vld [vmem:[#allocation7] ss:$0 sm:$0xff] }
 0x3f2   : > { %7101 = vmatmul.mubr.bf16.gmra.mrb[108].mxu1 %v13970_v33  ;;  %v7952_v33 = vadd.f32 %v7951_v11, %v6895_v29  ;;  %v9482_v51 = vld [vmem:[#allocation2] sm:$0xff] }
 0x3f3   : > { %8158 = vmatmul.mubr.bf16.gmra.mrb[108].mxu0 %v13973_v8  ;;  %7108 = vmatprep.mubr.bf16.mxu1 %v13978_v44  ;;  %v7953_v8 = vpop.f32.mrb[5].mxu0  ;;  %v6899_v44 = vpop.f32.mrb[7].mxu1  ;;  %v9745_v41 = vmul.f32 %v16554_v30, %v9482_v51 }
 0x3f4   : > { %8165 = vmatprep.mubr.bf16.mxu0 %v13981_v1  ;;  %v13979_v1 = vld [vmem:[%s14921_s14 + $0x550] ss:$24 sps:$4 sm:$0xff]   ;;  %v7954_v56 = vpop.f32.mrb[6].mxu0  ;;  %v8968_v37 = vadd.f32 %v7952_v33, %v549_v2  ;;  %v6902_v29 = vpop.f32.mrb[8].mxu1  ;;  %v13990_v44 = vld [vmem:[%s14921_s14 + $0x5ac] ss:$24 sps:$4 sm:$0xff]  }
 0x3f5   : > { %v7956_v5 = vpop.f32.mrb[7].mxu0  ;;  %v7955_v54 = vadd.f32 %v7954_v56, %v6898_v17  ;;  %v13982_v2 = vld [vmem:[%s14921_s14 + $0x578] ss:$24 sps:$4 sm:$0xff]   ;;  %v6904_v56 = vpop.f32.mrb[9].mxu1 }
 0x3f6   : > { %9225 = vst.msk [vmem:[#allocation2 + $0x10] sm:$0xff] %vm290_vm0, %v8968_v37  ;;  %v7959_v38 = vpop.f32.mrb[8].mxu0  ;;  %v6905_v33 = vpop.f32.mrb[10].mxu1  ;;  %v13993_v5 = vld [vmem:[%s14921_s14 + $0x5b4] ss:$24 sps:$4 sm:$0xff]  }
 0x3f7   : > { %v8969_v26 = vadd.f32 %v7955_v54, %v550_v59  ;;  %v6906_v51 = vadd.f32 %v6905_v33, %v15248_v55 }
 0x3f8   : > { %v9483_v11 = vld [vmem:[#allocation2 + $0x8] sm:$0xff] }
 0x3f9   : > { %v9746_v8 = vmul.f32 %v16554_v30, %v9483_v11  ;;  %9226 = vst.msk [vmem:[#allocation2 + $0x18] sm:$0xff] %vm290_vm0, %v8969_v26 }
 0x3fa   : > { %7109 = vmatmul.mubr.bf16.gmra.mrb[112].mxu1 %v13976_v42  ;;  %v10008_v42 = vadd.f32 %v16560_v25, %v9745_v41  ;;  %v6907_v41 = vpop.f32.mrb[11].mxu1 }
 0x3fb   : > { %8166 = vmatmul.mubr.bf16.gmra.mrb[112].mxu0 %v13979_v1  ;;  %7116 = vmatprep.mubr.bf16.mxu1 %v13984_v3  ;;  %v6903_v1 = vadd.f32 %v6902_v29, %v15240_v50  ;;  %v7961_v3 = vpop.f32.mrb[9].mxu0  ;;  %v10009_v37 = vadd.f32 %v16560_v25, %v9746_v8  ;;  %v552_v50 = vld [vmem:[#allocation2 + $0x28] sm:$0xff] }
 0x3fc   : > { %8173 = vmatprep.mubr.bf16.mxu0 %v13987_v13  ;;  %v13985_v13 = vld [vmem:[%s14921_s14 + $0x580] ss:$24 sps:$4 sm:$0xff]   ;;  %v7962_v17 = vpop.f32.mrb[10].mxu0  ;;  %v10264_v59 = vmax.f32 %v10008_v42, 0.0 }
 0x3fd   : > { %v7960_v54 = vadd.f32 %v7959_v38, %v6903_v1  ;;  %v7964_v11 = vpop.f32.mrb[11].mxu0  ;;  %v10265_v29 = vmax.f32 %v10009_v37, 0.0  ;;  %v7963_v42 = vadd.f32 %v7962_v17, %v6906_v51  ;;  %v9484_v38 = vld [vmem:[#allocation2 + $0x10] sm:$0xff]  ;;  %v13988_v17 = vld [vmem:[%s14921_s14 + $0x5a8] ss:$24 sps:$4 sm:$0xff]  }
 0x3fe   : > { %v13005_v26 = vpack.c.bf16 %v10264_v59, %v10264_v59  ;;  %v9747_v8 = vmul.f32 %v16554_v30, %v9484_v38  ;;  %v7967_v33 = vpop.f32.mrb[12].mxu0  ;;  %v13996_v11 = vld [vmem:[%s14921_s14 + $0x5dc] ss:$24 sps:$4 sm:$0xff]  }
 0x3ff   : > { %v8970_v56 = vadd.f32 %v7960_v54, %v551_v10  ;;  %v13006_v55 = vpack.c.bf16 %v10265_v29, %v10265_v29  ;;  %v8971_v1 = vadd.f32 %v7963_v42, %v552_v50  ;;  %v6910_v10 = vpop.f32.mrb[12].mxu1  ;;  %v7969_v37 = vpop.f32.mrb[13].mxu0  ;;  %v13991_v54 = vld [vmem:[%s14921_s14 + $0x5b0] ss:$24 sps:$4 sm:$0xff]   ;;  %v13999_v50 = vld [vmem:[%s14921_s14 + $0x5e4] ss:$24 sps:$4 sm:$0xff]  }
 0x400   : > { %11545 = vst.msk [vmem:[%s16578_s15] sm:$0xf] %vm11544_vm1, %v13005_v26  ;;  %v9485_v3 = vld [vmem:[#allocation2 + $0x18] sm:$0xff]  ;;  %v6912_v59 = vpop.f32.mrb[13].mxu1  ;;  %v7970_v41 = vpop.f32.mrb[14].mxu0 }
 0x401   : > { %9227 = vst.msk [vmem:[#allocation2 + $0x20] sm:$0xff] %vm290_vm0, %v8970_v56  ;;  %9228 = vst.msk [vmem:[#allocation2 + $0x28] sm:$0xff] %vm290_vm0, %v8971_v1  ;;  %v6913_v51 = vpop.f32.mrb[14].mxu1  ;;  %v13994_v37 = vld [vmem:[%s14921_s14 + $0x5d8] ss:$24 sps:$4 sm:$0xff]  }
 0x402   : > { %7117 = vmatmul.mubr.bf16.gmra.mrb[116].mxu1 %v13982_v2  ;;  %11546 = vst.msk [vmem:[%s16578_s15 + $0x4] sm:$0xf] %vm11544_vm1, %v13006_v55  ;;  %v10010_v2 = vadd.f32 %v16560_v25, %v9747_v8  ;;  %v6914_v42 = vadd.f32 %v6913_v51, %v15261_v4  ;;  %v6915_v38 = vpop.f32.mrb[15].mxu1  ;;  %v7972_v55 = vpop.f32.mrb[15].mxu0  ;;  %v554_v8 = vld [vmem:[#allocation2 + $0x38] sm:$0xff] }
 0x403   : > { %8174 = vmatmul.mubr.bf16.gmra.mrb[116].mxu0 %v13985_v13  ;;  %7124 = vmatprep.mubr.bf16.mxu1 %v13990_v44  ;;  %v9748_v13 = vmul.f32 %v16554_v30, %v9485_v3  ;;  %v6911_v44 = vadd.f32 %v6910_v10, %v15257_v63  ;;  %v14005_v38 = vld [vmem:[%s14921_s14 + $0x614] ss:$24 sps:$4 sm:$0xff]  }
 0x404   : > { %8181 = vmatprep.mubr.bf16.mxu0 %v13993_v5  ;;  %v553_v5 = vld [vmem:[#allocation2 + $0x30] sm:$0xff]  ;;  %v10266_v26 = vmax.f32 %v10010_v2, 0.0  ;;  %v7971_v10 = vadd.f32 %v7970_v41, %v6914_v42  ;;  %v555_v41 = vld [vmem:[#allocation2 + $0x40] sm:$0xff] }
 0x405   : > { %v10011_v29 = vadd.f32 %v16560_v25, %v9748_v13  ;;  %v7968_v56 = vadd.f32 %v7967_v33, %v6911_v44  ;;  %v6918_v44 = vpop.f32.mrb[16].mxu1  ;;  %v14002_v42 = vld [vmem:[%s14921_s14 + $0x60c] ss:$24 sps:$4 sm:$0xff]  }
 0x406   : > { %v13007_v1 = vpack.c.bf16 %v10266_v26, %v10266_v26  ;;  %v8973_v33 = vadd.f32 %v7971_v10, %v554_v8  ;;  %v6919_v51 = vadd.f32 %v6918_v44, %v15269_v12  ;;  %v13997_v26 = vld [vmem:[%s14921_s14 + $0x5e0] ss:$24 sps:$4 sm:$0xff]  }
 0x407   : > { %v10267_v63 = vmax.f32 %v10011_v29, 0.0  ;;  %v8972_v3 = vadd.f32 %v7968_v56, %v553_v5  ;;  %v7975_v5 = vpop.f32.mrb[16].mxu0 }
 0x408   : > { %v9486_v59 = vld [vmem:[#allocation2 + $0x20] sm:$0xff]  ;;  %11547 = vst.msk [vmem:[%s16578_s15 + $0x8] sm:$0xf] %vm11544_vm1, %v13007_v1  ;;  %v9487_v13 = vld [vmem:[#allocation2 + $0x28] sm:$0xff]  ;;  %v7976_v1 = vadd.f32 %v7975_v5, %v6919_v51 }
 0x409   : > { %v13008_v2 = vpack.c.bf16 %v10267_v63, %v10267_v63  ;;  %v9749_v4 = vmul.f32 %v16554_v30, %v9486_v59  ;;  %9229 = vst.msk [vmem:[#allocation2 + $0x30] sm:$0xff] %vm290_vm0, %v8972_v3  ;;  %9230 = vst.msk [vmem:[#allocation2 + $0x38] sm:$0xff] %vm290_vm0, %v8973_v33  ;;  %v556_v59 = vld [vmem:[#allocation2 + $0x48] sm:$0xff] }
 0x40a   : > { %7125 = vmatmul.mubr.bf16.gmra.mrb[120].mxu1 %v13988_v17 }
 0x40b   : > { %8182 = vmatmul.mubr.bf16.gmra.mrb[120].mxu0 %v13991_v54  ;;  %7132 = vmatprep.mubr.bf16.mxu1 %v13996_v11  ;;  %11548 = vst.msk [vmem:[%s16578_s15 + $0xc] sm:$0xf] %vm11544_vm1, %v13008_v2  ;;  %v10012_v17 = vadd.f32 %v16560_v25, %v9749_v4  ;;  %v9750_v54 = vmul.f32 %v16554_v30, %v9487_v13  ;;  %v6920_v11 = vpop.f32.mrb[17].mxu1 }
 0x40c   : > { %8189 = vmatprep.mubr.bf16.mxu0 %v13999_v50  ;;  %v7977_v50 = vpop.f32.mrb[17].mxu0  ;;  %v6921_v29 = vpop.f32.mrb[18].mxu1  ;;  %v8974_v4 = vadd.f32 %v7976_v1, %v555_v41  ;;  %v14000_v41 = vld [vmem:[%s14921_s14 + $0x608] ss:$24 sps:$4 sm:$0xff]   ;;  %v14011_v1 = vld [vmem:[%s14921_s14 + $0x644] ss:$24 sps:$4 sm:$0xff]  }
 0x40d   : > { %v7978_v56 = vpop.f32.mrb[18].mxu0  ;;  %v10268_v55 = vmax.f32 %v10012_v17, 0.0  ;;  %v10013_v8 = vadd.f32 %v16560_v25, %v9750_v54  ;;  %v6922_v63 = vadd.f32 %v6921_v29, %v15273_v16  ;;  %v6923_v3 = vpop.f32.mrb[19].mxu1 }
 0x40e   : > { %v7980_v10 = vpop.f32.mrb[19].mxu0  ;;  %9231 = vst.msk [vmem:[#allocation2 + $0x40] sm:$0xff] %vm290_vm0, %v8974_v4  ;;  %v6926_v54 = vpop.f32.mrb[20].mxu1  ;;  %v558_v4 = vld [vmem:[#allocation2 + $0x58] sm:$0xff] }
 0x40f   : > { %v13009_v2 = vpack.c.bf16 %v10268_v55, %v10268_v55  ;;  %v10269_v12 = vmax.f32 %v10013_v8, 0.0  ;;  %v7979_v33 = vadd.f32 %v7978_v56, %v6922_v63  ;;  %v7983_v51 = vpop.f32.mrb[20].mxu0  ;;  %v6927_v50 = vadd.f32 %v6926_v54, %v15281_v24  ;;  %v6928_v29 = vpop.f32.mrb[21].mxu1  ;;  %v14008_v8 = vld [vmem:[%s14921_s14 + $0x63c] ss:$24 sps:$4 sm:$0xff]  }
 0x410   : > { %v9488_v13 = vld [vmem:[#allocation2 + $0x30] sm:$0xff]  ;;  %v9489_v17 = vld [vmem:[#allocation2 + $0x38] sm:$0xff]  ;;  %v7985_v56 = vpop.f32.mrb[21].mxu0  ;;  %v559_v29 = vld [vmem:[#allocation2 + $0x60] sm:$0xff] }
 0x411   : > { %11549 = vst.msk [vmem:[%s16578_s15 + $0x10] sm:$0xf] %vm11544_vm1, %v13009_v2  ;;  %v13010_v44 = vpack.c.bf16 %v10269_v12, %v10269_v12  ;;  %v9751_v16 = vmul.f32 %v16554_v30, %v9488_v13  ;;  %v8975_v5 = vadd.f32 %v7979_v33, %v556_v59  ;;  %v9752_v11 = vmul.f32 %v16554_v30, %v9489_v17  ;;  %v7986_v55 = vpop.f32.mrb[22].mxu0 }
 0x412   : > { %7133 = vmatmul.mubr.bf16.gmra.mrb[124].mxu1 %v13994_v37  ;;  %v7984_v10 = vadd.f32 %v7983_v51, %v6927_v50  ;;  %v7988_v12 = vpop.f32.mrb[23].mxu0 }
 0x413   : > { %8190 = vmatmul.mubr.bf16.gmra.mrb[124].mxu0 %v13997_v26  ;;  %7140 = vmatprep.mubr.bf16.mxu1 %v14002_v42  ;;  %11550 = vst.msk [vmem:[%s16578_s15 + $0x14] sm:$0xf] %vm11544_vm1, %v13010_v44  ;;  %v10014_v37 = vadd.f32 %v16560_v25, %v9751_v16  ;;  %v557_v26 = vld [vmem:[#allocation2 + $0x50] sm:$0xff]  ;;  %v10015_v3 = vadd.f32 %v16560_v25, %v9752_v11 }
 0x414   : > { %8197 = vmatprep.mubr.bf16.mxu0 %v14005_v38  ;;  %9232 = vst.msk [vmem:[#allocation2 + $0x48] sm:$0xff] %vm290_vm0, %v8975_v5  ;;  %v14003_v42 = vld [vmem:[%s14921_s14 + $0x610] ss:$24 sps:$4 sm:$0xff]   ;;  %v6929_v38 = vpop.f32.mrb[22].mxu1  ;;  %v8976_v13 = vadd.f32 %v7984_v10, %v557_v26 }
 0x415   : > { %v10270_v63 = vmax.f32 %v10014_v37, 0.0  ;;  %v6930_v59 = vadd.f32 %v6929_v38, %v15285_v32  ;;  %v6931_v2 = vpop.f32.mrb[23].mxu1  ;;  %v10271_v24 = vmax.f32 %v10015_v3, 0.0  ;;  %v9490_v16 = vld [vmem:[#allocation2 + $0x40] sm:$0xff]  ;;  %v7991_v37 = vpop.f32.mrb[24].mxu0 }
 0x416   : > { %v9753_v32 = vmul.f32 %v16554_v30, %v9490_v16  ;;  %9233 = vst.msk [vmem:[#allocation2 + $0x50] sm:$0xff] %vm290_vm0, %v8976_v13  ;;  %v6934_v51 = vpop.f32.mrb[24].mxu1  ;;  %v14006_v11 = vld [vmem:[%s14921_s14 + $0x638] ss:$24 sps:$4 sm:$0xff]  }
 0x417   : > { %v13011_v33 = vpack.c.bf16 %v10270_v63, %v10270_v63  ;;  %v7987_v44 = vadd.f32 %v7986_v55, %v6930_v59  ;;  %v13012_v5 = vpack.c.bf16 %v10271_v24, %v10271_v24  ;;  %v6935_v26 = vadd.f32 %v6934_v51, %v15296_v45  ;;  %v6936_v56 = vpop.f32.mrb[25].mxu1  ;;  %v14009_v38 = vld [vmem:[%s14921_s14 + $0x640] ss:$24 sps:$4 sm:$0xff]   ;;  %v14017_v63 = vld [vmem:[%s14921_s14 + $0x674] ss:$24 sps:$4 sm:$0xff]  }
 0x418   : > { %v6937_v55 = vpop.f32.mrb[26].mxu1 }
 0x419   : > { %11551 = vst.msk [vmem:[%s16578_s15 + $0x18] sm:$0xf] %vm11544_vm1, %v13011_v33  ;;  %v8977_v17 = vadd.f32 %v7987_v44, %v558_v4  ;;  %11552 = vst.msk [vmem:[%s16578_s15 + $0x1c] sm:$0xf] %vm11544_vm1, %v13012_v5  ;;  %v7992_v59 = vadd.f32 %v7991_v37, %v6935_v26  ;;  %v6938_v2 = vadd.f32 %v6937_v55, %v15304_v52  ;;  %v6939_v12 = vpop.f32.mrb[27].mxu1  ;;  %v560_v33 = vld [vmem:[#allocation2 + $0x68] sm:$0xff] }
 0x41a   : > { %7141 = vmatmul.mubr.bf16.gmra.mrb[128].mxu1 %v14000_v41  ;;  %v10016_v41 = vadd.f32 %v16560_v25, %v9753_v32  ;;  %v14012_v37 = vld [vmem:[%s14921_s14 + $0x668] ss:$24 sps:$4 sm:$0xff]   ;;  %v561_v26 = vld [vmem:[#allocation2 + $0x70] sm:$0xff] }
 0x41b   : > { %8198 = vmatmul.mubr.bf16.gmra.mrb[128].mxu0 %v14003_v42  ;;  %7148 = vmatprep.mubr.bf16.mxu1 %v14008_v8  ;;  %v9491_v54 = vld [vmem:[#allocation2 + $0x48] sm:$0xff]  ;;  %9234 = vst.msk [vmem:[#allocation2 + $0x58] sm:$0xff] %vm290_vm0, %v8977_v17  ;;  %v7993_v42 = vpop.f32.mrb[25].mxu0  ;;  %v8978_v13 = vadd.f32 %v7992_v59, %v559_v29 }
 0x41c   : > { %8205 = vmatprep.mubr.bf16.mxu0 %v14011_v1  ;;  %v9754_v50 = vmul.f32 %v16554_v30, %v9491_v54  ;;  %v7994_v8 = vpop.f32.mrb[26].mxu0  ;;  %v14014_v1 = vld [vmem:[%s14921_s14 + $0x66c] ss:$24 sps:$4 sm:$0xff]   ;;  %v10272_v3 = vmax.f32 %v10016_v41, 0.0  ;;  %v6942_v54 = vpop.f32.mrb[28].mxu1 }
 0x41d   : > { %v7996_v4 = vpop.f32.mrb[27].mxu0  ;;  %v7995_v44 = vadd.f32 %v7994_v8, %v6938_v2  ;;  %v9492_v16 = vld [vmem:[#allocation2 + $0x50] sm:$0xff]  ;;  %9235 = vst.msk [vmem:[#allocation2 + $0x60] sm:$0xff] %vm290_vm0, %v8978_v13  ;;  %v6944_v29 = vpop.f32.mrb[29].mxu1 }
 0x41e   : > { %v10017_v10 = vadd.f32 %v16560_v25, %v9754_v50  ;;  %v13013_v24 = vpack.c.bf16 %v10272_v3, %v10272_v3  ;;  %v9755_v52 = vmul.f32 %v16554_v30, %v9492_v16  ;;  %v7999_v51 = vpop.f32.mrb[28].mxu0  ;;  %v6943_v50 = vadd.f32 %v6942_v54, %v15313_v62  ;;  %v14015_v42 = vld [vmem:[%s14921_s14 + $0x670] ss:$24 sps:$4 sm:$0xff]   ;;  %v14020_v8 = vld [vmem:[%s14921_s14 + $0x69c] ss:$24 sps:$4 sm:$0xff]  }
 0x41f   : > { %v8979_v32 = vadd.f32 %v7995_v44, %v560_v33  ;;  %v8001_v56 = vpop.f32.mrb[29].mxu0  ;;  %v562_v4 = vld [vmem:[#allocation2 + $0x78] sm:$0xff] }
 0x420   : > { %v10273_v45 = vmax.f32 %v10017_v10, 0.0  ;;  %11553 = vst.msk [vmem:[%s16578_s15 + $0x20] sm:$0xf] %vm11544_vm1, %v13013_v24  ;;  %v8002_v55 = vpop.f32.mrb[30].mxu0  ;;  %v8000_v10 = vadd.f32 %v7999_v51, %v6943_v50 }
 0x421   : > { %9236 = vst.msk [vmem:[#allocation2 + $0x68] sm:$0xff] %vm290_vm0, %v8979_v32  ;;  %v8004_v12 = vpop.f32.mrb[31].mxu0 }
 0x422   : > { %7149 = vmatmul.mubr.bf16.gmra.mrb[132].mxu1 %v14006_v11  ;;  %v13014_v5 = vpack.c.bf16 %v10273_v45, %v10273_v45  ;;  %v9493_v17 = vld [vmem:[#allocation2 + $0x58] sm:$0xff]  ;;  %v10018_v11 = vadd.f32 %v16560_v25, %v9755_v52  ;;  %v8980_v24 = vadd.f32 %v8000_v10, %v561_v26  ;;  %v8007_v32 = vpop.f32.mrb[32].mxu0 }
 0x423   : > { %8206 = vmatmul.mubr.bf16.gmra.mrb[132].mxu0 %v14009_v38  ;;  %7156 = vmatprep.mubr.bf16.mxu1 %v14014_v1  ;;  %v9756_v41 = vmul.f32 %v16554_v30, %v9493_v17  ;;  %v6945_v38 = vpop.f32.mrb[30].mxu1  ;;  %v14023_v1 = vld [vmem:[%s14921_s14 + $0x6a4] ss:$24 sps:$4 sm:$0xff]   ;;  %v14018_v17 = vld [vmem:[%s14921_s14 + $0x698] ss:$24 sps:$4 sm:$0xff]   ;;  %v8009_v50 = vpop.f32.mrb[33].mxu0 }
 0x424   : > { %8213 = vmatprep.mubr.bf16.mxu0 %v14017_v63  ;;  %11554 = vst.msk [vmem:[%s16578_s15 + $0x24] sm:$0xf] %vm11544_vm1, %v13014_v5  ;;  %v10274_v63 = vmax.f32 %v10018_v11, 0.0  ;;  %v6946_v59 = vadd.f32 %v6945_v38, %v15317_v7  ;;  %v6947_v2 = vpop.f32.mrb[31].mxu1  ;;  %v9494_v13 = vld [vmem:[#allocation2 + $0x60] sm:$0xff]  ;;  %v8010_v56 = vpop.f32.mrb[34].mxu0 }
 0x425   : > { %v10019_v3 = vadd.f32 %v16560_v25, %v9756_v41  ;;  %v9757_v7 = vmul.f32 %v16554_v30, %v9494_v13  ;;  %9237 = vst.msk [vmem:[#allocation2 + $0x70] sm:$0xff] %vm290_vm0, %v8980_v24  ;;  %v6950_v52 = vpop.f32.mrb[32].mxu1  ;;  %v563_v11 = vld [vmem:[#allocation2 + $0x80] sm:$0xff]  ;;  %v14029_v38 = vld [vmem:[%s14921_s14 + $0x6d4] ss:$24 sps:$4 sm:$0xff]   ;;  %v8012_v10 = vpop.f32.mrb[35].mxu0 }
 0x426   : > { %v13015_v33 = vpack.c.bf16 %v10274_v63, %v10274_v63  ;;  %v8003_v45 = vadd.f32 %v8002_v55, %v6946_v59  ;;  %v6952_v41 = vpop.f32.mrb[33].mxu1  ;;  %v14021_v26 = vld [vmem:[%s14921_s14 + $0x6a0] ss:$24 sps:$4 sm:$0xff]   ;;  %v564_v59 = vld [vmem:[#allocation2 + $0x88] sm:$0xff]  ;;  %v14035_v50 = vld [vmem:[%s14921_s14 + $0x704] ss:$24 sps:$4 sm:$0xff]  }
 0x427   : > { %v10275_v62 = vmax.f32 %v10019_v3, 0.0  ;;  %v10020_v54 = vadd.f32 %v16560_v25, %v9757_v7  ;;  %v6953_v29 = vpop.f32.mrb[34].mxu1  ;;  %v14024_v7 = vld [vmem:[%s14921_s14 + $0x6c8] ss:$24 sps:$4 sm:$0xff]   ;;  %v14032_v41 = vld [vmem:[%s14921_s14 + $0x6fc] ss:$24 sps:$4 sm:$0xff]  }
 0x428   : > { %11555 = vst.msk [vmem:[%s16578_s15 + $0x28] sm:$0xf] %vm11544_vm1, %v13015_v33  ;;  %v8981_v16 = vadd.f32 %v8003_v45, %v562_v4  ;;  %v9495_v5 = vld [vmem:[#allocation2 + $0x68] sm:$0xff]  ;;  %v6954_v63 = vadd.f32 %v6953_v29, %v15329_v23  ;;  %v6955_v3 = vpop.f32.mrb[35].mxu1 }
 0x429   : > { %v13016_v44 = vpack.c.bf16 %v10275_v62, %v10275_v62  ;;  %v9758_v51 = vmul.f32 %v16554_v30, %v9495_v5  ;;  %v10276_v55 = vmax.f32 %v10020_v54, 0.0  ;;  %v6958_v13 = vpop.f32.mrb[36].mxu1 }
 0x42a   : > { %7157 = vmatmul.mubr.bf16.gmra.mrb[136].mxu1 %v14012_v37  ;;  %9238 = vst.msk [vmem:[#allocation2 + $0x78] sm:$0xff] %vm290_vm0, %v8981_v16  ;;  %v6951_v37 = vadd.f32 %v6950_v52, %v15325_v19  ;;  %v8011_v4 = vadd.f32 %v8010_v56, %v6954_v63  ;;  %v6959_v52 = vadd.f32 %v6958_v13, %v15337_v43 }
 0x42b   : > { %8214 = vmatmul.mubr.bf16.gmra.mrb[136].mxu0 %v14015_v42  ;;  %7164 = vmatprep.mubr.bf16.mxu1 %v14020_v8  ;;  %11556 = vst.msk [vmem:[%s16578_s15 + $0x2c] sm:$0xf] %vm11544_vm1, %v13016_v44  ;;  %v14026_v42 = vld [vmem:[%s14921_s14 + $0x6cc] ss:$24 sps:$4 sm:$0xff]   ;;  %v10021_v8 = vadd.f32 %v16560_v25, %v9758_v51  ;;  %v13017_v2 = vpack.c.bf16 %v10276_v55, %v10276_v55  ;;  %v8015_v44 = vpop.f32.mrb[36].mxu0 }
 0x42c   : > { %8221 = vmatprep.mubr.bf16.mxu0 %v14023_v1  ;;  %v8008_v1 = vadd.f32 %v8007_v32, %v6951_v37  ;;  %v9496_v33 = vld [vmem:[#allocation2 + $0x70] sm:$0xff]  ;;  %v8983_v24 = vadd.f32 %v8011_v4, %v564_v59  ;;  %v8017_v54 = vpop.f32.mrb[37].mxu0  ;;  %v8016_v56 = vadd.f32 %v8015_v44, %v6959_v52  ;;  %v14038_v52 = vld [vmem:[%s14921_s14 + $0x72c] ss:$24 sps:$4 sm:$0xff]  }
 0x42d   : > { %v10277_v19 = vmax.f32 %v10021_v8, 0.0  ;;  %11557 = vst.msk [vmem:[%s16578_s15 + $0x30] sm:$0xf] %vm11544_vm1, %v13017_v2  ;;  %v9759_v23 = vmul.f32 %v16554_v30, %v9496_v33  ;;  %v565_v32 = vld [vmem:[#allocation2 + $0x90] sm:$0xff]  ;;  %v566_v8 = vld [vmem:[#allocation2 + $0x98] sm:$0xff] }
 0x42e   : > { %v8982_v12 = vadd.f32 %v8008_v1, %v563_v11  ;;  %9240 = vst.msk [vmem:[#allocation2 + $0x88] sm:$0xff] %vm290_vm0, %v8983_v24  ;;  %v14027_v51 = vld [vmem:[%s14921_s14 + $0x6d0] ss:$24 sps:$4 sm:$0xff]   ;;  %v8018_v11 = vpop.f32.mrb[38].mxu0  ;;  %v8984_v63 = vadd.f32 %v8016_v56, %v565_v32  ;;  %v14041_v32 = vld [vmem:[%s14921_s14 + $0x734] ss:$24 sps:$4 sm:$0xff]  }
 0x42f   : > { %v13018_v62 = vpack.c.bf16 %v10277_v19, %v10277_v19  ;;  %v10022_v16 = vadd.f32 %v16560_v25, %v9759_v23  ;;  %v8020_v55 = vpop.f32.mrb[39].mxu0  ;;  %v14030_v33 = vld [vmem:[%s14921_s14 + $0x6f8] ss:$24 sps:$4 sm:$0xff]  }
 0x430   : > { %9239 = vst.msk [vmem:[#allocation2 + $0x80] sm:$0xff] %vm290_vm0, %v8982_v12  ;;  %9241 = vst.msk [vmem:[#allocation2 + $0x90] sm:$0xff] %vm290_vm0, %v8984_v63  ;;  %v8023_v4 = vpop.f32.mrb[40].mxu0  ;;  %v14036_v63 = vld [vmem:[%s14921_s14 + $0x728] ss:$24 sps:$4 sm:$0xff]  }
 0x431   : > { %v9497_v45 = vld [vmem:[#allocation2 + $0x78] sm:$0xff]  ;;  %11558 = vst.msk [vmem:[%s16578_s15 + $0x34] sm:$0xf] %vm11544_vm1, %v13018_v62  ;;  %v8025_v44 = vpop.f32.mrb[41].mxu0 }
 0x432   : > { %7165 = vmatmul.mubr.bf16.gmra.mrb[140].mxu1 %v14018_v17  ;;  %v9760_v5 = vmul.f32 %v16554_v30, %v9497_v45  ;;  %v6960_v17 = vpop.f32.mrb[37].mxu1  ;;  %v567_v45 = vld [vmem:[#allocation2 + $0xa0] sm:$0xff] }
 0x433   : > { %8222 = vmatmul.mubr.bf16.gmra.mrb[140].mxu0 %v14021_v26  ;;  %7172 = vmatprep.mubr.bf16.mxu1 %v14026_v42  ;;  %v6961_v37 = vpop.f32.mrb[38].mxu1  ;;  %v10278_v26 = vmax.f32 %v10022_v16, 0.0 }
 0x434   : > { %8229 = vmatprep.mubr.bf16.mxu0 %v14029_v38  ;;  %v10023_v29 = vadd.f32 %v16560_v25, %v9760_v5  ;;  %v6962_v42 = vadd.f32 %v6961_v37, %v15341_v49  ;;  %v6963_v38 = vpop.f32.mrb[39].mxu1  ;;  %v8026_v5 = vpop.f32.mrb[42].mxu0 }
 0x435   : > { %v13019_v1 = vpack.c.bf16 %v10278_v26, %v10278_v26  ;;  %v9499_v19 = vld [vmem:[#allocation2 + $0x88] sm:$0xff]  ;;  %v6966_v12 = vpop.f32.mrb[40].mxu1 }
 0x436   : > { %v10279_v43 = vmax.f32 %v10023_v29, 0.0  ;;  %v8019_v3 = vadd.f32 %v8018_v11, %v6962_v42  ;;  %v9762_v23 = vmul.f32 %v16554_v30, %v9499_v19  ;;  %v6967_v24 = vadd.f32 %v6966_v12, %v15352_v9  ;;  %v6968_v13 = vpop.f32.mrb[41].mxu1  ;;  %v14039_v12 = vld [vmem:[%s14921_s14 + $0x730] ss:$24 sps:$4 sm:$0xff]  }
 0x437   : > { %v9498_v10 = vld [vmem:[#allocation2 + $0x80] sm:$0xff]  ;;  %11559 = vst.msk [vmem:[%s16578_s15 + $0x38] sm:$0xf] %vm11544_vm1, %v13019_v1  ;;  %v6969_v16 = vpop.f32.mrb[42].mxu1  ;;  %v9500_v42 = vld [vmem:[#allocation2 + $0x90] sm:$0xff] }
 0x438   : > { %v13020_v59 = vpack.c.bf16 %v10279_v43, %v10279_v43  ;;  %v9761_v49 = vmul.f32 %v16554_v30, %v9498_v10  ;;  %v8985_v2 = vadd.f32 %v8019_v3, %v566_v8  ;;  %v10025_v54 = vadd.f32 %v16560_v25, %v9762_v23  ;;  %v6971_v11 = vpop.f32.mrb[43].mxu1  ;;  %v14047_v23 = vld [vmem:[%s14921_s14 + $0x764] ss:$24 sps:$4 sm:$0xff]  }
 0x439   : > { %v6970_v37 = vadd.f32 %v6969_v16, %v15360_v18  ;;  %v9763_v18 = vmul.f32 %v16554_v30, %v9500_v42  ;;  %v6974_v1 = vpop.f32.mrb[44].mxu1  ;;  %v571_v42 = vld [vmem:[#allocation2 + $0xc0] sm:$0xff] }
 0x43a   : > { %7173 = vmatmul.mubr.bf16.gmra.mrb[144].mxu1 %v14024_v7  ;;  %11560 = vst.msk [vmem:[%s16578_s15 + $0x3c] sm:$0xf] %vm11544_vm1, %v13020_v59  ;;  %v10024_v62 = vadd.f32 %v16560_v25, %v9761_v49  ;;  %v14033_v7 = vld [vmem:[%s14921_s14 + $0x700] ss:$24 sps:$4 sm:$0xff]   ;;  %v10281_v9 = vmax.f32 %v10025_v54, 0.0  ;;  %v6975_v59 = vadd.f32 %v6974_v1, %v15369_v40  ;;  %v569_v49 = vld [vmem:[#allocation2 + $0xb0] sm:$0xff] }
 0x43b   : > { %8230 = vmatmul.mubr.bf16.gmra.mrb[144].mxu0 %v14027_v51  ;;  %7180 = vmatprep.mubr.bf16.mxu1 %v14032_v41  ;;  %9242 = vst.msk [vmem:[#allocation2 + $0x98] sm:$0xff] %vm290_vm0, %v8985_v2  ;;  %v8024_v51 = vadd.f32 %v8023_v4, %v6967_v24  ;;  %v8028_v41 = vpop.f32.mrb[43].mxu0  ;;  %v8027_v56 = vadd.f32 %v8026_v5, %v6970_v37  ;;  %v6976_v2 = vpop.f32.mrb[45].mxu1  ;;  %v570_v5 = vld [vmem:[#allocation2 + $0xb8] sm:$0xff] }
 0x43c   : > { %8237 = vmatprep.mubr.bf16.mxu0 %v14035_v50  ;;  %v10280_v17 = vmax.f32 %v10024_v62, 0.0  ;;  %v568_v50 = vld [vmem:[#allocation2 + $0xa8] sm:$0xff]  ;;  %v13022_v38 = vpack.c.bf16 %v10281_v9, %v10281_v9  ;;  %v8031_v43 = vpop.f32.mrb[44].mxu0  ;;  %v10026_v3 = vadd.f32 %v16560_v25, %v9763_v18  ;;  %v6977_v4 = vpop.f32.mrb[46].mxu1  ;;  %v14044_v62 = vld [vmem:[%s14921_s14 + $0x75c] ss:$24 sps:$4 sm:$0xff]  }
 0x43d   : > { %v8986_v29 = vadd.f32 %v8024_v51, %v567_v45  ;;  %v8987_v55 = vadd.f32 %v8027_v56, %v568_v50  ;;  %v8033_v19 = vpop.f32.mrb[45].mxu0  ;;  %v8032_v13 = vadd.f32 %v8031_v43, %v6975_v59  ;;  %v6978_v44 = vadd.f32 %v6977_v4, %v15373_v58  ;;  %v14050_v43 = vld [vmem:[%s14921_s14 + $0x78c] ss:$24 sps:$4 sm:$0xff]  }
 0x43e   : > { %v13021_v26 = vpack.c.bf16 %v10280_v17, %v10280_v17  ;;  %11562 = vst.msk [vmem:[%s16578_s15 + $0x44] sm:$0xf] %vm11544_vm1, %v13022_v38  ;;  %v10282_v24 = vmax.f32 %v10026_v3, 0.0 }
 0x43f   : > { %9243 = vst.msk [vmem:[#allocation2 + $0xa0] sm:$0xff] %vm290_vm0, %v8986_v29  ;;  %9244 = vst.msk [vmem:[#allocation2 + $0xa8] sm:$0xff] %vm290_vm0, %v8987_v55  ;;  %v14045_v55 = vld [vmem:[%s14921_s14 + $0x760] ss:$24 sps:$4 sm:$0xff]  }
 0x440   : > { %11561 = vst.msk [vmem:[%s16578_s15 + $0x40] sm:$0xf] %vm11544_vm1, %v13021_v26  ;;  %v14042_v26 = vld [vmem:[%s14921_s14 + $0x758] ss:$24 sps:$4 sm:$0xff]  }
 0x442   : > { %7181 = vmatmul.mubr.bf16.gmra.mrb[148].mxu1 %v14030_v33  ;;  %v9501_v8 = vld [vmem:[#allocation2 + $0x98] sm:$0xff]  ;;  %v8034_v33 = vpop.f32.mrb[46].mxu0 }
 0x443   : > { %8238 = vmatmul.mubr.bf16.gmra.mrb[148].mxu0 %v14033_v7  ;;  %7188 = vmatprep.mubr.bf16.mxu1 %v14038_v52  ;;  %v9764_v10 = vmul.f32 %v16554_v30, %v9501_v8  ;;  %v6979_v7 = vpop.f32.mrb[47].mxu1  ;;  %v8036_v16 = vpop.f32.mrb[47].mxu0  ;;  %v13023_v52 = vpack.c.bf16 %v10282_v24, %v10282_v24  ;;  %v8035_v17 = vadd.f32 %v8034_v33, %v6978_v44 }
 0x444   : > { %8245 = vmatprep.mubr.bf16.mxu0 %v14041_v32  ;;  %v8988_v32 = vadd.f32 %v8032_v13, %v569_v49  ;;  %v14048_v16 = vld [vmem:[%s14921_s14 + $0x788] ss:$24 sps:$4 sm:$0xff]  }
 0x445   : > { %v10027_v45 = vadd.f32 %v16560_v25, %v9764_v10  ;;  %11563 = vst.msk [vmem:[%s16578_s15 + $0x48] sm:$0xf] %vm11544_vm1, %v13023_v52  ;;  %v8989_v37 = vadd.f32 %v8035_v17, %v570_v5 }
 0x446   : > { %v9502_v54 = vld [vmem:[#allocation2 + $0xa0] sm:$0xff]  ;;  %9245 = vst.msk [vmem:[#allocation2 + $0xb0] sm:$0xff] %vm290_vm0, %v8988_v32  ;;  %v9503_v11 = vld [vmem:[#allocation2 + $0xa8] sm:$0xff]  ;;  %v573_v32 = vld [vmem:[#allocation2 + $0xd0] sm:$0xff] }
 0x447   : > { %v10283_v40 = vmax.f32 %v10027_v45, 0.0  ;;  %v9765_v58 = vmul.f32 %v16554_v30, %v9502_v54  ;;  %v9766_v29 = vmul.f32 %v16554_v30, %v9503_v11  ;;  %9246 = vst.msk [vmem:[#allocation2 + $0xb8] sm:$0xff] %vm290_vm0, %v8989_v37  ;;  %v14056_v11 = vld [vmem:[%s14921_s14 + $0x7bc] ss:$24 sps:$4 sm:$0xff]  }
 0x449   : > { %v13024_v51 = vpack.c.bf16 %v10283_v40, %v10283_v40  ;;  %v10028_v9 = vadd.f32 %v16560_v25, %v9765_v58  ;;  %v10029_v10 = vadd.f32 %v16560_v25, %v9766_v29 }
 0x44a   : > { %7189 = vmatmul.mubr.bf16.gmra.mrb[152].mxu1 %v14036_v63  ;;  %v14053_v63 = vld [vmem:[%s14921_s14 + $0x794] ss:$24 sps:$4 sm:$0xff]  }
 0x44b   : > { %8246 = vmatmul.mubr.bf16.gmra.mrb[152].mxu0 %v14039_v12  ;;  %7196 = vmatprep.mubr.bf16.mxu1 %v14044_v62  ;;  %11564 = vst.msk [vmem:[%s16578_s15 + $0x4c] sm:$0xf] %vm11544_vm1, %v13024_v51  ;;  %v10284_v3 = vmax.f32 %v10028_v9, 0.0  ;;  %v572_v12 = vld [vmem:[#allocation2 + $0xc8] sm:$0xff] }
 0x44c   : > { %8253 = vmatprep.mubr.bf16.mxu0 %v14047_v23  ;;  %v14051_v51 = vld [vmem:[%s14921_s14 + $0x790] ss:$24 sps:$4 sm:$0xff]  }
 0x44d   : > { %v6982_v41 = vpop.f32.mrb[48].mxu1  ;;  %v13025_v4 = vpack.c.bf16 %v10284_v3, %v10284_v3  ;;  %v9504_v23 = vld [vmem:[#allocation2 + $0xb0] sm:$0xff] }
 0x44e   : > { %v8039_v50 = vpop.f32.mrb[48].mxu0  ;;  %v6983_v56 = vadd.f32 %v6982_v41, %v15381_v15  ;;  %v6984_v38 = vpop.f32.mrb[49].mxu1  ;;  %v10285_v15 = vmax.f32 %v10029_v10, 0.0  ;;  %v9505_v13 = vld [vmem:[#allocation2 + $0xb8] sm:$0xff] }
 0x44f   : > { %v8041_v18 = vpop.f32.mrb[49].mxu0  ;;  %v6985_v8 = vpop.f32.mrb[50].mxu1  ;;  %11565 = vst.msk [vmem:[%s16578_s15 + $0x50] sm:$0xf] %vm11544_vm1, %v13025_v4  ;;  %v9768_v52 = vmul.f32 %v16554_v30, %v9505_v13  ;;  %v14059_v41 = vld [vmem:[%s14921_s14 + $0x7c4] ss:$24 sps:$4 sm:$0xff]  }
 0x450   : > { %v8042_v1 = vpop.f32.mrb[50].mxu0  ;;  %v8040_v59 = vadd.f32 %v8039_v50, %v6983_v56  ;;  %v6986_v49 = vadd.f32 %v6985_v8, %v15385_v35  ;;  %v6987_v2 = vpop.f32.mrb[51].mxu1  ;;  %v13026_v24 = vpack.c.bf16 %v10285_v15, %v10285_v15  ;;  %v9767_v35 = vmul.f32 %v16554_v30, %v9504_v23  ;;  %v574_v38 = vld [vmem:[#allocation2 + $0xd8] sm:$0xff]  ;;  %v575_v4 = vld [vmem:[#allocation2 + $0xe0] sm:$0xff] }
 0x451   : > { %v8044_v19 = vpop.f32.mrb[51].mxu0 }
 0x452   : > { %v8990_v33 = vadd.f32 %v8040_v59, %v571_v42  ;;  %v8043_v62 = vadd.f32 %v8042_v1, %v6986_v49  ;;  %7197 = vmatmul.mubr.bf16.gmra.mrb[156].mxu1 %v14042_v26  ;;  %11566 = vst.msk [vmem:[%s16578_s15 + $0x54] sm:$0xf] %vm11544_vm1, %v13026_v24  ;;  %v10030_v5 = vadd.f32 %v16560_v25, %v9767_v35  ;;  %v14054_v49 = vld [vmem:[%s14921_s14 + $0x7b8] ss:$24 sps:$4 sm:$0xff]   ;;  %v14062_v35 = vld [vmem:[%s14921_s14 + $0x7ec] ss:$24 sps:$4 sm:$0xff]  }
 0x453   : > { %8254 = vmatmul.mubr.bf16.gmra.mrb[156].mxu0 %v14045_v55  ;;  %7204 = vmatprep.mubr.bf16.mxu1 %v14050_v43  ;;  %v10031_v26 = vadd.f32 %v16560_v25, %v9768_v52 }
 0x454   : > { %8261 = vmatprep.mubr.bf16.mxu0 %v14053_v63  ;;  %9247 = vst.msk [vmem:[#allocation2 + $0xc0] sm:$0xff] %vm290_vm0, %v8990_v33  ;;  %v8991_v45 = vadd.f32 %v8043_v62, %v572_v12  ;;  %v10286_v50 = vmax.f32 %v10030_v5, 0.0  ;;  %v14057_v62 = vld [vmem:[%s14921_s14 + $0x7c0] ss:$24 sps:$4 sm:$0xff]  }
 0x455   : > { %v6990_v44 = vpop.f32.mrb[52].mxu1 }
 0x456   : > { %v8047_v7 = vpop.f32.mrb[52].mxu0  ;;  %9248 = vst.msk [vmem:[#allocation2 + $0xc8] sm:$0xff] %vm290_vm0, %v8991_v45  ;;  %v6991_v40 = vadd.f32 %v6990_v44, %v15393_v6  ;;  %v6992_v17 = vpop.f32.mrb[53].mxu1  ;;  %v13027_v18 = vpack.c.bf16 %v10286_v50, %v10286_v50  ;;  %v10287_v6 = vmax.f32 %v10031_v26, 0.0  ;;  %v14065_v45 = vld [vmem:[%s14921_s14 + $0x7f4] ss:$24 sps:$4 sm:$0xff]  }
 0x457   : > { %v8049_v54 = vpop.f32.mrb[53].mxu0  ;;  %v6993_v58 = vpop.f32.mrb[54].mxu1  ;;  %v14060_v26 = vld [vmem:[%s14921_s14 + $0x7e8] ss:$24 sps:$4 sm:$0xff]  }
 0x458   : > { %v8050_v37 = vpop.f32.mrb[54].mxu0  ;;  %v8048_v9 = vadd.f32 %v8047_v7, %v6991_v40  ;;  %v6994_v29 = vadd.f32 %v6993_v58, %v15397_v22  ;;  %v6995_v56 = vpop.f32.mrb[55].mxu1  ;;  %11567 = vst.msk [vmem:[%s16578_s15 + $0x58] sm:$0xf] %vm11544_vm1, %v13027_v18  ;;  %v13028_v43 = vpack.c.bf16 %v10287_v6, %v10287_v6  ;;  %v576_v40 = vld [vmem:[#allocation2 + $0xe8] sm:$0xff] }
 0x459   : > { %v8052_v42 = vpop.f32.mrb[55].mxu0  ;;  %v14063_v6 = vld [vmem:[%s14921_s14 + $0x7f0] ss:$24 sps:$4 sm:$0xff]  }
 0x45a   : > { %v8992_v55 = vadd.f32 %v8048_v9, %v573_v32  ;;  %v8051_v8 = vadd.f32 %v8050_v37, %v6994_v29  ;;  %7205 = vmatmul.mubr.bf16.gmra.mrb[160].mxu1 %v14048_v16  ;;  %11568 = vst.msk [vmem:[%s16578_s15 + $0x5c] sm:$0xf] %vm11544_vm1, %v13028_v43  ;;  %v16780_v29 = vld [vmem:[#allocation5] ss:$0 sm:$0xff]  ;;  %v577_v42 = vld [vmem:[#allocation2 + $0xf0] sm:$0xff] }
 0x45b   : > { %8262 = vmatmul.mubr.bf16.gmra.mrb[160].mxu0 %v14051_v51  ;;  %v9506_v1 = vld [vmem:[#allocation2 + $0xc0] sm:$0xff]  ;;  %7212 = vmatprep.mubr.bf16.mxu1 %v14056_v11 }
 0x45c   : > { %8269 = vmatprep.mubr.bf16.mxu0 %v14059_v41  ;;  %v9769_v22 = vmul.f32 %v16554_v30, %v9506_v1  ;;  %9249 = vst.msk [vmem:[#allocation2 + $0xd0] sm:$0xff] %vm290_vm0, %v8992_v55  ;;  %v8993_v63 = vadd.f32 %v8051_v8, %v574_v38  ;;  %v14068_v1 = vld [vmem:[%s14921_s14 + $0x81c] ss:$24 sps:$4 sm:$0xff]  }
 0x45d   : > { %v9507_v3 = vld [vmem:[#allocation2 + $0xc8] sm:$0xff]  ;;  %v6998_v10 = vpop.f32.mrb[56].mxu1  ;;  %v14071_v43 = vld [vmem:[%s14921_s14 + $0x824] ss:$24 sps:$4 sm:$0xff]  }
 0x45e   : > { %v8055_v59 = vpop.f32.mrb[56].mxu0  ;;  %v10032_v2 = vadd.f32 %v16560_v25, %v9769_v22  ;;  %v9770_v19 = vmul.f32 %v16554_v30, %v9507_v3  ;;  %9250 = vst.msk [vmem:[#allocation2 + $0xd8] sm:$0xff] %vm290_vm0, %v8993_v63  ;;  %v6999_v12 = vadd.f32 %v6998_v10, %v15406_v0  ;;  %v7000_v15 = vpop.f32.mrb[57].mxu1  ;;  %v16788_v63 = vld [vmem:[#allocation7] ss:$0 sm:$0xff] }
 0x45f   : > { %v8057_v33 = vpop.f32.mrb[57].mxu0  ;;  %v7001_v23 = vpop.f32.mrb[58].mxu1 }
 0x460   : > { %v8058_v24 = vpop.f32.mrb[58].mxu0  ;;  %v10288_v13 = vmax.f32 %v10032_v2, 0.0  ;;  %v10033_v44 = vadd.f32 %v16560_v25, %v9770_v19  ;;  %v8056_v7 = vadd.f32 %v8055_v59, %v6999_v12  ;;  %v7002_v16 = vadd.f32 %v7001_v23, %v15416_v48  ;;  %v7003_v5 = vpop.f32.mrb[59].mxu1 }
 0x461   : > { %v8060_v52 = vpop.f32.mrb[59].mxu0 }
 0x462   : > { %v13029_v32 = vpack.c.bf16 %v10288_v13, %v10288_v13  ;;  %v10289_v0 = vmax.f32 %v10033_v44, 0.0  ;;  %v8994_v17 = vadd.f32 %v8056_v7, %v575_v4  ;;  %v8059_v54 = vadd.f32 %v8058_v24, %v7002_v16  ;;  %7213 = vmatmul.mubr.bf16.gmra.mrb[164].mxu1 %v14054_v49  ;;  %v579_v16 = vld [vmem:[#allocation2 + $0x100] sm:$0xff] }
 0x463   : > { %8270 = vmatmul.mubr.bf16.gmra.mrb[164].mxu0 %v14057_v62  ;;  %v9508_v51 = vld [vmem:[#allocation2 + $0xd0] sm:$0xff]  ;;  %7220 = vmatprep.mubr.bf16.mxu1 %v14062_v35 }
 0x464   : > { %8277 = vmatprep.mubr.bf16.mxu0 %v14065_v45  ;;  %11569 = vst.msk [vmem:[%s16578_s15 + $0x60] sm:$0xf] %vm11544_vm1, %v13029_v32  ;;  %v13030_v58 = vpack.c.bf16 %v10289_v0, %v10289_v0  ;;  %v9771_v37 = vmul.f32 %v16554_v30, %v9508_v51  ;;  %v8995_v48 = vadd.f32 %v8059_v54, %v576_v40  ;;  %v14066_v45 = vld [vmem:[%s14921_s14 + $0x818] ss:$24 sps:$4 sm:$0xff]   ;;  %v14077_v54 = vld [vmem:[%s14921_s14 + $0x854] ss:$24 sps:$4 sm:$0xff]  }
 0x465   : > { %9251 = vst.msk [vmem:[#allocation2 + $0xe0] sm:$0xff] %vm290_vm0, %v8994_v17  ;;  %v9509_v11 = vld [vmem:[#allocation2 + $0xd8] sm:$0xff]  ;;  %v7006_v41 = vpop.f32.mrb[60].mxu1  ;;  %v14074_v17 = vld [vmem:[%s14921_s14 + $0x84c] ss:$24 sps:$4 sm:$0xff]  }
 0x466   : > { %v8063_v50 = vpop.f32.mrb[60].mxu0  ;;  %11570 = vst.msk [vmem:[%s16578_s15 + $0x64] sm:$0xf] %vm11544_vm1, %v13030_v58  ;;  %v10034_v9 = vadd.f32 %v16560_v25, %v9771_v37  ;;  %v9772_v56 = vmul.f32 %v16780_v29, %v9509_v11  ;;  %v7007_v30 = vadd.f32 %v7006_v41, %v15423_v61  ;;  %v7008_v38 = vpop.f32.mrb[61].mxu1  ;;  %v578_v61 = vld [vmem:[#allocation2 + $0xf8] sm:$0xff] }
 0x467   : > { %9252 = vst.msk [vmem:[#allocation2 + $0xe8] sm:$0xff] %vm290_vm0, %v8995_v48  ;;  %v8065_v18 = vpop.f32.mrb[61].mxu0  ;;  %v7009_v55 = vpop.f32.mrb[62].mxu1  ;;  %v14069_v40 = vld [vmem:[%s14921_s14 + $0x820] ss:$24 sps:$4 sm:$0xff]  }
 0x468   : > { %v8066_v8 = vpop.f32.mrb[62].mxu0  ;;  %v10290_v22 = vmax.f32 %v10034_v9, 0.0  ;;  %v10035_v25 = vadd.f32 %v16788_v63, %v9772_v56  ;;  %v8064_v3 = vadd.f32 %v8063_v50, %v7007_v30  ;;  %v7010_v10 = vadd.f32 %v7009_v55, %v15429_v60  ;;  %v7011_v59 = vpop.f32.mrb[63].mxu1  ;;  %v580_v50 = vld [vmem:[#allocation2 + $0x108] sm:$0xff] }
 0x469   : > { %v8068_v49 = vpop.f32.mrb[63].mxu0  ;;  %v14075_v59 = vld [vmem:[%s14921_s14 + $0x850] ss:$24 sps:$4 sm:$0xff]  }
 0x46a   : > { %v13031_v2 = vpack.c.bf16 %v10290_v22, %v10290_v22  ;;  %v10291_v19 = vmax.f32 %v10035_v25, 0.0  ;;  %v8996_v12 = vadd.f32 %v8064_v3, %v577_v42  ;;  %v8067_v4 = vadd.f32 %v8066_v8, %v7010_v10  ;;  %7221 = vmatmul.mubr.bf16.gmra.mrb[168].mxu1 %v14060_v26  ;;  %v14072_v8 = vld [vmem:[%s14921_s14 + $0x848] ss:$24 sps:$4 sm:$0xff]   ;;  %v581_v25 = vld [vmem:[#allocation2 + $0x110] sm:$0xff] }
 0x46b   : > { %8278 = vmatmul.mubr.bf16.gmra.mrb[168].mxu0 %v14063_v6  ;;  %7228 = vmatprep.mubr.bf16.mxu1 %v14068_v1 }
 0x46c   : > { %v9510_v15 = vld [vmem:[#allocation2 + $0xe0] sm:$0xff]  ;;  %8285 = vmatprep.mubr.bf16.mxu0 %v14071_v43  ;;  %11571 = vst.msk [vmem:[%s16578_s15 + $0x68] sm:$0xf] %vm11544_vm1, %v13031_v2  ;;  %v13032_v33 = vpack.c.bf16 %v10291_v19, %v10291_v19  ;;  %v8997_v62 = vadd.f32 %v8067_v4, %v578_v61  ;;  %v14080_v2 = vld [vmem:[%s14921_s14 + $0x87c] ss:$24 sps:$4 sm:$0xff]  }
 0x46d   : > { %v9773_v60 = vmul.f32 %v16780_v29, %v9510_v15  ;;  %9253 = vst.msk [vmem:[#allocation2 + $0xf0] sm:$0xff] %vm290_vm0, %v8996_v12  ;;  %v7014_v24 = vpop.f32.mrb[64].mxu1  ;;  %v14083_v19 = vld [vmem:[%s14921_s14 + $0x884] ss:$24 sps:$4 sm:$0xff]  }
 0x46e   : > { %v9511_v23 = vld [vmem:[#allocation2 + $0xe8] sm:$0xff]  ;;  %v8071_v35 = vpop.f32.mrb[64].mxu0  ;;  %11572 = vst.msk [vmem:[%s16578_s15 + $0x6c] sm:$0xf] %vm11544_vm1, %v13032_v33  ;;  %v7015_v7 = vadd.f32 %v7014_v24, %v15435_v47  ;;  %v7016_v5 = vpop.f32.mrb[65].mxu1 }
 0x46f   : > { %v10036_v13 = vadd.f32 %v16788_v63, %v9773_v60  ;;  %v9774_v44 = vmul.f32 %v16780_v29, %v9511_v23  ;;  %9254 = vst.msk [vmem:[#allocation2 + $0xf8] sm:$0xff] %vm290_vm0, %v8997_v62  ;;  %v8073_v52 = vpop.f32.mrb[65].mxu0  ;;  %v7017_v32 = vpop.f32.mrb[66].mxu1  ;;  %v582_v23 = vld [vmem:[#allocation2 + $0x118] sm:$0xff] }
 0x470   : > { %v8074_v0 = vpop.f32.mrb[66].mxu0  ;;  %v8072_v37 = vadd.f32 %v8071_v35, %v7015_v7  ;;  %v7018_v48 = vadd.f32 %v7017_v32, %v15441_v36  ;;  %v7019_v11 = vpop.f32.mrb[67].mxu1 }
 0x471   : > { %v10292_v51 = vmax.f32 %v10036_v13, 0.0  ;;  %v10037_v58 = vadd.f32 %v16788_v63, %v9774_v44  ;;  %v8076_v41 = vpop.f32.mrb[67].mxu0 }
 0x472   : > { %v8998_v9 = vadd.f32 %v8072_v37, %v579_v16  ;;  %v8075_v56 = vadd.f32 %v8074_v0, %v7018_v48  ;;  %7229 = vmatmul.mubr.bf16.gmra.mrb[172].mxu1 %v14066_v45  ;;  %v14081_v37 = vld [vmem:[%s14921_s14 + $0x880] ss:$24 sps:$4 sm:$0xff]   ;;  %v14086_v41 = vld [vmem:[%s14921_s14 + $0x8ac] ss:$24 sps:$4 sm:$0xff]  }
 0x473   : > { %v13033_v26 = vpack.c.bf16 %v10292_v51, %v10292_v51  ;;  %v10293_v47 = vmax.f32 %v10037_v58, 0.0  ;;  %8286 = vmatmul.mubr.bf16.gmra.mrb[172].mxu0 %v14069_v40  ;;  %7236 = vmatprep.mubr.bf16.mxu1 %v14074_v17  ;;  %v14078_v40 = vld [vmem:[%s14921_s14 + $0x878] ss:$24 sps:$4 sm:$0xff]  }
 0x474   : > { %v9512_v30 = vld [vmem:[#allocation2 + $0xf0] sm:$0xff]  ;;  %8293 = vmatprep.mubr.bf16.mxu0 %v14077_v54  ;;  %9255 = vst.msk [vmem:[#allocation2 + $0x100] sm:$0xff] %vm290_vm0, %v8998_v9  ;;  %v8999_v38 = vadd.f32 %v8075_v56, %v580_v50  ;;  %v583_v54 = vld [vmem:[#allocation2 + $0x120] sm:$0xff] }
 0x475   : > { %11573 = vst.msk [vmem:[%s16578_s15 + $0x70] sm:$0xf] %vm11544_vm1, %v13033_v26  ;;  %v13034_v42 = vpack.c.bf16 %v10293_v47, %v10293_v47  ;;  %v9775_v36 = vmul.f32 %v16780_v29, %v9512_v30  ;;  %v7022_v6 = vpop.f32.mrb[68].mxu1  ;;  %v14089_v50 = vld [vmem:[%s14921_s14 + $0x8b4] ss:$24 sps:$4 sm:$0xff]  }
 0x476   : > { %v9513_v18 = vld [vmem:[#allocation2 + $0xf8] sm:$0xff]  ;;  %v8079_v55 = vpop.f32.mrb[68].mxu0  ;;  %9256 = vst.msk [vmem:[#allocation2 + $0x108] sm:$0xff] %vm290_vm0, %v8999_v38  ;;  %v7023_v22 = vadd.f32 %v7022_v6, %v15447_v34  ;;  %v7024_v3 = vpop.f32.mrb[69].mxu1 }
 0x477   : > { %11574 = vst.msk [vmem:[%s16578_s15 + $0x74] sm:$0xf] %vm11544_vm1, %v13034_v42  ;;  %v10038_v1 = vadd.f32 %v16788_v63, %v9775_v36  ;;  %v9776_v43 = vmul.f32 %v16780_v29, %v9513_v18  ;;  %v8081_v10 = vpop.f32.mrb[69].mxu0  ;;  %v7025_v49 = vpop.f32.mrb[70].mxu1  ;;  %v584_v36 = vld [vmem:[#allocation2 + $0x128] sm:$0xff] }
 0x478   : > { %v8082_v61 = vpop.f32.mrb[70].mxu0  ;;  %v8080_v15 = vadd.f32 %v8079_v55, %v7023_v22  ;;  %v7026_v33 = vadd.f32 %v7025_v49, %v15453_v20  ;;  %v7027_v60 = vpop.f32.mrb[71].mxu1  ;;  %v14084_v3 = vld [vmem:[%s14921_s14 + $0x8a8] ss:$24 sps:$4 sm:$0xff]  }
 0x479   : > { %v10294_v12 = vmax.f32 %v10038_v1, 0.0  ;;  %v10039_v4 = vadd.f32 %v16788_v63, %v9776_v43  ;;  %v8084_v62 = vpop.f32.mrb[71].mxu0  ;;  %v14095_v60 = vld [vmem:[%s14921_s14 + $0x8e4] ss:$24 sps:$4 sm:$0xff]  }
 0x47a   : > { %v9000_v35 = vadd.f32 %v8080_v15, %v581_v25  ;;  %v8083_v45 = vadd.f32 %v8082_v61, %v7026_v33  ;;  %7237 = vmatmul.mubr.bf16.gmra.mrb[176].mxu1 %v14072_v8  ;;  %v585_v61 = vld [vmem:[#allocation2 + $0x130] sm:$0xff] }
 0x47b   : > { %v13035_v24 = vpack.c.bf16 %v10294_v12, %v10294_v12  ;;  %v10295_v34 = vmax.f32 %v10039_v4, 0.0  ;;  %8294 = vmatmul.mubr.bf16.gmra.mrb[176].mxu0 %v14075_v59  ;;  %v9514_v13 = vld [vmem:[#allocation2 + $0x100] sm:$0xff]  ;;  %7244 = vmatprep.mubr.bf16.mxu1 %v14080_v2  ;;  %v14087_v12 = vld [vmem:[%s14921_s14 + $0x8b0] ss:$24 sps:$4 sm:$0xff]   ;;  %v14092_v33 = vld [vmem:[%s14921_s14 + $0x8dc] ss:$24 sps:$4 sm:$0xff]  }
 0x47c   : > { %8301 = vmatprep.mubr.bf16.mxu0 %v14083_v19  ;;  %v9777_v20 = vmul.f32 %v16780_v29, %v9514_v13  ;;  %9257 = vst.msk [vmem:[#allocation2 + $0x110] sm:$0xff] %vm290_vm0, %v9000_v35  ;;  %v9001_v7 = vadd.f32 %v8083_v45, %v582_v23  ;;  %v586_v13 = vld [vmem:[#allocation2 + $0x138] sm:$0xff] }
 0x47d   : > { %11575 = vst.msk [vmem:[%s16578_s15 + $0x78] sm:$0xf] %vm11544_vm1, %v13035_v24  ;;  %v13036_v44 = vpack.c.bf16 %v10295_v34, %v10295_v34  ;;  %v9515_v16 = vld [vmem:[#allocation2 + $0x108] sm:$0xff]  ;;  %v7030_v5 = vpop.f32.mrb[72].mxu1 }
 0x47e   : > { %v8087_v52 = vpop.f32.mrb[72].mxu0  ;;  %v10040_v32 = vadd.f32 %v16788_v63, %v9777_v20  ;;  %v9778_v0 = vmul.f32 %v16780_v29, %v9515_v16  ;;  %9258 = vst.msk [vmem:[#allocation2 + $0x118] sm:$0xff] %vm290_vm0, %v9001_v7  ;;  %v7031_v17 = vadd.f32 %v7030_v5, %v15462_v21  ;;  %v7032_v51 = vpop.f32.mrb[73].mxu1 }
 0x47f   : > { %11576 = vst.msk [vmem:[%s16578_s15 + $0x7c] sm:$0xf] %vm11544_vm1, %v13036_v44  ;;  %v8089_v58 = vpop.f32.mrb[73].mxu0  ;;  %v7033_v48 = vpop.f32.mrb[74].mxu1 }
 0x480   : > { %v8090_v11 = vpop.f32.mrb[74].mxu0  ;;  %v10296_v26 = vmax.f32 %v10040_v32, 0.0  ;;  %v10041_v47 = vadd.f32 %v16788_v63, %v9778_v0  ;;  %v8088_v9 = vadd.f32 %v8087_v52, %v7031_v17  ;;  %v7034_v56 = vadd.f32 %v7033_v48, %v15471_v28  ;;  %v7035_v30 = vpop.f32.mrb[75].mxu1  ;;  %v14090_v17 = vld [vmem:[%s14921_s14 + $0x8d8] ss:$24 sps:$4 sm:$0xff]  }
 0x481   : > { %v8092_v42 = vpop.f32.mrb[75].mxu0 }
 0x482   : > { %v13037_v38 = vpack.c.bf16 %v10296_v26, %v10296_v26  ;;  %v10297_v21 = vmax.f32 %v10041_v47, 0.0  ;;  %v9002_v18 = vadd.f32 %v8088_v9, %v583_v54  ;;  %v8091_v6 = vadd.f32 %v8090_v11, %v7034_v56  ;;  %7245 = vmatmul.mubr.bf16.gmra.mrb[180].mxu1 %v14078_v40  ;;  %v14098_v47 = vld [vmem:[%s14921_s14 + $0x90c] ss:$24 sps:$4 sm:$0xff]  }
 0x483   : > { %8302 = vmatmul.mubr.bf16.gmra.mrb[180].mxu0 %v14081_v37  ;;  %v9516_v55 = vld [vmem:[#allocation2 + $0x110] sm:$0xff]  ;;  %7252 = vmatprep.mubr.bf16.mxu1 %v14086_v41  ;;  %v587_v37 = vld [vmem:[#allocation2 + $0x140] sm:$0xff] }
 0x484   : > { %8309 = vmatprep.mubr.bf16.mxu0 %v14089_v50  ;;  %11577 = vst.msk [vmem:[%s16578_s15 + $0x80] sm:$0xf] %vm11544_vm1, %v13037_v38  ;;  %v13038_v8 = vpack.c.bf16 %v10297_v21, %v10297_v21  ;;  %v9779_v28 = vmul.f32 %v16780_v29, %v9516_v55  ;;  %v9003_v1 = vadd.f32 %v8091_v6, %v584_v36  ;;  %v14093_v41 = vld [vmem:[%s14921_s14 + $0x8e0] ss:$24 sps:$4 sm:$0xff]   ;;  %v14101_v9 = vld [vmem:[%s14921_s14 + $0x914] ss:$24 sps:$4 sm:$0xff]  }
 0x485   : > { %9259 = vst.msk [vmem:[#allocation2 + $0x120] sm:$0xff] %vm290_vm0, %v9002_v18  ;;  %v9517_v43 = vld [vmem:[#allocation2 + $0x118] sm:$0xff]  ;;  %v7038_v22 = vpop.f32.mrb[76].mxu1  ;;  %v588_v18 = vld [vmem:[#allocation2 + $0x148] sm:$0xff] }
 0x486   : > { %v8095_v25 = vpop.f32.mrb[76].mxu0  ;;  %11578 = vst.msk [vmem:[%s16578_s15 + $0x84] sm:$0xf] %vm11544_vm1, %v13038_v8  ;;  %v10042_v10 = vadd.f32 %v16788_v63, %v9779_v28  ;;  %v9780_v59 = vmul.f32 %v16780_v29, %v9517_v43  ;;  %v7039_v49 = vadd.f32 %v7038_v22, %v15477_v57  ;;  %v7040_v2 = vpop.f32.mrb[77].mxu1 }
 0x487   : > { %9260 = vst.msk [vmem:[#allocation2 + $0x128] sm:$0xff] %vm290_vm0, %v9003_v1  ;;  %v8097_v19 = vpop.f32.mrb[77].mxu0  ;;  %v7041_v4 = vpop.f32.mrb[78].mxu1  ;;  %v589_v2 = vld [vmem:[#allocation2 + $0x150] sm:$0xff] }
 0x488   : > { %v8098_v15 = vpop.f32.mrb[78].mxu0  ;;  %v10298_v62 = vmax.f32 %v10042_v10, 0.0  ;;  %v10043_v23 = vadd.f32 %v16788_v63, %v9780_v59  ;;  %v8096_v24 = vadd.f32 %v8095_v25, %v7039_v49  ;;  %v7042_v34 = vadd.f32 %v7041_v4, %v15483_v46  ;;  %v7043_v35 = vpop.f32.mrb[79].mxu1  ;;  %v14096_v10 = vld [vmem:[%s14921_s14 + $0x908] ss:$24 sps:$4 sm:$0xff]  }
 0x489   : > { %v8100_v45 = vpop.f32.mrb[79].mxu0  ;;  %v14099_v4 = vld [vmem:[%s14921_s14 + $0x910] ss:$24 sps:$4 sm:$0xff]  }
 0x48a   : > { %v13039_v44 = vpack.c.bf16 %v10298_v62, %v10298_v62  ;;  %v10299_v57 = vmax.f32 %v10043_v23, 0.0  ;;  %v9004_v20 = vadd.f32 %v8096_v24, %v585_v61  ;;  %v8099_v7 = vadd.f32 %v8098_v15, %v7042_v34  ;;  %7253 = vmatmul.mubr.bf16.gmra.mrb[184].mxu1 %v14084_v3  ;;  %v14107_v62 = vld [vmem:[%s14921_s14 + $0x944] ss:$24 sps:$4 sm:$0xff]  }
 0x48b   : > { %8310 = vmatmul.mubr.bf16.gmra.mrb[184].mxu0 %v14087_v12  ;;  %7260 = vmatprep.mubr.bf16.mxu1 %v14092_v33 }
 0x48c   : > { %v9518_v16 = vld [vmem:[#allocation2 + $0x120] sm:$0xff]  ;;  %8317 = vmatprep.mubr.bf16.mxu0 %v14095_v60  ;;  %11579 = vst.msk [vmem:[%s16578_s15 + $0x88] sm:$0xf] %vm11544_vm1, %v13039_v44  ;;  %v13040_v5 = vpack.c.bf16 %v10299_v57, %v10299_v57  ;;  %v9005_v52 = vadd.f32 %v8099_v7, %v586_v13  ;;  %v14104_v60 = vld [vmem:[%s14921_s14 + $0x93c] ss:$24 sps:$4 sm:$0xff]  }
 0x48d   : > { %v9781_v46 = vmul.f32 %v16780_v29, %v9518_v16  ;;  %9261 = vst.msk [vmem:[#allocation2 + $0x130] sm:$0xff] %vm290_vm0, %v9004_v20  ;;  %v7046_v32 = vpop.f32.mrb[80].mxu1  ;;  %v590_v44 = vld [vmem:[#allocation2 + $0x158] sm:$0xff] }
 0x48e   : > { %v9519_v40 = vld [vmem:[#allocation2 + $0x128] sm:$0xff]  ;;  %v8103_v0 = vpop.f32.mrb[80].mxu0  ;;  %11580 = vst.msk [vmem:[%s16578_s15 + $0x8c] sm:$0xf] %vm11544_vm1, %v13040_v5  ;;  %v7047_v58 = vadd.f32 %v7046_v32, %v15489_v14  ;;  %v7048_v48 = vpop.f32.mrb[81].mxu1 }
 0x48f   : > { %v10044_v54 = vadd.f32 %v16788_v63, %v9781_v46  ;;  %v9782_v51 = vmul.f32 %v16780_v29, %v9519_v40  ;;  %9262 = vst.msk [vmem:[#allocation2 + $0x138] sm:$0xff] %vm290_vm0, %v9005_v52  ;;  %v8105_v11 = vpop.f32.mrb[81].mxu0  ;;  %v7049_v50 = vpop.f32.mrb[82].mxu1 }
 0x490   : > { %v8106_v26 = vpop.f32.mrb[82].mxu0  ;;  %v8104_v42 = vadd.f32 %v8103_v0, %v7047_v58  ;;  %v7050_v36 = vadd.f32 %v7049_v50, %v15495_v39  ;;  %v7051_v38 = vpop.f32.mrb[83].mxu1  ;;  %v14102_v0 = vld [vmem:[%s14921_s14 + $0x938] ss:$24 sps:$4 sm:$0xff]   ;;  %v591_v58 = vld [vmem:[#allocation2 + $0x160] sm:$0xff] }
 0x491   : > { %v10300_v56 = vmax.f32 %v10044_v54, 0.0  ;;  %v10045_v30 = vadd.f32 %v16788_v63, %v9782_v51  ;;  %v8108_v21 = vpop.f32.mrb[83].mxu0  ;;  %v14105_v11 = vld [vmem:[%s14921_s14 + $0x940] ss:$24 sps:$4 sm:$0xff]  }
 0x492   : > { %v9006_v55 = vadd.f32 %v8104_v42, %v587_v37  ;;  %v8107_v8 = vadd.f32 %v8106_v26, %v7050_v36  ;;  %7261 = vmatmul.mubr.bf16.gmra.mrb[188].mxu1 %v14090_v17  ;;  %v14110_v26 = vld [vmem:[%s14921_s14 + $0x96c] ss:$24 sps:$4 sm:$0xff]  }
 0x493   : > { %v13041_v6 = vpack.c.bf16 %v10300_v56, %v10300_v56  ;;  %v10301_v14 = vmax.f32 %v10045_v30, 0.0  ;;  %8318 = vmatmul.mubr.bf16.gmra.mrb[188].mxu0 %v14093_v41  ;;  %7268 = vmatprep.mubr.bf16.mxu1 %v14098_v47  ;;  %v14113_v47 = vld [vmem:[%s14921_s14 + $0x974] ss:$24 sps:$4 sm:$0xff]  }
 0x494   : > { %v9520_v28 = vld [vmem:[#allocation2 + $0x130] sm:$0xff]  ;;  %8325 = vmatprep.mubr.bf16.mxu0 %v14101_v9  ;;  %9263 = vst.msk [vmem:[#allocation2 + $0x140] sm:$0xff] %vm290_vm0, %v9006_v55  ;;  %v9007_v43 = vadd.f32 %v8107_v8, %v588_v18  ;;  %v592_v18 = vld [vmem:[#allocation2 + $0x168] sm:$0xff] }
 0x495   : > { %11581 = vst.msk [vmem:[%s16578_s15 + $0x90] sm:$0xf] %vm11544_vm1, %v13041_v6  ;;  %v13042_v1 = vpack.c.bf16 %v10301_v14, %v10301_v14  ;;  %v9783_v39 = vmul.f32 %v16780_v29, %v9520_v28  ;;  %v7054_v25 = vpop.f32.mrb[84].mxu1  ;;  %v18776_v42 = vld [vmem:[#allocation55_spill] sm:$0xff] }
 0x496   : > { %v9521_v22 = vld [vmem:[#allocation2 + $0x138] sm:$0xff]  ;;  %v8111_v3 = vpop.f32.mrb[84].mxu0  ;;  %9264 = vst.msk [vmem:[#allocation2 + $0x148] sm:$0xff] %vm290_vm0, %v9007_v43  ;;  %v7055_v61 = vadd.f32 %v7054_v25, %v15501_v31  ;;  %v7056_v19 = vpop.f32.mrb[85].mxu1 }
 0x497   : > { %11582 = vst.msk [vmem:[%s16578_s15 + $0x94] sm:$0xf] %vm11544_vm1, %v13042_v1  ;;  %v10046_v59 = vadd.f32 %v16788_v63, %v9783_v39  ;;  %v9784_v49 = vmul.f32 %v16780_v29, %v9521_v22  ;;  %v8113_v12 = vpop.f32.mrb[85].mxu0  ;;  %v7057_v15 = vpop.f32.mrb[86].mxu1 }
 0x498   : > { %v8114_v33 = vpop.f32.mrb[86].mxu0  ;;  %v8112_v34 = vadd.f32 %v8111_v3, %v7055_v61  ;;  %v7058_v35 = vadd.f32 %v7057_v15, %v15507_v27  ;;  %v7059_v45 = vpop.f32.mrb[87].mxu1  ;;  %v14108_v3 = vld [vmem:[%s14921_s14 + $0x968] ss:$24 sps:$4 sm:$0xff]  }
 0x499   : > { %v10302_v23 = vmax.f32 %v10046_v59, 0.0  ;;  %v10047_v24 = vadd.f32 %v16788_v63, %v9784_v49  ;;  %v8116_v13 = vpop.f32.mrb[87].mxu0  ;;  %v18777_v49 = vld [vmem:[#allocation57_spill] sm:$0xff] }
 0x49a   : > { %v9008_v20 = vadd.f32 %v8112_v34, %v589_v2  ;;  %v8115_v7 = vadd.f32 %v8114_v33, %v7058_v35  ;;  %7269 = vmatmul.mubr.bf16.gmra.mrb[192].mxu1 %v14096_v10  ;;  %v593_v2 = vld [vmem:[#allocation2 + $0x170] sm:$0xff] }
 0x49b   : > { %v13043_v57 = vpack.c.bf16 %v10302_v23, %v10302_v23  ;;  %v10303_v31 = vmax.f32 %v10047_v24, 0.0  ;;  %8326 = vmatmul.mubr.bf16.gmra.mrb[192].mxu0 %v14099_v4  ;;  %v9522_v16 = vld [vmem:[#allocation2 + $0x140] sm:$0xff]  ;;  %7276 = vmatprep.mubr.bf16.mxu1 %v14104_v60  ;;  %v14111_v4 = vld [vmem:[%s14921_s14 + $0x970] ss:$24 sps:$4 sm:$0xff]   ;;  %v14116_v60 = vld [vmem:[%s14921_s14 + $0x99c] ss:$24 sps:$4 sm:$0xff]  }
 0x49c   : > { %8333 = vmatprep.mubr.bf16.mxu0 %v14107_v62  ;;  %v9785_v27 = vmul.f32 %v16780_v29, %v9522_v16  ;;  %9265 = vst.msk [vmem:[#allocation2 + $0x150] sm:$0xff] %vm290_vm0, %v9008_v20  ;;  %v9009_v46 = vadd.f32 %v8115_v7, %v590_v44  ;;  %v14119_v62 = vld [vmem:[%s14921_s14 + $0x9a4] ss:$24 sps:$4 sm:$0xff]   ;;  %v18778_v35 = vld [vmem:[#allocation59_spill] sm:$0xff] }
 0x49d   : > { %11583 = vst.msk [vmem:[%s16578_s15 + $0x98] sm:$0xf] %vm11544_vm1, %v13043_v57  ;;  %v13044_v5 = vpack.c.bf16 %v10303_v31, %v10303_v31  ;;  %v9523_v52 = vld [vmem:[#allocation2 + $0x148] sm:$0xff]  ;;  %v7062_v40 = vpop.f32.mrb[88].mxu1  ;;  %v594_v57 = vld [vmem:[#allocation2 + $0x178] sm:$0xff] }
 0x49e   : > { %v8119_v32 = vpop.f32.mrb[88].mxu0  ;;  %v10048_v17 = vadd.f32 %v16788_v63, %v9785_v27  ;;  %v9786_v54 = vmul.f32 %v16780_v29, %v9523_v52  ;;  %9266 = vst.msk [vmem:[#allocation2 + $0x158] sm:$0xff] %vm290_vm0, %v9009_v46  ;;  %v7063_v51 = vadd.f32 %v7062_v40, %v15513_v53  ;;  %v7064_v37 = vpop.f32.mrb[89].mxu1 }
 0x49f   : > { %11584 = vst.msk [vmem:[%s16578_s15 + $0x9c] sm:$0xf] %vm11544_vm1, %v13044_v5  ;;  %v8121_v48 = vpop.f32.mrb[89].mxu0  ;;  %v7065_v41 = vpop.f32.mrb[90].mxu1 }
 0x4a0   : > { %v8122_v50 = vpop.f32.mrb[90].mxu0  ;;  %v10304_v9 = vmax.f32 %v10048_v17, 0.0  ;;  %v10049_v56 = vadd.f32 %v16788_v63, %v9786_v54  ;;  %v8120_v30 = vadd.f32 %v8119_v32, %v7063_v51  ;;  %v7066_v36 = vadd.f32 %v7065_v41, %v18776_v42  ;;  %v7067_v38 = vpop.f32.mrb[91].mxu1  ;;  %v14114_v17 = vld [vmem:[%s14921_s14 + $0x998] ss:$24 sps:$4 sm:$0xff]   ;;  %v595_v48 = vld [vmem:[#allocation2 + $0x180] sm:$0xff] }
 0x4a1   : > { %v8124_v21 = vpop.f32.mrb[91].mxu0  ;;  %v18780_v38 = vld [vmem:[#allocation63_spill] sm:$0xff] }
 0x4a2   : > { %v13045_v6 = vpack.c.bf16 %v10304_v9, %v10304_v9  ;;  %v10305_v53 = vmax.f32 %v10049_v56, 0.0  ;;  %v9010_v14 = vadd.f32 %v8120_v30, %v591_v58  ;;  %v8123_v55 = vadd.f32 %v8122_v50, %v7066_v36  ;;  %7277 = vmatmul.mubr.bf16.gmra.mrb[196].mxu1 %v14102_v0  ;;  %v18779_v58 = vld [vmem:[#allocation61_spill] sm:$0xff]  ;;  %v14122_v9 = vld [vmem:[%s14921_s14 + $0x9cc] ss:$24 sps:$4 sm:$0xff]  }
 0x4a3   : > { %8334 = vmatmul.mubr.bf16.gmra.mrb[196].mxu0 %v14105_v11  ;;  %v9524_v8 = vld [vmem:[#allocation2 + $0x150] sm:$0xff]  ;;  %7284 = vmatprep.mubr.bf16.mxu1 %v14110_v26  ;;  %v14117_v50 = vld [vmem:[%s14921_s14 + $0x9a0] ss:$24 sps:$4 sm:$0xff]  }
 0x4a4   : > { %8341 = vmatprep.mubr.bf16.mxu0 %v14113_v47  ;;  %11585 = vst.msk [vmem:[%s16578_s15 + $0xa0] sm:$0xf] %vm11544_vm1, %v13045_v6  ;;  %v13046_v28 = vpack.c.bf16 %v10305_v53, %v10305_v53  ;;  %v9787_v1 = vmul.f32 %v16780_v29, %v9524_v8  ;;  %v9011_v39 = vadd.f32 %v8123_v55, %v592_v18  ;;  %v14125_v56 = vld [vmem:[%s14921_s14 + $0x9d4] ss:$24 sps:$4 sm:$0xff]  }
 0x4a5   : > { %9267 = vst.msk [vmem:[#allocation2 + $0x160] sm:$0xff] %vm290_vm0, %v9010_v14  ;;  %v9525_v43 = vld [vmem:[#allocation2 + $0x158] sm:$0xff]  ;;  %v7070_v22 = vpop.f32.mrb[92].mxu1  ;;  %v596_v53 = vld [vmem:[#allocation2 + $0x188] sm:$0xff] }
 0x4a6   : > { %v8127_v25 = vpop.f32.mrb[92].mxu0  ;;  %11586 = vst.msk [vmem:[%s16578_s15 + $0xa4] sm:$0xf] %vm11544_vm1, %v13046_v28  ;;  %v10050_v10 = vadd.f32 %v16788_v63, %v9787_v1  ;;  %v9788_v59 = vmul.f32 %v16780_v29, %v9525_v43  ;;  %v7071_v61 = vadd.f32 %v7070_v22, %v18777_v49  ;;  %v7072_v19 = vpop.f32.mrb[93].mxu1 }
 0x4a7   : > { %9268 = vst.msk [vmem:[#allocation2 + $0x168] sm:$0xff] %vm290_vm0, %v9011_v39  ;;  %v8129_v12 = vpop.f32.mrb[93].mxu0  ;;  %v7073_v15 = vpop.f32.mrb[94].mxu1 }
 0x4a8   : > { %v8130_v33 = vpop.f32.mrb[94].mxu0  ;;  %v10306_v23 = vmax.f32 %v10050_v10, 0.0  ;;  %v10051_v24 = vadd.f32 %v16788_v63, %v9788_v59  ;;  %v8128_v34 = vadd.f32 %v8127_v25, %v7071_v61  ;;  %v7074_v45 = vadd.f32 %v7073_v15, %v18778_v35  ;;  %v7075_v13 = vpop.f32.mrb[95].mxu1  ;;  %v14120_v59 = vld [vmem:[%s14921_s14 + $0x9c8] ss:$24 sps:$4 sm:$0xff]   ;;  %v597_v12 = vld [vmem:[#allocation2 + $0x190] sm:$0xff] }
 0x4a9   : > { %v8132_v44 = vpop.f32.mrb[95].mxu0  ;;  %v18782_v13 = vld [vmem:[#allocation67_spill] sm:$0xff] }
 0x4aa   : > { %v13047_v31 = vpack.c.bf16 %v10306_v23, %v10306_v23  ;;  %v10307_v20 = vmax.f32 %v10051_v24, 0.0  ;;  %v9012_v7 = vadd.f32 %v8128_v34, %v593_v2  ;;  %v8131_v16 = vadd.f32 %v8130_v33, %v7074_v45  ;;  %7285 = vmatmul.mubr.bf16.gmra.mrb[200].mxu1 %v14108_v3  ;;  %v18781_v2 = vld [vmem:[#allocation65_spill] sm:$0xff]  ;;  %v14123_v33 = vld [vmem:[%s14921_s14 + $0x9d0] ss:$24 sps:$4 sm:$0xff]  }
 0x4ab   : > { %8342 = vmatmul.mubr.bf16.gmra.mrb[200].mxu0 %v14111_v4  ;;  %7292 = vmatprep.mubr.bf16.mxu1 %v14116_v60  ;;  %v14128_v23 = vld [vmem:[%s14921_s14 + $0x9fc] ss:$24 sps:$4 sm:$0xff]  }
 0x4ac   : > { %v9526_v5 = vld [vmem:[#allocation2 + $0x160] sm:$0xff]  ;;  %8349 = vmatprep.mubr.bf16.mxu0 %v14119_v62  ;;  %11587 = vst.msk [vmem:[%s16578_s15 + $0xa8] sm:$0xf] %vm11544_vm1, %v13047_v31  ;;  %v13048_v27 = vpack.c.bf16 %v10307_v20, %v10307_v20  ;;  %v9013_v52 = vadd.f32 %v8131_v16, %v594_v57  ;;  %v598_v20 = vld [vmem:[#allocation2 + $0x198] sm:$0xff] }
 0x4ad   : > { %v9789_v46 = vmul.f32 %v16780_v29, %v9526_v5  ;;  %9269 = vst.msk [vmem:[#allocation2 + $0x170] sm:$0xff] %vm290_vm0, %v9012_v7  ;;  %v7078_v32 = vpop.f32.mrb[96].mxu1  ;;  %v14131_v24 = vld [vmem:[%s14921_s14 + $0xa04] ss:$24 sps:$4 sm:$0xff]  }
 0x4ae   : > { %v9527_v40 = vld [vmem:[#allocation2 + $0x168] sm:$0xff]  ;;  %v8135_v0 = vpop.f32.mrb[96].mxu0  ;;  %11588 = vst.msk [vmem:[%s16578_s15 + $0xac] sm:$0xf] %vm11544_vm1, %v13048_v27  ;;  %v7079_v37 = vadd.f32 %v7078_v32, %v18779_v58  ;;  %v7080_v11 = vpop.f32.mrb[97].mxu1 }
 0x4af   : > { %v10052_v54 = vadd.f32 %v16788_v63, %v9789_v46  ;;  %v9790_v51 = vmul.f32 %v16780_v29, %v9527_v40  ;;  %9270 = vst.msk [vmem:[#allocation2 + $0x178] sm:$0xff] %vm290_vm0, %v9013_v52  ;;  %v8137_v41 = vpop.f32.mrb[97].mxu0  ;;  %v7081_v26 = vpop.f32.mrb[98].mxu1 }
 0x4b0   : > { %v8138_v47 = vpop.f32.mrb[98].mxu0  ;;  %v8136_v36 = vadd.f32 %v8135_v0, %v7079_v37  ;;  %v7082_v21 = vadd.f32 %v7081_v26, %v18780_v38  ;;  %v7083_v18 = vpop.f32.mrb[99].mxu1  ;;  %v599_v41 = vld [vmem:[#allocation2 + $0x1a0] sm:$0xff] }
 0x4b1   : > { %v10308_v30 = vmax.f32 %v10052_v54, 0.0  ;;  %v10053_v42 = vadd.f32 %v16788_v63, %v9790_v51  ;;  %v8140_v6 = vpop.f32.mrb[99].mxu0  ;;  %v14126_v51 = vld [vmem:[%s14921_s14 + $0x9f8] ss:$24 sps:$4 sm:$0xff]  }
 0x4b2   : > { %v9014_v8 = vadd.f32 %v8136_v36, %v595_v48  ;;  %v8139_v28 = vadd.f32 %v8138_v47, %v7082_v21  ;;  %7293 = vmatmul.mubr.bf16.gmra.mrb[204].mxu1 %v14114_v17  ;;  %v18783_v48 = vld [vmem:[#allocation69_spill] sm:$0xff]  ;;  %v18784_v18 = vld [vmem:[#allocation71_spill] sm:$0xff] }
 0x4b3   : > { %v13049_v14 = vpack.c.bf16 %v10308_v30, %v10308_v30  ;;  %v10309_v55 = vmax.f32 %v10053_v42, 0.0  ;;  %8350 = vmatmul.mubr.bf16.gmra.mrb[204].mxu0 %v14117_v50  ;;  %7300 = vmatprep.mubr.bf16.mxu1 %v14122_v9  ;;  %v14129_v47 = vld [vmem:[%s14921_s14 + $0xa00] ss:$24 sps:$4 sm:$0xff]   ;;  %v14134_v30 = vld [vmem:[%s14921_s14 + $0xa2c] ss:$24 sps:$4 sm:$0xff]  }
 0x4b4   : > { %v9528_v1 = vld [vmem:[#allocation2 + $0x170] sm:$0xff]  ;;  %8357 = vmatprep.mubr.bf16.mxu0 %v14125_v56  ;;  %9271 = vst.msk [vmem:[#allocation2 + $0x180] sm:$0xff] %vm290_vm0, %v9014_v8  ;;  %v9015_v22 = vadd.f32 %v8139_v28, %v596_v53 }
 0x4b5   : > { %11589 = vst.msk [vmem:[%s16578_s15 + $0xb0] sm:$0xf] %vm11544_vm1, %v13049_v14  ;;  %v13050_v39 = vpack.c.bf16 %v10309_v55, %v10309_v55  ;;  %v9791_v43 = vmul.f32 %v16780_v29, %v9528_v1  ;;  %v7086_v3 = vpop.f32.mrb[100].mxu1  ;;  %v14137_v42 = vld [vmem:[%s14921_s14 + $0xa34] ss:$24 sps:$4 sm:$0xff]  }
 0x4b6   : > { %v9529_v25 = vld [vmem:[#allocation2 + $0x178] sm:$0xff]  ;;  %v8143_v10 = vpop.f32.mrb[100].mxu0  ;;  %9272 = vst.msk [vmem:[#allocation2 + $0x188] sm:$0xff] %vm290_vm0, %v9015_v22  ;;  %v7087_v19 = vadd.f32 %v7086_v3, %v18781_v2  ;;  %v7088_v4 = vpop.f32.mrb[101].mxu1  ;;  %v600_v55 = vld [vmem:[#allocation2 + $0x1a8] sm:$0xff] }
 0x4b7   : > { %11590 = vst.msk [vmem:[%s16578_s15 + $0xb4] sm:$0xf] %vm11544_vm1, %v13050_v39  ;;  %v10054_v49 = vadd.f32 %v16788_v63, %v9791_v43  ;;  %v9792_v61 = vmul.f32 %v16780_v29, %v9529_v25  ;;  %v8145_v15 = vpop.f32.mrb[101].mxu0  ;;  %v7089_v60 = vpop.f32.mrb[102].mxu1 }
 0x4b8   : > { %v8146_v62 = vpop.f32.mrb[102].mxu0  ;;  %v8144_v45 = vadd.f32 %v8143_v10, %v7087_v19  ;;  %v7090_v44 = vadd.f32 %v7089_v60, %v18782_v13  ;;  %v7091_v57 = vpop.f32.mrb[103].mxu1  ;;  %v601_v15 = vld [vmem:[#allocation2 + $0x1b0] sm:$0xff] }
 0x4b9   : > { %v10310_v34 = vmax.f32 %v10054_v49, 0.0  ;;  %v10055_v35 = vadd.f32 %v16788_v63, %v9792_v61  ;;  %v8148_v31 = vpop.f32.mrb[103].mxu0  ;;  %v14132_v61 = vld [vmem:[%s14921_s14 + $0xa28] ss:$24 sps:$4 sm:$0xff]   ;;  %v18786_v57 = vld [vmem:[#allocation75_spill] sm:$0xff] }
 0x4ba   : > { %v9016_v5 = vadd.f32 %v8144_v45, %v597_v12  ;;  %v8147_v27 = vadd.f32 %v8146_v62, %v7090_v44  ;;  %7301 = vmatmul.mubr.bf16.gmra.mrb[208].mxu1 %v14120_v59  ;;  %v18785_v12 = vld [vmem:[#allocation73_spill] sm:$0xff]  ;;  %v14135_v62 = vld [vmem:[%s14921_s14 + $0xa30] ss:$24 sps:$4 sm:$0xff]  }
 0x4bb   : > { %v13051_v7 = vpack.c.bf16 %v10310_v34, %v10310_v34  ;;  %v10311_v16 = vmax.f32 %v10055_v35, 0.0  ;;  %8358 = vmatmul.mubr.bf16.gmra.mrb[208].mxu0 %v14123_v33  ;;  %v9530_v46 = vld [vmem:[#allocation2 + $0x180] sm:$0xff]  ;;  %7308 = vmatprep.mubr.bf16.mxu1 %v14128_v23  ;;  %v14140_v34 = vld [vmem:[%s14921_s14 + $0xa5c] ss:$24 sps:$4 sm:$0xff]  }
 0x4bc   : > { %8365 = vmatprep.mubr.bf16.mxu0 %v14131_v24  ;;  %v9793_v40 = vmul.f32 %v16780_v29, %v9530_v46  ;;  %9273 = vst.msk [vmem:[#allocation2 + $0x190] sm:$0xff] %vm290_vm0, %v9016_v5  ;;  %v9017_v32 = vadd.f32 %v8147_v27, %v598_v20  ;;  %v14143_v35 = vld [vmem:[%s14921_s14 + $0xa64] ss:$24 sps:$4 sm:$0xff]  }
 0x4bd   : > { %11591 = vst.msk [vmem:[%s16578_s15 + $0xb8] sm:$0xf] %vm11544_vm1, %v13051_v7  ;;  %v13052_v52 = vpack.c.bf16 %v10311_v16, %v10311_v16  ;;  %v9531_v0 = vld [vmem:[#allocation2 + $0x188] sm:$0xff]  ;;  %v7094_v17 = vpop.f32.mrb[104].mxu1  ;;  %v602_v16 = vld [vmem:[#allocation2 + $0x1b8] sm:$0xff] }
 0x4be   : > { %v8151_v54 = vpop.f32.mrb[104].mxu0  ;;  %v10056_v58 = vadd.f32 %v16788_v63, %v9793_v40  ;;  %v9794_v37 = vmul.f32 %v16780_v29, %v9531_v0  ;;  %9274 = vst.msk [vmem:[#allocation2 + $0x198] sm:$0xff] %vm290_vm0, %v9017_v32  ;;  %v7095_v11 = vadd.f32 %v7094_v17, %v18783_v48  ;;  %v7096_v50 = vpop.f32.mrb[105].mxu1 }
 0x4bf   : > { %11592 = vst.msk [vmem:[%s16578_s15 + $0xbc] sm:$0xf] %vm11544_vm1, %v13052_v52  ;;  %v8153_v26 = vpop.f32.mrb[105].mxu0  ;;  %v7097_v9 = vpop.f32.mrb[106].mxu1 }
 0x4c0   : > { %v8154_v56 = vpop.f32.mrb[106].mxu0  ;;  %v10312_v36 = vmax.f32 %v10056_v58, 0.0  ;;  %v10057_v38 = vadd.f32 %v16788_v63, %v9794_v37  ;;  %v8152_v21 = vadd.f32 %v8151_v54, %v7095_v11  ;;  %v7098_v6 = vadd.f32 %v7097_v9, %v18784_v18  ;;  %v7099_v53 = vpop.f32.mrb[107].mxu1  ;;  %v14138_v37 = vld [vmem:[%s14921_s14 + $0xa58] ss:$24 sps:$4 sm:$0xff]   ;;  %v603_v26 = vld [vmem:[#allocation2 + $0x1c0] sm:$0xff] }
 0x4c1   : > { %v8156_v14 = vpop.f32.mrb[107].mxu0  ;;  %v18788_v53 = vld [vmem:[#allocation79_spill] sm:$0xff] }
 0x4c2   : > { %v13053_v8 = vpack.c.bf16 %v10312_v36, %v10312_v36  ;;  %v10313_v28 = vmax.f32 %v10057_v38, 0.0  ;;  %v9018_v1 = vadd.f32 %v8152_v21, %v599_v41  ;;  %v8155_v39 = vadd.f32 %v8154_v56, %v7098_v6  ;;  %7309 = vmatmul.mubr.bf16.gmra.mrb[212].mxu1 %v14126_v51  ;;  %v18787_v41 = vld [vmem:[#allocation77_spill] sm:$0xff]  ;;  %v14146_v36 = vld [vmem:[%s14921_s14 + $0xa8c] ss:$24 sps:$4 sm:$0xff]  }
 0x4c3   : > { %8366 = vmatmul.mubr.bf16.gmra.mrb[212].mxu0 %v14129_v47  ;;  %v9532_v43 = vld [vmem:[#allocation2 + $0x190] sm:$0xff]  ;;  %7316 = vmatprep.mubr.bf16.mxu1 %v14134_v30  ;;  %v14141_v56 = vld [vmem:[%s14921_s14 + $0xa60] ss:$24 sps:$4 sm:$0xff]  }
 0x4c4   : > { %8373 = vmatprep.mubr.bf16.mxu0 %v14137_v42  ;;  %11593 = vst.msk [vmem:[%s16578_s15 + $0xc0] sm:$0xf] %vm11544_vm1, %v13053_v8  ;;  %v13054_v22 = vpack.c.bf16 %v10313_v28, %v10313_v28  ;;  %v9795_v25 = vmul.f32 %v16780_v29, %v9532_v43  ;;  %v9019_v3 = vadd.f32 %v8155_v39, %v600_v55  ;;  %v14149_v38 = vld [vmem:[%s14921_s14 + $0xa94] ss:$24 sps:$4 sm:$0xff]  }
 0x4c5   : > { %9275 = vst.msk [vmem:[#allocation2 + $0x1a0] sm:$0xff] %vm290_vm0, %v9018_v1  ;;  %v9533_v10 = vld [vmem:[#allocation2 + $0x198] sm:$0xff]  ;;  %v7102_v59 = vpop.f32.mrb[108].mxu1  ;;  %v604_v8 = vld [vmem:[#allocation2 + $0x1c8] sm:$0xff] }
 0x4c6   : > { %v8159_v49 = vpop.f32.mrb[108].mxu0  ;;  %11594 = vst.msk [vmem:[%s16578_s15 + $0xc4] sm:$0xf] %vm11544_vm1, %v13054_v22  ;;  %v10058_v2 = vadd.f32 %v16788_v63, %v9795_v25  ;;  %v9796_v19 = vmul.f32 %v16780_v29, %v9533_v10  ;;  %v7103_v4 = vadd.f32 %v7102_v59, %v18785_v12  ;;  %v7104_v33 = vpop.f32.mrb[109].mxu1  ;;  %v17002_v25 = vld [vmem:[#allocation5] ss:$0 sm:$0xff] }
 0x4c7   : > { %9276 = vst.msk [vmem:[#allocation2 + $0x1a8] sm:$0xff] %vm290_vm0, %v9019_v3  ;;  %v8161_v60 = vpop.f32.mrb[109].mxu0  ;;  %v7105_v23 = vpop.f32.mrb[110].mxu1 }
 0x4c8   : > { %v8162_v24 = vpop.f32.mrb[110].mxu0  ;;  %v10314_v45 = vmax.f32 %v10058_v2, 0.0  ;;  %v10059_v13 = vadd.f32 %v16788_v63, %v9796_v19  ;;  %v8160_v44 = vadd.f32 %v8159_v49, %v7103_v4  ;;  %v7106_v31 = vadd.f32 %v7105_v23, %v18786_v57  ;;  %v7107_v20 = vpop.f32.mrb[111].mxu1  ;;  %v14144_v2 = vld [vmem:[%s14921_s14 + $0xa88] ss:$24 sps:$4 sm:$0xff]   ;;  %v605_v60 = vld [vmem:[#allocation2 + $0x1d0] sm:$0xff] }
 0x4c9   : > { %v8164_v7 = vpop.f32.mrb[111].mxu0  ;;  %v17009_v19 = vld [vmem:[#allocation7] ss:$0 sm:$0xff]  ;;  %v18790_v20 = vld [vmem:[#allocation83_spill] sm:$0xff] }
 0x4ca   : > { %v13055_v5 = vpack.c.bf16 %v10314_v45, %v10314_v45  ;;  %v10315_v27 = vmax.f32 %v10059_v13, 0.0  ;;  %v9020_v46 = vadd.f32 %v8160_v44, %v601_v15  ;;  %v8163_v52 = vadd.f32 %v8162_v24, %v7106_v31  ;;  %7317 = vmatmul.mubr.bf16.gmra.mrb[216].mxu1 %v14132_v61  ;;  %v18789_v15 = vld [vmem:[#allocation81_spill] sm:$0xff]  ;;  %v14147_v24 = vld [vmem:[%s14921_s14 + $0xa90] ss:$24 sps:$4 sm:$0xff]  }
 0x4cb   : > { %8374 = vmatmul.mubr.bf16.gmra.mrb[216].mxu0 %v14135_v62  ;;  %7324 = vmatprep.mubr.bf16.mxu1 %v14140_v34  ;;  %v14152_v45 = vld [vmem:[%s14921_s14 + $0xabc] ss:$24 sps:$4 sm:$0xff]  }
 0x4cc   : > { %v9534_v40 = vld [vmem:[#allocation2 + $0x1a0] sm:$0xff]  ;;  %8381 = vmatprep.mubr.bf16.mxu0 %v14143_v35  ;;  %11595 = vst.msk [vmem:[%s16578_s15 + $0xc8] sm:$0xf] %vm11544_vm1, %v13055_v5  ;;  %v13056_v32 = vpack.c.bf16 %v10315_v27, %v10315_v27  ;;  %v9021_v17 = vadd.f32 %v8163_v52, %v602_v16  ;;  %v606_v27 = vld [vmem:[#allocation2 + $0x1d8] sm:$0xff] }
 0x4cd   : > { %v9797_v0 = vmul.f32 %v16780_v29, %v9534_v40  ;;  %9277 = vst.msk [vmem:[#allocation2 + $0x1b0] sm:$0xff] %vm290_vm0, %v9020_v46  ;;  %v7110_v51 = vpop.f32.mrb[112].mxu1  ;;  %v14155_v13 = vld [vmem:[%s14921_s14 + $0xac4] ss:$24 sps:$4 sm:$0xff]  }
 0x4ce   : > { %v9535_v54 = vld [vmem:[#allocation2 + $0x1a8] sm:$0xff]  ;;  %v8167_v58 = vpop.f32.mrb[112].mxu0  ;;  %11596 = vst.msk [vmem:[%s16578_s15 + $0xcc] sm:$0xf] %vm11544_vm1, %v13056_v32  ;;  %v7111_v50 = vadd.f32 %v7110_v51, %v18787_v41  ;;  %v7112_v47 = vpop.f32.mrb[113].mxu1 }
 0x4cf   : > { %v10060_v48 = vadd.f32 %v16788_v63, %v9797_v0  ;;  %v9798_v11 = vmul.f32 %v16780_v29, %v9535_v54  ;;  %9278 = vst.msk [vmem:[#allocation2 + $0x1b8] sm:$0xff] %vm290_vm0, %v9021_v17  ;;  %v8169_v9 = vpop.f32.mrb[113].mxu0  ;;  %v7113_v30 = vpop.f32.mrb[114].mxu1 }
 0x4d0   : > { %v8170_v42 = vpop.f32.mrb[114].mxu0  ;;  %v8168_v6 = vadd.f32 %v8167_v58, %v7111_v50  ;;  %v7114_v14 = vadd.f32 %v7113_v30, %v18788_v53  ;;  %v7115_v29 = vpop.f32.mrb[115].mxu1  ;;  %v607_v9 = vld [vmem:[#allocation2 + $0x1e0] sm:$0xff] }
 0x4d1   : > { %v10316_v21 = vmax.f32 %v10060_v48, 0.0  ;;  %v10061_v18 = vadd.f32 %v16788_v63, %v9798_v11  ;;  %v8172_v55 = vpop.f32.mrb[115].mxu0  ;;  %v14150_v11 = vld [vmem:[%s14921_s14 + $0xab8] ss:$24 sps:$4 sm:$0xff]  }
 0x4d2   : > { %v9022_v39 = vadd.f32 %v8168_v6, %v603_v26  ;;  %v8171_v43 = vadd.f32 %v8170_v42, %v7114_v14  ;;  %7325 = vmatmul.mubr.bf16.gmra.mrb[220].mxu1 %v14138_v37  ;;  %v18791_v26 = vld [vmem:[#allocation85_spill] sm:$0xff]  ;;  %v18792_v29 = vld [vmem:[#allocation87_spill] sm:$0xff] }
 0x4d3   : > { %v13057_v28 = vpack.c.bf16 %v10316_v21, %v10316_v21  ;;  %v10317_v1 = vmax.f32 %v10061_v18, 0.0  ;;  %8382 = vmatmul.mubr.bf16.gmra.mrb[220].mxu0 %v14141_v56  ;;  %7332 = vmatprep.mubr.bf16.mxu1 %v14146_v36  ;;  %v14153_v42 = vld [vmem:[%s14921_s14 + $0xac0] ss:$24 sps:$4 sm:$0xff]   ;;  %v14158_v21 = vld [vmem:[%s14921_s14 + $0xaec] ss:$24 sps:$4 sm:$0xff]  }
 0x4d4   : > { %v9536_v22 = vld [vmem:[#allocation2 + $0x1b0] sm:$0xff]  ;;  %8389 = vmatprep.mubr.bf16.mxu0 %v14149_v38  ;;  %9279 = vst.msk [vmem:[#allocation2 + $0x1c0] sm:$0xff] %vm290_vm0, %v9022_v39  ;;  %v9023_v10 = vadd.f32 %v8171_v43, %v604_v8 }
 0x4d5   : > { %11597 = vst.msk [vmem:[%s16578_s15 + $0xd0] sm:$0xf] %vm11544_vm1, %v13057_v28  ;;  %v13058_v63 = vpack.c.bf16 %v10317_v1, %v10317_v1  ;;  %v9799_v3 = vmul.f32 %v17002_v25, %v9536_v22  ;;  %v7118_v49 = vpop.f32.mrb[116].mxu1  ;;  %v14161_v18 = vld [vmem:[%s14921_s14 + $0xaf4] ss:$24 sps:$4 sm:$0xff]  }
 0x4d6   : > { %v9537_v59 = vld [vmem:[#allocation2 + $0x1b8] sm:$0xff]  ;;  %v8175_v61 = vpop.f32.mrb[116].mxu0  ;;  %9280 = vst.msk [vmem:[#allocation2 + $0x1c8] sm:$0xff] %vm290_vm0, %v9023_v10  ;;  %v7119_v33 = vadd.f32 %v7118_v49, %v18789_v15  ;;  %v7120_v62 = vpop.f32.mrb[117].mxu1  ;;  %v608_v1 = vld [vmem:[#allocation2 + $0x1e8] sm:$0xff] }
 0x4d7   : > { %11598 = vst.msk [vmem:[%s16578_s15 + $0xd4] sm:$0xf] %vm11544_vm1, %v13058_v63  ;;  %v10062_v12 = vadd.f32 %v17009_v19, %v9799_v3  ;;  %v9800_v4 = vmul.f32 %v17002_v25, %v9537_v59  ;;  %v8177_v23 = vpop.f32.mrb[117].mxu0  ;;  %v7121_v34 = vpop.f32.mrb[118].mxu1 }
 0x4d8   : > { %v8178_v35 = vpop.f32.mrb[118].mxu0  ;;  %v8176_v31 = vadd.f32 %v8175_v61, %v7119_v33  ;;  %v7122_v7 = vadd.f32 %v7121_v34, %v18790_v20  ;;  %v7123_v16 = vpop.f32.mrb[119].mxu1  ;;  %v609_v23 = vld [vmem:[#allocation2 + $0x1f0] sm:$0xff] }
 0x4d9   : > { %v10318_v44 = vmax.f32 %v10062_v12, 0.0  ;;  %v10063_v57 = vadd.f32 %v17009_v19, %v9800_v4  ;;  %v8180_v5 = vpop.f32.mrb[119].mxu0  ;;  %v14156_v4 = vld [vmem:[%s14921_s14 + $0xae8] ss:$24 sps:$4 sm:$0xff]   ;;  %v18794_v16 = vld [vmem:[#allocation91_spill] sm:$0xff] }
 0x4da   : > { %v9024_v40 = vadd.f32 %v8176_v31, %v605_v60  ;;  %v8179_v32 = vadd.f32 %v8178_v35, %v7122_v7  ;;  %7333 = vmatmul.mubr.bf16.gmra.mrb[224].mxu1 %v14144_v2  ;;  %v18793_v60 = vld [vmem:[#allocation89_spill] sm:$0xff]  ;;  %v14159_v35 = vld [vmem:[%s14921_s14 + $0xaf0] ss:$24 sps:$4 sm:$0xff]  }
 0x4db   : > { %v13059_v46 = vpack.c.bf16 %v10318_v44, %v10318_v44  ;;  %v10319_v52 = vmax.f32 %v10063_v57, 0.0  ;;  %8390 = vmatmul.mubr.bf16.gmra.mrb[224].mxu0 %v14147_v24  ;;  %v9538_v0 = vld [vmem:[#allocation2 + $0x1c0] sm:$0xff]  ;;  %7340 = vmatprep.mubr.bf16.mxu1 %v14152_v45  ;;  %v14164_v44 = vld [vmem:[%s14921_s14 + $0xb1c] ss:$24 sps:$4 sm:$0xff]  }
 0x4dc   : > { %8397 = vmatprep.mubr.bf16.mxu0 %v14155_v13  ;;  %v9801_v54 = vmul.f32 %v17002_v25, %v9538_v0  ;;  %9281 = vst.msk [vmem:[#allocation2 + $0x1d0] sm:$0xff] %vm290_vm0, %v9024_v40  ;;  %v9025_v51 = vadd.f32 %v8179_v32, %v606_v27  ;;  %v14167_v57 = vld [vmem:[%s14921_s14 + $0xb24] ss:$24 sps:$4 sm:$0xff]  }
 0x4dd   : > { %11599 = vst.msk [vmem:[%s16578_s15 + $0xd8] sm:$0xf] %vm11544_vm1, %v13059_v46  ;;  %v13060_v17 = vpack.c.bf16 %v10319_v52, %v10319_v52  ;;  %v9539_v58 = vld [vmem:[#allocation2 + $0x1c8] sm:$0xff]  ;;  %v7126_v37 = vpop.f32.mrb[120].mxu1  ;;  %v610_v52 = vld [vmem:[#allocation2 + $0x1f8] sm:$0xff] }
 0x4de   : > { %v8183_v48 = vpop.f32.mrb[120].mxu0  ;;  %v10064_v41 = vadd.f32 %v17009_v19, %v9801_v54  ;;  %v9802_v50 = vmul.f32 %v17002_v25, %v9539_v58  ;;  %9282 = vst.msk [vmem:[#allocation2 + $0x1d8] sm:$0xff] %vm290_vm0, %v9025_v51  ;;  %v7127_v47 = vadd.f32 %v7126_v37, %v18791_v26  ;;  %v7128_v56 = vpop.f32.mrb[121].mxu1 }
 0x4df   : > { %11600 = vst.msk [vmem:[%s16578_s15 + $0xdc] sm:$0xf] %vm11544_vm1, %v13060_v17  ;;  %v8185_v30 = vpop.f32.mrb[121].mxu0  ;;  %v7129_v36 = vpop.f32.mrb[122].mxu1 }
 0x4e0   : > { %v8186_v38 = vpop.f32.mrb[122].mxu0  ;;  %v10320_v6 = vmax.f32 %v10064_v41, 0.0  ;;  %v10065_v53 = vadd.f32 %v17009_v19, %v9802_v50  ;;  %v8184_v14 = vadd.f32 %v8183_v48, %v7127_v47  ;;  %v7130_v55 = vadd.f32 %v7129_v36, %v18792_v29  ;;  %v7131_v8 = vpop.f32.mrb[123].mxu1  ;;  %v14162_v50 = vld [vmem:[%s14921_s14 + $0xb18] ss:$24 sps:$4 sm:$0xff]   ;;  %v611_v30 = vld [vmem:[#allocation2 + $0x200] sm:$0xff] }
 0x4e1   : > { %v8188_v28 = vpop.f32.mrb[123].mxu0  ;;  %v18796_v8 = vld [vmem:[#allocation95_spill] sm:$0xff] }
 0x4e2   : > { %v13061_v39 = vpack.c.bf16 %v10320_v6, %v10320_v6  ;;  %v10321_v43 = vmax.f32 %v10065_v53, 0.0  ;;  %v9026_v22 = vadd.f32 %v8184_v14, %v607_v9  ;;  %v8187_v63 = vadd.f32 %v8186_v38, %v7130_v55  ;;  %7341 = vmatmul.mubr.bf16.gmra.mrb[228].mxu1 %v14150_v11  ;;  %v18795_v9 = vld [vmem:[#allocation93_spill] sm:$0xff]  ;;  %v14170_v6 = vld [vmem:[%s14921_s14 + $0xb4c] ss:$24 sps:$4 sm:$0xff]  }
 0x4e3   : > { %8398 = vmatmul.mubr.bf16.gmra.mrb[228].mxu0 %v14153_v42  ;;  %v9540_v3 = vld [vmem:[#allocation2 + $0x1d0] sm:$0xff]  ;;  %7348 = vmatprep.mubr.bf16.mxu1 %v14158_v21  ;;  %v14165_v38 = vld [vmem:[%s14921_s14 + $0xb20] ss:$24 sps:$4 sm:$0xff]  }
 0x4e4   : > { %8405 = vmatprep.mubr.bf16.mxu0 %v14161_v18  ;;  %11601 = vst.msk [vmem:[%s16578_s15 + $0xe0] sm:$0xf] %vm11544_vm1, %v13061_v39  ;;  %v13062_v10 = vpack.c.bf16 %v10321_v43, %v10321_v43  ;;  %v9803_v59 = vmul.f32 %v17002_v25, %v9540_v3  ;;  %v9027_v49 = vadd.f32 %v8187_v63, %v608_v1  ;;  %v14173_v53 = vld [vmem:[%s14921_s14 + $0xb54] ss:$24 sps:$4 sm:$0xff]  }
 0x4e5   : > { %9283 = vst.msk [vmem:[#allocation2 + $0x1e0] sm:$0xff] %vm290_vm0, %v9026_v22  ;;  %v9541_v61 = vld [vmem:[#allocation2 + $0x1d8] sm:$0xff]  ;;  %v7134_v2 = vpop.f32.mrb[124].mxu1  ;;  %v612_v43 = vld [vmem:[#allocation2 + $0x208] sm:$0xff] }
 0x4e6   : > { %v8191_v12 = vpop.f32.mrb[124].mxu0  ;;  %11602 = vst.msk [vmem:[%s16578_s15 + $0xe4] sm:$0xf] %vm11544_vm1, %v13062_v10  ;;  %v10066_v15 = vadd.f32 %v17009_v19, %v9803_v59  ;;  %v9804_v33 = vmul.f32 %v17002_v25, %v9541_v61  ;;  %v7135_v62 = vadd.f32 %v7134_v2, %v18793_v60  ;;  %v7136_v24 = vpop.f32.mrb[125].mxu1 }
 0x4e7   : > { %9284 = vst.msk [vmem:[#allocation2 + $0x1e8] sm:$0xff] %vm290_vm0, %v9027_v49  ;;  %v8193_v34 = vpop.f32.mrb[125].mxu0  ;;  %v7137_v45 = vpop.f32.mrb[126].mxu1 }
 0x4e8   : > { %v8194_v13 = vpop.f32.mrb[126].mxu0  ;;  %v10322_v31 = vmax.f32 %v10066_v15, 0.0  ;;  %v10067_v20 = vadd.f32 %v17009_v19, %v9804_v33  ;;  %v8192_v7 = vadd.f32 %v8191_v12, %v7135_v62  ;;  %v7138_v5 = vadd.f32 %v7137_v45, %v18794_v16  ;;  %v7139_v27 = vpop.f32.mrb[127].mxu1  ;;  %v14168_v33 = vld [vmem:[%s14921_s14 + $0xb48] ss:$24 sps:$4 sm:$0xff]   ;;  %v613_v34 = vld [vmem:[#allocation2 + $0x210] sm:$0xff] }
 0x4e9   : > { %v8196_v46 = vpop.f32.mrb[127].mxu0  ;;  %v18798_v27 = vld [vmem:[#allocation99_spill] sm:$0xff] }
 0x4ea   : > { %v13063_v40 = vpack.c.bf16 %v10322_v31, %v10322_v31  ;;  %v10323_v32 = vmax.f32 %v10067_v20, 0.0  ;;  %v9028_v0 = vadd.f32 %v8192_v7, %v609_v23  ;;  %v8195_v17 = vadd.f32 %v8194_v13, %v7138_v5  ;;  %7349 = vmatmul.mubr.bf16.gmra.mrb[232].mxu1 %v14156_v4  ;;  %v18797_v23 = vld [vmem:[#allocation97_spill] sm:$0xff]  ;;  %v14171_v13 = vld [vmem:[%s14921_s14 + $0xb50] ss:$24 sps:$4 sm:$0xff]  }
 0x4eb   : > { %8406 = vmatmul.mubr.bf16.gmra.mrb[232].mxu0 %v14159_v35  ;;  %7356 = vmatprep.mubr.bf16.mxu1 %v14164_v44  ;;  %v14176_v31 = vld [vmem:[%s14921_s14 + $0xb7c] ss:$24 sps:$4 sm:$0xff]  }
 0x4ec   : > { %v9542_v54 = vld [vmem:[#allocation2 + $0x1e0] sm:$0xff]  ;;  %8413 = vmatprep.mubr.bf16.mxu0 %v14167_v57  ;;  %11603 = vst.msk [vmem:[%s16578_s15 + $0xe8] sm:$0xf] %vm11544_vm1, %v13063_v40  ;;  %v13064_v51 = vpack.c.bf16 %v10323_v32, %v10323_v32  ;;  %v9029_v37 = vadd.f32 %v8195_v17, %v610_v52  ;;  %v614_v32 = vld [vmem:[#allocation2 + $0x218] sm:$0xff] }
 0x4ed   : > { %v9805_v58 = vmul.f32 %v17002_v25, %v9542_v54  ;;  %9285 = vst.msk [vmem:[#allocation2 + $0x1f0] sm:$0xff] %vm290_vm0, %v9028_v0  ;;  %v7142_v11 = vpop.f32.mrb[128].mxu1  ;;  %v14179_v20 = vld [vmem:[%s14921_s14 + $0xb84] ss:$24 sps:$4 sm:$0xff]  }
 0x4ee   : > { %v9543_v48 = vld [vmem:[#allocation2 + $0x1e8] sm:$0xff]  ;;  %v8199_v41 = vpop.f32.mrb[128].mxu0  ;;  %11604 = vst.msk [vmem:[%s16578_s15 + $0xec] sm:$0xf] %vm11544_vm1, %v13064_v51  ;;  %v7143_v56 = vadd.f32 %v7142_v11, %v18795_v9  ;;  %v7144_v42 = vpop.f32.mrb[129].mxu1 }
 0x4ef   : > { %v10068_v26 = vadd.f32 %v17009_v19, %v9805_v58  ;;  %v9806_v47 = vmul.f32 %v17002_v25, %v9543_v48  ;;  %9286 = vst.msk [vmem:[#allocation2 + $0x1f8] sm:$0xff] %vm290_vm0, %v9029_v37  ;;  %v8201_v36 = vpop.f32.mrb[129].mxu0  ;;  %v7145_v21 = vpop.f32.mrb[130].mxu1 }
 0x4f0   : > { %v8202_v18 = vpop.f32.mrb[130].mxu0  ;;  %v8200_v55 = vadd.f32 %v8199_v41, %v7143_v56  ;;  %v7146_v28 = vadd.f32 %v7145_v21, %v18796_v8  ;;  %v7147_v1 = vpop.f32.mrb[131].mxu1  ;;  %v615_v36 = vld [vmem:[#allocation2 + $0x220] sm:$0xff] }
 0x4f1   : > { %v10324_v14 = vmax.f32 %v10068_v26, 0.0  ;;  %v10069_v29 = vadd.f32 %v17009_v19, %v9806_v47  ;;  %v8204_v39 = vpop.f32.mrb[131].mxu0  ;;  %v14174_v47 = vld [vmem:[%s14921_s14 + $0xb78] ss:$24 sps:$4 sm:$0xff]  }
 0x4f2   : > { %v9030_v3 = vadd.f32 %v8200_v55, %v611_v30  ;;  %v8203_v10 = vadd.f32 %v8202_v18, %v7146_v28  ;;  %7357 = vmatmul.mubr.bf16.gmra.mrb[236].mxu1 %v14162_v50  ;;  %v18799_v30 = vld [vmem:[#allocation101_spill] sm:$0xff]  ;;  %v18800_v1 = vld [vmem:[#allocation103_spill] sm:$0xff] }
 0x4f3   : > { %v13065_v22 = vpack.c.bf16 %v10324_v14, %v10324_v14  ;;  %v10325_v63 = vmax.f32 %v10069_v29, 0.0  ;;  %8414 = vmatmul.mubr.bf16.gmra.mrb[236].mxu0 %v14165_v38  ;;  %7364 = vmatprep.mubr.bf16.mxu1 %v14170_v6  ;;  %v14177_v18 = vld [vmem:[%s14921_s14 + $0xb80] ss:$24 sps:$4 sm:$0xff]   ;;  %v14182_v14 = vld [vmem:[%s14921_s14 + $0xbac] ss:$24 sps:$4 sm:$0xff]  }
 0x4f4   : > { %v9544_v59 = vld [vmem:[#allocation2 + $0x1f0] sm:$0xff]  ;;  %8421 = vmatprep.mubr.bf16.mxu0 %v14173_v53  ;;  %9287 = vst.msk [vmem:[#allocation2 + $0x200] sm:$0xff] %vm290_vm0, %v9030_v3  ;;  %v9031_v2 = vadd.f32 %v8203_v10, %v612_v43 }
 0x4f5   : > { %11605 = vst.msk [vmem:[%s16578_s15 + $0xf0] sm:$0xf] %vm11544_vm1, %v13065_v22  ;;  %v13066_v49 = vpack.c.bf16 %v10325_v63, %v10325_v63  ;;  %v9807_v61 = vmul.f32 %v17002_v25, %v9544_v59  ;;  %v7150_v4 = vpop.f32.mrb[132].mxu1  ;;  %v14185_v29 = vld [vmem:[%s14921_s14 + $0xbb4] ss:$24 sps:$4 sm:$0xff]  }
 0x4f6   : > { %v9545_v12 = vld [vmem:[#allocation2 + $0x1f8] sm:$0xff]  ;;  %v8207_v15 = vpop.f32.mrb[132].mxu0  ;;  %9288 = vst.msk [vmem:[#allocation2 + $0x208] sm:$0xff] %vm290_vm0, %v9031_v2  ;;  %v7151_v24 = vadd.f32 %v7150_v4, %v18797_v23  ;;  %v7152_v35 = vpop.f32.mrb[133].mxu1  ;;  %v616_v63 = vld [vmem:[#allocation2 + $0x228] sm:$0xff] }
 0x4f7   : > { %11606 = vst.msk [vmem:[%s16578_s15 + $0xf4] sm:$0xf] %vm11544_vm1, %v13066_v49  ;;  %v10070_v60 = vadd.f32 %v17009_v19, %v9807_v61  ;;  %v9808_v62 = vmul.f32 %v17002_v25, %v9545_v12  ;;  %v8209_v45 = vpop.f32.mrb[133].mxu0  ;;  %v7153_v44 = vpop.f32.mrb[134].mxu1 }
 0x4f8   : > { %v8210_v57 = vpop.f32.mrb[134].mxu0  ;;  %v8208_v5 = vadd.f32 %v8207_v15, %v7151_v24  ;;  %v7154_v46 = vadd.f32 %v7153_v44, %v18798_v27  ;;  %v7155_v52 = vpop.f32.mrb[135].mxu1  ;;  %v617_v45 = vld [vmem:[#allocation2 + $0x230] sm:$0xff] }
 0x4f9   : > { %v10326_v7 = vmax.f32 %v10070_v60, 0.0  ;;  %v10071_v16 = vadd.f32 %v17009_v19, %v9808_v62  ;;  %v8212_v40 = vpop.f32.mrb[135].mxu0  ;;  %v14180_v62 = vld [vmem:[%s14921_s14 + $0xba8] ss:$24 sps:$4 sm:$0xff]   ;;  %v18802_v52 = vld [vmem:[#allocation107_spill] sm:$0xff] }
 0x4fa   : > { %v9032_v54 = vadd.f32 %v8208_v5, %v613_v34  ;;  %v8211_v51 = vadd.f32 %v8210_v57, %v7154_v46  ;;  %7365 = vmatmul.mubr.bf16.gmra.mrb[240].mxu1 %v14168_v33  ;;  %v18801_v34 = vld [vmem:[#allocation105_spill] sm:$0xff]  ;;  %v14183_v57 = vld [vmem:[%s14921_s14 + $0xbb0] ss:$24 sps:$4 sm:$0xff]  }
 0x4fb   : > { %v13067_v0 = vpack.c.bf16 %v10326_v7, %v10326_v7  ;;  %v10327_v17 = vmax.f32 %v10071_v16, 0.0  ;;  %8422 = vmatmul.mubr.bf16.gmra.mrb[240].mxu0 %v14171_v13  ;;  %v9546_v58 = vld [vmem:[#allocation2 + $0x200] sm:$0xff]  ;;  %7372 = vmatprep.mubr.bf16.mxu1 %v14176_v31  ;;  %v14188_v7 = vld [vmem:[%s14921_s14 + $0xbdc] ss:$24 sps:$4 sm:$0xff]  }
 0x4fc   : > { %8429 = vmatprep.mubr.bf16.mxu0 %v14179_v20  ;;  %v9809_v48 = vmul.f32 %v17002_v25, %v9546_v58  ;;  %9289 = vst.msk [vmem:[#allocation2 + $0x210] sm:$0xff] %vm290_vm0, %v9032_v54  ;;  %v9033_v11 = vadd.f32 %v8211_v51, %v614_v32  ;;  %v14191_v16 = vld [vmem:[%s14921_s14 + $0xbe4] ss:$24 sps:$4 sm:$0xff]  }
 0x4fd   : > { %11607 = vst.msk [vmem:[%s16578_s15 + $0xf8] sm:$0xf] %vm11544_vm1, %v13067_v0  ;;  %v13068_v37 = vpack.c.bf16 %v10327_v17, %v10327_v17  ;;  %v9547_v41 = vld [vmem:[#allocation2 + $0x208] sm:$0xff]  ;;  %v7158_v50 = vpop.f32.mrb[136].mxu1  ;;  %v618_v17 = vld [vmem:[#allocation2 + $0x238] sm:$0xff] }
 0x4fe   : > { %v8215_v26 = vpop.f32.mrb[136].mxu0  ;;  %v10072_v9 = vadd.f32 %v17009_v19, %v9809_v48  ;;  %v9810_v56 = vmul.f32 %v17002_v25, %v9547_v41  ;;  %9290 = vst.msk [vmem:[#allocation2 + $0x218] sm:$0xff] %vm290_vm0, %v9033_v11  ;;  %v7159_v42 = vadd.f32 %v7158_v50, %v18799_v30  ;;  %v7160_v38 = vpop.f32.mrb[137].mxu1 }
 0x4ff   : > { %11608 = vst.msk [vmem:[%s16578_s15 + $0xfc] sm:$0xf] %vm11544_vm1, %v13068_v37  ;;  %v8217_v21 = vpop.f32.mrb[137].mxu0  ;;  %v7161_v6 = vpop.f32.mrb[138].mxu1 }
 0x500   : > { %v8218_v53 = vpop.f32.mrb[138].mxu0  ;;  %v10328_v55 = vmax.f32 %v10072_v9, 0.0  ;;  %v10073_v8 = vadd.f32 %v17009_v19, %v9810_v56  ;;  %v8216_v28 = vadd.f32 %v8215_v26, %v7159_v42  ;;  %v7162_v39 = vadd.f32 %v7161_v6, %v18800_v1  ;;  %v7163_v43 = vpop.f32.mrb[139].mxu1  ;;  %v14186_v56 = vld [vmem:[%s14921_s14 + $0xbd8] ss:$24 sps:$4 sm:$0xff]   ;;  %v619_v21 = vld [vmem:[#allocation2 + $0x240] sm:$0xff] }
 0x501   : > { %v8220_v22 = vpop.f32.mrb[139].mxu0  ;;  %v18804_v43 = vld [vmem:[#allocation111_spill] sm:$0xff] }
 0x502   : > { %v13069_v3 = vpack.c.bf16 %v10328_v55, %v10328_v55  ;;  %v10329_v10 = vmax.f32 %v10073_v8, 0.0  ;;  %v9034_v59 = vadd.f32 %v8216_v28, %v615_v36  ;;  %v8219_v49 = vadd.f32 %v8218_v53, %v7162_v39  ;;  %7373 = vmatmul.mubr.bf16.gmra.mrb[244].mxu1 %v14174_v47  ;;  %v18803_v36 = vld [vmem:[#allocation109_spill] sm:$0xff]  ;;  %v14194_v55 = vld [vmem:[%s14921_s14 + $0xc0c] ss:$24 sps:$4 sm:$0xff]  }
 0x503   : > { %8430 = vmatmul.mubr.bf16.gmra.mrb[244].mxu0 %v14177_v18  ;;  %v9548_v61 = vld [vmem:[#allocation2 + $0x210] sm:$0xff]  ;;  %7380 = vmatprep.mubr.bf16.mxu1 %v14182_v14  ;;  %v14189_v53 = vld [vmem:[%s14921_s14 + $0xbe0] ss:$24 sps:$4 sm:$0xff]  }
 0x504   : > { %8437 = vmatprep.mubr.bf16.mxu0 %v14185_v29  ;;  %11609 = vst.msk [vmem:[%s16578_s15 + $0x100] sm:$0xf] %vm11544_vm1, %v13069_v3  ;;  %v13070_v2 = vpack.c.bf16 %v10329_v10, %v10329_v10  ;;  %v9811_v12 = vmul.f32 %v17002_v25, %v9548_v61  ;;  %v9035_v4 = vadd.f32 %v8219_v49, %v616_v63  ;;  %v14197_v8 = vld [vmem:[%s14921_s14 + $0xc14] ss:$24 sps:$4 sm:$0xff]  }
 0x505   : > { %9291 = vst.msk [vmem:[#allocation2 + $0x220] sm:$0xff] %vm290_vm0, %v9034_v59  ;;  %v9549_v15 = vld [vmem:[#allocation2 + $0x218] sm:$0xff]  ;;  %v7166_v33 = vpop.f32.mrb[140].mxu1  ;;  %v620_v10 = vld [vmem:[#allocation2 + $0x248] sm:$0xff] }
 0x506   : > { %v8223_v60 = vpop.f32.mrb[140].mxu0  ;;  %11610 = vst.msk [vmem:[%s16578_s15 + $0x104] sm:$0xf] %vm11544_vm1, %v13070_v2  ;;  %v10074_v23 = vadd.f32 %v17009_v19, %v9811_v12  ;;  %v9812_v24 = vmul.f32 %v17002_v25, %v9549_v15  ;;  %v7167_v35 = vadd.f32 %v7166_v33, %v18801_v34  ;;  %v7168_v13 = vpop.f32.mrb[141].mxu1 }
 0x507   : > { %9292 = vst.msk [vmem:[#allocation2 + $0x228] sm:$0xff] %vm290_vm0, %v9035_v4  ;;  %v8225_v44 = vpop.f32.mrb[141].mxu0  ;;  %v7169_v31 = vpop.f32.mrb[142].mxu1 }
 0x508   : > { %v8226_v20 = vpop.f32.mrb[142].mxu0  ;;  %v10330_v5 = vmax.f32 %v10074_v23, 0.0  ;;  %v10075_v27 = vadd.f32 %v17009_v19, %v9812_v24  ;;  %v8224_v46 = vadd.f32 %v8223_v60, %v7167_v35  ;;  %v7170_v40 = vadd.f32 %v7169_v31, %v18802_v52  ;;  %v7171_v32 = vpop.f32.mrb[143].mxu1  ;;  %v14192_v24 = vld [vmem:[%s14921_s14 + $0xc08] ss:$24 sps:$4 sm:$0xff]   ;;  %v621_v44 = vld [vmem:[#allocation2 + $0x250] sm:$0xff] }
 0x509   : > { %v8228_v0 = vpop.f32.mrb[143].mxu0  ;;  %v18806_v32 = vld [vmem:[#allocation115_spill] sm:$0xff] }
 0x50a   : > { %v13071_v54 = vpack.c.bf16 %v10330_v5, %v10330_v5  ;;  %v10331_v51 = vmax.f32 %v10075_v27, 0.0  ;;  %v9036_v58 = vadd.f32 %v8224_v46, %v617_v45  ;;  %v8227_v37 = vadd.f32 %v8226_v20, %v7170_v40  ;;  %7381 = vmatmul.mubr.bf16.gmra.mrb[248].mxu1 %v14180_v62  ;;  %v18805_v45 = vld [vmem:[#allocation113_spill] sm:$0xff]  ;;  %v14195_v20 = vld [vmem:[%s14921_s14 + $0xc10] ss:$24 sps:$4 sm:$0xff]  }
 0x50b   : > { %8438 = vmatmul.mubr.bf16.gmra.mrb[248].mxu0 %v14183_v57  ;;  %7388 = vmatprep.mubr.bf16.mxu1 %v14188_v7  ;;  %v14200_v5 = vld [vmem:[%s14921_s14 + $0xc3c] ss:$24 sps:$4 sm:$0xff]  }
 0x50c   : > { %v9550_v48 = vld [vmem:[#allocation2 + $0x220] sm:$0xff]  ;;  %8445 = vmatprep.mubr.bf16.mxu0 %v14191_v16  ;;  %11611 = vst.msk [vmem:[%s16578_s15 + $0x108] sm:$0xf] %vm11544_vm1, %v13071_v54  ;;  %v13072_v11 = vpack.c.bf16 %v10331_v51, %v10331_v51  ;;  %v9037_v50 = vadd.f32 %v8227_v37, %v618_v17  ;;  %v622_v51 = vld [vmem:[#allocation2 + $0x258] sm:$0xff] }
 0x50d   : > { %v9813_v41 = vmul.f32 %v17002_v25, %v9550_v48  ;;  %9293 = vst.msk [vmem:[#allocation2 + $0x230] sm:$0xff] %vm290_vm0, %v9036_v58  ;;  %v7174_v47 = vpop.f32.mrb[144].mxu1  ;;  %v14203_v27 = vld [vmem:[%s14921_s14 + $0xc44] ss:$24 sps:$4 sm:$0xff]  }
 0x50e   : > { %v9551_v26 = vld [vmem:[#allocation2 + $0x228] sm:$0xff]  ;;  %v8231_v9 = vpop.f32.mrb[144].mxu0  ;;  %11612 = vst.msk [vmem:[%s16578_s15 + $0x10c] sm:$0xf] %vm11544_vm1, %v13072_v11  ;;  %v7175_v38 = vadd.f32 %v7174_v47, %v18803_v36  ;;  %v7176_v18 = vpop.f32.mrb[145].mxu1 }
 0x50f   : > { %v10076_v30 = vadd.f32 %v17009_v19, %v9813_v41  ;;  %v9814_v42 = vmul.f32 %v17002_v25, %v9551_v26  ;;  %9294 = vst.msk [vmem:[#allocation2 + $0x238] sm:$0xff] %vm290_vm0, %v9037_v50  ;;  %v8233_v6 = vpop.f32.mrb[145].mxu0  ;;  %v7177_v14 = vpop.f32.mrb[146].mxu1 }
 0x510   : > { %v8234_v29 = vpop.f32.mrb[146].mxu0  ;;  %v8232_v39 = vadd.f32 %v8231_v9, %v7175_v38  ;;  %v7178_v22 = vadd.f32 %v7177_v14, %v18804_v43  ;;  %v7179_v63 = vpop.f32.mrb[147].mxu1  ;;  %v623_v6 = vld [vmem:[#allocation2 + $0x260] sm:$0xff] }
 0x511   : > { %v10332_v28 = vmax.f32 %v10076_v30, 0.0  ;;  %v10077_v1 = vadd.f32 %v17009_v19, %v9814_v42  ;;  %v8236_v3 = vpop.f32.mrb[147].mxu0  ;;  %v14198_v42 = vld [vmem:[%s14921_s14 + $0xc38] ss:$24 sps:$4 sm:$0xff]  }
 0x512   : > { %v9038_v61 = vadd.f32 %v8232_v39, %v619_v21  ;;  %v8235_v2 = vadd.f32 %v8234_v29, %v7178_v22  ;;  %7389 = vmatmul.mubr.bf16.gmra.mrb[252].mxu1 %v14186_v56  ;;  %v18807_v21 = vld [vmem:[#allocation117_spill] sm:$0xff]  ;;  %v18808_v63 = vld [vmem:[#allocation119_spill] sm:$0xff] }
 0x513   : > { %v13073_v59 = vpack.c.bf16 %v10332_v28, %v10332_v28  ;;  %v10333_v49 = vmax.f32 %v10077_v1, 0.0  ;;  %8446 = vmatmul.mubr.bf16.gmra.mrb[252].mxu0 %v14189_v53  ;;  %7396 = vmatprep.mubr.bf16.mxu1 %v14194_v55  ;;  %v14201_v29 = vld [vmem:[%s14921_s14 + $0xc40] ss:$24 sps:$4 sm:$0xff]   ;;  %v14206_v28 = vld [vmem:[%s14921_s14 + $0xc6c] ss:$24 sps:$4 sm:$0xff]  }
 0x514   : > { %v9552_v12 = vld [vmem:[#allocation2 + $0x230] sm:$0xff]  ;;  %8453 = vmatprep.mubr.bf16.mxu0 %v14197_v8  ;;  %9295 = vst.msk [vmem:[#allocation2 + $0x240] sm:$0xff] %vm290_vm0, %v9038_v61  ;;  %v9039_v33 = vadd.f32 %v8235_v2, %v620_v10 }
 0x515   : > { %11613 = vst.msk [vmem:[%s16578_s15 + $0x110] sm:$0xf] %vm11544_vm1, %v13073_v59  ;;  %v13074_v4 = vpack.c.bf16 %v10333_v49, %v10333_v49  ;;  %v9815_v15 = vmul.f32 %v17002_v25, %v9552_v12  ;;  %v7182_v62 = vpop.f32.mrb[148].mxu1  ;;  %v14209_v1 = vld [vmem:[%s14921_s14 + $0xc74] ss:$24 sps:$4 sm:$0xff]  }
 0x516   : > { %v9553_v60 = vld [vmem:[#allocation2 + $0x238] sm:$0xff]  ;;  %v8239_v23 = vpop.f32.mrb[148].mxu0  ;;  %9296 = vst.msk [vmem:[#allocation2 + $0x248] sm:$0xff] %vm290_vm0, %v9039_v33  ;;  %v7183_v13 = vadd.f32 %v7182_v62, %v18805_v45  ;;  %v7184_v57 = vpop.f32.mrb[149].mxu1  ;;  %v624_v49 = vld [vmem:[#allocation2 + $0x268] sm:$0xff] }
 0x517   : > { %11614 = vst.msk [vmem:[%s16578_s15 + $0x114] sm:$0xf] %vm11544_vm1, %v13074_v4  ;;  %v10078_v34 = vadd.f32 %v17009_v19, %v9815_v15  ;;  %v9816_v35 = vmul.f32 %v17002_v25, %v9553_v60  ;;  %v8241_v31 = vpop.f32.mrb[149].mxu0  ;;  %v7185_v7 = vpop.f32.mrb[150].mxu1 }
 0x518   : > { %v8242_v16 = vpop.f32.mrb[150].mxu0  ;;  %v8240_v40 = vadd.f32 %v8239_v23, %v7183_v13  ;;  %v7186_v0 = vadd.f32 %v7185_v7, %v18806_v32  ;;  %v7187_v17 = vpop.f32.mrb[151].mxu1  ;;  %v625_v31 = vld [vmem:[#allocation2 + $0x270] sm:$0xff] }
 0x519   : > { %v10334_v46 = vmax.f32 %v10078_v34, 0.0  ;;  %v10079_v52 = vadd.f32 %v17009_v19, %v9816_v35  ;;  %v8244_v54 = vpop.f32.mrb[151].mxu0  ;;  %v14204_v35 = vld [vmem:[%s14921_s14 + $0xc68] ss:$24 sps:$4 sm:$0xff]   ;;  %v18810_v17 = vld [vmem:[#allocation123_spill] sm:$0xff] }
 0x51a   : > { %v9040_v48 = vadd.f32 %v8240_v40, %v621_v44  ;;  %v8243_v11 = vadd.f32 %v8242_v16, %v7186_v0  ;;  %7397 = vmatmul.mubr.bf16.gmra.mrb[0].mxu1 %v14192_v24  ;;  %v18809_v44 = vld [vmem:[#allocation121_spill] sm:$0xff]  ;;  %v14207_v16 = vld [vmem:[%s14921_s14 + $0xc70] ss:$24 sps:$4 sm:$0xff]  }
 0x51b   : > { %v13075_v58 = vpack.c.bf16 %v10334_v46, %v10334_v46  ;;  %v10335_v37 = vmax.f32 %v10079_v52, 0.0  ;;  %8454 = vmatmul.mubr.bf16.gmra.mrb[0].mxu0 %v14195_v20  ;;  %v9554_v41 = vld [vmem:[#allocation2 + $0x240] sm:$0xff]  ;;  %7404 = vmatprep.mubr.bf16.mxu1 %v14200_v5  ;;  %v14212_v46 = vld [vmem:[%s14921_s14 + $0xc9c] ss:$24 sps:$4 sm:$0xff]  }
 0x51c   : > { %8461 = vmatprep.mubr.bf16.mxu0 %v14203_v27  ;;  %v9817_v26 = vmul.f32 %v17002_v25, %v9554_v41  ;;  %9297 = vst.msk [vmem:[#allocation2 + $0x250] sm:$0xff] %vm290_vm0, %v9040_v48  ;;  %v9041_v47 = vadd.f32 %v8243_v11, %v622_v51  ;;  %v14215_v52 = vld [vmem:[%s14921_s14 + $0xca4] ss:$24 sps:$4 sm:$0xff]  }
 0x51d   : > { %11615 = vst.msk [vmem:[%s16578_s15 + $0x118] sm:$0xf] %vm11544_vm1, %v13075_v58  ;;  %v13076_v50 = vpack.c.bf16 %v10335_v37, %v10335_v37  ;;  %v9555_v9 = vld [vmem:[#allocation2 + $0x248] sm:$0xff]  ;;  %v7190_v56 = vpop.f32.mrb[152].mxu1  ;;  %v626_v37 = vld [vmem:[#allocation2 + $0x278] sm:$0xff] }
 0x51e   : > { %v8247_v30 = vpop.f32.mrb[152].mxu0  ;;  %v10080_v36 = vadd.f32 %v17009_v19, %v9817_v26  ;;  %v9818_v38 = vmul.f32 %v17002_v25, %v9555_v9  ;;  %9298 = vst.msk [vmem:[#allocation2 + $0x258] sm:$0xff] %vm290_vm0, %v9041_v47  ;;  %v7191_v18 = vadd.f32 %v7190_v56, %v18807_v21  ;;  %v7192_v53 = vpop.f32.mrb[153].mxu1 }
 0x51f   : > { %11616 = vst.msk [vmem:[%s16578_s15 + $0x11c] sm:$0xf] %vm11544_vm1, %v13076_v50  ;;  %v8249_v14 = vpop.f32.mrb[153].mxu0  ;;  %v7193_v55 = vpop.f32.mrb[154].mxu1 }
 0x520   : > { %v8250_v8 = vpop.f32.mrb[154].mxu0  ;;  %v10336_v39 = vmax.f32 %v10080_v36, 0.0  ;;  %v10081_v43 = vadd.f32 %v17009_v19, %v9818_v38  ;;  %v8248_v22 = vadd.f32 %v8247_v30, %v7191_v18  ;;  %v7194_v3 = vadd.f32 %v7193_v55, %v18808_v63  ;;  %v7195_v10 = vpop.f32.mrb[155].mxu1  ;;  %v14210_v38 = vld [vmem:[%s14921_s14 + $0xc98] ss:$24 sps:$4 sm:$0xff]   ;;  %v627_v14 = vld [vmem:[#allocation2 + $0x280] sm:$0xff] }
 0x521   : > { %v8252_v59 = vpop.f32.mrb[155].mxu0  ;;  %v18812_v10 = vld [vmem:[#allocation127_spill] sm:$0xff] }
 0x522   : > { %v13077_v61 = vpack.c.bf16 %v10336_v39, %v10336_v39  ;;  %v10337_v2 = vmax.f32 %v10081_v43, 0.0  ;;  %v9042_v12 = vadd.f32 %v8248_v22, %v623_v6  ;;  %v8251_v4 = vadd.f32 %v8250_v8, %v7194_v3  ;;  %7405 = vmatmul.mubr.bf16.gmra.mrb[4].mxu1 %v14198_v42  ;;  %v18811_v6 = vld [vmem:[#allocation125_spill] sm:$0xff]  ;;  %v14218_v39 = vld [vmem:[%s14921_s14 + $0xccc] ss:$24 sps:$4 sm:$0xff]  }
 0x523   : > { %8462 = vmatmul.mubr.bf16.gmra.mrb[4].mxu0 %v14201_v29  ;;  %v9556_v15 = vld [vmem:[#allocation2 + $0x250] sm:$0xff]  ;;  %7412 = vmatprep.mubr.bf16.mxu1 %v14206_v28  ;;  %v14213_v8 = vld [vmem:[%s14921_s14 + $0xca0] ss:$24 sps:$4 sm:$0xff]  }
 0x524   : > { %8469 = vmatprep.mubr.bf16.mxu0 %v14209_v1  ;;  %11617 = vst.msk [vmem:[%s16578_s15 + $0x120] sm:$0xf] %vm11544_vm1, %v13077_v61  ;;  %v13078_v33 = vpack.c.bf16 %v10337_v2, %v10337_v2  ;;  %v9819_v60 = vmul.f32 %v17002_v25, %v9556_v15  ;;  %v9043_v62 = vadd.f32 %v8251_v4, %v624_v49  ;;  %v14221_v43 = vld [vmem:[%s14921_s14 + $0xcd4] ss:$24 sps:$4 sm:$0xff]  }
 0x525   : > { %9299 = vst.msk [vmem:[#allocation2 + $0x260] sm:$0xff] %vm290_vm0, %v9042_v12  ;;  %v9557_v23 = vld [vmem:[#allocation2 + $0x258] sm:$0xff]  ;;  %v7198_v24 = vpop.f32.mrb[156].mxu1  ;;  %v628_v2 = vld [vmem:[#allocation2 + $0x288] sm:$0xff] }
 0x526   : > { %v8255_v34 = vpop.f32.mrb[156].mxu0  ;;  %11618 = vst.msk [vmem:[%s16578_s15 + $0x124] sm:$0xf] %vm11544_vm1, %v13078_v33  ;;  %v10082_v45 = vadd.f32 %v17009_v19, %v9819_v60  ;;  %v9820_v13 = vmul.f32 %v17002_v25, %v9557_v23  ;;  %v7199_v57 = vadd.f32 %v7198_v24, %v18809_v44  ;;  %v7200_v20 = vpop.f32.mrb[157].mxu1 }
 0x527   : > { %9300 = vst.msk [vmem:[#allocation2 + $0x268] sm:$0xff] %vm290_vm0, %v9043_v62  ;;  %v8257_v7 = vpop.f32.mrb[157].mxu0  ;;  %v7201_v5 = vpop.f32.mrb[158].mxu1 }
 0x528   : > { %v8258_v27 = vpop.f32.mrb[158].mxu0  ;;  %v10338_v40 = vmax.f32 %v10082_v45, 0.0  ;;  %v10083_v32 = vadd.f32 %v17009_v19, %v9820_v13  ;;  %v8256_v0 = vadd.f32 %v8255_v34, %v7199_v57  ;;  %v7202_v54 = vadd.f32 %v7201_v5, %v18810_v17  ;;  %v7203_v51 = vpop.f32.mrb[159].mxu1  ;;  %v14216_v13 = vld [vmem:[%s14921_s14 + $0xcc8] ss:$24 sps:$4 sm:$0xff]   ;;  %v629_v7 = vld [vmem:[#allocation2 + $0x290] sm:$0xff] }
 0x529   : > { %v8260_v58 = vpop.f32.mrb[159].mxu0  ;;  %v18814_v51 = vld [vmem:[#allocation131_spill] sm:$0xff] }
 0x52a   : > { %v13079_v48 = vpack.c.bf16 %v10338_v40, %v10338_v40  ;;  %v10339_v11 = vmax.f32 %v10083_v32, 0.0  ;;  %v9044_v41 = vadd.f32 %v8256_v0, %v625_v31  ;;  %v8259_v50 = vadd.f32 %v8258_v27, %v7202_v54  ;;  %7413 = vmatmul.mubr.bf16.gmra.mrb[8].mxu1 %v14204_v35  ;;  %v18813_v31 = vld [vmem:[#allocation129_spill] sm:$0xff]  ;;  %v14219_v27 = vld [vmem:[%s14921_s14 + $0xcd0] ss:$24 sps:$4 sm:$0xff]  }
 0x52b   : > { %8470 = vmatmul.mubr.bf16.gmra.mrb[8].mxu0 %v14207_v16  ;;  %7420 = vmatprep.mubr.bf16.mxu1 %v14212_v46  ;;  %v14224_v40 = vld [vmem:[%s14921_s14 + $0xcfc] ss:$24 sps:$4 sm:$0xff]  }
 0x52c   : > { %v9558_v26 = vld [vmem:[#allocation2 + $0x260] sm:$0xff]  ;;  %8477 = vmatprep.mubr.bf16.mxu0 %v14215_v52  ;;  %11619 = vst.msk [vmem:[%s16578_s15 + $0x128] sm:$0xf] %vm11544_vm1, %v13079_v48  ;;  %v13080_v47 = vpack.c.bf16 %v10339_v11, %v10339_v11  ;;  %v9045_v56 = vadd.f32 %v8259_v50, %v626_v37  ;;  %v630_v11 = vld [vmem:[#allocation2 + $0x298] sm:$0xff] }
 0x52d   : > { %v9821_v9 = vmul.f32 %v17002_v25, %v9558_v26  ;;  %9301 = vst.msk [vmem:[#allocation2 + $0x270] sm:$0xff] %vm290_vm0, %v9044_v41  ;;  %v7206_v42 = vpop.f32.mrb[160].mxu1  ;;  %v14227_v32 = vld [vmem:[%s14921_s14 + $0xd04] ss:$24 sps:$4 sm:$0xff]  }
 0x52e   : > { %v9559_v30 = vld [vmem:[#allocation2 + $0x268] sm:$0xff]  ;;  %v8263_v36 = vpop.f32.mrb[160].mxu0  ;;  %11620 = vst.msk [vmem:[%s16578_s15 + $0x12c] sm:$0xf] %vm11544_vm1, %v13080_v47  ;;  %v7207_v53 = vadd.f32 %v7206_v42, %v18811_v6  ;;  %v7208_v29 = vpop.f32.mrb[161].mxu1 }
 0x52f   : > { %v10084_v21 = vadd.f32 %v17009_v19, %v9821_v9  ;;  %v9822_v18 = vmul.f32 %v17002_v25, %v9559_v30  ;;  %9302 = vst.msk [vmem:[#allocation2 + $0x278] sm:$0xff] %vm290_vm0, %v9045_v56  ;;  %v8265_v55 = vpop.f32.mrb[161].mxu0  ;;  %v7209_v28 = vpop.f32.mrb[162].mxu1 }
 0x530   : > { %v8266_v1 = vpop.f32.mrb[162].mxu0  ;;  %v8264_v3 = vadd.f32 %v8263_v36, %v7207_v53  ;;  %v7210_v59 = vadd.f32 %v7209_v28, %v18812_v10  ;;  %v7211_v49 = vpop.f32.mrb[163].mxu1  ;;  %v631_v55 = vld [vmem:[#allocation2 + $0x2a0] sm:$0xff] }
 0x531   : > { %v10340_v22 = vmax.f32 %v10084_v21, 0.0  ;;  %v10085_v63 = vadd.f32 %v17009_v19, %v9822_v18  ;;  %v8268_v61 = vpop.f32.mrb[163].mxu0  ;;  %v14222_v18 = vld [vmem:[%s14921_s14 + $0xcf8] ss:$24 sps:$4 sm:$0xff]  }
 0x532   : > { %v9046_v15 = vadd.f32 %v8264_v3, %v627_v14  ;;  %v8267_v33 = vadd.f32 %v8266_v1, %v7210_v59  ;;  %7421 = vmatmul.mubr.bf16.gmra.mrb[12].mxu1 %v14210_v38  ;;  %v18815_v14 = vld [vmem:[#allocation133_spill] sm:$0xff]  ;;  %v18816_v49 = vld [vmem:[#allocation135_spill] sm:$0xff] }
 0x533   : > { %v13081_v12 = vpack.c.bf16 %v10340_v22, %v10340_v22  ;;  %v10341_v4 = vmax.f32 %v10085_v63, 0.0  ;;  %8478 = vmatmul.mubr.bf16.gmra.mrb[12].mxu0 %v14213_v8  ;;  %7428 = vmatprep.mubr.bf16.mxu1 %v14218_v39  ;;  %v14225_v1 = vld [vmem:[%s14921_s14 + $0xd00] ss:$24 sps:$4 sm:$0xff]   ;;  %v14230_v22 = vld [vmem:[%s14921_s14 + $0xd2c] ss:$24 sps:$4 sm:$0xff]  }
 0x534   : > { %v9560_v60 = vld [vmem:[#allocation2 + $0x270] sm:$0xff]  ;;  %8485 = vmatprep.mubr.bf16.mxu0 %v14221_v43  ;;  %9303 = vst.msk [vmem:[#allocation2 + $0x280] sm:$0xff] %vm290_vm0, %v9046_v15  ;;  %v9047_v24 = vadd.f32 %v8267_v33, %v628_v2 }
 0x535   : > { %11621 = vst.msk [vmem:[%s16578_s15 + $0x130] sm:$0xf] %vm11544_vm1, %v13081_v12  ;;  %v13082_v62 = vpack.c.bf16 %v10341_v4, %v10341_v4  ;;  %v9823_v23 = vmul.f32 %v17002_v25, %v9560_v60  ;;  %v7214_v35 = vpop.f32.mrb[164].mxu1  ;;  %v14233_v63 = vld [vmem:[%s14921_s14 + $0xd34] ss:$24 sps:$4 sm:$0xff]  }
 0x536   : > { %v9561_v34 = vld [vmem:[#allocation2 + $0x278] sm:$0xff]  ;;  %v8271_v45 = vpop.f32.mrb[164].mxu0  ;;  %9304 = vst.msk [vmem:[#allocation2 + $0x288] sm:$0xff] %vm290_vm0, %v9047_v24  ;;  %v7215_v20 = vadd.f32 %v7214_v35, %v18813_v31  ;;  %v7216_v16 = vpop.f32.mrb[165].mxu1  ;;  %v632_v12 = vld [vmem:[#allocation2 + $0x2a8] sm:$0xff] }
 0x537   : > { %11622 = vst.msk [vmem:[%s16578_s15 + $0x134] sm:$0xf] %vm11544_vm1, %v13082_v62  ;;  %v10086_v44 = vadd.f32 %v17009_v19, %v9823_v23  ;;  %v9824_v57 = vmul.f32 %v17002_v25, %v9561_v34  ;;  %v8273_v5 = vpop.f32.mrb[165].mxu0  ;;  %v7217_v46 = vpop.f32.mrb[166].mxu1  ;;  %v17230_v23 = vld [vmem:[#allocation5] ss:$0 sm:$0xff] }
 0x538   : > { %v8274_v52 = vpop.f32.mrb[166].mxu0  ;;  %v8272_v54 = vadd.f32 %v8271_v45, %v7215_v20  ;;  %v7218_v58 = vadd.f32 %v7217_v46, %v18814_v51  ;;  %v7219_v37 = vpop.f32.mrb[167].mxu1  ;;  %v633_v5 = vld [vmem:[#allocation2 + $0x2b0] sm:$0xff] }
 0x539   : > { %v10342_v0 = vmax.f32 %v10086_v44, 0.0  ;;  %v10087_v17 = vadd.f32 %v17009_v19, %v9824_v57  ;;  %v8276_v48 = vpop.f32.mrb[167].mxu0  ;;  %v14228_v44 = vld [vmem:[%s14921_s14 + $0xd28] ss:$24 sps:$4 sm:$0xff]   ;;  %v18818_v37 = vld [vmem:[#allocation139_spill] sm:$0xff] }
 0x53a   : > { %v9048_v26 = vadd.f32 %v8272_v54, %v629_v7  ;;  %v8275_v47 = vadd.f32 %v8274_v52, %v7218_v58  ;;  %7429 = vmatmul.mubr.bf16.gmra.mrb[16].mxu1 %v14216_v13  ;;  %v17237_v57 = vld [vmem:[#allocation7] ss:$0 sm:$0xff]  ;;  %v14231_v52 = vld [vmem:[%s14921_s14 + $0xd30] ss:$24 sps:$4 sm:$0xff]  }
 0x53b   : > { %v13083_v41 = vpack.c.bf16 %v10342_v0, %v10342_v0  ;;  %v10343_v50 = vmax.f32 %v10087_v17, 0.0  ;;  %8486 = vmatmul.mubr.bf16.gmra.mrb[16].mxu0 %v14219_v27  ;;  %v9562_v9 = vld [vmem:[#allocation2 + $0x280] sm:$0xff]  ;;  %7436 = vmatprep.mubr.bf16.mxu1 %v14224_v40  ;;  %v14236_v0 = vld [vmem:[%s14921_s14 + $0xd5c] ss:$24 sps:$4 sm:$0xff]  }
 0x53c   : > { %8493 = vmatprep.mubr.bf16.mxu0 %v14227_v32  ;;  %v9825_v30 = vmul.f32 %v17002_v25, %v9562_v9  ;;  %9305 = vst.msk [vmem:[#allocation2 + $0x290] sm:$0xff] %vm290_vm0, %v9048_v26  ;;  %v9049_v42 = vadd.f32 %v8275_v47, %v630_v11  ;;  %v18817_v7 = vld [vmem:[#allocation137_spill] sm:$0xff] }
 0x53d   : > { %11623 = vst.msk [vmem:[%s16578_s15 + $0x138] sm:$0xf] %vm11544_vm1, %v13083_v41  ;;  %v13084_v56 = vpack.c.bf16 %v10343_v50, %v10343_v50  ;;  %v9563_v36 = vld [vmem:[#allocation2 + $0x288] sm:$0xff]  ;;  %v7222_v38 = vpop.f32.mrb[168].mxu1  ;;  %v14239_v17 = vld [vmem:[%s14921_s14 + $0xd64] ss:$24 sps:$4 sm:$0xff]  }
 0x53e   : > { %v8279_v21 = vpop.f32.mrb[168].mxu0  ;;  %v10088_v6 = vadd.f32 %v17009_v19, %v9825_v30  ;;  %v9826_v53 = vmul.f32 %v17002_v25, %v9563_v36  ;;  %9306 = vst.msk [vmem:[#allocation2 + $0x298] sm:$0xff] %vm290_vm0, %v9049_v42  ;;  %v7223_v29 = vadd.f32 %v7222_v38, %v18815_v14  ;;  %v7224_v8 = vpop.f32.mrb[169].mxu1  ;;  %v634_v50 = vld [vmem:[#allocation2 + $0x2b8] sm:$0xff] }
 0x53f   : > { %11624 = vst.msk [vmem:[%s16578_s15 + $0x13c] sm:$0xf] %vm11544_vm1, %v13084_v56  ;;  %v8281_v28 = vpop.f32.mrb[169].mxu0  ;;  %v7225_v39 = vpop.f32.mrb[170].mxu1 }
 0x540   : > { %v8282_v43 = vpop.f32.mrb[170].mxu0  ;;  %v10344_v3 = vmax.f32 %v10088_v6, 0.0  ;;  %v10089_v10 = vadd.f32 %v17009_v19, %v9826_v53  ;;  %v8280_v59 = vadd.f32 %v8279_v21, %v7223_v29  ;;  %v7226_v61 = vadd.f32 %v7225_v39, %v18816_v49  ;;  %v7227_v25 = vpop.f32.mrb[171].mxu1  ;;  %v14234_v53 = vld [vmem:[%s14921_s14 + $0xd58] ss:$24 sps:$4 sm:$0xff]   ;;  %v635_v28 = vld [vmem:[#allocation2 + $0x2c0] sm:$0xff] }
 0x541   : > { %v8284_v2 = vpop.f32.mrb[171].mxu0  ;;  %v18820_v25 = vld [vmem:[#allocation143_spill] sm:$0xff] }
 0x542   : > { %v13085_v4 = vpack.c.bf16 %v10344_v3, %v10344_v3  ;;  %v10345_v15 = vmax.f32 %v10089_v10, 0.0  ;;  %v9050_v33 = vadd.f32 %v8280_v59, %v631_v55  ;;  %v8283_v60 = vadd.f32 %v8282_v43, %v7226_v61  ;;  %7437 = vmatmul.mubr.bf16.gmra.mrb[20].mxu1 %v14222_v18  ;;  %v18819_v55 = vld [vmem:[#allocation141_spill] sm:$0xff]  ;;  %v14242_v3 = vld [vmem:[%s14921_s14 + $0xd8c] ss:$24 sps:$4 sm:$0xff]  }
 0x543   : > { %8494 = vmatmul.mubr.bf16.gmra.mrb[20].mxu0 %v14225_v1  ;;  %v9564_v62 = vld [vmem:[#allocation2 + $0x290] sm:$0xff]  ;;  %7444 = vmatprep.mubr.bf16.mxu1 %v14230_v22  ;;  %v14237_v43 = vld [vmem:[%s14921_s14 + $0xd60] ss:$24 sps:$4 sm:$0xff]  }
 0x544   : > { %8501 = vmatprep.mubr.bf16.mxu0 %v14233_v63  ;;  %11625 = vst.msk [vmem:[%s16578_s15 + $0x140] sm:$0xf] %vm11544_vm1, %v13085_v4  ;;  %v13086_v19 = vpack.c.bf16 %v10345_v15, %v10345_v15  ;;  %v9827_v24 = vmul.f32 %v17230_v23, %v9564_v62  ;;  %v9051_v34 = vadd.f32 %v8283_v60, %v632_v12  ;;  %v14245_v10 = vld [vmem:[%s14921_s14 + $0xd94] ss:$24 sps:$4 sm:$0xff]  }
 0x545   : > { %9307 = vst.msk [vmem:[#allocation2 + $0x2a0] sm:$0xff] %vm290_vm0, %v9050_v33  ;;  %v9565_v35 = vld [vmem:[#allocation2 + $0x298] sm:$0xff]  ;;  %v7230_v45 = vpop.f32.mrb[172].mxu1  ;;  %v636_v15 = vld [vmem:[#allocation2 + $0x2c8] sm:$0xff] }
 0x546   : > { %v8287_v13 = vpop.f32.mrb[172].mxu0  ;;  %11626 = vst.msk [vmem:[%s16578_s15 + $0x144] sm:$0xf] %vm11544_vm1, %v13086_v19  ;;  %v10090_v31 = vadd.f32 %v17237_v57, %v9827_v24  ;;  %v9828_v20 = vmul.f32 %v17230_v23, %v9565_v35  ;;  %v7231_v16 = vadd.f32 %v7230_v45, %v18817_v7  ;;  %v7232_v27 = vpop.f32.mrb[173].mxu1 }
 0x547   : > { %9308 = vst.msk [vmem:[#allocation2 + $0x2a8] sm:$0xff] %vm290_vm0, %v9051_v34  ;;  %v8289_v46 = vpop.f32.mrb[173].mxu0  ;;  %v7233_v40 = vpop.f32.mrb[174].mxu1 }
 0x548   : > { %v8290_v32 = vpop.f32.mrb[174].mxu0  ;;  %v10346_v54 = vmax.f32 %v10090_v31, 0.0  ;;  %v10091_v51 = vadd.f32 %v17237_v57, %v9828_v20  ;;  %v8288_v58 = vadd.f32 %v8287_v13, %v7231_v16  ;;  %v7234_v48 = vadd.f32 %v7233_v40, %v18818_v37  ;;  %v7235_v11 = vpop.f32.mrb[175].mxu1  ;;  %v14240_v20 = vld [vmem:[%s14921_s14 + $0xd88] ss:$24 sps:$4 sm:$0xff]   ;;  %v637_v46 = vld [vmem:[#allocation2 + $0x2d0] sm:$0xff] }
 0x549   : > { %v8292_v41 = vpop.f32.mrb[175].mxu0  ;;  %v18822_v11 = vld [vmem:[#allocation147_spill] sm:$0xff] }
 0x54a   : > { %v13087_v26 = vpack.c.bf16 %v10346_v54, %v10346_v54  ;;  %v10347_v47 = vmax.f32 %v10091_v51, 0.0  ;;  %v9052_v9 = vadd.f32 %v8288_v58, %v633_v5  ;;  %v8291_v56 = vadd.f32 %v8290_v32, %v7234_v48  ;;  %7445 = vmatmul.mubr.bf16.gmra.mrb[24].mxu1 %v14228_v44  ;;  %v18821_v5 = vld [vmem:[#allocation145_spill] sm:$0xff]  ;;  %v14243_v32 = vld [vmem:[%s14921_s14 + $0xd90] ss:$24 sps:$4 sm:$0xff]  }
 0x54b   : > { %8502 = vmatmul.mubr.bf16.gmra.mrb[24].mxu0 %v14231_v52  ;;  %7452 = vmatprep.mubr.bf16.mxu1 %v14236_v0  ;;  %v14248_v54 = vld [vmem:[%s14921_s14 + $0xdbc] ss:$24 sps:$4 sm:$0xff]  }
 0x54c   : > { %v9566_v30 = vld [vmem:[#allocation2 + $0x2a0] sm:$0xff]  ;;  %8509 = vmatprep.mubr.bf16.mxu0 %v14239_v17  ;;  %11627 = vst.msk [vmem:[%s16578_s15 + $0x148] sm:$0xf] %vm11544_vm1, %v13087_v26  ;;  %v13088_v42 = vpack.c.bf16 %v10347_v47, %v10347_v47  ;;  %v9053_v38 = vadd.f32 %v8291_v56, %v634_v50  ;;  %v638_v47 = vld [vmem:[#allocation2 + $0x2d8] sm:$0xff] }
 0x54d   : > { %v9829_v36 = vmul.f32 %v17230_v23, %v9566_v30  ;;  %9309 = vst.msk [vmem:[#allocation2 + $0x2b0] sm:$0xff] %vm290_vm0, %v9052_v9  ;;  %v7238_v18 = vpop.f32.mrb[176].mxu1  ;;  %v14251_v51 = vld [vmem:[%s14921_s14 + $0xdc4] ss:$24 sps:$4 sm:$0xff]  }
 0x54e   : > { %v9567_v21 = vld [vmem:[#allocation2 + $0x2a8] sm:$0xff]  ;;  %v8295_v6 = vpop.f32.mrb[176].mxu0  ;;  %11628 = vst.msk [vmem:[%s16578_s15 + $0x14c] sm:$0xf] %vm11544_vm1, %v13088_v42  ;;  %v7239_v8 = vadd.f32 %v7238_v18, %v18819_v55  ;;  %v7240_v1 = vpop.f32.mrb[177].mxu1 }
 0x54f   : > { %v10092_v14 = vadd.f32 %v17237_v57, %v9829_v36  ;;  %v9830_v29 = vmul.f32 %v17230_v23, %v9567_v21  ;;  %9310 = vst.msk [vmem:[#allocation2 + $0x2b8] sm:$0xff] %vm290_vm0, %v9053_v38  ;;  %v8297_v39 = vpop.f32.mrb[177].mxu0  ;;  %v7241_v22 = vpop.f32.mrb[178].mxu1 }
 0x550   : > { %v8298_v63 = vpop.f32.mrb[178].mxu0  ;;  %v8296_v61 = vadd.f32 %v8295_v6, %v7239_v8  ;;  %v7242_v2 = vadd.f32 %v7241_v22, %v18820_v25  ;;  %v7243_v12 = vpop.f32.mrb[179].mxu1  ;;  %v639_v39 = vld [vmem:[#allocation2 + $0x2e0] sm:$0xff] }
 0x551   : > { %v10348_v59 = vmax.f32 %v10092_v14, 0.0  ;;  %v10093_v49 = vadd.f32 %v17237_v57, %v9830_v29  ;;  %v8300_v4 = vpop.f32.mrb[179].mxu0  ;;  %v14246_v29 = vld [vmem:[%s14921_s14 + $0xdb8] ss:$24 sps:$4 sm:$0xff]  }
 0x552   : > { %v9054_v62 = vadd.f32 %v8296_v61, %v635_v28  ;;  %v8299_v19 = vadd.f32 %v8298_v63, %v7242_v2  ;;  %7453 = vmatmul.mubr.bf16.gmra.mrb[28].mxu1 %v14234_v53  ;;  %v18823_v28 = vld [vmem:[#allocation149_spill] sm:$0xff]  ;;  %v18824_v12 = vld [vmem:[#allocation151_spill] sm:$0xff] }
 0x553   : > { %v13089_v33 = vpack.c.bf16 %v10348_v59, %v10348_v59  ;;  %v10349_v60 = vmax.f32 %v10093_v49, 0.0  ;;  %8510 = vmatmul.mubr.bf16.gmra.mrb[28].mxu0 %v14237_v43  ;;  %7460 = vmatprep.mubr.bf16.mxu1 %v14242_v3  ;;  %v14249_v63 = vld [vmem:[%s14921_s14 + $0xdc0] ss:$24 sps:$4 sm:$0xff]   ;;  %v14254_v59 = vld [vmem:[%s14921_s14 + $0xdec] ss:$24 sps:$4 sm:$0xff]  }
 0x554   : > { %v9568_v24 = vld [vmem:[#allocation2 + $0x2b0] sm:$0xff]  ;;  %8517 = vmatprep.mubr.bf16.mxu0 %v14245_v10  ;;  %9311 = vst.msk [vmem:[#allocation2 + $0x2c0] sm:$0xff] %vm290_vm0, %v9054_v62  ;;  %v9055_v45 = vadd.f32 %v8299_v19, %v636_v15 }
 0x555   : > { %11629 = vst.msk [vmem:[%s16578_s15 + $0x150] sm:$0xf] %vm11544_vm1, %v13089_v33  ;;  %v13090_v34 = vpack.c.bf16 %v10349_v60, %v10349_v60  ;;  %v9831_v35 = vmul.f32 %v17230_v23, %v9568_v24  ;;  %v7246_v44 = vpop.f32.mrb[180].mxu1  ;;  %v14257_v49 = vld [vmem:[%s14921_s14 + $0xdf4] ss:$24 sps:$4 sm:$0xff]  }
 0x556   : > { %v9569_v13 = vld [vmem:[#allocation2 + $0x2b8] sm:$0xff]  ;;  %v8303_v31 = vpop.f32.mrb[180].mxu0  ;;  %9312 = vst.msk [vmem:[#allocation2 + $0x2c8] sm:$0xff] %vm290_vm0, %v9055_v45  ;;  %v7247_v27 = vadd.f32 %v7246_v44, %v18821_v5  ;;  %v7248_v52 = vpop.f32.mrb[181].mxu1  ;;  %v640_v60 = vld [vmem:[#allocation2 + $0x2e8] sm:$0xff] }
 0x557   : > { %11630 = vst.msk [vmem:[%s16578_s15 + $0x154] sm:$0xf] %vm11544_vm1, %v13090_v34  ;;  %v10094_v7 = vadd.f32 %v17237_v57, %v9831_v35  ;;  %v9832_v16 = vmul.f32 %v17230_v23, %v9569_v13  ;;  %v8305_v40 = vpop.f32.mrb[181].mxu0  ;;  %v7249_v0 = vpop.f32.mrb[182].mxu1 }
 0x558   : > { %v8306_v17 = vpop.f32.mrb[182].mxu0  ;;  %v8304_v48 = vadd.f32 %v8303_v31, %v7247_v27  ;;  %v7250_v41 = vadd.f32 %v7249_v0, %v18822_v11  ;;  %v7251_v50 = vpop.f32.mrb[183].mxu1  ;;  %v641_v40 = vld [vmem:[#allocation2 + $0x2f0] sm:$0xff] }
 0x559   : > { %v10350_v58 = vmax.f32 %v10094_v7, 0.0  ;;  %v10095_v37 = vadd.f32 %v17237_v57, %v9832_v16  ;;  %v8308_v26 = vpop.f32.mrb[183].mxu0  ;;  %v14252_v16 = vld [vmem:[%s14921_s14 + $0xde8] ss:$24 sps:$4 sm:$0xff]   ;;  %v18826_v50 = vld [vmem:[#allocation155_spill] sm:$0xff] }
 0x55a   : > { %v9056_v30 = vadd.f32 %v8304_v48, %v637_v46  ;;  %v8307_v42 = vadd.f32 %v8306_v17, %v7250_v41  ;;  %7461 = vmatmul.mubr.bf16.gmra.mrb[32].mxu1 %v14240_v20  ;;  %v18825_v46 = vld [vmem:[#allocation153_spill] sm:$0xff]  ;;  %v14255_v17 = vld [vmem:[%s14921_s14 + $0xdf0] ss:$24 sps:$4 sm:$0xff]  }
 0x55b   : > { %v13091_v9 = vpack.c.bf16 %v10350_v58, %v10350_v58  ;;  %v10351_v56 = vmax.f32 %v10095_v37, 0.0  ;;  %8518 = vmatmul.mubr.bf16.gmra.mrb[32].mxu0 %v14243_v32  ;;  %v9570_v36 = vld [vmem:[#allocation2 + $0x2c0] sm:$0xff]  ;;  %7468 = vmatprep.mubr.bf16.mxu1 %v14248_v54  ;;  %v14260_v58 = vld [vmem:[%s14921_s14 + $0xe1c] ss:$24 sps:$4 sm:$0xff]  }
 0x55c   : > { %8525 = vmatprep.mubr.bf16.mxu0 %v14251_v51  ;;  %v9833_v21 = vmul.f32 %v17230_v23, %v9570_v36  ;;  %9313 = vst.msk [vmem:[#allocation2 + $0x2d0] sm:$0xff] %vm290_vm0, %v9056_v30  ;;  %v9057_v18 = vadd.f32 %v8307_v42, %v638_v47  ;;  %v14263_v37 = vld [vmem:[%s14921_s14 + $0xe24] ss:$24 sps:$4 sm:$0xff]  }
 0x55d   : > { %11631 = vst.msk [vmem:[%s16578_s15 + $0x158] sm:$0xf] %vm11544_vm1, %v13091_v9  ;;  %v13092_v38 = vpack.c.bf16 %v10351_v56, %v10351_v56  ;;  %v9571_v6 = vld [vmem:[#allocation2 + $0x2c8] sm:$0xff]  ;;  %v7254_v53 = vpop.f32.mrb[184].mxu1  ;;  %v642_v56 = vld [vmem:[#allocation2 + $0x2f8] sm:$0xff] }
 0x55e   : > { %v8311_v14 = vpop.f32.mrb[184].mxu0  ;;  %v10096_v55 = vadd.f32 %v17237_v57, %v9833_v21  ;;  %v9834_v8 = vmul.f32 %v17230_v23, %v9571_v6  ;;  %9314 = vst.msk [vmem:[#allocation2 + $0x2d8] sm:$0xff] %vm290_vm0, %v9057_v18  ;;  %v7255_v1 = vadd.f32 %v7254_v53, %v18823_v28  ;;  %v7256_v43 = vpop.f32.mrb[185].mxu1 }
 0x55f   : > { %11632 = vst.msk [vmem:[%s16578_s15 + $0x15c] sm:$0xf] %vm11544_vm1, %v13092_v38  ;;  %v8313_v22 = vpop.f32.mrb[185].mxu0  ;;  %v7257_v3 = vpop.f32.mrb[186].mxu1 }
 0x560   : > { %v8314_v10 = vpop.f32.mrb[186].mxu0  ;;  %v10352_v61 = vmax.f32 %v10096_v55, 0.0  ;;  %v10097_v25 = vadd.f32 %v17237_v57, %v9834_v8  ;;  %v8312_v2 = vadd.f32 %v8311_v14, %v7255_v1  ;;  %v7258_v4 = vadd.f32 %v7257_v3, %v18824_v12  ;;  %v7259_v15 = vpop.f32.mrb[187].mxu1  ;;  %v14258_v8 = vld [vmem:[%s14921_s14 + $0xe18] ss:$24 sps:$4 sm:$0xff]   ;;  %v643_v22 = vld [vmem:[#allocation2 + $0x300] sm:$0xff] }
 0x561   : > { %v8316_v33 = vpop.f32.mrb[187].mxu0  ;;  %v18828_v15 = vld [vmem:[#allocation159_spill] sm:$0xff] }
 0x562   : > { %v13093_v62 = vpack.c.bf16 %v10352_v61, %v10352_v61  ;;  %v10353_v19 = vmax.f32 %v10097_v25, 0.0  ;;  %v9058_v24 = vadd.f32 %v8312_v2, %v639_v39  ;;  %v8315_v34 = vadd.f32 %v8314_v10, %v7258_v4  ;;  %7469 = vmatmul.mubr.bf16.gmra.mrb[36].mxu1 %v14246_v29  ;;  %v18827_v39 = vld [vmem:[#allocation157_spill] sm:$0xff]  ;;  %v14266_v61 = vld [vmem:[%s14921_s14 + $0xe4c] ss:$24 sps:$4 sm:$0xff]  }
 0x563   : > { %8526 = vmatmul.mubr.bf16.gmra.mrb[36].mxu0 %v14249_v63  ;;  %v9572_v35 = vld [vmem:[#allocation2 + $0x2d0] sm:$0xff]  ;;  %7476 = vmatprep.mubr.bf16.mxu1 %v14254_v59  ;;  %v14261_v10 = vld [vmem:[%s14921_s14 + $0xe20] ss:$24 sps:$4 sm:$0xff]  }
 0x564   : > { %8533 = vmatprep.mubr.bf16.mxu0 %v14257_v49  ;;  %11633 = vst.msk [vmem:[%s16578_s15 + $0x160] sm:$0xf] %vm11544_vm1, %v13093_v62  ;;  %v13094_v45 = vpack.c.bf16 %v10353_v19, %v10353_v19  ;;  %v9835_v13 = vmul.f32 %v17230_v23, %v9572_v35  ;;  %v9059_v44 = vadd.f32 %v8315_v34, %v640_v60  ;;  %v14269_v25 = vld [vmem:[%s14921_s14 + $0xe54] ss:$24 sps:$4 sm:$0xff]  }
 0x565   : > { %9315 = vst.msk [vmem:[#allocation2 + $0x2e0] sm:$0xff] %vm290_vm0, %v9058_v24  ;;  %v9573_v31 = vld [vmem:[#allocation2 + $0x2d8] sm:$0xff]  ;;  %v7262_v20 = vpop.f32.mrb[188].mxu1  ;;  %v644_v19 = vld [vmem:[#allocation2 + $0x308] sm:$0xff] }
 0x566   : > { %v8319_v7 = vpop.f32.mrb[188].mxu0  ;;  %11634 = vst.msk [vmem:[%s16578_s15 + $0x164] sm:$0xf] %vm11544_vm1, %v13094_v45  ;;  %v10098_v5 = vadd.f32 %v17237_v57, %v9835_v13  ;;  %v9836_v27 = vmul.f32 %v17230_v23, %v9573_v31  ;;  %v7263_v52 = vadd.f32 %v7262_v20, %v18825_v46  ;;  %v7264_v32 = vpop.f32.mrb[189].mxu1 }
 0x567   : > { %9316 = vst.msk [vmem:[#allocation2 + $0x2e8] sm:$0xff] %vm290_vm0, %v9059_v44  ;;  %v8321_v0 = vpop.f32.mrb[189].mxu0  ;;  %v7265_v54 = vpop.f32.mrb[190].mxu1 }
 0x568   : > { %v8322_v51 = vpop.f32.mrb[190].mxu0  ;;  %v10354_v48 = vmax.f32 %v10098_v5, 0.0  ;;  %v10099_v11 = vadd.f32 %v17237_v57, %v9836_v27  ;;  %v8320_v41 = vadd.f32 %v8319_v7, %v7263_v52  ;;  %v7266_v26 = vadd.f32 %v7265_v54, %v18826_v50  ;;  %v7267_v47 = vpop.f32.mrb[191].mxu1  ;;  %v14264_v27 = vld [vmem:[%s14921_s14 + $0xe48] ss:$24 sps:$4 sm:$0xff]   ;;  %v645_v0 = vld [vmem:[#allocation2 + $0x310] sm:$0xff] }
 0x569   : > { %v8324_v9 = vpop.f32.mrb[191].mxu0  ;;  %v18830_v47 = vld [vmem:[#allocation163_spill] sm:$0xff] }
 0x56a   : > { %v13095_v30 = vpack.c.bf16 %v10354_v48, %v10354_v48  ;;  %v10355_v42 = vmax.f32 %v10099_v11, 0.0  ;;  %v9060_v36 = vadd.f32 %v8320_v41, %v641_v40  ;;  %v8323_v38 = vadd.f32 %v8322_v51, %v7266_v26  ;;  %7477 = vmatmul.mubr.bf16.gmra.mrb[40].mxu1 %v14252_v16  ;;  %v18829_v40 = vld [vmem:[#allocation161_spill] sm:$0xff]  ;;  %v14267_v51 = vld [vmem:[%s14921_s14 + $0xe50] ss:$24 sps:$4 sm:$0xff]  }
 0x56b   : > { %8534 = vmatmul.mubr.bf16.gmra.mrb[40].mxu0 %v14255_v17  ;;  %7484 = vmatprep.mubr.bf16.mxu1 %v14260_v58  ;;  %v14272_v48 = vld [vmem:[%s14921_s14 + $0xe7c] ss:$24 sps:$4 sm:$0xff]  }
 0x56c   : > { %v9574_v21 = vld [vmem:[#allocation2 + $0x2e0] sm:$0xff]  ;;  %8541 = vmatprep.mubr.bf16.mxu0 %v14263_v37  ;;  %11635 = vst.msk [vmem:[%s16578_s15 + $0x168] sm:$0xf] %vm11544_vm1, %v13095_v30  ;;  %v13096_v18 = vpack.c.bf16 %v10355_v42, %v10355_v42  ;;  %v9061_v53 = vadd.f32 %v8323_v38, %v642_v56  ;;  %v646_v42 = vld [vmem:[#allocation2 + $0x318] sm:$0xff] }
 0x56d   : > { %v9837_v6 = vmul.f32 %v17230_v23, %v9574_v21  ;;  %9317 = vst.msk [vmem:[#allocation2 + $0x2f0] sm:$0xff] %vm290_vm0, %v9060_v36  ;;  %v7270_v29 = vpop.f32.mrb[192].mxu1  ;;  %v14275_v11 = vld [vmem:[%s14921_s14 + $0xe84] ss:$24 sps:$4 sm:$0xff]  }
 0x56e   : > { %v9575_v14 = vld [vmem:[#allocation2 + $0x2e8] sm:$0xff]  ;;  %v8327_v55 = vpop.f32.mrb[192].mxu0  ;;  %11636 = vst.msk [vmem:[%s16578_s15 + $0x16c] sm:$0xf] %vm11544_vm1, %v13096_v18  ;;  %v7271_v43 = vadd.f32 %v7270_v29, %v18827_v39  ;;  %v7272_v63 = vpop.f32.mrb[193].mxu1 }
 0x56f   : > { %v10100_v28 = vadd.f32 %v17237_v57, %v9837_v6  ;;  %v9838_v1 = vmul.f32 %v17230_v23, %v9575_v14  ;;  %9318 = vst.msk [vmem:[#allocation2 + $0x2f8] sm:$0xff] %vm290_vm0, %v9061_v53  ;;  %v8329_v3 = vpop.f32.mrb[193].mxu0  ;;  %v7273_v59 = vpop.f32.mrb[194].mxu1 }
 0x570   : > { %v8330_v49 = vpop.f32.mrb[194].mxu0  ;;  %v8328_v4 = vadd.f32 %v8327_v55, %v7271_v43  ;;  %v7274_v33 = vadd.f32 %v7273_v59, %v18828_v15  ;;  %v7275_v60 = vpop.f32.mrb[195].mxu1  ;;  %v647_v3 = vld [vmem:[#allocation2 + $0x320] sm:$0xff] }
 0x571   : > { %v10356_v2 = vmax.f32 %v10100_v28, 0.0  ;;  %v10101_v12 = vadd.f32 %v17237_v57, %v9838_v1  ;;  %v8332_v62 = vpop.f32.mrb[195].mxu0  ;;  %v14270_v1 = vld [vmem:[%s14921_s14 + $0xe78] ss:$24 sps:$4 sm:$0xff]  }
 0x572   : > { %v9062_v35 = vadd.f32 %v8328_v4, %v643_v22  ;;  %v8331_v45 = vadd.f32 %v8330_v49, %v7274_v33  ;;  %7485 = vmatmul.mubr.bf16.gmra.mrb[44].mxu1 %v14258_v8  ;;  %v18831_v22 = vld [vmem:[#allocation165_spill] sm:$0xff]  ;;  %v18832_v60 = vld [vmem:[#allocation167_spill] sm:$0xff] }
 0x573   : > { %v13097_v24 = vpack.c.bf16 %v10356_v2, %v10356_v2  ;;  %v10357_v34 = vmax.f32 %v10101_v12, 0.0  ;;  %8542 = vmatmul.mubr.bf16.gmra.mrb[44].mxu0 %v14261_v10  ;;  %7492 = vmatprep.mubr.bf16.mxu1 %v14266_v61  ;;  %v14273_v49 = vld [vmem:[%s14921_s14 + $0xe80] ss:$24 sps:$4 sm:$0xff]   ;;  %v14278_v2 = vld [vmem:[%s14921_s14 + $0xeac] ss:$24 sps:$4 sm:$0xff]  }
 0x574   : > { %v9576_v13 = vld [vmem:[#allocation2 + $0x2f0] sm:$0xff]  ;;  %8549 = vmatprep.mubr.bf16.mxu0 %v14269_v25  ;;  %9319 = vst.msk [vmem:[#allocation2 + $0x300] sm:$0xff] %vm290_vm0, %v9062_v35  ;;  %v9063_v20 = vadd.f32 %v8331_v45, %v644_v19 }
 0x575   : > { %11637 = vst.msk [vmem:[%s16578_s15 + $0x170] sm:$0xf] %vm11544_vm1, %v13097_v24  ;;  %v13098_v44 = vpack.c.bf16 %v10357_v34, %v10357_v34  ;;  %v9839_v31 = vmul.f32 %v17230_v23, %v9576_v13  ;;  %v7278_v16 = vpop.f32.mrb[196].mxu1  ;;  %v14281_v12 = vld [vmem:[%s14921_s14 + $0xeb4] ss:$24 sps:$4 sm:$0xff]  }
 0x576   : > { %v9577_v7 = vld [vmem:[#allocation2 + $0x2f8] sm:$0xff]  ;;  %v8335_v5 = vpop.f32.mrb[196].mxu0  ;;  %9320 = vst.msk [vmem:[#allocation2 + $0x308] sm:$0xff] %vm290_vm0, %v9063_v20  ;;  %v7279_v32 = vadd.f32 %v7278_v16, %v18829_v40  ;;  %v7280_v17 = vpop.f32.mrb[197].mxu1  ;;  %v648_v34 = vld [vmem:[#allocation2 + $0x328] sm:$0xff] }
 0x577   : > { %11638 = vst.msk [vmem:[%s16578_s15 + $0x174] sm:$0xf] %vm11544_vm1, %v13098_v44  ;;  %v10102_v46 = vadd.f32 %v17237_v57, %v9839_v31  ;;  %v9840_v52 = vmul.f32 %v17230_v23, %v9577_v7  ;;  %v8337_v54 = vpop.f32.mrb[197].mxu0  ;;  %v7281_v58 = vpop.f32.mrb[198].mxu1 }
 0x578   : > { %v8338_v37 = vpop.f32.mrb[198].mxu0  ;;  %v8336_v26 = vadd.f32 %v8335_v5, %v7279_v32  ;;  %v7282_v9 = vadd.f32 %v7281_v58, %v18830_v47  ;;  %v7283_v56 = vpop.f32.mrb[199].mxu1  ;;  %v649_v54 = vld [vmem:[#allocation2 + $0x330] sm:$0xff] }
 0x579   : > { %v10358_v41 = vmax.f32 %v10102_v46, 0.0  ;;  %v10103_v50 = vadd.f32 %v17237_v57, %v9840_v52  ;;  %v8340_v30 = vpop.f32.mrb[199].mxu0  ;;  %v14276_v52 = vld [vmem:[%s14921_s14 + $0xea8] ss:$24 sps:$4 sm:$0xff]   ;;  %v18834_v56 = vld [vmem:[#allocation171_spill] sm:$0xff] }
 0x57a   : > { %v9064_v21 = vadd.f32 %v8336_v26, %v645_v0  ;;  %v8339_v18 = vadd.f32 %v8338_v37, %v7282_v9  ;;  %7493 = vmatmul.mubr.bf16.gmra.mrb[48].mxu1 %v14264_v27  ;;  %v18833_v0 = vld [vmem:[#allocation169_spill] sm:$0xff]  ;;  %v14279_v37 = vld [vmem:[%s14921_s14 + $0xeb0] ss:$24 sps:$4 sm:$0xff]  }
 0x57b   : > { %v13099_v36 = vpack.c.bf16 %v10358_v41, %v10358_v41  ;;  %v10359_v38 = vmax.f32 %v10103_v50, 0.0  ;;  %8550 = vmatmul.mubr.bf16.gmra.mrb[48].mxu0 %v14267_v51  ;;  %v9578_v6 = vld [vmem:[#allocation2 + $0x300] sm:$0xff]  ;;  %7500 = vmatprep.mubr.bf16.mxu1 %v14272_v48  ;;  %v14284_v41 = vld [vmem:[%s14921_s14 + $0xedc] ss:$24 sps:$4 sm:$0xff]  }
 0x57c   : > { %8557 = vmatprep.mubr.bf16.mxu0 %v14275_v11  ;;  %v9841_v14 = vmul.f32 %v17230_v23, %v9578_v6  ;;  %9321 = vst.msk [vmem:[#allocation2 + $0x310] sm:$0xff] %vm290_vm0, %v9064_v21  ;;  %v9065_v29 = vadd.f32 %v8339_v18, %v646_v42  ;;  %v14287_v50 = vld [vmem:[%s14921_s14 + $0xee4] ss:$24 sps:$4 sm:$0xff]  }
 0x57d   : > { %11639 = vst.msk [vmem:[%s16578_s15 + $0x178] sm:$0xf] %vm11544_vm1, %v13099_v36  ;;  %v13100_v53 = vpack.c.bf16 %v10359_v38, %v10359_v38  ;;  %v9579_v55 = vld [vmem:[#allocation2 + $0x308] sm:$0xff]  ;;  %v7286_v8 = vpop.f32.mrb[200].mxu1  ;;  %v650_v38 = vld [vmem:[#allocation2 + $0x338] sm:$0xff] }
 0x57e   : > { %v8343_v28 = vpop.f32.mrb[200].mxu0  ;;  %v10104_v39 = vadd.f32 %v17237_v57, %v9841_v14  ;;  %v9842_v43 = vmul.f32 %v17230_v23, %v9579_v55  ;;  %9322 = vst.msk [vmem:[#allocation2 + $0x318] sm:$0xff] %vm290_vm0, %v9065_v29  ;;  %v7287_v63 = vadd.f32 %v7286_v8, %v18831_v22  ;;  %v7288_v10 = vpop.f32.mrb[201].mxu1 }
 0x57f   : > { %11640 = vst.msk [vmem:[%s16578_s15 + $0x17c] sm:$0xf] %vm11544_vm1, %v13100_v53  ;;  %v8345_v59 = vpop.f32.mrb[201].mxu0  ;;  %v7289_v61 = vpop.f32.mrb[202].mxu1 }
 0x580   : > { %v8346_v25 = vpop.f32.mrb[202].mxu0  ;;  %v10360_v4 = vmax.f32 %v10104_v39, 0.0  ;;  %v10105_v15 = vadd.f32 %v17237_v57, %v9842_v43  ;;  %v8344_v33 = vadd.f32 %v8343_v28, %v7287_v63  ;;  %v7290_v62 = vadd.f32 %v7289_v61, %v18832_v60  ;;  %v7291_v19 = vpop.f32.mrb[203].mxu1  ;;  %v14282_v43 = vld [vmem:[%s14921_s14 + $0xed8] ss:$24 sps:$4 sm:$0xff]   ;;  %v651_v59 = vld [vmem:[#allocation2 + $0x340] sm:$0xff] }
 0x581   : > { %v8348_v24 = vpop.f32.mrb[203].mxu0  ;;  %v18836_v19 = vld [vmem:[#allocation175_spill] sm:$0xff] }
 0x582   : > { %v13101_v35 = vpack.c.bf16 %v10360_v4, %v10360_v4  ;;  %v10361_v45 = vmax.f32 %v10105_v15, 0.0  ;;  %v9066_v13 = vadd.f32 %v8344_v33, %v647_v3  ;;  %v8347_v44 = vadd.f32 %v8346_v25, %v7290_v62  ;;  %7501 = vmatmul.mubr.bf16.gmra.mrb[52].mxu1 %v14270_v1  ;;  %v18835_v3 = vld [vmem:[#allocation173_spill] sm:$0xff]  ;;  %v14290_v4 = vld [vmem:[%s14921_s14 + $0xf0c] ss:$24 sps:$4 sm:$0xff]  }
 0x583   : > { %8558 = vmatmul.mubr.bf16.gmra.mrb[52].mxu0 %v14273_v49  ;;  %v9580_v31 = vld [vmem:[#allocation2 + $0x310] sm:$0xff]  ;;  %7508 = vmatprep.mubr.bf16.mxu1 %v14278_v2  ;;  %v14285_v25 = vld [vmem:[%s14921_s14 + $0xee0] ss:$24 sps:$4 sm:$0xff]  }
 0x584   : > { %8565 = vmatprep.mubr.bf16.mxu0 %v14281_v12  ;;  %11641 = vst.msk [vmem:[%s16578_s15 + $0x180] sm:$0xf] %vm11544_vm1, %v13101_v35  ;;  %v13102_v20 = vpack.c.bf16 %v10361_v45, %v10361_v45  ;;  %v9843_v7 = vmul.f32 %v17230_v23, %v9580_v31  ;;  %v9067_v16 = vadd.f32 %v8347_v44, %v648_v34  ;;  %v14293_v15 = vld [vmem:[%s14921_s14 + $0xf14] ss:$24 sps:$4 sm:$0xff]  }
 0x585   : > { %9323 = vst.msk [vmem:[#allocation2 + $0x320] sm:$0xff] %vm290_vm0, %v9066_v13  ;;  %v9581_v5 = vld [vmem:[#allocation2 + $0x318] sm:$0xff]  ;;  %v7294_v27 = vpop.f32.mrb[204].mxu1  ;;  %v652_v45 = vld [vmem:[#allocation2 + $0x348] sm:$0xff] }
 0x586   : > { %v8351_v46 = vpop.f32.mrb[204].mxu0  ;;  %11642 = vst.msk [vmem:[%s16578_s15 + $0x184] sm:$0xf] %vm11544_vm1, %v13102_v20  ;;  %v10106_v40 = vadd.f32 %v17237_v57, %v9843_v7  ;;  %v9844_v32 = vmul.f32 %v17230_v23, %v9581_v5  ;;  %v7295_v17 = vadd.f32 %v7294_v27, %v18833_v0  ;;  %v7296_v51 = vpop.f32.mrb[205].mxu1 }
 0x587   : > { %9324 = vst.msk [vmem:[#allocation2 + $0x328] sm:$0xff] %vm290_vm0, %v9067_v16  ;;  %v8353_v58 = vpop.f32.mrb[205].mxu0  ;;  %v7297_v48 = vpop.f32.mrb[206].mxu1 }
 0x588   : > { %v8354_v11 = vpop.f32.mrb[206].mxu0  ;;  %v10362_v26 = vmax.f32 %v10106_v40, 0.0  ;;  %v10107_v47 = vadd.f32 %v17237_v57, %v9844_v32  ;;  %v8352_v9 = vadd.f32 %v8351_v46, %v7295_v17  ;;  %v7298_v30 = vadd.f32 %v7297_v48, %v18834_v56  ;;  %v7299_v42 = vpop.f32.mrb[207].mxu1  ;;  %v14288_v32 = vld [vmem:[%s14921_s14 + $0xf08] ss:$24 sps:$4 sm:$0xff]   ;;  %v653_v58 = vld [vmem:[#allocation2 + $0x350] sm:$0xff] }
 0x589   : > { %v8356_v36 = vpop.f32.mrb[207].mxu0  ;;  %v18838_v42 = vld [vmem:[#allocation179_spill] sm:$0xff] }
 0x58a   : > { %v13103_v21 = vpack.c.bf16 %v10362_v26, %v10362_v26  ;;  %v10363_v18 = vmax.f32 %v10107_v47, 0.0  ;;  %v9068_v6 = vadd.f32 %v8352_v9, %v649_v54  ;;  %v8355_v53 = vadd.f32 %v8354_v11, %v7298_v30  ;;  %7509 = vmatmul.mubr.bf16.gmra.mrb[56].mxu1 %v14276_v52  ;;  %v18837_v54 = vld [vmem:[#allocation177_spill] sm:$0xff]  ;;  %v14291_v11 = vld [vmem:[%s14921_s14 + $0xf10] ss:$24 sps:$4 sm:$0xff]  }
 0x58b   : > { %8566 = vmatmul.mubr.bf16.gmra.mrb[56].mxu0 %v14279_v37  ;;  %7516 = vmatprep.mubr.bf16.mxu1 %v14284_v41  ;;  %v14296_v26 = vld [vmem:[%s14921_s14 + $0xf3c] ss:$24 sps:$4 sm:$0xff]  }
 0x58c   : > { %v9582_v14 = vld [vmem:[#allocation2 + $0x320] sm:$0xff]  ;;  %8573 = vmatprep.mubr.bf16.mxu0 %v14287_v50  ;;  %11643 = vst.msk [vmem:[%s16578_s15 + $0x188] sm:$0xf] %vm11544_vm1, %v13103_v21  ;;  %v13104_v29 = vpack.c.bf16 %v10363_v18, %v10363_v18  ;;  %v9069_v8 = vadd.f32 %v8355_v53, %v650_v38  ;;  %v654_v18 = vld [vmem:[#allocation2 + $0x358] sm:$0xff] }
 0x58d   : > { %v9845_v55 = vmul.f32 %v17230_v23, %v9582_v14  ;;  %9325 = vst.msk [vmem:[#allocation2 + $0x330] sm:$0xff] %vm290_vm0, %v9068_v6  ;;  %v7302_v1 = vpop.f32.mrb[208].mxu1  ;;  %v14299_v47 = vld [vmem:[%s14921_s14 + $0xf44] ss:$24 sps:$4 sm:$0xff]  }
 0x58e   : > { %v9583_v28 = vld [vmem:[#allocation2 + $0x328] sm:$0xff]  ;;  %v8359_v39 = vpop.f32.mrb[208].mxu0  ;;  %11644 = vst.msk [vmem:[%s16578_s15 + $0x18c] sm:$0xf] %vm11544_vm1, %v13104_v29  ;;  %v7303_v10 = vadd.f32 %v7302_v1, %v18835_v3  ;;  %v7304_v49 = vpop.f32.mrb[209].mxu1 }
 0x58f   : > { %v10108_v22 = vadd.f32 %v17237_v57, %v9845_v55  ;;  %v9846_v63 = vmul.f32 %v17230_v23, %v9583_v28  ;;  %9326 = vst.msk [vmem:[#allocation2 + $0x338] sm:$0xff] %vm290_vm0, %v9069_v8  ;;  %v8361_v61 = vpop.f32.mrb[209].mxu0  ;;  %v7305_v2 = vpop.f32.mrb[210].mxu1 }
 0x590   : > { %v8362_v12 = vpop.f32.mrb[210].mxu0  ;;  %v8360_v62 = vadd.f32 %v8359_v39, %v7303_v10  ;;  %v7306_v24 = vadd.f32 %v7305_v2, %v18836_v19  ;;  %v7307_v34 = vpop.f32.mrb[211].mxu1  ;;  %v655_v61 = vld [vmem:[#allocation2 + $0x360] sm:$0xff] }
 0x591   : > { %v10364_v33 = vmax.f32 %v10108_v22, 0.0  ;;  %v10109_v60 = vadd.f32 %v17237_v57, %v9846_v63  ;;  %v8364_v35 = vpop.f32.mrb[211].mxu0  ;;  %v14294_v63 = vld [vmem:[%s14921_s14 + $0xf38] ss:$24 sps:$4 sm:$0xff]  }
 0x592   : > { %v9070_v31 = vadd.f32 %v8360_v62, %v651_v59  ;;  %v8363_v20 = vadd.f32 %v8362_v12, %v7306_v24  ;;  %7517 = vmatmul.mubr.bf16.gmra.mrb[60].mxu1 %v14282_v43  ;;  %v18839_v59 = vld [vmem:[#allocation181_spill] sm:$0xff]  ;;  %v18840_v34 = vld [vmem:[#allocation183_spill] sm:$0xff] }
 0x593   : > { %v13105_v13 = vpack.c.bf16 %v10364_v33, %v10364_v33  ;;  %v10365_v44 = vmax.f32 %v10109_v60, 0.0  ;;  %8574 = vmatmul.mubr.bf16.gmra.mrb[60].mxu0 %v14285_v25  ;;  %7524 = vmatprep.mubr.bf16.mxu1 %v14290_v4  ;;  %v14297_v12 = vld [vmem:[%s14921_s14 + $0xf40] ss:$24 sps:$4 sm:$0xff]   ;;  %v14302_v33 = vld [vmem:[%s14921_s14 + $0xf6c] ss:$24 sps:$4 sm:$0xff]  }
 0x594   : > { %v9584_v7 = vld [vmem:[#allocation2 + $0x330] sm:$0xff]  ;;  %8581 = vmatprep.mubr.bf16.mxu0 %v14293_v15  ;;  %9327 = vst.msk [vmem:[#allocation2 + $0x340] sm:$0xff] %vm290_vm0, %v9070_v31  ;;  %v9071_v27 = vadd.f32 %v8363_v20, %v652_v45 }
 0x595   : > { %11645 = vst.msk [vmem:[%s16578_s15 + $0x190] sm:$0xf] %vm11544_vm1, %v13105_v13  ;;  %v13106_v16 = vpack.c.bf16 %v10365_v44, %v10365_v44  ;;  %v9847_v5 = vmul.f32 %v17230_v23, %v9584_v7  ;;  %v7310_v52 = vpop.f32.mrb[212].mxu1  ;;  %v14305_v60 = vld [vmem:[%s14921_s14 + $0xf74] ss:$24 sps:$4 sm:$0xff]  }
 0x596   : > { %v9585_v46 = vld [vmem:[#allocation2 + $0x338] sm:$0xff]  ;;  %v8367_v40 = vpop.f32.mrb[212].mxu0  ;;  %9328 = vst.msk [vmem:[#allocation2 + $0x348] sm:$0xff] %vm290_vm0, %v9071_v27  ;;  %v7311_v51 = vadd.f32 %v7310_v52, %v18837_v54  ;;  %v7312_v37 = vpop.f32.mrb[213].mxu1  ;;  %v656_v44 = vld [vmem:[#allocation2 + $0x368] sm:$0xff] }
 0x597   : > { %11646 = vst.msk [vmem:[%s16578_s15 + $0x194] sm:$0xf] %vm11544_vm1, %v13106_v16  ;;  %v10110_v0 = vadd.f32 %v17237_v57, %v9847_v5  ;;  %v9848_v17 = vmul.f32 %v17230_v23, %v9585_v46  ;;  %v8369_v48 = vpop.f32.mrb[213].mxu0  ;;  %v7313_v41 = vpop.f32.mrb[214].mxu1 }
 0x598   : > { %v8370_v50 = vpop.f32.mrb[214].mxu0  ;;  %v8368_v30 = vadd.f32 %v8367_v40, %v7311_v51  ;;  %v7314_v36 = vadd.f32 %v7313_v41, %v18838_v42  ;;  %v7315_v38 = vpop.f32.mrb[215].mxu1  ;;  %v657_v48 = vld [vmem:[#allocation2 + $0x370] sm:$0xff] }
 0x599   : > { %v10366_v9 = vmax.f32 %v10110_v0, 0.0  ;;  %v10111_v56 = vadd.f32 %v17237_v57, %v9848_v17  ;;  %v8372_v21 = vpop.f32.mrb[215].mxu0  ;;  %v14300_v17 = vld [vmem:[%s14921_s14 + $0xf68] ss:$24 sps:$4 sm:$0xff]   ;;  %v18842_v38 = vld [vmem:[#allocation187_spill] sm:$0xff] }
 0x59a   : > { %v9072_v14 = vadd.f32 %v8368_v30, %v653_v58  ;;  %v8371_v29 = vadd.f32 %v8370_v50, %v7314_v36  ;;  %7525 = vmatmul.mubr.bf16.gmra.mrb[64].mxu1 %v14288_v32  ;;  %v18841_v58 = vld [vmem:[#allocation185_spill] sm:$0xff]  ;;  %v14303_v50 = vld [vmem:[%s14921_s14 + $0xf70] ss:$24 sps:$4 sm:$0xff]  }
 0x59b   : > { %v13107_v6 = vpack.c.bf16 %v10366_v9, %v10366_v9  ;;  %v10367_v53 = vmax.f32 %v10111_v56, 0.0  ;;  %8582 = vmatmul.mubr.bf16.gmra.mrb[64].mxu0 %v14291_v11  ;;  %v9586_v55 = vld [vmem:[#allocation2 + $0x340] sm:$0xff]  ;;  %7532 = vmatprep.mubr.bf16.mxu1 %v14296_v26  ;;  %v14308_v9 = vld [vmem:[%s14921_s14 + $0xf9c] ss:$24 sps:$4 sm:$0xff]  }
 0x59c   : > { %8589 = vmatprep.mubr.bf16.mxu0 %v14299_v47  ;;  %v9849_v28 = vmul.f32 %v17230_v23, %v9586_v55  ;;  %9329 = vst.msk [vmem:[#allocation2 + $0x350] sm:$0xff] %vm290_vm0, %v9072_v14  ;;  %v9073_v1 = vadd.f32 %v8371_v29, %v654_v18  ;;  %v14311_v56 = vld [vmem:[%s14921_s14 + $0xfa4] ss:$24 sps:$4 sm:$0xff]  }
 0x59d   : > { %11647 = vst.msk [vmem:[%s16578_s15 + $0x198] sm:$0xf] %vm11544_vm1, %v13107_v6  ;;  %v13108_v8 = vpack.c.bf16 %v10367_v53, %v10367_v53  ;;  %v9587_v39 = vld [vmem:[#allocation2 + $0x348] sm:$0xff]  ;;  %v7318_v43 = vpop.f32.mrb[216].mxu1  ;;  %v658_v53 = vld [vmem:[#allocation2 + $0x378] sm:$0xff] }
 0x59e   : > { %v8375_v22 = vpop.f32.mrb[216].mxu0  ;;  %v10112_v3 = vadd.f32 %v17237_v57, %v9849_v28  ;;  %v9850_v10 = vmul.f32 %v17230_v23, %v9587_v39  ;;  %9330 = vst.msk [vmem:[#allocation2 + $0x358] sm:$0xff] %vm290_vm0, %v9073_v1  ;;  %v7319_v49 = vadd.f32 %v7318_v43, %v18839_v59  ;;  %v7320_v25 = vpop.f32.mrb[217].mxu1 }
 0x59f   : > { %11648 = vst.msk [vmem:[%s16578_s15 + $0x19c] sm:$0xf] %vm11544_vm1, %v13108_v8  ;;  %v8377_v2 = vpop.f32.mrb[217].mxu0  ;;  %v7321_v4 = vpop.f32.mrb[218].mxu1 }
 0x5a0   : > { %v8378_v15 = vpop.f32.mrb[218].mxu0  ;;  %v10368_v62 = vmax.f32 %v10112_v3, 0.0  ;;  %v10113_v19 = vadd.f32 %v17237_v57, %v9850_v10  ;;  %v8376_v24 = vadd.f32 %v8375_v22, %v7319_v49  ;;  %v7322_v35 = vadd.f32 %v7321_v4, %v18840_v34  ;;  %v7323_v45 = vpop.f32.mrb[219].mxu1  ;;  %v14306_v10 = vld [vmem:[%s14921_s14 + $0xf98] ss:$24 sps:$4 sm:$0xff]   ;;  %v659_v2 = vld [vmem:[#allocation2 + $0x380] sm:$0xff] }
 0x5a1   : > { %v8380_v13 = vpop.f32.mrb[219].mxu0  ;;  %v18844_v45 = vld [vmem:[#allocation191_spill] sm:$0xff] }
 0x5a2   : > { %v13109_v31 = vpack.c.bf16 %v10368_v62, %v10368_v62  ;;  %v10369_v20 = vmax.f32 %v10113_v19, 0.0  ;;  %v9074_v7 = vadd.f32 %v8376_v24, %v655_v61  ;;  %v8379_v16 = vadd.f32 %v8378_v15, %v7322_v35  ;;  %7533 = vmatmul.mubr.bf16.gmra.mrb[68].mxu1 %v14294_v63  ;;  %v18843_v61 = vld [vmem:[#allocation189_spill] sm:$0xff]  ;;  %v14314_v62 = vld [vmem:[%s14921_s14 + $0xfcc] ss:$24 sps:$4 sm:$0xff]  }
 0x5a3   : > { %8590 = vmatmul.mubr.bf16.gmra.mrb[68].mxu0 %v14297_v12  ;;  %v9588_v5 = vld [vmem:[#allocation2 + $0x350] sm:$0xff]  ;;  %7540 = vmatprep.mubr.bf16.mxu1 %v14302_v33  ;;  %v14309_v15 = vld [vmem:[%s14921_s14 + $0xfa0] ss:$24 sps:$4 sm:$0xff]  }
 0x5a4   : > { %8597 = vmatprep.mubr.bf16.mxu0 %v14305_v60  ;;  %11649 = vst.msk [vmem:[%s16578_s15 + $0x1a0] sm:$0xf] %vm11544_vm1, %v13109_v31  ;;  %v13110_v27 = vpack.c.bf16 %v10369_v20, %v10369_v20  ;;  %v9851_v46 = vmul.f32 %v17230_v23, %v9588_v5  ;;  %v9075_v52 = vadd.f32 %v8379_v16, %v656_v44  ;;  %v14317_v19 = vld [vmem:[%s14921_s14 + $0xfd4] ss:$24 sps:$4 sm:$0xff]  }
 0x5a5   : > { %9331 = vst.msk [vmem:[#allocation2 + $0x360] sm:$0xff] %vm290_vm0, %v9074_v7  ;;  %v9589_v40 = vld [vmem:[#allocation2 + $0x358] sm:$0xff]  ;;  %v7326_v32 = vpop.f32.mrb[220].mxu1  ;;  %v660_v31 = vld [vmem:[#allocation2 + $0x388] sm:$0xff] }
 0x5a6   : > { %v8383_v0 = vpop.f32.mrb[220].mxu0  ;;  %11650 = vst.msk [vmem:[%s16578_s15 + $0x1a4] sm:$0xf] %vm11544_vm1, %v13110_v27  ;;  %v10114_v54 = vadd.f32 %v17237_v57, %v9851_v46  ;;  %v9852_v51 = vmul.f32 %v17230_v23, %v9589_v40  ;;  %v7327_v37 = vadd.f32 %v7326_v32, %v18841_v58  ;;  %v7328_v11 = vpop.f32.mrb[221].mxu1  ;;  %v17458_v46 = vld [vmem:[#allocation5] ss:$0 sm:$0xff] }
 0x5a7   : > { %9332 = vst.msk [vmem:[#allocation2 + $0x368] sm:$0xff] %vm290_vm0, %v9075_v52  ;;  %v8385_v41 = vpop.f32.mrb[221].mxu0  ;;  %v7329_v26 = vpop.f32.mrb[222].mxu1 }
 0x5a8   : > { %v8386_v47 = vpop.f32.mrb[222].mxu0  ;;  %v10370_v30 = vmax.f32 %v10114_v54, 0.0  ;;  %v10115_v42 = vadd.f32 %v17237_v57, %v9852_v51  ;;  %v8384_v36 = vadd.f32 %v8383_v0, %v7327_v37  ;;  %v7330_v21 = vadd.f32 %v7329_v26, %v18842_v38  ;;  %v7331_v18 = vpop.f32.mrb[223].mxu1  ;;  %v14312_v54 = vld [vmem:[%s14921_s14 + $0xfc8] ss:$24 sps:$4 sm:$0xff]   ;;  %v661_v41 = vld [vmem:[#allocation2 + $0x390] sm:$0xff] }
 0x5a9   : > { %v8388_v6 = vpop.f32.mrb[223].mxu0  ;;  %v17465_v51 = vld [vmem:[#allocation7] ss:$0 sm:$0xff]  ;;  %v18846_v18 = vld [vmem:[#allocation195_spill] sm:$0xff] }
 0x5aa   : > { %v13111_v14 = vpack.c.bf16 %v10370_v30, %v10370_v30  ;;  %v10371_v29 = vmax.f32 %v10115_v42, 0.0  ;;  %v9076_v55 = vadd.f32 %v8384_v36, %v657_v48  ;;  %v8387_v8 = vadd.f32 %v8386_v47, %v7330_v21  ;;  %7541 = vmatmul.mubr.bf16.gmra.mrb[72].mxu1 %v14300_v17  ;;  %v18845_v48 = vld [vmem:[#allocation193_spill] sm:$0xff]  ;;  %v14315_v47 = vld [vmem:[%s14921_s14 + $0xfd0] ss:$24 sps:$4 sm:$0xff]  }
 0x5ab   : > { %8598 = vmatmul.mubr.bf16.gmra.mrb[72].mxu0 %v14303_v50  ;;  %7548 = vmatprep.mubr.bf16.mxu1 %v14308_v9  ;;  %v14320_v30 = vld [vmem:[%s14921_s14 + $0xffc] ss:$24 sps:$4 sm:$0xff]  }
 0x5ac   : > { %v9590_v28 = vld [vmem:[#allocation2 + $0x360] sm:$0xff]  ;;  %8605 = vmatprep.mubr.bf16.mxu0 %v14311_v56  ;;  %11651 = vst.msk [vmem:[%s16578_s15 + $0x1a8] sm:$0xf] %vm11544_vm1, %v13111_v14  ;;  %v13112_v1 = vpack.c.bf16 %v10371_v29, %v10371_v29  ;;  %v9077_v43 = vadd.f32 %v8387_v8, %v658_v53  ;;  %v662_v29 = vld [vmem:[#allocation2 + $0x398] sm:$0xff] }
 0x5ad   : > { %v9853_v39 = vmul.f32 %v17230_v23, %v9590_v28  ;;  %9333 = vst.msk [vmem:[#allocation2 + $0x370] sm:$0xff] %vm290_vm0, %v9076_v55  ;;  %v7334_v63 = vpop.f32.mrb[224].mxu1  ;;  %v14323_v42 = vld [vmem:[%s14921_s14 + $0x1004] ss:$24 sps:$4 sm:$0xff]  }
 0x5ae   : > { %v9591_v22 = vld [vmem:[#allocation2 + $0x368] sm:$0xff]  ;;  %v8391_v3 = vpop.f32.mrb[224].mxu0  ;;  %11652 = vst.msk [vmem:[%s16578_s15 + $0x1ac] sm:$0xf] %vm11544_vm1, %v13112_v1  ;;  %v7335_v25 = vadd.f32 %v7334_v63, %v18843_v61  ;;  %v7336_v12 = vpop.f32.mrb[225].mxu1 }
 0x5af   : > { %v10116_v59 = vadd.f32 %v17237_v57, %v9853_v39  ;;  %v9854_v49 = vmul.f32 %v17230_v23, %v9591_v22  ;;  %9334 = vst.msk [vmem:[#allocation2 + $0x378] sm:$0xff] %vm290_vm0, %v9077_v43  ;;  %v8393_v4 = vpop.f32.mrb[225].mxu0  ;;  %v7337_v33 = vpop.f32.mrb[226].mxu1 }
 0x5b0   : > { %v8394_v60 = vpop.f32.mrb[226].mxu0  ;;  %v8392_v35 = vadd.f32 %v8391_v3, %v7335_v25  ;;  %v7338_v13 = vadd.f32 %v7337_v33, %v18844_v45  ;;  %v7339_v23 = vpop.f32.mrb[227].mxu1  ;;  %v663_v4 = vld [vmem:[#allocation2 + $0x3a0] sm:$0xff] }
 0x5b1   : > { %v10372_v24 = vmax.f32 %v10116_v59, 0.0  ;;  %v10117_v34 = vadd.f32 %v17237_v57, %v9854_v49  ;;  %v8396_v44 = vpop.f32.mrb[227].mxu0  ;;  %v14318_v49 = vld [vmem:[%s14921_s14 + $0xff8] ss:$24 sps:$4 sm:$0xff]  }
 0x5b2   : > { %v9078_v16 = vadd.f32 %v8392_v35, %v659_v2  ;;  %v8395_v5 = vadd.f32 %v8394_v60, %v7338_v13  ;;  %7549 = vmatmul.mubr.bf16.gmra.mrb[76].mxu1 %v14306_v10  ;;  %v18847_v2 = vld [vmem:[#allocation197_spill] sm:$0xff]  ;;  %v18848_v23 = vld [vmem:[#allocation199_spill] sm:$0xff] }
 0x5b3   : > { %v13113_v20 = vpack.c.bf16 %v10372_v24, %v10372_v24  ;;  %v10373_v7 = vmax.f32 %v10117_v34, 0.0  ;;  %8606 = vmatmul.mubr.bf16.gmra.mrb[76].mxu0 %v14309_v15  ;;  %7556 = vmatprep.mubr.bf16.mxu1 %v14314_v62  ;;  %v14321_v60 = vld [vmem:[%s14921_s14 + $0x1000] ss:$24 sps:$4 sm:$0xff]   ;;  %v14326_v24 = vld [vmem:[%s14921_s14 + $0x102c] ss:$24 sps:$4 sm:$0xff]  }
 0x5b4   : > { %v9592_v27 = vld [vmem:[#allocation2 + $0x370] sm:$0xff]  ;;  %8613 = vmatprep.mubr.bf16.mxu0 %v14317_v19  ;;  %9335 = vst.msk [vmem:[#allocation2 + $0x380] sm:$0xff] %vm290_vm0, %v9078_v16  ;;  %v9079_v40 = vadd.f32 %v8395_v5, %v660_v31 }
 0x5b5   : > { %11653 = vst.msk [vmem:[%s16578_s15 + $0x1b0] sm:$0xf] %vm11544_vm1, %v13113_v20  ;;  %v13114_v57 = vpack.c.bf16 %v10373_v7, %v10373_v7  ;;  %v9855_v52 = vmul.f32 %v17458_v46, %v9592_v27  ;;  %v7342_v0 = vpop.f32.mrb[228].mxu1  ;;  %v14329_v34 = vld [vmem:[%s14921_s14 + $0x1034] ss:$24 sps:$4 sm:$0xff]  }
 0x5b6   : > { %v9593_v32 = vld [vmem:[#allocation2 + $0x378] sm:$0xff]  ;;  %v8399_v17 = vpop.f32.mrb[228].mxu0  ;;  %9336 = vst.msk [vmem:[#allocation2 + $0x388] sm:$0xff] %vm290_vm0, %v9079_v40  ;;  %v7343_v11 = vadd.f32 %v7342_v0, %v18845_v48  ;;  %v7344_v50 = vpop.f32.mrb[229].mxu1  ;;  %v664_v7 = vld [vmem:[#allocation2 + $0x3a8] sm:$0xff] }
 0x5b7   : > { %11654 = vst.msk [vmem:[%s16578_s15 + $0x1b4] sm:$0xf] %vm11544_vm1, %v13114_v57  ;;  %v10118_v58 = vadd.f32 %v17465_v51, %v9855_v52  ;;  %v9856_v37 = vmul.f32 %v17458_v46, %v9593_v32  ;;  %v8401_v26 = vpop.f32.mrb[229].mxu0  ;;  %v7345_v9 = vpop.f32.mrb[230].mxu1 }
 0x5b8   : > { %v8402_v56 = vpop.f32.mrb[230].mxu0  ;;  %v8400_v21 = vadd.f32 %v8399_v17, %v7343_v11  ;;  %v7346_v6 = vadd.f32 %v7345_v9, %v18846_v18  ;;  %v7347_v53 = vpop.f32.mrb[231].mxu1  ;;  %v665_v26 = vld [vmem:[#allocation2 + $0x3b0] sm:$0xff] }
 0x5b9   : > { %v10374_v36 = vmax.f32 %v10118_v58, 0.0  ;;  %v10119_v38 = vadd.f32 %v17465_v51, %v9856_v37  ;;  %v8404_v14 = vpop.f32.mrb[231].mxu0  ;;  %v14324_v37 = vld [vmem:[%s14921_s14 + $0x1028] ss:$24 sps:$4 sm:$0xff]   ;;  %v18850_v53 = vld [vmem:[#allocation203_spill] sm:$0xff] }
 0x5ba   : > { %v9080_v28 = vadd.f32 %v8400_v21, %v661_v41  ;;  %v8403_v1 = vadd.f32 %v8402_v56, %v7346_v6  ;;  %7557 = vmatmul.mubr.bf16.gmra.mrb[80].mxu1 %v14312_v54  ;;  %v18849_v41 = vld [vmem:[#allocation201_spill] sm:$0xff]  ;;  %v14327_v56 = vld [vmem:[%s14921_s14 + $0x1030] ss:$24 sps:$4 sm:$0xff]  }
 0x5bb   : > { %v13115_v55 = vpack.c.bf16 %v10374_v36, %v10374_v36  ;;  %v10375_v8 = vmax.f32 %v10119_v38, 0.0  ;;  %8614 = vmatmul.mubr.bf16.gmra.mrb[80].mxu0 %v14315_v47  ;;  %v9594_v39 = vld [vmem:[#allocation2 + $0x380] sm:$0xff]  ;;  %7564 = vmatprep.mubr.bf16.mxu1 %v14320_v30  ;;  %v14332_v36 = vld [vmem:[%s14921_s14 + $0x105c] ss:$24 sps:$4 sm:$0xff]  }
 0x5bc   : > { %8621 = vmatprep.mubr.bf16.mxu0 %v14323_v42  ;;  %v9857_v22 = vmul.f32 %v17458_v46, %v9594_v39  ;;  %9337 = vst.msk [vmem:[#allocation2 + $0x390] sm:$0xff] %vm290_vm0, %v9080_v28  ;;  %v9081_v63 = vadd.f32 %v8403_v1, %v662_v29  ;;  %v14335_v38 = vld [vmem:[%s14921_s14 + $0x1064] ss:$24 sps:$4 sm:$0xff]  }
 0x5bd   : > { %11655 = vst.msk [vmem:[%s16578_s15 + $0x1b8] sm:$0xf] %vm11544_vm1, %v13115_v55  ;;  %v13116_v43 = vpack.c.bf16 %v10375_v8, %v10375_v8  ;;  %v9595_v3 = vld [vmem:[#allocation2 + $0x388] sm:$0xff]  ;;  %v7350_v10 = vpop.f32.mrb[232].mxu1  ;;  %v666_v8 = vld [vmem:[#allocation2 + $0x3b8] sm:$0xff] }
 0x5be   : > { %v8407_v59 = vpop.f32.mrb[232].mxu0  ;;  %v10120_v61 = vadd.f32 %v17465_v51, %v9857_v22  ;;  %v9858_v25 = vmul.f32 %v17458_v46, %v9595_v3  ;;  %9338 = vst.msk [vmem:[#allocation2 + $0x398] sm:$0xff] %vm290_vm0, %v9081_v63  ;;  %v7351_v12 = vadd.f32 %v7350_v10, %v18847_v2  ;;  %v7352_v15 = vpop.f32.mrb[233].mxu1 }
 0x5bf   : > { %11656 = vst.msk [vmem:[%s16578_s15 + $0x1bc] sm:$0xf] %vm11544_vm1, %v13116_v43  ;;  %v8409_v33 = vpop.f32.mrb[233].mxu0  ;;  %v7353_v62 = vpop.f32.mrb[234].mxu1 }
 0x5c0   : > { %v8410_v19 = vpop.f32.mrb[234].mxu0  ;;  %v10376_v35 = vmax.f32 %v10120_v61, 0.0  ;;  %v10121_v45 = vadd.f32 %v17465_v51, %v9858_v25  ;;  %v8408_v13 = vadd.f32 %v8407_v59, %v7351_v12  ;;  %v7354_v44 = vadd.f32 %v7353_v62, %v18848_v23  ;;  %v7355_v31 = vpop.f32.mrb[235].mxu1  ;;  %v14330_v25 = vld [vmem:[%s14921_s14 + $0x1058] ss:$24 sps:$4 sm:$0xff]   ;;  %v667_v33 = vld [vmem:[#allocation2 + $0x3c0] sm:$0xff] }
 0x5c1   : > { %v8412_v20 = vpop.f32.mrb[235].mxu0  ;;  %v18852_v31 = vld [vmem:[#allocation207_spill] sm:$0xff] }
 0x5c2   : > { %v13117_v16 = vpack.c.bf16 %v10376_v35, %v10376_v35  ;;  %v10377_v5 = vmax.f32 %v10121_v45, 0.0  ;;  %v9082_v27 = vadd.f32 %v8408_v13, %v663_v4  ;;  %v8411_v57 = vadd.f32 %v8410_v19, %v7354_v44  ;;  %7565 = vmatmul.mubr.bf16.gmra.mrb[84].mxu1 %v14318_v49  ;;  %v18851_v4 = vld [vmem:[#allocation205_spill] sm:$0xff]  ;;  %v14338_v35 = vld [vmem:[%s14921_s14 + $0x108c] ss:$24 sps:$4 sm:$0xff]  }
 0x5c3   : > { %8622 = vmatmul.mubr.bf16.gmra.mrb[84].mxu0 %v14321_v60  ;;  %v9596_v52 = vld [vmem:[#allocation2 + $0x390] sm:$0xff]  ;;  %7572 = vmatprep.mubr.bf16.mxu1 %v14326_v24  ;;  %v14333_v19 = vld [vmem:[%s14921_s14 + $0x1060] ss:$24 sps:$4 sm:$0xff]  }
 0x5c4   : > { %8629 = vmatprep.mubr.bf16.mxu0 %v14329_v34  ;;  %11657 = vst.msk [vmem:[%s16578_s15 + $0x1c0] sm:$0xf] %vm11544_vm1, %v13117_v16  ;;  %v13118_v40 = vpack.c.bf16 %v10377_v5, %v10377_v5  ;;  %v9859_v32 = vmul.f32 %v17458_v46, %v9596_v52  ;;  %v9083_v0 = vadd.f32 %v8411_v57, %v664_v7  ;;  %v14341_v45 = vld [vmem:[%s14921_s14 + $0x1094] ss:$24 sps:$4 sm:$0xff]  }
 0x5c5   : > { %9339 = vst.msk [vmem:[#allocation2 + $0x3a0] sm:$0xff] %vm290_vm0, %v9082_v27  ;;  %v9597_v17 = vld [vmem:[#allocation2 + $0x398] sm:$0xff]  ;;  %v7358_v54 = vpop.f32.mrb[236].mxu1  ;;  %v668_v5 = vld [vmem:[#allocation2 + $0x3c8] sm:$0xff] }
 0x5c6   : > { %v8415_v58 = vpop.f32.mrb[236].mxu0  ;;  %11658 = vst.msk [vmem:[%s16578_s15 + $0x1c4] sm:$0xf] %vm11544_vm1, %v13118_v40  ;;  %v10122_v48 = vadd.f32 %v17465_v51, %v9859_v32  ;;  %v9860_v11 = vmul.f32 %v17458_v46, %v9597_v17  ;;  %v7359_v50 = vadd.f32 %v7358_v54, %v18849_v41  ;;  %v7360_v47 = vpop.f32.mrb[237].mxu1 }
 0x5c7   : > { %9340 = vst.msk [vmem:[#allocation2 + $0x3a8] sm:$0xff] %vm290_vm0, %v9083_v0  ;;  %v8417_v9 = vpop.f32.mrb[237].mxu0  ;;  %v7361_v30 = vpop.f32.mrb[238].mxu1 }
 0x5c8   : > { %v8418_v42 = vpop.f32.mrb[238].mxu0  ;;  %v10378_v21 = vmax.f32 %v10122_v48, 0.0  ;;  %v10123_v18 = vadd.f32 %v17465_v51, %v9860_v11  ;;  %v8416_v6 = vadd.f32 %v8415_v58, %v7359_v50  ;;  %v7362_v14 = vadd.f32 %v7361_v30, %v18850_v53  ;;  %v7363_v29 = vpop.f32.mrb[239].mxu1  ;;  %v14336_v11 = vld [vmem:[%s14921_s14 + $0x1088] ss:$24 sps:$4 sm:$0xff]   ;;  %v669_v9 = vld [vmem:[#allocation2 + $0x3d0] sm:$0xff] }
 0x5c9   : > { %v8420_v55 = vpop.f32.mrb[239].mxu0  ;;  %v18854_v29 = vld [vmem:[#allocation211_spill] sm:$0xff] }
 0x5ca   : > { %v13119_v28 = vpack.c.bf16 %v10378_v21, %v10378_v21  ;;  %v10379_v1 = vmax.f32 %v10123_v18, 0.0  ;;  %v9084_v39 = vadd.f32 %v8416_v6, %v665_v26  ;;  %v8419_v43 = vadd.f32 %v8418_v42, %v7362_v14  ;;  %7573 = vmatmul.mubr.bf16.gmra.mrb[88].mxu1 %v14324_v37  ;;  %v18853_v26 = vld [vmem:[#allocation209_spill] sm:$0xff]  ;;  %v14339_v42 = vld [vmem:[%s14921_s14 + $0x1090] ss:$24 sps:$4 sm:$0xff]  }
 0x5cb   : > { %8630 = vmatmul.mubr.bf16.gmra.mrb[88].mxu0 %v14327_v56  ;;  %7580 = vmatprep.mubr.bf16.mxu1 %v14332_v36  ;;  %v14344_v21 = vld [vmem:[%s14921_s14 + $0x10bc] ss:$24 sps:$4 sm:$0xff]  }
 0x5cc   : > { %v9598_v22 = vld [vmem:[#allocation2 + $0x3a0] sm:$0xff]  ;;  %8637 = vmatprep.mubr.bf16.mxu0 %v14335_v38  ;;  %11659 = vst.msk [vmem:[%s16578_s15 + $0x1c8] sm:$0xf] %vm11544_vm1, %v13119_v28  ;;  %v13120_v63 = vpack.c.bf16 %v10379_v1, %v10379_v1  ;;  %v9085_v10 = vadd.f32 %v8419_v43, %v666_v8  ;;  %v670_v1 = vld [vmem:[#allocation2 + $0x3d8] sm:$0xff] }
 0x5cd   : > { %v9861_v3 = vmul.f32 %v17458_v46, %v9598_v22  ;;  %9341 = vst.msk [vmem:[#allocation2 + $0x3b0] sm:$0xff] %vm290_vm0, %v9084_v39  ;;  %v7366_v49 = vpop.f32.mrb[240].mxu1  ;;  %v14347_v18 = vld [vmem:[%s14921_s14 + $0x10c4] ss:$24 sps:$4 sm:$0xff]  }
 0x5ce   : > { %v9599_v59 = vld [vmem:[#allocation2 + $0x3a8] sm:$0xff]  ;;  %v8423_v61 = vpop.f32.mrb[240].mxu0  ;;  %11660 = vst.msk [vmem:[%s16578_s15 + $0x1cc] sm:$0xf] %vm11544_vm1, %v13120_v63  ;;  %v7367_v15 = vadd.f32 %v7366_v49, %v18851_v4  ;;  %v7368_v60 = vpop.f32.mrb[241].mxu1 }
 0x5cf   : > { %v10124_v2 = vadd.f32 %v17465_v51, %v9861_v3  ;;  %v9862_v12 = vmul.f32 %v17458_v46, %v9599_v59  ;;  %9342 = vst.msk [vmem:[#allocation2 + $0x3b8] sm:$0xff] %vm290_vm0, %v9085_v10  ;;  %v8425_v62 = vpop.f32.mrb[241].mxu0  ;;  %v7369_v24 = vpop.f32.mrb[242].mxu1 }
 0x5d0   : > { %v8426_v34 = vpop.f32.mrb[242].mxu0  ;;  %v8424_v44 = vadd.f32 %v8423_v61, %v7367_v15  ;;  %v7370_v20 = vadd.f32 %v7369_v24, %v18852_v31  ;;  %v7371_v7 = vpop.f32.mrb[243].mxu1  ;;  %v671_v62 = vld [vmem:[#allocation2 + $0x3e0] sm:$0xff] }
 0x5d1   : > { %v10380_v13 = vmax.f32 %v10124_v2, 0.0  ;;  %v10125_v23 = vadd.f32 %v17465_v51, %v9862_v12  ;;  %v8428_v16 = vpop.f32.mrb[243].mxu0  ;;  %v14342_v12 = vld [vmem:[%s14921_s14 + $0x10b8] ss:$24 sps:$4 sm:$0xff]  }
 0x5d2   : > { %v9086_v52 = vadd.f32 %v8424_v44, %v667_v33  ;;  %v8427_v40 = vadd.f32 %v8426_v34, %v7370_v20  ;;  %7581 = vmatmul.mubr.bf16.gmra.mrb[92].mxu1 %v14330_v25  ;;  %v18855_v33 = vld [vmem:[#allocation213_spill] sm:$0xff]  ;;  %v18856_v7 = vld [vmem:[#allocation215_spill] sm:$0xff] }
 0x5d3   : > { %v13121_v27 = vpack.c.bf16 %v10380_v13, %v10380_v13  ;;  %v10381_v57 = vmax.f32 %v10125_v23, 0.0  ;;  %8638 = vmatmul.mubr.bf16.gmra.mrb[92].mxu0 %v14333_v19  ;;  %7588 = vmatprep.mubr.bf16.mxu1 %v14338_v35  ;;  %v14345_v34 = vld [vmem:[%s14921_s14 + $0x10c0] ss:$24 sps:$4 sm:$0xff]   ;;  %v14350_v13 = vld [vmem:[%s14921_s14 + $0x10ec] ss:$24 sps:$4 sm:$0xff]  }
 0x5d4   : > { %v9600_v32 = vld [vmem:[#allocation2 + $0x3b0] sm:$0xff]  ;;  %8645 = vmatprep.mubr.bf16.mxu0 %v14341_v45  ;;  %9343 = vst.msk [vmem:[#allocation2 + $0x3c0] sm:$0xff] %vm290_vm0, %v9086_v52  ;;  %v9087_v54 = vadd.f32 %v8427_v40, %v668_v5 }
 0x5d5   : > { %11661 = vst.msk [vmem:[%s16578_s15 + $0x1d0] sm:$0xf] %vm11544_vm1, %v13121_v27  ;;  %v13122_v0 = vpack.c.bf16 %v10381_v57, %v10381_v57  ;;  %v9863_v17 = vmul.f32 %v17458_v46, %v9600_v32  ;;  %v7374_v37 = vpop.f32.mrb[244].mxu1  ;;  %v14353_v23 = vld [vmem:[%s14921_s14 + $0x10f4] ss:$24 sps:$4 sm:$0xff]  }
 0x5d6   : > { %v9601_v58 = vld [vmem:[#allocation2 + $0x3b8] sm:$0xff]  ;;  %v8431_v48 = vpop.f32.mrb[244].mxu0  ;;  %9344 = vst.msk [vmem:[#allocation2 + $0x3c8] sm:$0xff] %vm290_vm0, %v9087_v54  ;;  %v7375_v47 = vadd.f32 %v7374_v37, %v18853_v26  ;;  %v7376_v56 = vpop.f32.mrb[245].mxu1  ;;  %v672_v57 = vld [vmem:[#allocation2 + $0x3e8] sm:$0xff] }
 0x5d7   : > { %11662 = vst.msk [vmem:[%s16578_s15 + $0x1d4] sm:$0xf] %vm11544_vm1, %v13122_v0  ;;  %v10126_v41 = vadd.f32 %v17465_v51, %v9863_v17  ;;  %v9864_v50 = vmul.f32 %v17458_v46, %v9601_v58  ;;  %v8433_v30 = vpop.f32.mrb[245].mxu0  ;;  %v7377_v36 = vpop.f32.mrb[246].mxu1 }
 0x5d8   : > { %v8434_v38 = vpop.f32.mrb[246].mxu0  ;;  %v8432_v14 = vadd.f32 %v8431_v48, %v7375_v47  ;;  %v7378_v55 = vadd.f32 %v7377_v36, %v18854_v29  ;;  %v7379_v8 = vpop.f32.mrb[247].mxu1  ;;  %v673_v30 = vld [vmem:[#allocation2 + $0x3f0] sm:$0xff] }
 0x5d9   : > { %v10382_v6 = vmax.f32 %v10126_v41, 0.0  ;;  %v10127_v53 = vadd.f32 %v17465_v51, %v9864_v50  ;;  %v8436_v28 = vpop.f32.mrb[247].mxu0  ;;  %v14348_v50 = vld [vmem:[%s14921_s14 + $0x10e8] ss:$24 sps:$4 sm:$0xff]   ;;  %v18858_v8 = vld [vmem:[#allocation219_spill] sm:$0xff] }
 0x5da   : > { %v9088_v22 = vadd.f32 %v8432_v14, %v669_v9  ;;  %v8435_v63 = vadd.f32 %v8434_v38, %v7378_v55  ;;  %7589 = vmatmul.mubr.bf16.gmra.mrb[96].mxu1 %v14336_v11  ;;  %v18857_v9 = vld [vmem:[#allocation217_spill] sm:$0xff]  ;;  %v14351_v38 = vld [vmem:[%s14921_s14 + $0x10f0] ss:$24 sps:$4 sm:$0xff]  }
 0x5db   : > { %v13123_v39 = vpack.c.bf16 %v10382_v6, %v10382_v6  ;;  %v10383_v43 = vmax.f32 %v10127_v53, 0.0  ;;  %8646 = vmatmul.mubr.bf16.gmra.mrb[96].mxu0 %v14339_v42  ;;  %v9602_v3 = vld [vmem:[#allocation2 + $0x3c0] sm:$0xff]  ;;  %7596 = vmatprep.mubr.bf16.mxu1 %v14344_v21  ;;  %v14356_v6 = vld [vmem:[%s14921_s14 + $0x111c] ss:$24 sps:$4 sm:$0xff]  }
 0x5dc   : > { %8653 = vmatprep.mubr.bf16.mxu0 %v14347_v18  ;;  %v9865_v59 = vmul.f32 %v17458_v46, %v9602_v3  ;;  %9345 = vst.msk [vmem:[#allocation2 + $0x3d0] sm:$0xff] %vm290_vm0, %v9088_v22  ;;  %v9089_v49 = vadd.f32 %v8435_v63, %v670_v1  ;;  %v14359_v53 = vld [vmem:[%s14921_s14 + $0x1124] ss:$24 sps:$4 sm:$0xff]  }
 0x5dd   : > { %11663 = vst.msk [vmem:[%s16578_s15 + $0x1d8] sm:$0xf] %vm11544_vm1, %v13123_v39  ;;  %v13124_v10 = vpack.c.bf16 %v10383_v43, %v10383_v43  ;;  %v9603_v61 = vld [vmem:[#allocation2 + $0x3c8] sm:$0xff]  ;;  %v7382_v25 = vpop.f32.mrb[248].mxu1  ;;  %v674_v43 = vld [vmem:[#allocation2 + $0x3f8] sm:$0xff] }
 0x5de   : > { %v8439_v2 = vpop.f32.mrb[248].mxu0  ;;  %v10128_v4 = vadd.f32 %v17465_v51, %v9865_v59  ;;  %v9866_v15 = vmul.f32 %v17458_v46, %v9603_v61  ;;  %9346 = vst.msk [vmem:[#allocation2 + $0x3d8] sm:$0xff] %vm290_vm0, %v9089_v49  ;;  %v7383_v60 = vadd.f32 %v7382_v25, %v18855_v33  ;;  %v7384_v19 = vpop.f32.mrb[249].mxu1 }
 0x5df   : > { %11664 = vst.msk [vmem:[%s16578_s15 + $0x1dc] sm:$0xf] %vm11544_vm1, %v13124_v10  ;;  %v8441_v24 = vpop.f32.mrb[249].mxu0  ;;  %v7385_v35 = vpop.f32.mrb[250].mxu1 }
 0x5e0   : > { %v8442_v45 = vpop.f32.mrb[250].mxu0  ;;  %v10384_v44 = vmax.f32 %v10128_v4, 0.0  ;;  %v10129_v31 = vadd.f32 %v17465_v51, %v9866_v15  ;;  %v8440_v20 = vadd.f32 %v8439_v2, %v7383_v60  ;;  %v7386_v16 = vadd.f32 %v7385_v35, %v18856_v7  ;;  %v7387_v5 = vpop.f32.mrb[251].mxu1  ;;  %v14354_v15 = vld [vmem:[%s14921_s14 + $0x1118] ss:$24 sps:$4 sm:$0xff]   ;;  %v675_v24 = vld [vmem:[#allocation2 + $0x400] sm:$0xff] }
 0x5e1   : > { %v8444_v27 = vpop.f32.mrb[251].mxu0  ;;  %v18860_v5 = vld [vmem:[#allocation11_spill] sm:$0xff] }
 0x5e2   : > { %v13125_v52 = vpack.c.bf16 %v10384_v44, %v10384_v44  ;;  %v10385_v40 = vmax.f32 %v10129_v31, 0.0  ;;  %v9090_v32 = vadd.f32 %v8440_v20, %v671_v62  ;;  %v8443_v0 = vadd.f32 %v8442_v45, %v7386_v16  ;;  %7597 = vmatmul.mubr.bf16.gmra.mrb[100].mxu1 %v14342_v12  ;;  %v18859_v62 = vld [vmem:[#allocation10_spill] sm:$0xff]  ;;  %v14357_v45 = vld [vmem:[%s14921_s14 + $0x1120] ss:$24 sps:$4 sm:$0xff]   ;;  %v14365_v31 = vld [vmem:[%s14921_s14 + $0x1154] ss:$24 sps:$4 sm:$0xff]  }
 0x5e3   : > { %8654 = vmatmul.mubr.bf16.gmra.mrb[100].mxu0 %v14345_v34  ;;  %v9604_v17 = vld [vmem:[#allocation2 + $0x3d0] sm:$0xff]  ;;  %7604 = vmatprep.mubr.bf16.mxu1 %v14350_v13  ;;  %v14362_v44 = vld [vmem:[%s14921_s14 + $0x114c] ss:$24 sps:$4 sm:$0xff]  }
 0x5e4   : > { %8661 = vmatprep.mubr.bf16.mxu0 %v14353_v23  ;;  %11665 = vst.msk [vmem:[%s16578_s15 + $0x1e0] sm:$0xf] %vm11544_vm1, %v13125_v52  ;;  %v13126_v54 = vpack.c.bf16 %v10385_v40, %v10385_v40  ;;  %v9867_v58 = vmul.f32 %v17458_v46, %v9604_v17  ;;  %v9091_v37 = vadd.f32 %v8443_v0, %v672_v57  ;;  %v676_v40 = vld [vmem:[#allocation2 + $0x408] sm:$0xff] }
 0x5e5   : > { %9347 = vst.msk [vmem:[#allocation2 + $0x3e0] sm:$0xff] %vm290_vm0, %v9090_v32  ;;  %v9605_v48 = vld [vmem:[#allocation2 + $0x3d8] sm:$0xff]  ;;  %v7390_v11 = vpop.f32.mrb[252].mxu1 }
 0x5e6   : > { %v8447_v41 = vpop.f32.mrb[252].mxu0  ;;  %11666 = vst.msk [vmem:[%s16578_s15 + $0x1e4] sm:$0xf] %vm11544_vm1, %v13126_v54  ;;  %v10130_v26 = vadd.f32 %v17465_v51, %v9867_v58  ;;  %v9868_v47 = vmul.f32 %v17458_v46, %v9605_v48  ;;  %v7391_v56 = vadd.f32 %v7390_v11, %v18857_v9  ;;  %v7392_v42 = vpop.f32.mrb[253].mxu1 }
 0x5e7   : > { %9348 = vst.msk [vmem:[#allocation2 + $0x3e8] sm:$0xff] %vm290_vm0, %v9091_v37  ;;  %v8449_v36 = vpop.f32.mrb[253].mxu0  ;;  %v7393_v21 = vpop.f32.mrb[254].mxu1 }
 0x5e8   : > { %v8450_v18 = vpop.f32.mrb[254].mxu0  ;;  %v10386_v14 = vmax.f32 %v10130_v26, 0.0  ;;  %v10131_v29 = vadd.f32 %v17465_v51, %v9868_v47  ;;  %v8448_v55 = vadd.f32 %v8447_v41, %v7391_v56  ;;  %v7394_v28 = vadd.f32 %v7393_v21, %v18858_v8  ;;  %v7395_v1 = vpop.f32.mrb[255].mxu1  ;;  %v14360_v47 = vld [vmem:[%s14921_s14 + $0x1148] ss:$24 sps:$4 sm:$0xff]   ;;  %v677_v36 = vld [vmem:[#allocation2 + $0x410] sm:$0xff] }
 0x5e9   : > { %v8452_v39 = vpop.f32.mrb[255].mxu0  ;;  %v18862_v1 = vld [vmem:[#allocation13_spill] sm:$0xff] }
 0x5ea   : > { %v13127_v22 = vpack.c.bf16 %v10386_v14, %v10386_v14  ;;  %v10387_v63 = vmax.f32 %v10131_v29, 0.0  ;;  %v9092_v3 = vadd.f32 %v8448_v55, %v673_v30  ;;  %v8451_v10 = vadd.f32 %v8450_v18, %v7394_v28  ;;  %7605 = vmatmul.mubr.bf16.gmra.mrb[104].mxu1 %v14348_v50  ;;  %v18861_v30 = vld [vmem:[#allocation12_spill] sm:$0xff]  ;;  %v14363_v18 = vld [vmem:[%s14921_s14 + $0x1150] ss:$24 sps:$4 sm:$0xff]   ;;  %v14371_v29 = vld [vmem:[%s14921_s14 + $0x1184] ss:$24 sps:$4 sm:$0xff]  }
 0x5eb   : > { %8662 = vmatmul.mubr.bf16.gmra.mrb[104].mxu0 %v14351_v38  ;;  %7612 = vmatprep.mubr.bf16.mxu1 %v14356_v6  ;;  %v14368_v14 = vld [vmem:[%s14921_s14 + $0x117c] ss:$24 sps:$4 sm:$0xff]  }
 0x5ec   : > { %v9606_v59 = vld [vmem:[#allocation2 + $0x3e0] sm:$0xff]  ;;  %8669 = vmatprep.mubr.bf16.mxu0 %v14359_v53  ;;  %11667 = vst.msk [vmem:[%s16578_s15 + $0x1e8] sm:$0xf] %vm11544_vm1, %v13127_v22  ;;  %v13128_v49 = vpack.c.bf16 %v10387_v63, %v10387_v63  ;;  %v9093_v25 = vadd.f32 %v8451_v10, %v674_v43  ;;  %v678_v63 = vld [vmem:[#allocation2 + $0x418] sm:$0xff] }
 0x5ed   : > { %v9869_v61 = vmul.f32 %v17458_v46, %v9606_v59  ;;  %9349 = vst.msk [vmem:[#allocation2 + $0x3f0] sm:$0xff] %vm290_vm0, %v9092_v3  ;;  %v7398_v12 = vpop.f32.mrb[0].mxu1 }
 0x5ee   : > { %v9607_v2 = vld [vmem:[#allocation2 + $0x3e8] sm:$0xff]  ;;  %v8455_v4 = vpop.f32.mrb[0].mxu0  ;;  %11668 = vst.msk [vmem:[%s16578_s15 + $0x1ec] sm:$0xf] %vm11544_vm1, %v13128_v49  ;;  %v7399_v19 = vadd.f32 %v7398_v12, %v18859_v62  ;;  %v7400_v34 = vpop.f32.mrb[1].mxu1 }
 0x5ef   : > { %v10132_v33 = vadd.f32 %v17465_v51, %v9869_v61  ;;  %v9870_v60 = vmul.f32 %v17458_v46, %v9607_v2  ;;  %9350 = vst.msk [vmem:[#allocation2 + $0x3f8] sm:$0xff] %vm290_vm0, %v9093_v25  ;;  %v8457_v35 = vpop.f32.mrb[1].mxu0  ;;  %v7401_v13 = vpop.f32.mrb[2].mxu1 }
 0x5f0   : > { %v8458_v23 = vpop.f32.mrb[2].mxu0  ;;  %v8456_v16 = vadd.f32 %v8455_v4, %v7399_v19  ;;  %v7402_v27 = vadd.f32 %v7401_v13, %v18860_v5  ;;  %v7403_v57 = vpop.f32.mrb[3].mxu1  ;;  %v679_v35 = vld [vmem:[#allocation2 + $0x420] sm:$0xff] }
 0x5f1   : > { %v10388_v20 = vmax.f32 %v10132_v33, 0.0  ;;  %v10133_v7 = vadd.f32 %v17465_v51, %v9870_v60  ;;  %v8460_v52 = vpop.f32.mrb[3].mxu0  ;;  %v14366_v60 = vld [vmem:[%s14921_s14 + $0x1178] ss:$24 sps:$4 sm:$0xff]  }
 0x5f2   : > { %v9094_v17 = vadd.f32 %v8456_v16, %v675_v24  ;;  %v8459_v54 = vadd.f32 %v8458_v23, %v7402_v27  ;;  %7613 = vmatmul.mubr.bf16.gmra.mrb[108].mxu1 %v14354_v15  ;;  %v18863_v24 = vld [vmem:[#allocation14_spill] sm:$0xff]  ;;  %v14369_v23 = vld [vmem:[%s14921_s14 + $0x1180] ss:$24 sps:$4 sm:$0xff]   ;;  %v18864_v57 = vld [vmem:[#allocation15_spill] sm:$0xff] }
 0x5f3   : > { %v13129_v32 = vpack.c.bf16 %v10388_v20, %v10388_v20  ;;  %v10389_v0 = vmax.f32 %v10133_v7, 0.0  ;;  %8670 = vmatmul.mubr.bf16.gmra.mrb[108].mxu0 %v14357_v45  ;;  %7620 = vmatprep.mubr.bf16.mxu1 %v14362_v44  ;;  %v14374_v20 = vld [vmem:[%s14921_s14 + $0x11ac] ss:$24 sps:$4 sm:$0xff]  }
 0x5f4   : > { %v9608_v58 = vld [vmem:[#allocation2 + $0x3f0] sm:$0xff]  ;;  %8677 = vmatprep.mubr.bf16.mxu0 %v14365_v31  ;;  %9351 = vst.msk [vmem:[#allocation2 + $0x400] sm:$0xff] %vm290_vm0, %v9094_v17  ;;  %v9095_v11 = vadd.f32 %v8459_v54, %v676_v40 }
 0x5f5   : > { %11669 = vst.msk [vmem:[%s16578_s15 + $0x1f0] sm:$0xf] %vm11544_vm1, %v13129_v32  ;;  %v13130_v37 = vpack.c.bf16 %v10389_v0, %v10389_v0  ;;  %v9871_v48 = vmul.f32 %v17458_v46, %v9608_v58  ;;  %v7406_v50 = vpop.f32.mrb[4].mxu1  ;;  %v14377_v7 = vld [vmem:[%s14921_s14 + $0x11b4] ss:$24 sps:$4 sm:$0xff]  }
 0x5f6   : > { %v9609_v41 = vld [vmem:[#allocation2 + $0x3f8] sm:$0xff]  ;;  %v8463_v26 = vpop.f32.mrb[4].mxu0  ;;  %9352 = vst.msk [vmem:[#allocation2 + $0x408] sm:$0xff] %vm290_vm0, %v9095_v11  ;;  %v7407_v42 = vadd.f32 %v7406_v50, %v18861_v30  ;;  %v7408_v38 = vpop.f32.mrb[5].mxu1  ;;  %v680_v0 = vld [vmem:[#allocation2 + $0x428] sm:$0xff] }
 0x5f7   : > { %11670 = vst.msk [vmem:[%s16578_s15 + $0x1f4] sm:$0xf] %vm11544_vm1, %v13130_v37  ;;  %v10134_v9 = vadd.f32 %v17465_v51, %v9871_v48  ;;  %v9872_v56 = vmul.f32 %v17458_v46, %v9609_v41  ;;  %v8465_v21 = vpop.f32.mrb[5].mxu0  ;;  %v7409_v6 = vpop.f32.mrb[6].mxu1 }
 0x5f8   : > { %v8466_v53 = vpop.f32.mrb[6].mxu0  ;;  %v8464_v28 = vadd.f32 %v8463_v26, %v7407_v42  ;;  %v7410_v39 = vadd.f32 %v7409_v6, %v18862_v1  ;;  %v7411_v43 = vpop.f32.mrb[7].mxu1  ;;  %v681_v21 = vld [vmem:[#allocation2 + $0x430] sm:$0xff] }
 0x5f9   : > { %v10390_v55 = vmax.f32 %v10134_v9, 0.0  ;;  %v10135_v8 = vadd.f32 %v17465_v51, %v9872_v56  ;;  %v8468_v22 = vpop.f32.mrb[7].mxu0  ;;  %v14372_v56 = vld [vmem:[%s14921_s14 + $0x11a8] ss:$24 sps:$4 sm:$0xff]  }
 0x5fa   : > { %v9096_v59 = vadd.f32 %v8464_v28, %v677_v36  ;;  %v8467_v49 = vadd.f32 %v8466_v53, %v7410_v39  ;;  %7621 = vmatmul.mubr.bf16.gmra.mrb[112].mxu1 %v14360_v47  ;;  %v18865_v36 = vld [vmem:[#allocation16_spill] sm:$0xff]  ;;  %v14375_v53 = vld [vmem:[%s14921_s14 + $0x11b0] ss:$24 sps:$4 sm:$0xff]   ;;  %v18866_v43 = vld [vmem:[#allocation17_spill] sm:$0xff] }
 0x5fb   : > { %v13131_v3 = vpack.c.bf16 %v10390_v55, %v10390_v55  ;;  %v10391_v10 = vmax.f32 %v10135_v8, 0.0  ;;  %8678 = vmatmul.mubr.bf16.gmra.mrb[112].mxu0 %v14363_v18  ;;  %v9610_v61 = vld [vmem:[#allocation2 + $0x400] sm:$0xff]  ;;  %7628 = vmatprep.mubr.bf16.mxu1 %v14368_v14  ;;  %v14380_v55 = vld [vmem:[%s14921_s14 + $0x11dc] ss:$24 sps:$4 sm:$0xff]  }
 0x5fc   : > { %8685 = vmatprep.mubr.bf16.mxu0 %v14371_v29  ;;  %v9873_v2 = vmul.f32 %v17458_v46, %v9610_v61  ;;  %9353 = vst.msk [vmem:[#allocation2 + $0x410] sm:$0xff] %vm290_vm0, %v9096_v59  ;;  %v9097_v12 = vadd.f32 %v8467_v49, %v678_v63  ;;  %v14383_v8 = vld [vmem:[%s14921_s14 + $0x11e4] ss:$24 sps:$4 sm:$0xff]  }
 0x5fd   : > { %11671 = vst.msk [vmem:[%s16578_s15 + $0x1f8] sm:$0xf] %vm11544_vm1, %v13131_v3  ;;  %v13132_v25 = vpack.c.bf16 %v10391_v10, %v10391_v10  ;;  %v9611_v4 = vld [vmem:[#allocation2 + $0x408] sm:$0xff]  ;;  %v7414_v15 = vpop.f32.mrb[8].mxu1  ;;  %v682_v10 = vld [vmem:[#allocation2 + $0x438] sm:$0xff] }
 0x5fe   : > { %v8471_v33 = vpop.f32.mrb[8].mxu0  ;;  %v10136_v62 = vadd.f32 %v17465_v51, %v9873_v2  ;;  %v9874_v19 = vmul.f32 %v17458_v46, %v9611_v4  ;;  %9354 = vst.msk [vmem:[#allocation2 + $0x418] sm:$0xff] %vm290_vm0, %v9097_v12  ;;  %v7415_v34 = vadd.f32 %v7414_v15, %v18863_v24  ;;  %v7416_v45 = vpop.f32.mrb[9].mxu1 }
 0x5ff   : > { %11672 = vst.msk [vmem:[%s16578_s15 + $0x1fc] sm:$0xf] %vm11544_vm1, %v13132_v25  ;;  %v8473_v13 = vpop.f32.mrb[9].mxu0  ;;  %v7417_v44 = vpop.f32.mrb[10].mxu1 }
 0x600   : > { %v8474_v31 = vpop.f32.mrb[10].mxu0  ;;  %v10392_v16 = vmax.f32 %v10136_v62, 0.0  ;;  %v10137_v5 = vadd.f32 %v17465_v51, %v9874_v19  ;;  %v8472_v27 = vadd.f32 %v8471_v33, %v7415_v34  ;;  %v7418_v52 = vadd.f32 %v7417_v44, %v18864_v57  ;;  %v7419_v40 = vpop.f32.mrb[11].mxu1  ;;  %v14378_v19 = vld [vmem:[%s14921_s14 + $0x11d8] ss:$24 sps:$4 sm:$0xff]   ;;  %v683_v13 = vld [vmem:[#allocation2 + $0x440] sm:$0xff] }
 0x601   : > { %v8476_v32 = vpop.f32.mrb[11].mxu0  ;;  %v18868_v40 = vld [vmem:[#allocation19_spill] sm:$0xff] }
 0x602   : > { %v13133_v17 = vpack.c.bf16 %v10392_v16, %v10392_v16  ;;  %v10393_v54 = vmax.f32 %v10137_v5, 0.0  ;;  %v9098_v58 = vadd.f32 %v8472_v27, %v679_v35  ;;  %v8475_v37 = vadd.f32 %v8474_v31, %v7418_v52  ;;  %7629 = vmatmul.mubr.bf16.gmra.mrb[116].mxu1 %v14366_v60  ;;  %v18867_v35 = vld [vmem:[#allocation18_spill] sm:$0xff]  ;;  %v14381_v31 = vld [vmem:[%s14921_s14 + $0x11e0] ss:$24 sps:$4 sm:$0xff]   ;;  %v14389_v5 = vld [vmem:[%s14921_s14 + $0x1214] ss:$24 sps:$4 sm:$0xff]  }
 0x603   : > { %8686 = vmatmul.mubr.bf16.gmra.mrb[116].mxu0 %v14369_v23  ;;  %v9612_v48 = vld [vmem:[#allocation2 + $0x410] sm:$0xff]  ;;  %7636 = vmatprep.mubr.bf16.mxu1 %v14374_v20  ;;  %v14386_v16 = vld [vmem:[%s14921_s14 + $0x120c] ss:$24 sps:$4 sm:$0xff]  }
 0x604   : > { %8693 = vmatprep.mubr.bf16.mxu0 %v14377_v7  ;;  %11673 = vst.msk [vmem:[%s16578_s15 + $0x200] sm:$0xf] %vm11544_vm1, %v13133_v17  ;;  %v13134_v11 = vpack.c.bf16 %v10393_v54, %v10393_v54  ;;  %v9875_v41 = vmul.f32 %v17458_v46, %v9612_v48  ;;  %v9099_v50 = vadd.f32 %v8475_v37, %v680_v0  ;;  %v684_v54 = vld [vmem:[#allocation2 + $0x448] sm:$0xff] }
 0x605   : > { %9355 = vst.msk [vmem:[#allocation2 + $0x420] sm:$0xff] %vm290_vm0, %v9098_v58  ;;  %v9613_v26 = vld [vmem:[#allocation2 + $0x418] sm:$0xff]  ;;  %v7422_v47 = vpop.f32.mrb[12].mxu1 }
 0x606   : > { %v8479_v9 = vpop.f32.mrb[12].mxu0  ;;  %11674 = vst.msk [vmem:[%s16578_s15 + $0x204] sm:$0xf] %vm11544_vm1, %v13134_v11  ;;  %v10138_v30 = vadd.f32 %v17465_v51, %v9875_v41  ;;  %v9876_v42 = vmul.f32 %v17458_v46, %v9613_v26  ;;  %v7423_v38 = vadd.f32 %v7422_v47, %v18865_v36  ;;  %v7424_v18 = vpop.f32.mrb[13].mxu1 }
 0x607   : > { %9356 = vst.msk [vmem:[#allocation2 + $0x428] sm:$0xff] %vm290_vm0, %v9099_v50  ;;  %v8481_v6 = vpop.f32.mrb[13].mxu0  ;;  %v7425_v14 = vpop.f32.mrb[14].mxu1 }
 0x608   : > { %v8482_v29 = vpop.f32.mrb[14].mxu0  ;;  %v10394_v28 = vmax.f32 %v10138_v30, 0.0  ;;  %v10139_v1 = vadd.f32 %v17465_v51, %v9876_v42  ;;  %v8480_v39 = vadd.f32 %v8479_v9, %v7423_v38  ;;  %v7426_v22 = vadd.f32 %v7425_v14, %v18866_v43  ;;  %v7427_v63 = vpop.f32.mrb[15].mxu1  ;;  %v14384_v42 = vld [vmem:[%s14921_s14 + $0x1208] ss:$24 sps:$4 sm:$0xff]   ;;  %v685_v6 = vld [vmem:[#allocation2 + $0x450] sm:$0xff] }
 0x609   : > { %v8484_v3 = vpop.f32.mrb[15].mxu0  ;;  %v18870_v63 = vld [vmem:[#allocation21_spill] sm:$0xff] }
 0x60a   : > { %v13135_v59 = vpack.c.bf16 %v10394_v28, %v10394_v28  ;;  %v10395_v49 = vmax.f32 %v10139_v1, 0.0  ;;  %v9100_v61 = vadd.f32 %v8480_v39, %v681_v21  ;;  %v8483_v25 = vadd.f32 %v8482_v29, %v7426_v22  ;;  %7637 = vmatmul.mubr.bf16.gmra.mrb[120].mxu1 %v14372_v56  ;;  %v18869_v21 = vld [vmem:[#allocation20_spill] sm:$0xff]  ;;  %v14387_v29 = vld [vmem:[%s14921_s14 + $0x1210] ss:$24 sps:$4 sm:$0xff]   ;;  %v14395_v1 = vld [vmem:[%s14921_s14 + $0x1244] ss:$24 sps:$4 sm:$0xff]  }
 0x60b   : > { %8694 = vmatmul.mubr.bf16.gmra.mrb[120].mxu0 %v14375_v53  ;;  %7644 = vmatprep.mubr.bf16.mxu1 %v14380_v55  ;;  %v14392_v28 = vld [vmem:[%s14921_s14 + $0x123c] ss:$24 sps:$4 sm:$0xff]  }
 0x60c   : > { %v9614_v2 = vld [vmem:[#allocation2 + $0x420] sm:$0xff]  ;;  %8701 = vmatprep.mubr.bf16.mxu0 %v14383_v8  ;;  %11675 = vst.msk [vmem:[%s16578_s15 + $0x208] sm:$0xf] %vm11544_vm1, %v13135_v59  ;;  %v13136_v12 = vpack.c.bf16 %v10395_v49, %v10395_v49  ;;  %v9101_v15 = vadd.f32 %v8483_v25, %v682_v10  ;;  %v686_v49 = vld [vmem:[#allocation2 + $0x458] sm:$0xff] }
 0x60d   : > { %v9877_v4 = vmul.f32 %v17458_v46, %v9614_v2  ;;  %9357 = vst.msk [vmem:[#allocation2 + $0x430] sm:$0xff] %vm290_vm0, %v9100_v61  ;;  %v7430_v60 = vpop.f32.mrb[16].mxu1 }
 0x60e   : > { %v9615_v33 = vld [vmem:[#allocation2 + $0x428] sm:$0xff]  ;;  %v8487_v62 = vpop.f32.mrb[16].mxu0  ;;  %11676 = vst.msk [vmem:[%s16578_s15 + $0x20c] sm:$0xf] %vm11544_vm1, %v13136_v12  ;;  %v7431_v45 = vadd.f32 %v7430_v60, %v18867_v35  ;;  %v7432_v23 = vpop.f32.mrb[17].mxu1 }
 0x60f   : > { %v10140_v24 = vadd.f32 %v17465_v51, %v9877_v4  ;;  %v9878_v34 = vmul.f32 %v17458_v46, %v9615_v33  ;;  %9358 = vst.msk [vmem:[#allocation2 + $0x438] sm:$0xff] %vm290_vm0, %v9101_v15  ;;  %v8489_v44 = vpop.f32.mrb[17].mxu0  ;;  %v7433_v20 = vpop.f32.mrb[18].mxu1 }
 0x610   : > { %v8490_v7 = vpop.f32.mrb[18].mxu0  ;;  %v8488_v52 = vadd.f32 %v8487_v62, %v7431_v45  ;;  %v7434_v32 = vadd.f32 %v7433_v20, %v18868_v40  ;;  %v7435_v0 = vpop.f32.mrb[19].mxu1  ;;  %v687_v44 = vld [vmem:[#allocation2 + $0x460] sm:$0xff] }
 0x611   : > { %v10396_v27 = vmax.f32 %v10140_v24, 0.0  ;;  %v10141_v57 = vadd.f32 %v17465_v51, %v9878_v34  ;;  %v8492_v17 = vpop.f32.mrb[19].mxu0  ;;  %v14390_v34 = vld [vmem:[%s14921_s14 + $0x1238] ss:$24 sps:$4 sm:$0xff]  }
 0x612   : > { %v9102_v48 = vadd.f32 %v8488_v52, %v683_v13  ;;  %v8491_v11 = vadd.f32 %v8490_v7, %v7434_v32  ;;  %7645 = vmatmul.mubr.bf16.gmra.mrb[124].mxu1 %v14378_v19  ;;  %v18871_v13 = vld [vmem:[#allocation22_spill] sm:$0xff]  ;;  %v14393_v7 = vld [vmem:[%s14921_s14 + $0x1240] ss:$24 sps:$4 sm:$0xff]   ;;  %v18872_v0 = vld [vmem:[#allocation23_spill] sm:$0xff] }
 0x613   : > { %v13137_v58 = vpack.c.bf16 %v10396_v27, %v10396_v27  ;;  %v10397_v37 = vmax.f32 %v10141_v57, 0.0  ;;  %8702 = vmatmul.mubr.bf16.gmra.mrb[124].mxu0 %v14381_v31  ;;  %7652 = vmatprep.mubr.bf16.mxu1 %v14386_v16  ;;  %v14398_v27 = vld [vmem:[%s14921_s14 + $0x126c] ss:$24 sps:$4 sm:$0xff]  }
 0x614   : > { %v9616_v41 = vld [vmem:[#allocation2 + $0x430] sm:$0xff]  ;;  %8709 = vmatprep.mubr.bf16.mxu0 %v14389_v5  ;;  %9359 = vst.msk [vmem:[#allocation2 + $0x440] sm:$0xff] %vm290_vm0, %v9102_v48  ;;  %v9103_v47 = vadd.f32 %v8491_v11, %v684_v54 }
 0x615   : > { %11677 = vst.msk [vmem:[%s16578_s15 + $0x210] sm:$0xf] %vm11544_vm1, %v13137_v58  ;;  %v13138_v50 = vpack.c.bf16 %v10397_v37, %v10397_v37  ;;  %v9879_v26 = vmul.f32 %v17458_v46, %v9616_v41  ;;  %v7438_v56 = vpop.f32.mrb[20].mxu1  ;;  %v14401_v57 = vld [vmem:[%s14921_s14 + $0x1274] ss:$24 sps:$4 sm:$0xff]  }
 0x616   : > { %v9617_v9 = vld [vmem:[#allocation2 + $0x438] sm:$0xff]  ;;  %v8495_v30 = vpop.f32.mrb[20].mxu0  ;;  %9360 = vst.msk [vmem:[#allocation2 + $0x448] sm:$0xff] %vm290_vm0, %v9103_v47  ;;  %v7439_v18 = vadd.f32 %v7438_v56, %v18869_v21  ;;  %v7440_v53 = vpop.f32.mrb[21].mxu1  ;;  %v688_v58 = vld [vmem:[#allocation2 + $0x468] sm:$0xff] }
 0x617   : > { %11678 = vst.msk [vmem:[%s16578_s15 + $0x214] sm:$0xf] %vm11544_vm1, %v13138_v50  ;;  %v10142_v36 = vadd.f32 %v17465_v51, %v9879_v26  ;;  %v9880_v38 = vmul.f32 %v17458_v46, %v9617_v9  ;;  %v8497_v14 = vpop.f32.mrb[21].mxu0  ;;  %v7441_v55 = vpop.f32.mrb[22].mxu1  ;;  %v17686_v26 = vld [vmem:[#allocation5] ss:$0 sm:$0xff] }
 0x618   : > { %v8498_v8 = vpop.f32.mrb[22].mxu0  ;;  %v8496_v22 = vadd.f32 %v8495_v30, %v7439_v18  ;;  %v7442_v3 = vadd.f32 %v7441_v55, %v18870_v63  ;;  %v7443_v10 = vpop.f32.mrb[23].mxu1  ;;  %v689_v14 = vld [vmem:[#allocation2 + $0x470] sm:$0xff] }
 0x619   : > { %v10398_v39 = vmax.f32 %v10142_v36, 0.0  ;;  %v10143_v43 = vadd.f32 %v17465_v51, %v9880_v38  ;;  %v8500_v59 = vpop.f32.mrb[23].mxu0  ;;  %v14396_v36 = vld [vmem:[%s14921_s14 + $0x1268] ss:$24 sps:$4 sm:$0xff]  }
 0x61a   : > { %v9104_v2 = vadd.f32 %v8496_v22, %v685_v6  ;;  %v8499_v12 = vadd.f32 %v8498_v8, %v7442_v3  ;;  %7653 = vmatmul.mubr.bf16.gmra.mrb[128].mxu1 %v14384_v42  ;;  %v17693_v38 = vld [vmem:[#allocation7] ss:$0 sm:$0xff]  ;;  %v18873_v6 = vld [vmem:[#allocation24_spill] sm:$0xff]  ;;  %v14399_v8 = vld [vmem:[%s14921_s14 + $0x1270] ss:$24 sps:$4 sm:$0xff]  }
 0x61b   : > { %v13139_v61 = vpack.c.bf16 %v10398_v39, %v10398_v39  ;;  %v10399_v25 = vmax.f32 %v10143_v43, 0.0  ;;  %8710 = vmatmul.mubr.bf16.gmra.mrb[128].mxu0 %v14387_v29  ;;  %v9618_v4 = vld [vmem:[#allocation2 + $0x440] sm:$0xff]  ;;  %7660 = vmatprep.mubr.bf16.mxu1 %v14392_v28  ;;  %v14404_v39 = vld [vmem:[%s14921_s14 + $0x129c] ss:$24 sps:$4 sm:$0xff]  }
 0x61c   : > { %8717 = vmatprep.mubr.bf16.mxu0 %v14395_v1  ;;  %v9881_v33 = vmul.f32 %v17458_v46, %v9618_v4  ;;  %9361 = vst.msk [vmem:[#allocation2 + $0x450] sm:$0xff] %vm290_vm0, %v9104_v2  ;;  %v9105_v60 = vadd.f32 %v8499_v12, %v686_v49  ;;  %v14407_v43 = vld [vmem:[%s14921_s14 + $0x12a4] ss:$24 sps:$4 sm:$0xff]  }
 0x61d   : > { %11679 = vst.msk [vmem:[%s16578_s15 + $0x218] sm:$0xf] %vm11544_vm1, %v13139_v61  ;;  %v13140_v15 = vpack.c.bf16 %v10399_v25, %v10399_v25  ;;  %v9619_v62 = vld [vmem:[#allocation2 + $0x448] sm:$0xff]  ;;  %v7446_v19 = vpop.f32.mrb[24].mxu1  ;;  %v18874_v10 = vld [vmem:[#allocation25_spill] sm:$0xff] }
 0x61e   : > { %v8503_v24 = vpop.f32.mrb[24].mxu0  ;;  %v10144_v35 = vadd.f32 %v17465_v51, %v9881_v33  ;;  %v9882_v45 = vmul.f32 %v17458_v46, %v9619_v62  ;;  %9362 = vst.msk [vmem:[#allocation2 + $0x458] sm:$0xff] %vm290_vm0, %v9105_v60  ;;  %v7447_v23 = vadd.f32 %v7446_v19, %v18871_v13  ;;  %v7448_v31 = vpop.f32.mrb[25].mxu1  ;;  %v690_v25 = vld [vmem:[#allocation2 + $0x478] sm:$0xff] }
 0x61f   : > { %11680 = vst.msk [vmem:[%s16578_s15 + $0x21c] sm:$0xf] %vm11544_vm1, %v13140_v15  ;;  %v8505_v20 = vpop.f32.mrb[25].mxu0  ;;  %v7449_v16 = vpop.f32.mrb[26].mxu1 }
 0x620   : > { %v8506_v5 = vpop.f32.mrb[26].mxu0  ;;  %v10400_v52 = vmax.f32 %v10144_v35, 0.0  ;;  %v10145_v40 = vadd.f32 %v17465_v51, %v9882_v45  ;;  %v8504_v32 = vadd.f32 %v8503_v24, %v7447_v23  ;;  %v7450_v17 = vadd.f32 %v7449_v16, %v18872_v0  ;;  %v7451_v46 = vpop.f32.mrb[27].mxu1  ;;  %v14402_v45 = vld [vmem:[%s14921_s14 + $0x1298] ss:$24 sps:$4 sm:$0xff]   ;;  %v691_v20 = vld [vmem:[#allocation2 + $0x480] sm:$0xff] }
 0x621   : > { %v8508_v54 = vpop.f32.mrb[27].mxu0  ;;  %v18876_v46 = vld [vmem:[#allocation27_spill] sm:$0xff] }
 0x622   : > { %v13141_v37 = vpack.c.bf16 %v10400_v52, %v10400_v52  ;;  %v10401_v48 = vmax.f32 %v10145_v40, 0.0  ;;  %v9106_v11 = vadd.f32 %v8504_v32, %v687_v44  ;;  %v8507_v41 = vadd.f32 %v8506_v5, %v7450_v17  ;;  %7661 = vmatmul.mubr.bf16.gmra.mrb[132].mxu1 %v14390_v34  ;;  %v18875_v44 = vld [vmem:[#allocation26_spill] sm:$0xff]  ;;  %v14405_v5 = vld [vmem:[%s14921_s14 + $0x12a0] ss:$24 sps:$4 sm:$0xff]   ;;  %v14413_v40 = vld [vmem:[%s14921_s14 + $0x12d4] ss:$24 sps:$4 sm:$0xff]  }
 0x623   : > { %8718 = vmatmul.mubr.bf16.gmra.mrb[132].mxu0 %v14393_v7  ;;  %v9620_v50 = vld [vmem:[#allocation2 + $0x450] sm:$0xff]  ;;  %7668 = vmatprep.mubr.bf16.mxu1 %v14398_v27  ;;  %v14410_v52 = vld [vmem:[%s14921_s14 + $0x12cc] ss:$24 sps:$4 sm:$0xff]  }
 0x624   : > { %8725 = vmatprep.mubr.bf16.mxu0 %v14401_v57  ;;  %11681 = vst.msk [vmem:[%s16578_s15 + $0x220] sm:$0xf] %vm11544_vm1, %v13141_v37  ;;  %v13142_v51 = vpack.c.bf16 %v10401_v48, %v10401_v48  ;;  %v9883_v47 = vmul.f32 %v17686_v26, %v9620_v50  ;;  %v9107_v9 = vadd.f32 %v8507_v41, %v688_v58  ;;  %v692_v48 = vld [vmem:[#allocation2 + $0x488] sm:$0xff] }
 0x625   : > { %9363 = vst.msk [vmem:[#allocation2 + $0x460] sm:$0xff] %vm290_vm0, %v9106_v11  ;;  %v9621_v56 = vld [vmem:[#allocation2 + $0x458] sm:$0xff]  ;;  %v7454_v30 = vpop.f32.mrb[28].mxu1 }
 0x626   : > { %v8511_v42 = vpop.f32.mrb[28].mxu0  ;;  %11682 = vst.msk [vmem:[%s16578_s15 + $0x224] sm:$0xf] %vm11544_vm1, %v13142_v51  ;;  %v10146_v21 = vadd.f32 %v17693_v38, %v9883_v47  ;;  %v9884_v18 = vmul.f32 %v17686_v26, %v9621_v56  ;;  %v7455_v53 = vadd.f32 %v7454_v30, %v18873_v6  ;;  %v7456_v29 = vpop.f32.mrb[29].mxu1 }
 0x627   : > { %9364 = vst.msk [vmem:[#allocation2 + $0x468] sm:$0xff] %vm290_vm0, %v9107_v9  ;;  %v8513_v55 = vpop.f32.mrb[29].mxu0  ;;  %v7457_v28 = vpop.f32.mrb[30].mxu1 }
 0x628   : > { %v8514_v1 = vpop.f32.mrb[30].mxu0  ;;  %v10402_v22 = vmax.f32 %v10146_v21, 0.0  ;;  %v10147_v63 = vadd.f32 %v17693_v38, %v9884_v18  ;;  %v8512_v3 = vadd.f32 %v8511_v42, %v7455_v53  ;;  %v7458_v59 = vadd.f32 %v7457_v28, %v18874_v10  ;;  %v7459_v49 = vpop.f32.mrb[31].mxu1  ;;  %v14408_v18 = vld [vmem:[%s14921_s14 + $0x12c8] ss:$24 sps:$4 sm:$0xff]   ;;  %v693_v55 = vld [vmem:[#allocation2 + $0x490] sm:$0xff] }
 0x629   : > { %v8516_v61 = vpop.f32.mrb[31].mxu0  ;;  %v18878_v49 = vld [vmem:[#allocation29_spill] sm:$0xff] }
 0x62a   : > { %v13143_v2 = vpack.c.bf16 %v10402_v22, %v10402_v22  ;;  %v10403_v12 = vmax.f32 %v10147_v63, 0.0  ;;  %v9108_v4 = vadd.f32 %v8512_v3, %v689_v14  ;;  %v8515_v15 = vadd.f32 %v8514_v1, %v7458_v59  ;;  %7669 = vmatmul.mubr.bf16.gmra.mrb[136].mxu1 %v14396_v36  ;;  %v18877_v14 = vld [vmem:[#allocation28_spill] sm:$0xff]  ;;  %v14411_v1 = vld [vmem:[%s14921_s14 + $0x12d0] ss:$24 sps:$4 sm:$0xff]   ;;  %v14419_v63 = vld [vmem:[%s14921_s14 + $0x1304] ss:$24 sps:$4 sm:$0xff]  }
 0x62b   : > { %8726 = vmatmul.mubr.bf16.gmra.mrb[136].mxu0 %v14399_v8  ;;  %7676 = vmatprep.mubr.bf16.mxu1 %v14404_v39  ;;  %v14416_v22 = vld [vmem:[%s14921_s14 + $0x12fc] ss:$24 sps:$4 sm:$0xff]  }
 0x62c   : > { %v9622_v33 = vld [vmem:[#allocation2 + $0x460] sm:$0xff]  ;;  %8733 = vmatprep.mubr.bf16.mxu0 %v14407_v43  ;;  %11683 = vst.msk [vmem:[%s16578_s15 + $0x228] sm:$0xf] %vm11544_vm1, %v13143_v2  ;;  %v13144_v60 = vpack.c.bf16 %v10403_v12, %v10403_v12  ;;  %v9109_v19 = vadd.f32 %v8515_v15, %v690_v25  ;;  %v694_v12 = vld [vmem:[#allocation2 + $0x498] sm:$0xff] }
 0x62d   : > { %v9885_v62 = vmul.f32 %v17686_v26, %v9622_v33  ;;  %9365 = vst.msk [vmem:[#allocation2 + $0x470] sm:$0xff] %vm290_vm0, %v9108_v4  ;;  %v7462_v34 = vpop.f32.mrb[32].mxu1 }
 0x62e   : > { %v9623_v24 = vld [vmem:[#allocation2 + $0x468] sm:$0xff]  ;;  %v8519_v35 = vpop.f32.mrb[32].mxu0  ;;  %11684 = vst.msk [vmem:[%s16578_s15 + $0x22c] sm:$0xf] %vm11544_vm1, %v13144_v60  ;;  %v7463_v31 = vadd.f32 %v7462_v34, %v18875_v44  ;;  %v7464_v7 = vpop.f32.mrb[33].mxu1 }
 0x62f   : > { %v10148_v13 = vadd.f32 %v17693_v38, %v9885_v62  ;;  %v9886_v23 = vmul.f32 %v17686_v26, %v9623_v24  ;;  %9366 = vst.msk [vmem:[#allocation2 + $0x478] sm:$0xff] %vm290_vm0, %v9109_v19  ;;  %v8521_v16 = vpop.f32.mrb[33].mxu0  ;;  %v7465_v27 = vpop.f32.mrb[34].mxu1 }
 0x630   : > { %v8522_v57 = vpop.f32.mrb[34].mxu0  ;;  %v8520_v17 = vadd.f32 %v8519_v35, %v7463_v31  ;;  %v7466_v54 = vadd.f32 %v7465_v27, %v18876_v46  ;;  %v7467_v58 = vpop.f32.mrb[35].mxu1  ;;  %v695_v16 = vld [vmem:[#allocation2 + $0x4a0] sm:$0xff] }
 0x631   : > { %v10404_v32 = vmax.f32 %v10148_v13, 0.0  ;;  %v10149_v0 = vadd.f32 %v17693_v38, %v9886_v23  ;;  %v8524_v37 = vpop.f32.mrb[35].mxu0  ;;  %v14414_v23 = vld [vmem:[%s14921_s14 + $0x12f8] ss:$24 sps:$4 sm:$0xff]  }
 0x632   : > { %v9110_v50 = vadd.f32 %v8520_v17, %v691_v20  ;;  %v8523_v51 = vadd.f32 %v8522_v57, %v7466_v54  ;;  %7677 = vmatmul.mubr.bf16.gmra.mrb[140].mxu1 %v14402_v45  ;;  %v18879_v20 = vld [vmem:[#allocation30_spill] sm:$0xff]  ;;  %v14417_v57 = vld [vmem:[%s14921_s14 + $0x1300] ss:$24 sps:$4 sm:$0xff]   ;;  %v18880_v58 = vld [vmem:[#allocation31_spill] sm:$0xff] }
 0x633   : > { %v13145_v11 = vpack.c.bf16 %v10404_v32, %v10404_v32  ;;  %v10405_v41 = vmax.f32 %v10149_v0, 0.0  ;;  %8734 = vmatmul.mubr.bf16.gmra.mrb[140].mxu0 %v14405_v5  ;;  %7684 = vmatprep.mubr.bf16.mxu1 %v14410_v52  ;;  %v14422_v32 = vld [vmem:[%s14921_s14 + $0x132c] ss:$24 sps:$4 sm:$0xff]  }
 0x634   : > { %v9624_v47 = vld [vmem:[#allocation2 + $0x470] sm:$0xff]  ;;  %8741 = vmatprep.mubr.bf16.mxu0 %v14413_v40  ;;  %9367 = vst.msk [vmem:[#allocation2 + $0x480] sm:$0xff] %vm290_vm0, %v9110_v50  ;;  %v9111_v30 = vadd.f32 %v8523_v51, %v692_v48 }
 0x635   : > { %11685 = vst.msk [vmem:[%s16578_s15 + $0x230] sm:$0xf] %vm11544_vm1, %v13145_v11  ;;  %v13146_v9 = vpack.c.bf16 %v10405_v41, %v10405_v41  ;;  %v9887_v56 = vmul.f32 %v17686_v26, %v9624_v47  ;;  %v7470_v36 = vpop.f32.mrb[36].mxu1  ;;  %v14425_v0 = vld [vmem:[%s14921_s14 + $0x1334] ss:$24 sps:$4 sm:$0xff]  }
 0x636   : > { %v9625_v42 = vld [vmem:[#allocation2 + $0x478] sm:$0xff]  ;;  %v8527_v21 = vpop.f32.mrb[36].mxu0  ;;  %9368 = vst.msk [vmem:[#allocation2 + $0x488] sm:$0xff] %vm290_vm0, %v9111_v30  ;;  %v7471_v29 = vadd.f32 %v7470_v36, %v18877_v14  ;;  %v7472_v8 = vpop.f32.mrb[37].mxu1  ;;  %v696_v41 = vld [vmem:[#allocation2 + $0x4a8] sm:$0xff] }
 0x637   : > { %11686 = vst.msk [vmem:[%s16578_s15 + $0x234] sm:$0xf] %vm11544_vm1, %v13146_v9  ;;  %v10150_v6 = vadd.f32 %v17693_v38, %v9887_v56  ;;  %v9888_v53 = vmul.f32 %v17686_v26, %v9625_v42  ;;  %v8529_v28 = vpop.f32.mrb[37].mxu0  ;;  %v7473_v39 = vpop.f32.mrb[38].mxu1 }
 0x638   : > { %v8530_v43 = vpop.f32.mrb[38].mxu0  ;;  %v8528_v59 = vadd.f32 %v8527_v21, %v7471_v29  ;;  %v7474_v61 = vadd.f32 %v7473_v39, %v18878_v49  ;;  %v7475_v25 = vpop.f32.mrb[39].mxu1  ;;  %v697_v28 = vld [vmem:[#allocation2 + $0x4b0] sm:$0xff] }
 0x639   : > { %v10406_v3 = vmax.f32 %v10150_v6, 0.0  ;;  %v10151_v10 = vadd.f32 %v17693_v38, %v9888_v53  ;;  %v8532_v2 = vpop.f32.mrb[39].mxu0  ;;  %v14420_v53 = vld [vmem:[%s14921_s14 + $0x1328] ss:$24 sps:$4 sm:$0xff]  }
 0x63a   : > { %v9112_v33 = vadd.f32 %v8528_v59, %v693_v55  ;;  %v8531_v60 = vadd.f32 %v8530_v43, %v7474_v61  ;;  %7685 = vmatmul.mubr.bf16.gmra.mrb[144].mxu1 %v14408_v18  ;;  %v18881_v55 = vld [vmem:[#allocation32_spill] sm:$0xff]  ;;  %v14423_v43 = vld [vmem:[%s14921_s14 + $0x1330] ss:$24 sps:$4 sm:$0xff]   ;;  %v18882_v25 = vld [vmem:[#allocation33_spill] sm:$0xff] }
 0x63b   : > { %v13147_v4 = vpack.c.bf16 %v10406_v3, %v10406_v3  ;;  %v10407_v15 = vmax.f32 %v10151_v10, 0.0  ;;  %8742 = vmatmul.mubr.bf16.gmra.mrb[144].mxu0 %v14411_v1  ;;  %v9626_v62 = vld [vmem:[#allocation2 + $0x480] sm:$0xff]  ;;  %7692 = vmatprep.mubr.bf16.mxu1 %v14416_v22  ;;  %v14428_v3 = vld [vmem:[%s14921_s14 + $0x135c] ss:$24 sps:$4 sm:$0xff]  }
 0x63c   : > { %8749 = vmatprep.mubr.bf16.mxu0 %v14419_v63  ;;  %v9889_v24 = vmul.f32 %v17686_v26, %v9626_v62  ;;  %9369 = vst.msk [vmem:[#allocation2 + $0x490] sm:$0xff] %vm290_vm0, %v9112_v33  ;;  %v9113_v34 = vadd.f32 %v8531_v60, %v694_v12  ;;  %v14431_v10 = vld [vmem:[%s14921_s14 + $0x1364] ss:$24 sps:$4 sm:$0xff]  }
 0x63d   : > { %11687 = vst.msk [vmem:[%s16578_s15 + $0x238] sm:$0xf] %vm11544_vm1, %v13147_v4  ;;  %v13148_v19 = vpack.c.bf16 %v10407_v15, %v10407_v15  ;;  %v9627_v35 = vld [vmem:[#allocation2 + $0x488] sm:$0xff]  ;;  %v7478_v45 = vpop.f32.mrb[40].mxu1  ;;  %v698_v15 = vld [vmem:[#allocation2 + $0x4b8] sm:$0xff] }
 0x63e   : > { %v8535_v13 = vpop.f32.mrb[40].mxu0  ;;  %v10152_v44 = vadd.f32 %v17693_v38, %v9889_v24  ;;  %v9890_v31 = vmul.f32 %v17686_v26, %v9627_v35  ;;  %9370 = vst.msk [vmem:[#allocation2 + $0x498] sm:$0xff] %vm290_vm0, %v9113_v34  ;;  %v7479_v7 = vadd.f32 %v7478_v45, %v18879_v20  ;;  %v7480_v5 = vpop.f32.mrb[41].mxu1 }
 0x63f   : > { %11688 = vst.msk [vmem:[%s16578_s15 + $0x23c] sm:$0xf] %vm11544_vm1, %v13148_v19  ;;  %v8537_v27 = vpop.f32.mrb[41].mxu0  ;;  %v7481_v52 = vpop.f32.mrb[42].mxu1 }
 0x640   : > { %v8538_v40 = vpop.f32.mrb[42].mxu0  ;;  %v10408_v17 = vmax.f32 %v10152_v44, 0.0  ;;  %v10153_v46 = vadd.f32 %v17693_v38, %v9890_v31  ;;  %v8536_v54 = vadd.f32 %v8535_v13, %v7479_v7  ;;  %v7482_v37 = vadd.f32 %v7481_v52, %v18880_v58  ;;  %v7483_v48 = vpop.f32.mrb[43].mxu1  ;;  %v14426_v31 = vld [vmem:[%s14921_s14 + $0x1358] ss:$24 sps:$4 sm:$0xff]   ;;  %v699_v27 = vld [vmem:[#allocation2 + $0x4c0] sm:$0xff] }
 0x641   : > { %v8540_v11 = vpop.f32.mrb[43].mxu0  ;;  %v18884_v48 = vld [vmem:[#allocation35_spill] sm:$0xff] }
 0x642   : > { %v13149_v50 = vpack.c.bf16 %v10408_v17, %v10408_v17  ;;  %v10409_v51 = vmax.f32 %v10153_v46, 0.0  ;;  %v9114_v47 = vadd.f32 %v8536_v54, %v695_v16  ;;  %v8539_v9 = vadd.f32 %v8538_v40, %v7482_v37  ;;  %7693 = vmatmul.mubr.bf16.gmra.mrb[148].mxu1 %v14414_v23  ;;  %v18883_v16 = vld [vmem:[#allocation34_spill] sm:$0xff]  ;;  %v14429_v40 = vld [vmem:[%s14921_s14 + $0x1360] ss:$24 sps:$4 sm:$0xff]   ;;  %v14437_v46 = vld [vmem:[%s14921_s14 + $0x1394] ss:$24 sps:$4 sm:$0xff]  }
 0x643   : > { %8750 = vmatmul.mubr.bf16.gmra.mrb[148].mxu0 %v14417_v57  ;;  %v9628_v56 = vld [vmem:[#allocation2 + $0x490] sm:$0xff]  ;;  %7700 = vmatprep.mubr.bf16.mxu1 %v14422_v32  ;;  %v14434_v17 = vld [vmem:[%s14921_s14 + $0x138c] ss:$24 sps:$4 sm:$0xff]  }
 0x644   : > { %8757 = vmatprep.mubr.bf16.mxu0 %v14425_v0  ;;  %11689 = vst.msk [vmem:[%s16578_s15 + $0x240] sm:$0xf] %vm11544_vm1, %v13149_v50  ;;  %v13150_v30 = vpack.c.bf16 %v10409_v51, %v10409_v51  ;;  %v9891_v42 = vmul.f32 %v17686_v26, %v9628_v56  ;;  %v9115_v36 = vadd.f32 %v8539_v9, %v696_v41  ;;  %v700_v51 = vld [vmem:[#allocation2 + $0x4c8] sm:$0xff] }
 0x645   : > { %9371 = vst.msk [vmem:[#allocation2 + $0x4a0] sm:$0xff] %vm290_vm0, %v9114_v47  ;;  %v9629_v21 = vld [vmem:[#allocation2 + $0x498] sm:$0xff]  ;;  %v7486_v18 = vpop.f32.mrb[44].mxu1 }
 0x646   : > { %v8543_v6 = vpop.f32.mrb[44].mxu0  ;;  %11690 = vst.msk [vmem:[%s16578_s15 + $0x244] sm:$0xf] %vm11544_vm1, %v13150_v30  ;;  %v10154_v14 = vadd.f32 %v17693_v38, %v9891_v42  ;;  %v9892_v29 = vmul.f32 %v17686_v26, %v9629_v21  ;;  %v7487_v8 = vadd.f32 %v7486_v18, %v18881_v55  ;;  %v7488_v1 = vpop.f32.mrb[45].mxu1 }
 0x647   : > { %9372 = vst.msk [vmem:[#allocation2 + $0x4a8] sm:$0xff] %vm290_vm0, %v9115_v36  ;;  %v8545_v39 = vpop.f32.mrb[45].mxu0  ;;  %v7489_v22 = vpop.f32.mrb[46].mxu1 }
 0x648   : > { %v8546_v63 = vpop.f32.mrb[46].mxu0  ;;  %v10410_v59 = vmax.f32 %v10154_v14, 0.0  ;;  %v10155_v49 = vadd.f32 %v17693_v38, %v9892_v29  ;;  %v8544_v61 = vadd.f32 %v8543_v6, %v7487_v8  ;;  %v7490_v2 = vadd.f32 %v7489_v22, %v18882_v25  ;;  %v7491_v12 = vpop.f32.mrb[47].mxu1  ;;  %v14432_v29 = vld [vmem:[%s14921_s14 + $0x1388] ss:$24 sps:$4 sm:$0xff]   ;;  %v701_v39 = vld [vmem:[#allocation2 + $0x4d0] sm:$0xff] }
 0x649   : > { %v8548_v4 = vpop.f32.mrb[47].mxu0  ;;  %v18886_v12 = vld [vmem:[#allocation37_spill] sm:$0xff] }
 0x64a   : > { %v13151_v33 = vpack.c.bf16 %v10410_v59, %v10410_v59  ;;  %v10411_v60 = vmax.f32 %v10155_v49, 0.0  ;;  %v9116_v62 = vadd.f32 %v8544_v61, %v697_v28  ;;  %v8547_v19 = vadd.f32 %v8546_v63, %v7490_v2  ;;  %7701 = vmatmul.mubr.bf16.gmra.mrb[152].mxu1 %v14420_v53  ;;  %v18885_v28 = vld [vmem:[#allocation36_spill] sm:$0xff]  ;;  %v14435_v63 = vld [vmem:[%s14921_s14 + $0x1390] ss:$24 sps:$4 sm:$0xff]   ;;  %v14443_v49 = vld [vmem:[%s14921_s14 + $0x13c4] ss:$24 sps:$4 sm:$0xff]  }
 0x64b   : > { %8758 = vmatmul.mubr.bf16.gmra.mrb[152].mxu0 %v14423_v43  ;;  %7708 = vmatprep.mubr.bf16.mxu1 %v14428_v3  ;;  %v14440_v59 = vld [vmem:[%s14921_s14 + $0x13bc] ss:$24 sps:$4 sm:$0xff]  }
 0x64c   : > { %v9630_v24 = vld [vmem:[#allocation2 + $0x4a0] sm:$0xff]  ;;  %8765 = vmatprep.mubr.bf16.mxu0 %v14431_v10  ;;  %11691 = vst.msk [vmem:[%s16578_s15 + $0x248] sm:$0xf] %vm11544_vm1, %v13151_v33  ;;  %v13152_v34 = vpack.c.bf16 %v10411_v60, %v10411_v60  ;;  %v9117_v45 = vadd.f32 %v8547_v19, %v698_v15  ;;  %v702_v60 = vld [vmem:[#allocation2 + $0x4d8] sm:$0xff] }
 0x64d   : > { %v9893_v35 = vmul.f32 %v17686_v26, %v9630_v24  ;;  %9373 = vst.msk [vmem:[#allocation2 + $0x4b0] sm:$0xff] %vm290_vm0, %v9116_v62  ;;  %v7494_v23 = vpop.f32.mrb[48].mxu1 }
 0x64e   : > { %v9631_v13 = vld [vmem:[#allocation2 + $0x4a8] sm:$0xff]  ;;  %v8551_v44 = vpop.f32.mrb[48].mxu0  ;;  %11692 = vst.msk [vmem:[%s16578_s15 + $0x24c] sm:$0xf] %vm11544_vm1, %v13152_v34  ;;  %v7495_v5 = vadd.f32 %v7494_v23, %v18883_v16  ;;  %v7496_v57 = vpop.f32.mrb[49].mxu1 }
 0x64f   : > { %v10156_v20 = vadd.f32 %v17693_v38, %v9893_v35  ;;  %v9894_v7 = vmul.f32 %v17686_v26, %v9631_v13  ;;  %9374 = vst.msk [vmem:[#allocation2 + $0x4b8] sm:$0xff] %vm290_vm0, %v9117_v45  ;;  %v8553_v52 = vpop.f32.mrb[49].mxu0  ;;  %v7497_v32 = vpop.f32.mrb[50].mxu1 }
 0x650   : > { %v8554_v0 = vpop.f32.mrb[50].mxu0  ;;  %v8552_v37 = vadd.f32 %v8551_v44, %v7495_v5  ;;  %v7498_v11 = vadd.f32 %v7497_v32, %v18884_v48  ;;  %v7499_v41 = vpop.f32.mrb[51].mxu1  ;;  %v703_v52 = vld [vmem:[#allocation2 + $0x4e0] sm:$0xff] }
 0x651   : > { %v10412_v54 = vmax.f32 %v10156_v20, 0.0  ;;  %v10157_v58 = vadd.f32 %v17693_v38, %v9894_v7  ;;  %v8556_v50 = vpop.f32.mrb[51].mxu0  ;;  %v14438_v7 = vld [vmem:[%s14921_s14 + $0x13b8] ss:$24 sps:$4 sm:$0xff]  }
 0x652   : > { %v9118_v56 = vadd.f32 %v8552_v37, %v699_v27  ;;  %v8555_v30 = vadd.f32 %v8554_v0, %v7498_v11  ;;  %7709 = vmatmul.mubr.bf16.gmra.mrb[156].mxu1 %v14426_v31  ;;  %v18887_v27 = vld [vmem:[#allocation38_spill] sm:$0xff]  ;;  %v14441_v0 = vld [vmem:[%s14921_s14 + $0x13c0] ss:$24 sps:$4 sm:$0xff]   ;;  %v18888_v41 = vld [vmem:[#allocation39_spill] sm:$0xff] }
 0x653   : > { %v13153_v47 = vpack.c.bf16 %v10412_v54, %v10412_v54  ;;  %v10413_v9 = vmax.f32 %v10157_v58, 0.0  ;;  %8766 = vmatmul.mubr.bf16.gmra.mrb[156].mxu0 %v14429_v40  ;;  %7716 = vmatprep.mubr.bf16.mxu1 %v14434_v17  ;;  %v14446_v54 = vld [vmem:[%s14921_s14 + $0x13ec] ss:$24 sps:$4 sm:$0xff]  }
 0x654   : > { %v9632_v42 = vld [vmem:[#allocation2 + $0x4b0] sm:$0xff]  ;;  %8773 = vmatprep.mubr.bf16.mxu0 %v14437_v46  ;;  %9375 = vst.msk [vmem:[#allocation2 + $0x4c0] sm:$0xff] %vm290_vm0, %v9118_v56  ;;  %v9119_v18 = vadd.f32 %v8555_v30, %v700_v51 }
 0x655   : > { %11693 = vst.msk [vmem:[%s16578_s15 + $0x250] sm:$0xf] %vm11544_vm1, %v13153_v47  ;;  %v13154_v36 = vpack.c.bf16 %v10413_v9, %v10413_v9  ;;  %v9895_v21 = vmul.f32 %v17686_v26, %v9632_v42  ;;  %v7502_v53 = vpop.f32.mrb[52].mxu1  ;;  %v14449_v58 = vld [vmem:[%s14921_s14 + $0x13f4] ss:$24 sps:$4 sm:$0xff]  }
 0x656   : > { %v9633_v6 = vld [vmem:[#allocation2 + $0x4b8] sm:$0xff]  ;;  %v8559_v14 = vpop.f32.mrb[52].mxu0  ;;  %9376 = vst.msk [vmem:[#allocation2 + $0x4c8] sm:$0xff] %vm290_vm0, %v9119_v18  ;;  %v7503_v1 = vadd.f32 %v7502_v53, %v18885_v28  ;;  %v7504_v43 = vpop.f32.mrb[53].mxu1  ;;  %v704_v9 = vld [vmem:[#allocation2 + $0x4e8] sm:$0xff] }
 0x657   : > { %11694 = vst.msk [vmem:[%s16578_s15 + $0x254] sm:$0xf] %vm11544_vm1, %v13154_v36  ;;  %v10158_v55 = vadd.f32 %v17693_v38, %v9895_v21  ;;  %v9896_v8 = vmul.f32 %v17686_v26, %v9633_v6  ;;  %v8561_v22 = vpop.f32.mrb[53].mxu0  ;;  %v7505_v3 = vpop.f32.mrb[54].mxu1 }
 0x658   : > { %v8562_v10 = vpop.f32.mrb[54].mxu0  ;;  %v8560_v2 = vadd.f32 %v8559_v14, %v7503_v1  ;;  %v7506_v4 = vadd.f32 %v7505_v3, %v18886_v12  ;;  %v7507_v15 = vpop.f32.mrb[55].mxu1  ;;  %v705_v22 = vld [vmem:[#allocation2 + $0x4f0] sm:$0xff] }
 0x659   : > { %v10414_v61 = vmax.f32 %v10158_v55, 0.0  ;;  %v10159_v25 = vadd.f32 %v17693_v38, %v9896_v8  ;;  %v8564_v33 = vpop.f32.mrb[55].mxu0  ;;  %v14444_v8 = vld [vmem:[%s14921_s14 + $0x13e8] ss:$24 sps:$4 sm:$0xff]  }
 0x65a   : > { %v9120_v24 = vadd.f32 %v8560_v2, %v701_v39  ;;  %v8563_v34 = vadd.f32 %v8562_v10, %v7506_v4  ;;  %7717 = vmatmul.mubr.bf16.gmra.mrb[160].mxu1 %v14432_v29  ;;  %v18889_v39 = vld [vmem:[#allocation40_spill] sm:$0xff]  ;;  %v14447_v10 = vld [vmem:[%s14921_s14 + $0x13f0] ss:$24 sps:$4 sm:$0xff]   ;;  %v18890_v15 = vld [vmem:[#allocation41_spill] sm:$0xff] }
 0x65b   : > { %v13155_v62 = vpack.c.bf16 %v10414_v61, %v10414_v61  ;;  %v10415_v19 = vmax.f32 %v10159_v25, 0.0  ;;  %8774 = vmatmul.mubr.bf16.gmra.mrb[160].mxu0 %v14435_v63  ;;  %v9634_v35 = vld [vmem:[#allocation2 + $0x4c0] sm:$0xff]  ;;  %7724 = vmatprep.mubr.bf16.mxu1 %v14440_v59  ;;  %v14452_v61 = vld [vmem:[%s14921_s14 + $0x141c] ss:$24 sps:$4 sm:$0xff]  }
 0x65c   : > { %8781 = vmatprep.mubr.bf16.mxu0 %v14443_v49  ;;  %v9897_v13 = vmul.f32 %v17686_v26, %v9634_v35  ;;  %9377 = vst.msk [vmem:[#allocation2 + $0x4d0] sm:$0xff] %vm290_vm0, %v9120_v24  ;;  %v9121_v23 = vadd.f32 %v8563_v34, %v702_v60  ;;  %v14455_v25 = vld [vmem:[%s14921_s14 + $0x1424] ss:$24 sps:$4 sm:$0xff]  }
 0x65d   : > { %11695 = vst.msk [vmem:[%s16578_s15 + $0x258] sm:$0xf] %vm11544_vm1, %v13155_v62  ;;  %v13156_v45 = vpack.c.bf16 %v10415_v19, %v10415_v19  ;;  %v9635_v44 = vld [vmem:[#allocation2 + $0x4c8] sm:$0xff]  ;;  %v7510_v31 = vpop.f32.mrb[56].mxu1  ;;  %v706_v19 = vld [vmem:[#allocation2 + $0x4f8] sm:$0xff] }
 0x65e   : > { %v8567_v20 = vpop.f32.mrb[56].mxu0  ;;  %v10160_v16 = vadd.f32 %v17693_v38, %v9897_v13  ;;  %v9898_v5 = vmul.f32 %v17686_v26, %v9635_v44  ;;  %9378 = vst.msk [vmem:[#allocation2 + $0x4d8] sm:$0xff] %vm290_vm0, %v9121_v23  ;;  %v7511_v57 = vadd.f32 %v7510_v31, %v18887_v27  ;;  %v7512_v40 = vpop.f32.mrb[57].mxu1 }
 0x65f   : > { %11696 = vst.msk [vmem:[%s16578_s15 + $0x25c] sm:$0xf] %vm11544_vm1, %v13156_v45  ;;  %v8569_v32 = vpop.f32.mrb[57].mxu0  ;;  %v7513_v17 = vpop.f32.mrb[58].mxu1 }
 0x660   : > { %v8570_v46 = vpop.f32.mrb[58].mxu0  ;;  %v10416_v37 = vmax.f32 %v10160_v16, 0.0  ;;  %v10161_v48 = vadd.f32 %v17693_v38, %v9898_v5  ;;  %v8568_v11 = vadd.f32 %v8567_v20, %v7511_v57  ;;  %v7514_v50 = vadd.f32 %v7513_v17, %v18888_v41  ;;  %v7515_v51 = vpop.f32.mrb[59].mxu1  ;;  %v14450_v5 = vld [vmem:[%s14921_s14 + $0x1418] ss:$24 sps:$4 sm:$0xff]   ;;  %v707_v32 = vld [vmem:[#allocation2 + $0x500] sm:$0xff] }
 0x661   : > { %v8572_v47 = vpop.f32.mrb[59].mxu0  ;;  %v18892_v51 = vld [vmem:[#allocation43_spill] sm:$0xff] }
 0x662   : > { %v13157_v56 = vpack.c.bf16 %v10416_v37, %v10416_v37  ;;  %v10417_v30 = vmax.f32 %v10161_v48, 0.0  ;;  %v9122_v42 = vadd.f32 %v8568_v11, %v703_v52  ;;  %v8571_v36 = vadd.f32 %v8570_v46, %v7514_v50  ;;  %7725 = vmatmul.mubr.bf16.gmra.mrb[164].mxu1 %v14438_v7  ;;  %v18891_v52 = vld [vmem:[#allocation42_spill] sm:$0xff]  ;;  %v14453_v46 = vld [vmem:[%s14921_s14 + $0x1420] ss:$24 sps:$4 sm:$0xff]   ;;  %v14461_v48 = vld [vmem:[%s14921_s14 + $0x1454] ss:$24 sps:$4 sm:$0xff]  }
 0x663   : > { %8782 = vmatmul.mubr.bf16.gmra.mrb[164].mxu0 %v14441_v0  ;;  %v9636_v21 = vld [vmem:[#allocation2 + $0x4d0] sm:$0xff]  ;;  %7732 = vmatprep.mubr.bf16.mxu1 %v14446_v54  ;;  %v14458_v37 = vld [vmem:[%s14921_s14 + $0x144c] ss:$24 sps:$4 sm:$0xff]  }
 0x664   : > { %8789 = vmatprep.mubr.bf16.mxu0 %v14449_v58  ;;  %11697 = vst.msk [vmem:[%s16578_s15 + $0x260] sm:$0xf] %vm11544_vm1, %v13157_v56  ;;  %v13158_v18 = vpack.c.bf16 %v10417_v30, %v10417_v30  ;;  %v9899_v6 = vmul.f32 %v17686_v26, %v9636_v21  ;;  %v9123_v53 = vadd.f32 %v8571_v36, %v704_v9  ;;  %v708_v30 = vld [vmem:[#allocation2 + $0x508] sm:$0xff] }
 0x665   : > { %9379 = vst.msk [vmem:[#allocation2 + $0x4e0] sm:$0xff] %vm290_vm0, %v9122_v42  ;;  %v9637_v14 = vld [vmem:[#allocation2 + $0x4d8] sm:$0xff]  ;;  %v7518_v29 = vpop.f32.mrb[60].mxu1 }
 0x666   : > { %v8575_v55 = vpop.f32.mrb[60].mxu0  ;;  %11698 = vst.msk [vmem:[%s16578_s15 + $0x264] sm:$0xf] %vm11544_vm1, %v13158_v18  ;;  %v10162_v28 = vadd.f32 %v17693_v38, %v9899_v6  ;;  %v9900_v1 = vmul.f32 %v17686_v26, %v9637_v14  ;;  %v7519_v43 = vadd.f32 %v7518_v29, %v18889_v39  ;;  %v7520_v63 = vpop.f32.mrb[61].mxu1 }
 0x667   : > { %9380 = vst.msk [vmem:[#allocation2 + $0x4e8] sm:$0xff] %vm290_vm0, %v9123_v53  ;;  %v8577_v3 = vpop.f32.mrb[61].mxu0  ;;  %v7521_v59 = vpop.f32.mrb[62].mxu1 }
 0x668   : > { %v8578_v49 = vpop.f32.mrb[62].mxu0  ;;  %v10418_v2 = vmax.f32 %v10162_v28, 0.0  ;;  %v10163_v12 = vadd.f32 %v17693_v38, %v9900_v1  ;;  %v8576_v4 = vadd.f32 %v8575_v55, %v7519_v43  ;;  %v7522_v33 = vadd.f32 %v7521_v59, %v18890_v15  ;;  %v7523_v60 = vpop.f32.mrb[63].mxu1  ;;  %v14456_v1 = vld [vmem:[%s14921_s14 + $0x1448] ss:$24 sps:$4 sm:$0xff]   ;;  %v709_v3 = vld [vmem:[#allocation2 + $0x510] sm:$0xff] }
 0x669   : > { %v8580_v62 = vpop.f32.mrb[63].mxu0  ;;  %v18894_v60 = vld [vmem:[#allocation45_spill] sm:$0xff] }
 0x66a   : > { %v13159_v24 = vpack.c.bf16 %v10418_v2, %v10418_v2  ;;  %v10419_v34 = vmax.f32 %v10163_v12, 0.0  ;;  %v9124_v35 = vadd.f32 %v8576_v4, %v705_v22  ;;  %v8579_v45 = vadd.f32 %v8578_v49, %v7522_v33  ;;  %7733 = vmatmul.mubr.bf16.gmra.mrb[168].mxu1 %v14444_v8  ;;  %v18893_v22 = vld [vmem:[#allocation44_spill] sm:$0xff]  ;;  %v14459_v49 = vld [vmem:[%s14921_s14 + $0x1450] ss:$24 sps:$4 sm:$0xff]   ;;  %v14467_v12 = vld [vmem:[%s14921_s14 + $0x1484] ss:$24 sps:$4 sm:$0xff]  }
 0x66b   : > { %8790 = vmatmul.mubr.bf16.gmra.mrb[168].mxu0 %v14447_v10  ;;  %7740 = vmatprep.mubr.bf16.mxu1 %v14452_v61  ;;  %v14464_v2 = vld [vmem:[%s14921_s14 + $0x147c] ss:$24 sps:$4 sm:$0xff]  }
 0x66c   : > { %v9638_v13 = vld [vmem:[#allocation2 + $0x4e0] sm:$0xff]  ;;  %8797 = vmatprep.mubr.bf16.mxu0 %v14455_v25  ;;  %11699 = vst.msk [vmem:[%s16578_s15 + $0x268] sm:$0xf] %vm11544_vm1, %v13159_v24  ;;  %v13160_v23 = vpack.c.bf16 %v10419_v34, %v10419_v34  ;;  %v9125_v31 = vadd.f32 %v8579_v45, %v706_v19  ;;  %v710_v34 = vld [vmem:[#allocation2 + $0x518] sm:$0xff] }
 0x66d   : > { %v9901_v44 = vmul.f32 %v17686_v26, %v9638_v13  ;;  %9381 = vst.msk [vmem:[#allocation2 + $0x4f0] sm:$0xff] %vm290_vm0, %v9124_v35  ;;  %v7526_v7 = vpop.f32.mrb[64].mxu1 }
 0x66e   : > { %v9639_v20 = vld [vmem:[#allocation2 + $0x4e8] sm:$0xff]  ;;  %v8583_v16 = vpop.f32.mrb[64].mxu0  ;;  %11700 = vst.msk [vmem:[%s16578_s15 + $0x26c] sm:$0xf] %vm11544_vm1, %v13160_v23  ;;  %v7527_v40 = vadd.f32 %v7526_v7, %v18891_v52  ;;  %v7528_v0 = vpop.f32.mrb[65].mxu1 }
 0x66f   : > { %v10164_v27 = vadd.f32 %v17693_v38, %v9901_v44  ;;  %v9902_v57 = vmul.f32 %v17686_v26, %v9639_v20  ;;  %9382 = vst.msk [vmem:[#allocation2 + $0x4f8] sm:$0xff] %vm290_vm0, %v9125_v31  ;;  %v8585_v17 = vpop.f32.mrb[65].mxu0  ;;  %v7529_v54 = vpop.f32.mrb[66].mxu1 }
 0x670   : > { %v8586_v58 = vpop.f32.mrb[66].mxu0  ;;  %v8584_v50 = vadd.f32 %v8583_v16, %v7527_v40  ;;  %v7530_v47 = vadd.f32 %v7529_v54, %v18892_v51  ;;  %v7531_v9 = vpop.f32.mrb[67].mxu1  ;;  %v711_v17 = vld [vmem:[#allocation2 + $0x520] sm:$0xff] }
 0x671   : > { %v10420_v11 = vmax.f32 %v10164_v27, 0.0  ;;  %v10165_v41 = vadd.f32 %v17693_v38, %v9902_v57  ;;  %v8588_v56 = vpop.f32.mrb[67].mxu0  ;;  %v14462_v57 = vld [vmem:[%s14921_s14 + $0x1478] ss:$24 sps:$4 sm:$0xff]  }
 0x672   : > { %v9126_v21 = vadd.f32 %v8584_v50, %v707_v32  ;;  %v8587_v18 = vadd.f32 %v8586_v58, %v7530_v47  ;;  %7741 = vmatmul.mubr.bf16.gmra.mrb[172].mxu1 %v14450_v5  ;;  %v18895_v32 = vld [vmem:[#allocation46_spill] sm:$0xff]  ;;  %v14465_v58 = vld [vmem:[%s14921_s14 + $0x1480] ss:$24 sps:$4 sm:$0xff]   ;;  %v18896_v9 = vld [vmem:[#allocation47_spill] sm:$0xff] }
 0x673   : > { %v13161_v42 = vpack.c.bf16 %v10420_v11, %v10420_v11  ;;  %v10421_v36 = vmax.f32 %v10165_v41, 0.0  ;;  %8798 = vmatmul.mubr.bf16.gmra.mrb[172].mxu0 %v14453_v46  ;;  %7748 = vmatprep.mubr.bf16.mxu1 %v14458_v37  ;;  %v14470_v11 = vld [vmem:[%s14921_s14 + $0x14ac] ss:$24 sps:$4 sm:$0xff]  }
 0x674   : > { %v9640_v6 = vld [vmem:[#allocation2 + $0x4f0] sm:$0xff]  ;;  %8805 = vmatprep.mubr.bf16.mxu0 %v14461_v48  ;;  %9383 = vst.msk [vmem:[#allocation2 + $0x500] sm:$0xff] %vm290_vm0, %v9126_v21  ;;  %v9127_v29 = vadd.f32 %v8587_v18, %v708_v30 }
 0x675   : > { %11701 = vst.msk [vmem:[%s16578_s15 + $0x270] sm:$0xf] %vm11544_vm1, %v13161_v42  ;;  %v13162_v53 = vpack.c.bf16 %v10421_v36, %v10421_v36  ;;  %v9903_v14 = vmul.f32 %v17686_v26, %v9640_v6  ;;  %v7534_v8 = vpop.f32.mrb[68].mxu1  ;;  %v14473_v41 = vld [vmem:[%s14921_s14 + $0x14b4] ss:$24 sps:$4 sm:$0xff]  }
 0x676   : > { %v9641_v55 = vld [vmem:[#allocation2 + $0x4f8] sm:$0xff]  ;;  %v8591_v28 = vpop.f32.mrb[68].mxu0  ;;  %9384 = vst.msk [vmem:[#allocation2 + $0x508] sm:$0xff] %vm290_vm0, %v9127_v29  ;;  %v7535_v63 = vadd.f32 %v7534_v8, %v18893_v22  ;;  %v7536_v10 = vpop.f32.mrb[69].mxu1  ;;  %v712_v36 = vld [vmem:[#allocation2 + $0x528] sm:$0xff] }
 0x677   : > { %11702 = vst.msk [vmem:[%s16578_s15 + $0x274] sm:$0xf] %vm11544_vm1, %v13162_v53  ;;  %v10166_v39 = vadd.f32 %v17693_v38, %v9903_v14  ;;  %v9904_v43 = vmul.f32 %v17686_v26, %v9641_v55  ;;  %v8593_v59 = vpop.f32.mrb[69].mxu0  ;;  %v7537_v61 = vpop.f32.mrb[70].mxu1 }
 0x678   : > { %v8594_v25 = vpop.f32.mrb[70].mxu0  ;;  %v8592_v33 = vadd.f32 %v8591_v28, %v7535_v63  ;;  %v7538_v62 = vadd.f32 %v7537_v61, %v18894_v60  ;;  %v7539_v19 = vpop.f32.mrb[71].mxu1  ;;  %v713_v59 = vld [vmem:[#allocation2 + $0x530] sm:$0xff] }
 0x679   : > { %v10422_v4 = vmax.f32 %v10166_v39, 0.0  ;;  %v10167_v15 = vadd.f32 %v17693_v38, %v9904_v43  ;;  %v8596_v24 = vpop.f32.mrb[71].mxu0  ;;  %v14468_v43 = vld [vmem:[%s14921_s14 + $0x14a8] ss:$24 sps:$4 sm:$0xff]  }
 0x67a   : > { %v9128_v13 = vadd.f32 %v8592_v33, %v709_v3  ;;  %v8595_v23 = vadd.f32 %v8594_v25, %v7538_v62  ;;  %7749 = vmatmul.mubr.bf16.gmra.mrb[176].mxu1 %v14456_v1  ;;  %v18897_v3 = vld [vmem:[#allocation48_spill] sm:$0xff]  ;;  %v14471_v25 = vld [vmem:[%s14921_s14 + $0x14b0] ss:$24 sps:$4 sm:$0xff]   ;;  %v18898_v19 = vld [vmem:[#allocation49_spill] sm:$0xff] }
 0x67b   : > { %v13163_v35 = vpack.c.bf16 %v10422_v4, %v10422_v4  ;;  %v10423_v45 = vmax.f32 %v10167_v15, 0.0  ;;  %8806 = vmatmul.mubr.bf16.gmra.mrb[176].mxu0 %v14459_v49  ;;  %v9642_v44 = vld [vmem:[#allocation2 + $0x500] sm:$0xff]  ;;  %7756 = vmatprep.mubr.bf16.mxu1 %v14464_v2  ;;  %v14476_v4 = vld [vmem:[%s14921_s14 + $0x14dc] ss:$24 sps:$4 sm:$0xff]  }
 0x67c   : > { %8813 = vmatprep.mubr.bf16.mxu0 %v14467_v12  ;;  %v9905_v20 = vmul.f32 %v17686_v26, %v9642_v44  ;;  %9385 = vst.msk [vmem:[#allocation2 + $0x510] sm:$0xff] %vm290_vm0, %v9128_v13  ;;  %v9129_v7 = vadd.f32 %v8595_v23, %v710_v34  ;;  %v14479_v15 = vld [vmem:[%s14921_s14 + $0x14e4] ss:$24 sps:$4 sm:$0xff]  }
 0x67d   : > { %11703 = vst.msk [vmem:[%s16578_s15 + $0x278] sm:$0xf] %vm11544_vm1, %v13163_v35  ;;  %v13164_v31 = vpack.c.bf16 %v10423_v45, %v10423_v45  ;;  %v9643_v16 = vld [vmem:[#allocation2 + $0x508] sm:$0xff]  ;;  %v7542_v5 = vpop.f32.mrb[72].mxu1  ;;  %v714_v45 = vld [vmem:[#allocation2 + $0x538] sm:$0xff] }
 0x67e   : > { %v8599_v27 = vpop.f32.mrb[72].mxu0  ;;  %v10168_v52 = vadd.f32 %v17693_v38, %v9905_v20  ;;  %v9906_v40 = vmul.f32 %v17686_v26, %v9643_v16  ;;  %9386 = vst.msk [vmem:[#allocation2 + $0x518] sm:$0xff] %vm290_vm0, %v9129_v7  ;;  %v7543_v0 = vadd.f32 %v7542_v5, %v18895_v32  ;;  %v7544_v46 = vpop.f32.mrb[73].mxu1 }
 0x67f   : > { %11704 = vst.msk [vmem:[%s16578_s15 + $0x27c] sm:$0xf] %vm11544_vm1, %v13164_v31  ;;  %v8601_v54 = vpop.f32.mrb[73].mxu0  ;;  %v7545_v37 = vpop.f32.mrb[74].mxu1 }
 0x680   : > { %v8602_v48 = vpop.f32.mrb[74].mxu0  ;;  %v10424_v50 = vmax.f32 %v10168_v52, 0.0  ;;  %v10169_v51 = vadd.f32 %v17693_v38, %v9906_v40  ;;  %v8600_v47 = vadd.f32 %v8599_v27, %v7543_v0  ;;  %v7546_v56 = vadd.f32 %v7545_v37, %v18896_v9  ;;  %v7547_v30 = vpop.f32.mrb[75].mxu1  ;;  %v14474_v40 = vld [vmem:[%s14921_s14 + $0x14d8] ss:$24 sps:$4 sm:$0xff]   ;;  %v715_v54 = vld [vmem:[#allocation2 + $0x540] sm:$0xff] }
 0x681   : > { %v8604_v42 = vpop.f32.mrb[75].mxu0  ;;  %v18900_v30 = vld [vmem:[#allocation51_spill] sm:$0xff] }
 0x682   : > { %v13165_v21 = vpack.c.bf16 %v10424_v50, %v10424_v50  ;;  %v10425_v18 = vmax.f32 %v10169_v51, 0.0  ;;  %v9130_v6 = vadd.f32 %v8600_v47, %v711_v17  ;;  %v8603_v53 = vadd.f32 %v8602_v48, %v7546_v56  ;;  %7757 = vmatmul.mubr.bf16.gmra.mrb[180].mxu1 %v14462_v57  ;;  %v18899_v17 = vld [vmem:[#allocation50_spill] sm:$0xff]  ;;  %v14477_v48 = vld [vmem:[%s14921_s14 + $0x14e0] ss:$24 sps:$4 sm:$0xff]   ;;  %v14485_v51 = vld [vmem:[%s14921_s14 + $0x1514] ss:$24 sps:$4 sm:$0xff]  }
 0x683   : > { %8814 = vmatmul.mubr.bf16.gmra.mrb[180].mxu0 %v14465_v58  ;;  %v9644_v14 = vld [vmem:[#allocation2 + $0x510] sm:$0xff]  ;;  %7764 = vmatprep.mubr.bf16.mxu1 %v14470_v11  ;;  %v14482_v50 = vld [vmem:[%s14921_s14 + $0x150c] ss:$24 sps:$4 sm:$0xff]  }
 0x684   : > { %8821 = vmatprep.mubr.bf16.mxu0 %v14473_v41  ;;  %11705 = vst.msk [vmem:[%s16578_s15 + $0x280] sm:$0xf] %vm11544_vm1, %v13165_v21  ;;  %v13166_v29 = vpack.c.bf16 %v10425_v18, %v10425_v18  ;;  %v9907_v55 = vmul.f32 %v17686_v26, %v9644_v14  ;;  %v9131_v8 = vadd.f32 %v8603_v53, %v712_v36  ;;  %v716_v21 = vld [vmem:[#allocation2 + $0x548] sm:$0xff] }
 0x685   : > { %9387 = vst.msk [vmem:[#allocation2 + $0x520] sm:$0xff] %vm290_vm0, %v9130_v6  ;;  %v9645_v28 = vld [vmem:[#allocation2 + $0x518] sm:$0xff]  ;;  %v7550_v1 = vpop.f32.mrb[76].mxu1 }
 0x686   : > { %v8607_v39 = vpop.f32.mrb[76].mxu0  ;;  %11706 = vst.msk [vmem:[%s16578_s15 + $0x284] sm:$0xf] %vm11544_vm1, %v13166_v29  ;;  %v10170_v22 = vadd.f32 %v17693_v38, %v9907_v55  ;;  %v9908_v63 = vmul.f32 %v17686_v26, %v9645_v28  ;;  %v7551_v10 = vadd.f32 %v7550_v1, %v18897_v3  ;;  %v7552_v49 = vpop.f32.mrb[77].mxu1  ;;  %v17914_v55 = vld [vmem:[#allocation5] ss:$0 sm:$0xff] }
 0x687   : > { %9388 = vst.msk [vmem:[#allocation2 + $0x528] sm:$0xff] %vm290_vm0, %v9131_v8  ;;  %v8609_v61 = vpop.f32.mrb[77].mxu0  ;;  %v7553_v2 = vpop.f32.mrb[78].mxu1 }
 0x688   : > { %v8610_v12 = vpop.f32.mrb[78].mxu0  ;;  %v10426_v33 = vmax.f32 %v10170_v22, 0.0  ;;  %v10171_v60 = vadd.f32 %v17693_v38, %v9908_v63  ;;  %v8608_v62 = vadd.f32 %v8607_v39, %v7551_v10  ;;  %v7554_v24 = vadd.f32 %v7553_v2, %v18898_v19  ;;  %v7555_v34 = vpop.f32.mrb[79].mxu1  ;;  %v14480_v22 = vld [vmem:[%s14921_s14 + $0x1508] ss:$24 sps:$4 sm:$0xff]   ;;  %v717_v61 = vld [vmem:[#allocation2 + $0x550] sm:$0xff] }
 0x689   : > { %v8612_v35 = vpop.f32.mrb[79].mxu0  ;;  %v17921_v63 = vld [vmem:[#allocation7] ss:$0 sm:$0xff] }
 0x68a   : > { %v13167_v13 = vpack.c.bf16 %v10426_v33, %v10426_v33  ;;  %v10427_v23 = vmax.f32 %v10171_v60, 0.0  ;;  %v9132_v44 = vadd.f32 %v8608_v62, %v713_v59  ;;  %v8611_v31 = vadd.f32 %v8610_v12, %v7554_v24  ;;  %7765 = vmatmul.mubr.bf16.gmra.mrb[184].mxu1 %v14468_v43  ;;  %v18901_v59 = vld [vmem:[#allocation52_spill] sm:$0xff]  ;;  %v14483_v12 = vld [vmem:[%s14921_s14 + $0x1510] ss:$24 sps:$4 sm:$0xff]   ;;  %v14491_v60 = vld [vmem:[%s14921_s14 + $0x1544] ss:$24 sps:$4 sm:$0xff]  }
 0x68b   : > { %8822 = vmatmul.mubr.bf16.gmra.mrb[184].mxu0 %v14471_v25  ;;  %7772 = vmatprep.mubr.bf16.mxu1 %v14476_v4  ;;  %v14488_v33 = vld [vmem:[%s14921_s14 + $0x153c] ss:$24 sps:$4 sm:$0xff]  }
 0x68c   : > { %v9646_v20 = vld [vmem:[#allocation2 + $0x520] sm:$0xff]  ;;  %8829 = vmatprep.mubr.bf16.mxu0 %v14479_v15  ;;  %11707 = vst.msk [vmem:[%s16578_s15 + $0x288] sm:$0xf] %vm11544_vm1, %v13167_v13  ;;  %v13168_v7 = vpack.c.bf16 %v10427_v23, %v10427_v23  ;;  %v9133_v5 = vadd.f32 %v8611_v31, %v714_v45  ;;  %v718_v23 = vld [vmem:[#allocation2 + $0x558] sm:$0xff] }
 0x68d   : > { %v9909_v16 = vmul.f32 %v17686_v26, %v9646_v20  ;;  %9389 = vst.msk [vmem:[#allocation2 + $0x530] sm:$0xff] %vm290_vm0, %v9132_v44  ;;  %v7558_v57 = vpop.f32.mrb[80].mxu1  ;;  %v18902_v34 = vld [vmem:[#allocation53_spill] sm:$0xff] }
 0x68e   : > { %v9647_v27 = vld [vmem:[#allocation2 + $0x528] sm:$0xff]  ;;  %v8615_v52 = vpop.f32.mrb[80].mxu0  ;;  %11708 = vst.msk [vmem:[%s16578_s15 + $0x28c] sm:$0xf] %vm11544_vm1, %v13168_v7  ;;  %v7559_v46 = vadd.f32 %v7558_v57, %v18899_v17  ;;  %v7560_v58 = vpop.f32.mrb[81].mxu1 }
 0x68f   : > { %v10172_v32 = vadd.f32 %v17693_v38, %v9909_v16  ;;  %v9910_v0 = vmul.f32 %v17686_v26, %v9647_v27  ;;  %9390 = vst.msk [vmem:[#allocation2 + $0x538] sm:$0xff] %vm290_vm0, %v9133_v5  ;;  %v8617_v37 = vpop.f32.mrb[81].mxu0  ;;  %v7561_v11 = vpop.f32.mrb[82].mxu1 }
 0x690   : > { %v8618_v41 = vpop.f32.mrb[82].mxu0  ;;  %v8616_v56 = vadd.f32 %v8615_v52, %v7559_v46  ;;  %v7562_v42 = vadd.f32 %v7561_v11, %v18900_v30  ;;  %v7563_v26 = vpop.f32.mrb[83].mxu1  ;;  %v719_v37 = vld [vmem:[#allocation2 + $0x560] sm:$0xff] }
 0x691   : > { %v10428_v47 = vmax.f32 %v10172_v32, 0.0  ;;  %v10173_v9 = vadd.f32 %v17693_v38, %v9910_v0  ;;  %v8620_v36 = vpop.f32.mrb[83].mxu0  ;;  %v14486_v0 = vld [vmem:[%s14921_s14 + $0x1538] ss:$24 sps:$4 sm:$0xff]  }
 0x692   : > { %v9134_v53 = vadd.f32 %v8616_v56, %v715_v54  ;;  %v8619_v14 = vadd.f32 %v8618_v41, %v7562_v42  ;;  %7773 = vmatmul.mubr.bf16.gmra.mrb[188].mxu1 %v14474_v40  ;;  %v18903_v54 = vld [vmem:[#allocation54_spill] sm:$0xff]  ;;  %v14489_v41 = vld [vmem:[%s14921_s14 + $0x1540] ss:$24 sps:$4 sm:$0xff]  }
 0x693   : > { %v13169_v18 = vpack.c.bf16 %v10428_v47, %v10428_v47  ;;  %v10429_v6 = vmax.f32 %v10173_v9, 0.0  ;;  %8830 = vmatmul.mubr.bf16.gmra.mrb[188].mxu0 %v14477_v48  ;;  %7780 = vmatprep.mubr.bf16.mxu1 %v14482_v50  ;;  %v14494_v47 = vld [vmem:[%s14921_s14 + $0x156c] ss:$24 sps:$4 sm:$0xff]   ;;  %v18904_v26 = vld [vmem:[#allocation56_spill] sm:$0xff] }
 0x694   : > { %v9648_v29 = vld [vmem:[#allocation2 + $0x530] sm:$0xff]  ;;  %8837 = vmatprep.mubr.bf16.mxu0 %v14485_v51  ;;  %9391 = vst.msk [vmem:[#allocation2 + $0x540] sm:$0xff] %vm290_vm0, %v9134_v53  ;;  %v9135_v28 = vadd.f32 %v8619_v14, %v716_v21 }
 0x695   : > { %11709 = vst.msk [vmem:[%s16578_s15 + $0x290] sm:$0xf] %vm11544_vm1, %v13169_v18  ;;  %v13170_v38 = vpack.c.bf16 %v10429_v6, %v10429_v6  ;;  %v9911_v8 = vmul.f32 %v17914_v55, %v9648_v29  ;;  %v7566_v39 = vpop.f32.mrb[84].mxu1  ;;  %v14497_v9 = vld [vmem:[%s14921_s14 + $0x1574] ss:$24 sps:$4 sm:$0xff]  }
 0x696   : > { %v9649_v1 = vld [vmem:[#allocation2 + $0x538] sm:$0xff]  ;;  %v8623_v43 = vpop.f32.mrb[84].mxu0  ;;  %9392 = vst.msk [vmem:[#allocation2 + $0x548] sm:$0xff] %vm290_vm0, %v9135_v28  ;;  %v7567_v49 = vadd.f32 %v7566_v39, %v18901_v59  ;;  %v7568_v25 = vpop.f32.mrb[85].mxu1  ;;  %v720_v6 = vld [vmem:[#allocation2 + $0x568] sm:$0xff] }
 0x697   : > { %11710 = vst.msk [vmem:[%s16578_s15 + $0x294] sm:$0xf] %vm11544_vm1, %v13170_v38  ;;  %v10174_v3 = vadd.f32 %v17921_v63, %v9911_v8  ;;  %v9912_v10 = vmul.f32 %v17914_v55, %v9649_v1  ;;  %v8625_v2 = vpop.f32.mrb[85].mxu0  ;;  %v7569_v4 = vpop.f32.mrb[86].mxu1 }
 0x698   : > { %v8626_v15 = vpop.f32.mrb[86].mxu0  ;;  %v8624_v24 = vadd.f32 %v8623_v43, %v7567_v49  ;;  %v7570_v35 = vadd.f32 %v7569_v4, %v18902_v34  ;;  %v7571_v45 = vpop.f32.mrb[87].mxu1  ;;  %v721_v2 = vld [vmem:[#allocation2 + $0x570] sm:$0xff] }
 0x699   : > { %v10430_v62 = vmax.f32 %v10174_v3, 0.0  ;;  %v10175_v19 = vadd.f32 %v17921_v63, %v9912_v10  ;;  %v8628_v13 = vpop.f32.mrb[87].mxu0  ;;  %v14492_v10 = vld [vmem:[%s14921_s14 + $0x1568] ss:$24 sps:$4 sm:$0xff]   ;;  %v18906_v45 = vld [vmem:[#allocation60_spill] sm:$0xff] }
 0x69a   : > { %v9136_v20 = vadd.f32 %v8624_v24, %v717_v61  ;;  %v8627_v7 = vadd.f32 %v8626_v15, %v7570_v35  ;;  %7781 = vmatmul.mubr.bf16.gmra.mrb[192].mxu1 %v14480_v22  ;;  %v18905_v61 = vld [vmem:[#allocation58_spill] sm:$0xff] }
 0x69b   : > { %v13171_v44 = vpack.c.bf16 %v10430_v62, %v10430_v62  ;;  %v10431_v31 = vmax.f32 %v10175_v19, 0.0  ;;  %8838 = vmatmul.mubr.bf16.gmra.mrb[192].mxu0 %v14483_v12  ;;  %v9650_v16 = vld [vmem:[#allocation2 + $0x540] sm:$0xff]  ;;  %7788 = vmatprep.mubr.bf16.mxu1 %v14488_v33  ;;  %v14495_v15 = vld [vmem:[%s14921_s14 + $0x1570] ss:$24 sps:$4 sm:$0xff]   ;;  %v14500_v62 = vld [vmem:[%s14921_s14 + $0x159c] ss:$24 sps:$4 sm:$0xff]  }
 0x69c   : > { %8845 = vmatprep.mubr.bf16.mxu0 %v14491_v60  ;;  %v9913_v27 = vmul.f32 %v17914_v55, %v9650_v16  ;;  %9393 = vst.msk [vmem:[#allocation2 + $0x550] sm:$0xff] %vm290_vm0, %v9136_v20  ;;  %v9137_v57 = vadd.f32 %v8627_v7, %v718_v23  ;;  %v14503_v19 = vld [vmem:[%s14921_s14 + $0x15a4] ss:$24 sps:$4 sm:$0xff]  }
 0x69d   : > { %11711 = vst.msk [vmem:[%s16578_s15 + $0x298] sm:$0xf] %vm11544_vm1, %v13171_v44  ;;  %v13172_v5 = vpack.c.bf16 %v10431_v31, %v10431_v31  ;;  %v9651_v52 = vld [vmem:[#allocation2 + $0x548] sm:$0xff]  ;;  %v7574_v40 = vpop.f32.mrb[88].mxu1  ;;  %v722_v31 = vld [vmem:[#allocation2 + $0x578] sm:$0xff] }
 0x69e   : > { %v8631_v32 = vpop.f32.mrb[88].mxu0  ;;  %v10176_v17 = vadd.f32 %v17921_v63, %v9913_v27  ;;  %v9914_v46 = vmul.f32 %v17914_v55, %v9651_v52  ;;  %9394 = vst.msk [vmem:[#allocation2 + $0x558] sm:$0xff] %vm290_vm0, %v9137_v57  ;;  %v7575_v58 = vadd.f32 %v7574_v40, %v18903_v54  ;;  %v7576_v48 = vpop.f32.mrb[89].mxu1 }
 0x69f   : > { %11712 = vst.msk [vmem:[%s16578_s15 + $0x29c] sm:$0xf] %vm11544_vm1, %v13172_v5  ;;  %v8633_v11 = vpop.f32.mrb[89].mxu0  ;;  %v7577_v50 = vpop.f32.mrb[90].mxu1 }
 0x6a0   : > { %v8634_v51 = vpop.f32.mrb[90].mxu0  ;;  %v10432_v56 = vmax.f32 %v10176_v17, 0.0  ;;  %v10177_v30 = vadd.f32 %v17921_v63, %v9914_v46  ;;  %v8632_v42 = vadd.f32 %v8631_v32, %v7575_v58  ;;  %v7578_v36 = vadd.f32 %v7577_v50, %v18904_v26  ;;  %v7579_v21 = vpop.f32.mrb[91].mxu1  ;;  %v14498_v46 = vld [vmem:[%s14921_s14 + $0x1598] ss:$24 sps:$4 sm:$0xff]   ;;  %v723_v11 = vld [vmem:[#allocation2 + $0x580] sm:$0xff] }
 0x6a1   : > { %v8636_v18 = vpop.f32.mrb[91].mxu0  ;;  %v18908_v21 = vld [vmem:[#allocation64_spill] sm:$0xff] }
 0x6a2   : > { %v13173_v53 = vpack.c.bf16 %v10432_v56, %v10432_v56  ;;  %v10433_v14 = vmax.f32 %v10177_v30, 0.0  ;;  %v9138_v29 = vadd.f32 %v8632_v42, %v719_v37  ;;  %v8635_v38 = vadd.f32 %v8634_v51, %v7578_v36  ;;  %7789 = vmatmul.mubr.bf16.gmra.mrb[196].mxu1 %v14486_v0  ;;  %v18907_v37 = vld [vmem:[#allocation62_spill] sm:$0xff]  ;;  %v14501_v51 = vld [vmem:[%s14921_s14 + $0x15a0] ss:$24 sps:$4 sm:$0xff]   ;;  %v14509_v30 = vld [vmem:[%s14921_s14 + $0x15d4] ss:$24 sps:$4 sm:$0xff]  }
 0x6a3   : > { %8846 = vmatmul.mubr.bf16.gmra.mrb[196].mxu0 %v14489_v41  ;;  %v9652_v8 = vld [vmem:[#allocation2 + $0x550] sm:$0xff]  ;;  %7796 = vmatprep.mubr.bf16.mxu1 %v14494_v47  ;;  %v14506_v56 = vld [vmem:[%s14921_s14 + $0x15cc] ss:$24 sps:$4 sm:$0xff]  }
 0x6a4   : > { %8853 = vmatprep.mubr.bf16.mxu0 %v14497_v9  ;;  %11713 = vst.msk [vmem:[%s16578_s15 + $0x2a0] sm:$0xf] %vm11544_vm1, %v13173_v53  ;;  %v13174_v28 = vpack.c.bf16 %v10433_v14, %v10433_v14  ;;  %v9915_v1 = vmul.f32 %v17914_v55, %v9652_v8  ;;  %v9139_v39 = vadd.f32 %v8635_v38, %v720_v6  ;;  %v724_v14 = vld [vmem:[#allocation2 + $0x588] sm:$0xff] }
 0x6a5   : > { %9395 = vst.msk [vmem:[#allocation2 + $0x560] sm:$0xff] %vm290_vm0, %v9138_v29  ;;  %v9653_v43 = vld [vmem:[#allocation2 + $0x558] sm:$0xff]  ;;  %v7582_v22 = vpop.f32.mrb[92].mxu1 }
 0x6a6   : > { %v8639_v3 = vpop.f32.mrb[92].mxu0  ;;  %11714 = vst.msk [vmem:[%s16578_s15 + $0x2a4] sm:$0xf] %vm11544_vm1, %v13174_v28  ;;  %v10178_v59 = vadd.f32 %v17921_v63, %v9915_v1  ;;  %v9916_v49 = vmul.f32 %v17914_v55, %v9653_v43  ;;  %v7583_v25 = vadd.f32 %v7582_v22, %v18905_v61  ;;  %v7584_v12 = vpop.f32.mrb[93].mxu1 }
 0x6a7   : > { %9396 = vst.msk [vmem:[#allocation2 + $0x568] sm:$0xff] %vm290_vm0, %v9139_v39  ;;  %v8641_v4 = vpop.f32.mrb[93].mxu0  ;;  %v7585_v33 = vpop.f32.mrb[94].mxu1 }
 0x6a8   : > { %v8642_v60 = vpop.f32.mrb[94].mxu0  ;;  %v10434_v24 = vmax.f32 %v10178_v59, 0.0  ;;  %v10179_v34 = vadd.f32 %v17921_v63, %v9916_v49  ;;  %v8640_v35 = vadd.f32 %v8639_v3, %v7583_v25  ;;  %v7586_v13 = vadd.f32 %v7585_v33, %v18906_v45  ;;  %v7587_v23 = vpop.f32.mrb[95].mxu1  ;;  %v14504_v49 = vld [vmem:[%s14921_s14 + $0x15c8] ss:$24 sps:$4 sm:$0xff]   ;;  %v725_v4 = vld [vmem:[#allocation2 + $0x590] sm:$0xff] }
 0x6a9   : > { %v8644_v44 = vpop.f32.mrb[95].mxu0  ;;  %v18910_v23 = vld [vmem:[#allocation68_spill] sm:$0xff] }
 0x6aa   : > { %v13175_v20 = vpack.c.bf16 %v10434_v24, %v10434_v24  ;;  %v10435_v7 = vmax.f32 %v10179_v34, 0.0  ;;  %v9140_v16 = vadd.f32 %v8640_v35, %v721_v2  ;;  %v8643_v5 = vadd.f32 %v8642_v60, %v7586_v13  ;;  %7797 = vmatmul.mubr.bf16.gmra.mrb[200].mxu1 %v14492_v10  ;;  %v18909_v2 = vld [vmem:[#allocation66_spill] sm:$0xff]  ;;  %v14512_v24 = vld [vmem:[%s14921_s14 + $0x15fc] ss:$24 sps:$4 sm:$0xff]  }
 0x6ab   : > { %8854 = vmatmul.mubr.bf16.gmra.mrb[200].mxu0 %v14495_v15  ;;  %7804 = vmatprep.mubr.bf16.mxu1 %v14500_v62  ;;  %v14507_v60 = vld [vmem:[%s14921_s14 + $0x15d0] ss:$24 sps:$4 sm:$0xff]   ;;  %v14515_v34 = vld [vmem:[%s14921_s14 + $0x1604] ss:$24 sps:$4 sm:$0xff]  }
 0x6ac   : > { %v9654_v27 = vld [vmem:[#allocation2 + $0x560] sm:$0xff]  ;;  %8861 = vmatprep.mubr.bf16.mxu0 %v14503_v19  ;;  %11715 = vst.msk [vmem:[%s16578_s15 + $0x2a8] sm:$0xf] %vm11544_vm1, %v13175_v20  ;;  %v13176_v57 = vpack.c.bf16 %v10435_v7, %v10435_v7  ;;  %v9141_v40 = vadd.f32 %v8643_v5, %v722_v31  ;;  %v726_v7 = vld [vmem:[#allocation2 + $0x598] sm:$0xff] }
 0x6ad   : > { %v9917_v52 = vmul.f32 %v17914_v55, %v9654_v27  ;;  %9397 = vst.msk [vmem:[#allocation2 + $0x570] sm:$0xff] %vm290_vm0, %v9140_v16  ;;  %v7590_v0 = vpop.f32.mrb[96].mxu1 }
 0x6ae   : > { %v9655_v32 = vld [vmem:[#allocation2 + $0x568] sm:$0xff]  ;;  %v8647_v17 = vpop.f32.mrb[96].mxu0  ;;  %11716 = vst.msk [vmem:[%s16578_s15 + $0x2ac] sm:$0xf] %vm11544_vm1, %v13176_v57  ;;  %v7591_v48 = vadd.f32 %v7590_v0, %v18907_v37  ;;  %v7592_v41 = vpop.f32.mrb[97].mxu1 }
 0x6af   : > { %v10180_v54 = vadd.f32 %v17921_v63, %v9917_v52  ;;  %v9918_v58 = vmul.f32 %v17914_v55, %v9655_v32  ;;  %9398 = vst.msk [vmem:[#allocation2 + $0x578] sm:$0xff] %vm290_vm0, %v9141_v40  ;;  %v8649_v50 = vpop.f32.mrb[97].mxu0  ;;  %v7593_v47 = vpop.f32.mrb[98].mxu1 }
 0x6b0   : > { %v8650_v9 = vpop.f32.mrb[98].mxu0  ;;  %v8648_v36 = vadd.f32 %v8647_v17, %v7591_v48  ;;  %v7594_v18 = vadd.f32 %v7593_v47, %v18908_v21  ;;  %v7595_v6 = vpop.f32.mrb[99].mxu1  ;;  %v727_v50 = vld [vmem:[#allocation2 + $0x5a0] sm:$0xff] }
 0x6b1   : > { %v10436_v42 = vmax.f32 %v10180_v54, 0.0  ;;  %v10181_v26 = vadd.f32 %v17921_v63, %v9918_v58  ;;  %v8652_v53 = vpop.f32.mrb[99].mxu0  ;;  %v14510_v58 = vld [vmem:[%s14921_s14 + $0x15f8] ss:$24 sps:$4 sm:$0xff]  }
 0x6b2   : > { %v9142_v8 = vadd.f32 %v8648_v36, %v723_v11  ;;  %v8651_v28 = vadd.f32 %v8650_v9, %v7594_v18  ;;  %7805 = vmatmul.mubr.bf16.gmra.mrb[204].mxu1 %v14498_v46  ;;  %v18911_v11 = vld [vmem:[#allocation70_spill] sm:$0xff]  ;;  %v14513_v9 = vld [vmem:[%s14921_s14 + $0x1600] ss:$24 sps:$4 sm:$0xff]  }
 0x6b3   : > { %v13177_v29 = vpack.c.bf16 %v10436_v42, %v10436_v42  ;;  %v10437_v38 = vmax.f32 %v10181_v26, 0.0  ;;  %8862 = vmatmul.mubr.bf16.gmra.mrb[204].mxu0 %v14501_v51  ;;  %7812 = vmatprep.mubr.bf16.mxu1 %v14506_v56  ;;  %v14518_v42 = vld [vmem:[%s14921_s14 + $0x162c] ss:$24 sps:$4 sm:$0xff]   ;;  %v18912_v6 = vld [vmem:[#allocation72_spill] sm:$0xff] }
 0x6b4   : > { %v9656_v1 = vld [vmem:[#allocation2 + $0x570] sm:$0xff]  ;;  %8869 = vmatprep.mubr.bf16.mxu0 %v14509_v30  ;;  %9399 = vst.msk [vmem:[#allocation2 + $0x580] sm:$0xff] %vm290_vm0, %v9142_v8  ;;  %v9143_v22 = vadd.f32 %v8651_v28, %v724_v14 }
 0x6b5   : > { %11717 = vst.msk [vmem:[%s16578_s15 + $0x2b0] sm:$0xf] %vm11544_vm1, %v13177_v29  ;;  %v13178_v39 = vpack.c.bf16 %v10437_v38, %v10437_v38  ;;  %v9919_v43 = vmul.f32 %v17914_v55, %v9656_v1  ;;  %v7598_v10 = vpop.f32.mrb[100].mxu1  ;;  %v14521_v26 = vld [vmem:[%s14921_s14 + $0x1634] ss:$24 sps:$4 sm:$0xff]  }
 0x6b6   : > { %v9657_v3 = vld [vmem:[#allocation2 + $0x578] sm:$0xff]  ;;  %v8655_v59 = vpop.f32.mrb[100].mxu0  ;;  %9400 = vst.msk [vmem:[#allocation2 + $0x588] sm:$0xff] %vm290_vm0, %v9143_v22  ;;  %v7599_v12 = vadd.f32 %v7598_v10, %v18909_v2  ;;  %v7600_v15 = vpop.f32.mrb[101].mxu1  ;;  %v728_v38 = vld [vmem:[#allocation2 + $0x5a8] sm:$0xff] }
 0x6b7   : > { %11718 = vst.msk [vmem:[%s16578_s15 + $0x2b4] sm:$0xf] %vm11544_vm1, %v13178_v39  ;;  %v10182_v61 = vadd.f32 %v17921_v63, %v9919_v43  ;;  %v9920_v25 = vmul.f32 %v17914_v55, %v9657_v3  ;;  %v8657_v33 = vpop.f32.mrb[101].mxu0  ;;  %v7601_v62 = vpop.f32.mrb[102].mxu1 }
 0x6b8   : > { %v8658_v19 = vpop.f32.mrb[102].mxu0  ;;  %v8656_v13 = vadd.f32 %v8655_v59, %v7599_v12  ;;  %v7602_v44 = vadd.f32 %v7601_v62, %v18910_v23  ;;  %v7603_v31 = vpop.f32.mrb[103].mxu1  ;;  %v729_v33 = vld [vmem:[#allocation2 + $0x5b0] sm:$0xff] }
 0x6b9   : > { %v10438_v35 = vmax.f32 %v10182_v61, 0.0  ;;  %v10183_v45 = vadd.f32 %v17921_v63, %v9920_v25  ;;  %v8660_v20 = vpop.f32.mrb[103].mxu0  ;;  %v14516_v25 = vld [vmem:[%s14921_s14 + $0x1628] ss:$24 sps:$4 sm:$0xff]   ;;  %v18914_v31 = vld [vmem:[#allocation76_spill] sm:$0xff] }
 0x6ba   : > { %v9144_v27 = vadd.f32 %v8656_v13, %v725_v4  ;;  %v8659_v57 = vadd.f32 %v8658_v19, %v7602_v44  ;;  %7813 = vmatmul.mubr.bf16.gmra.mrb[208].mxu1 %v14504_v49  ;;  %v18913_v4 = vld [vmem:[#allocation74_spill] sm:$0xff] }
 0x6bb   : > { %v13179_v16 = vpack.c.bf16 %v10438_v35, %v10438_v35  ;;  %v10439_v5 = vmax.f32 %v10183_v45, 0.0  ;;  %8870 = vmatmul.mubr.bf16.gmra.mrb[208].mxu0 %v14507_v60  ;;  %v9658_v52 = vld [vmem:[#allocation2 + $0x580] sm:$0xff]  ;;  %7820 = vmatprep.mubr.bf16.mxu1 %v14512_v24  ;;  %v14519_v19 = vld [vmem:[%s14921_s14 + $0x1630] ss:$24 sps:$4 sm:$0xff]   ;;  %v14524_v35 = vld [vmem:[%s14921_s14 + $0x165c] ss:$24 sps:$4 sm:$0xff]  }
 0x6bc   : > { %8877 = vmatprep.mubr.bf16.mxu0 %v14515_v34  ;;  %v9921_v32 = vmul.f32 %v17914_v55, %v9658_v52  ;;  %9401 = vst.msk [vmem:[#allocation2 + $0x590] sm:$0xff] %vm290_vm0, %v9144_v27  ;;  %v9145_v0 = vadd.f32 %v8659_v57, %v726_v7  ;;  %v14527_v45 = vld [vmem:[%s14921_s14 + $0x1664] ss:$24 sps:$4 sm:$0xff]  }
 0x6bd   : > { %11719 = vst.msk [vmem:[%s16578_s15 + $0x2b8] sm:$0xf] %vm11544_vm1, %v13179_v16  ;;  %v13180_v40 = vpack.c.bf16 %v10439_v5, %v10439_v5  ;;  %v9659_v17 = vld [vmem:[#allocation2 + $0x588] sm:$0xff]  ;;  %v7606_v46 = vpop.f32.mrb[104].mxu1  ;;  %v730_v5 = vld [vmem:[#allocation2 + $0x5b8] sm:$0xff] }
 0x6be   : > { %v8663_v54 = vpop.f32.mrb[104].mxu0  ;;  %v10184_v37 = vadd.f32 %v17921_v63, %v9921_v32  ;;  %v9922_v48 = vmul.f32 %v17914_v55, %v9659_v17  ;;  %9402 = vst.msk [vmem:[#allocation2 + $0x598] sm:$0xff] %vm290_vm0, %v9145_v0  ;;  %v7607_v41 = vadd.f32 %v7606_v46, %v18911_v11  ;;  %v7608_v51 = vpop.f32.mrb[105].mxu1 }
 0x6bf   : > { %11720 = vst.msk [vmem:[%s16578_s15 + $0x2bc] sm:$0xf] %vm11544_vm1, %v13180_v40  ;;  %v8665_v47 = vpop.f32.mrb[105].mxu0  ;;  %v7609_v56 = vpop.f32.mrb[106].mxu1 }
 0x6c0   : > { %v8666_v30 = vpop.f32.mrb[106].mxu0  ;;  %v10440_v36 = vmax.f32 %v10184_v37, 0.0  ;;  %v10185_v21 = vadd.f32 %v17921_v63, %v9922_v48  ;;  %v8664_v18 = vadd.f32 %v8663_v54, %v7607_v41  ;;  %v7610_v53 = vadd.f32 %v7609_v56, %v18912_v6  ;;  %v7611_v14 = vpop.f32.mrb[107].mxu1  ;;  %v14522_v48 = vld [vmem:[%s14921_s14 + $0x1658] ss:$24 sps:$4 sm:$0xff]   ;;  %v731_v47 = vld [vmem:[#allocation2 + $0x5c0] sm:$0xff] }
 0x6c1   : > { %v8668_v29 = vpop.f32.mrb[107].mxu0  ;;  %v18916_v14 = vld [vmem:[#allocation80_spill] sm:$0xff] }
 0x6c2   : > { %v13181_v8 = vpack.c.bf16 %v10440_v36, %v10440_v36  ;;  %v10441_v28 = vmax.f32 %v10185_v21, 0.0  ;;  %v9146_v1 = vadd.f32 %v8664_v18, %v727_v50  ;;  %v8667_v39 = vadd.f32 %v8666_v30, %v7610_v53  ;;  %7821 = vmatmul.mubr.bf16.gmra.mrb[212].mxu1 %v14510_v58  ;;  %v18915_v50 = vld [vmem:[#allocation78_spill] sm:$0xff]  ;;  %v14525_v30 = vld [vmem:[%s14921_s14 + $0x1660] ss:$24 sps:$4 sm:$0xff]   ;;  %v14533_v21 = vld [vmem:[%s14921_s14 + $0x1694] ss:$24 sps:$4 sm:$0xff]  }
 0x6c3   : > { %8878 = vmatmul.mubr.bf16.gmra.mrb[212].mxu0 %v14513_v9  ;;  %v9660_v43 = vld [vmem:[#allocation2 + $0x590] sm:$0xff]  ;;  %7828 = vmatprep.mubr.bf16.mxu1 %v14518_v42  ;;  %v14530_v36 = vld [vmem:[%s14921_s14 + $0x168c] ss:$24 sps:$4 sm:$0xff]  }
 0x6c4   : > { %8885 = vmatprep.mubr.bf16.mxu0 %v14521_v26  ;;  %11721 = vst.msk [vmem:[%s16578_s15 + $0x2c0] sm:$0xf] %vm11544_vm1, %v13181_v8  ;;  %v13182_v22 = vpack.c.bf16 %v10441_v28, %v10441_v28  ;;  %v9923_v3 = vmul.f32 %v17914_v55, %v9660_v43  ;;  %v9147_v10 = vadd.f32 %v8667_v39, %v728_v38  ;;  %v732_v28 = vld [vmem:[#allocation2 + $0x5c8] sm:$0xff] }
 0x6c5   : > { %9403 = vst.msk [vmem:[#allocation2 + $0x5a0] sm:$0xff] %vm290_vm0, %v9146_v1  ;;  %v9661_v59 = vld [vmem:[#allocation2 + $0x598] sm:$0xff]  ;;  %v7614_v49 = vpop.f32.mrb[108].mxu1 }
 0x6c6   : > { %v8671_v61 = vpop.f32.mrb[108].mxu0  ;;  %11722 = vst.msk [vmem:[%s16578_s15 + $0x2c4] sm:$0xf] %vm11544_vm1, %v13182_v22  ;;  %v10186_v2 = vadd.f32 %v17921_v63, %v9923_v3  ;;  %v9924_v12 = vmul.f32 %v17914_v55, %v9661_v59  ;;  %v7615_v15 = vadd.f32 %v7614_v49, %v18913_v4  ;;  %v7616_v60 = vpop.f32.mrb[109].mxu1 }
 0x6c7   : > { %9404 = vst.msk [vmem:[#allocation2 + $0x5a8] sm:$0xff] %vm290_vm0, %v9147_v10  ;;  %v8673_v62 = vpop.f32.mrb[109].mxu0  ;;  %v7617_v24 = vpop.f32.mrb[110].mxu1 }
 0x6c8   : > { %v8674_v34 = vpop.f32.mrb[110].mxu0  ;;  %v10442_v13 = vmax.f32 %v10186_v2, 0.0  ;;  %v10187_v23 = vadd.f32 %v17921_v63, %v9924_v12  ;;  %v8672_v44 = vadd.f32 %v8671_v61, %v7615_v15  ;;  %v7618_v20 = vadd.f32 %v7617_v24, %v18914_v31  ;;  %v7619_v7 = vpop.f32.mrb[111].mxu1  ;;  %v14528_v12 = vld [vmem:[%s14921_s14 + $0x1688] ss:$24 sps:$4 sm:$0xff]   ;;  %v733_v62 = vld [vmem:[#allocation2 + $0x5d0] sm:$0xff] }
 0x6c9   : > { %v8676_v16 = vpop.f32.mrb[111].mxu0  ;;  %v18918_v7 = vld [vmem:[#allocation84_spill] sm:$0xff] }
 0x6ca   : > { %v13183_v27 = vpack.c.bf16 %v10442_v13, %v10442_v13  ;;  %v10443_v57 = vmax.f32 %v10187_v23, 0.0  ;;  %v9148_v52 = vadd.f32 %v8672_v44, %v729_v33  ;;  %v8675_v40 = vadd.f32 %v8674_v34, %v7618_v20  ;;  %7829 = vmatmul.mubr.bf16.gmra.mrb[216].mxu1 %v14516_v25  ;;  %v18917_v33 = vld [vmem:[#allocation82_spill] sm:$0xff]  ;;  %v14536_v13 = vld [vmem:[%s14921_s14 + $0x16bc] ss:$24 sps:$4 sm:$0xff]  }
 0x6cb   : > { %8886 = vmatmul.mubr.bf16.gmra.mrb[216].mxu0 %v14519_v19  ;;  %7836 = vmatprep.mubr.bf16.mxu1 %v14524_v35  ;;  %v14531_v34 = vld [vmem:[%s14921_s14 + $0x1690] ss:$24 sps:$4 sm:$0xff]   ;;  %v14539_v23 = vld [vmem:[%s14921_s14 + $0x16c4] ss:$24 sps:$4 sm:$0xff]  }
 0x6cc   : > { %v9662_v32 = vld [vmem:[#allocation2 + $0x5a0] sm:$0xff]  ;;  %8893 = vmatprep.mubr.bf16.mxu0 %v14527_v45  ;;  %11723 = vst.msk [vmem:[%s16578_s15 + $0x2c8] sm:$0xf] %vm11544_vm1, %v13183_v27  ;;  %v13184_v0 = vpack.c.bf16 %v10443_v57, %v10443_v57  ;;  %v9149_v46 = vadd.f32 %v8675_v40, %v730_v5  ;;  %v734_v57 = vld [vmem:[#allocation2 + $0x5d8] sm:$0xff] }
 0x6cd   : > { %v9925_v17 = vmul.f32 %v17914_v55, %v9662_v32  ;;  %9405 = vst.msk [vmem:[#allocation2 + $0x5b0] sm:$0xff] %vm290_vm0, %v9148_v52  ;;  %v7622_v58 = vpop.f32.mrb[112].mxu1 }
 0x6ce   : > { %v9663_v54 = vld [vmem:[#allocation2 + $0x5a8] sm:$0xff]  ;;  %v8679_v37 = vpop.f32.mrb[112].mxu0  ;;  %11724 = vst.msk [vmem:[%s16578_s15 + $0x2cc] sm:$0xf] %vm11544_vm1, %v13184_v0  ;;  %v7623_v51 = vadd.f32 %v7622_v58, %v18915_v50  ;;  %v7624_v9 = vpop.f32.mrb[113].mxu1 }
 0x6cf   : > { %v10188_v11 = vadd.f32 %v17921_v63, %v9925_v17  ;;  %v9926_v41 = vmul.f32 %v17914_v55, %v9663_v54  ;;  %9406 = vst.msk [vmem:[#allocation2 + $0x5b8] sm:$0xff] %vm290_vm0, %v9149_v46  ;;  %v8681_v56 = vpop.f32.mrb[113].mxu0  ;;  %v7625_v42 = vpop.f32.mrb[114].mxu1 }
 0x6d0   : > { %v8682_v26 = vpop.f32.mrb[114].mxu0  ;;  %v8680_v53 = vadd.f32 %v8679_v37, %v7623_v51  ;;  %v7626_v29 = vadd.f32 %v7625_v42, %v18916_v14  ;;  %v7627_v38 = vpop.f32.mrb[115].mxu1  ;;  %v735_v56 = vld [vmem:[#allocation2 + $0x5e0] sm:$0xff] }
 0x6d1   : > { %v10444_v18 = vmax.f32 %v10188_v11, 0.0  ;;  %v10189_v6 = vadd.f32 %v17921_v63, %v9926_v41  ;;  %v8684_v8 = vpop.f32.mrb[115].mxu0  ;;  %v14534_v41 = vld [vmem:[%s14921_s14 + $0x16b8] ss:$24 sps:$4 sm:$0xff]  }
 0x6d2   : > { %v9150_v43 = vadd.f32 %v8680_v53, %v731_v47  ;;  %v8683_v22 = vadd.f32 %v8682_v26, %v7626_v29  ;;  %7837 = vmatmul.mubr.bf16.gmra.mrb[220].mxu1 %v14522_v48  ;;  %v18919_v47 = vld [vmem:[#allocation86_spill] sm:$0xff]  ;;  %v14537_v26 = vld [vmem:[%s14921_s14 + $0x16c0] ss:$24 sps:$4 sm:$0xff]  }
 0x6d3   : > { %v13185_v1 = vpack.c.bf16 %v10444_v18, %v10444_v18  ;;  %v10445_v39 = vmax.f32 %v10189_v6, 0.0  ;;  %8894 = vmatmul.mubr.bf16.gmra.mrb[220].mxu0 %v14525_v30  ;;  %7844 = vmatprep.mubr.bf16.mxu1 %v14530_v36  ;;  %v14542_v18 = vld [vmem:[%s14921_s14 + $0x16ec] ss:$24 sps:$4 sm:$0xff]   ;;  %v18920_v38 = vld [vmem:[#allocation88_spill] sm:$0xff] }
 0x6d4   : > { %v9664_v3 = vld [vmem:[#allocation2 + $0x5b0] sm:$0xff]  ;;  %8901 = vmatprep.mubr.bf16.mxu0 %v14533_v21  ;;  %9407 = vst.msk [vmem:[#allocation2 + $0x5c0] sm:$0xff] %vm290_vm0, %v9150_v43  ;;  %v9151_v49 = vadd.f32 %v8683_v22, %v732_v28 }
 0x6d5   : > { %11725 = vst.msk [vmem:[%s16578_s15 + $0x2d0] sm:$0xf] %vm11544_vm1, %v13185_v1  ;;  %v13186_v10 = vpack.c.bf16 %v10445_v39, %v10445_v39  ;;  %v9927_v59 = vmul.f32 %v17914_v55, %v9664_v3  ;;  %v7630_v25 = vpop.f32.mrb[116].mxu1  ;;  %v14545_v6 = vld [vmem:[%s14921_s14 + $0x16f4] ss:$24 sps:$4 sm:$0xff]  }
 0x6d6   : > { %v9665_v61 = vld [vmem:[#allocation2 + $0x5b8] sm:$0xff]  ;;  %v8687_v2 = vpop.f32.mrb[116].mxu0  ;;  %9408 = vst.msk [vmem:[#allocation2 + $0x5c8] sm:$0xff] %vm290_vm0, %v9151_v49  ;;  %v7631_v60 = vadd.f32 %v7630_v25, %v18917_v33  ;;  %v7632_v19 = vpop.f32.mrb[117].mxu1  ;;  %v736_v39 = vld [vmem:[#allocation2 + $0x5e8] sm:$0xff] }
 0x6d7   : > { %11726 = vst.msk [vmem:[%s16578_s15 + $0x2d4] sm:$0xf] %vm11544_vm1, %v13186_v10  ;;  %v10190_v4 = vadd.f32 %v17921_v63, %v9927_v59  ;;  %v9928_v15 = vmul.f32 %v17914_v55, %v9665_v61  ;;  %v8689_v24 = vpop.f32.mrb[117].mxu0  ;;  %v7633_v35 = vpop.f32.mrb[118].mxu1 }
 0x6d8   : > { %v8690_v45 = vpop.f32.mrb[118].mxu0  ;;  %v8688_v20 = vadd.f32 %v8687_v2, %v7631_v60  ;;  %v7634_v16 = vadd.f32 %v7633_v35, %v18918_v7  ;;  %v7635_v5 = vpop.f32.mrb[119].mxu1  ;;  %v737_v24 = vld [vmem:[#allocation2 + $0x5f0] sm:$0xff] }
 0x6d9   : > { %v10446_v44 = vmax.f32 %v10190_v4, 0.0  ;;  %v10191_v31 = vadd.f32 %v17921_v63, %v9928_v15  ;;  %v8692_v27 = vpop.f32.mrb[119].mxu0  ;;  %v14540_v15 = vld [vmem:[%s14921_s14 + $0x16e8] ss:$24 sps:$4 sm:$0xff]   ;;  %v18922_v5 = vld [vmem:[#allocation92_spill] sm:$0xff] }
 0x6da   : > { %v9152_v32 = vadd.f32 %v8688_v20, %v733_v62  ;;  %v8691_v0 = vadd.f32 %v8690_v45, %v7634_v16  ;;  %7845 = vmatmul.mubr.bf16.gmra.mrb[224].mxu1 %v14528_v12  ;;  %v18921_v62 = vld [vmem:[#allocation90_spill] sm:$0xff] }
 0x6db   : > { %v13187_v52 = vpack.c.bf16 %v10446_v44, %v10446_v44  ;;  %v10447_v40 = vmax.f32 %v10191_v31, 0.0  ;;  %8902 = vmatmul.mubr.bf16.gmra.mrb[224].mxu0 %v14531_v34  ;;  %v9666_v17 = vld [vmem:[#allocation2 + $0x5c0] sm:$0xff]  ;;  %7852 = vmatprep.mubr.bf16.mxu1 %v14536_v13  ;;  %v14543_v45 = vld [vmem:[%s14921_s14 + $0x16f0] ss:$24 sps:$4 sm:$0xff]   ;;  %v14548_v44 = vld [vmem:[%s14921_s14 + $0x171c] ss:$24 sps:$4 sm:$0xff]  }
 0x6dc   : > { %8909 = vmatprep.mubr.bf16.mxu0 %v14539_v23  ;;  %v9929_v54 = vmul.f32 %v17914_v55, %v9666_v17  ;;  %9409 = vst.msk [vmem:[#allocation2 + $0x5d0] sm:$0xff] %vm290_vm0, %v9152_v32  ;;  %v9153_v58 = vadd.f32 %v8691_v0, %v734_v57  ;;  %v14551_v31 = vld [vmem:[%s14921_s14 + $0x1724] ss:$24 sps:$4 sm:$0xff]  }
 0x6dd   : > { %11727 = vst.msk [vmem:[%s16578_s15 + $0x2d8] sm:$0xf] %vm11544_vm1, %v13187_v52  ;;  %v13188_v46 = vpack.c.bf16 %v10447_v40, %v10447_v40  ;;  %v9667_v37 = vld [vmem:[#allocation2 + $0x5c8] sm:$0xff]  ;;  %v7638_v48 = vpop.f32.mrb[120].mxu1  ;;  %v738_v40 = vld [vmem:[#allocation2 + $0x5f8] sm:$0xff] }
 0x6de   : > { %v8695_v11 = vpop.f32.mrb[120].mxu0  ;;  %v10192_v50 = vadd.f32 %v17921_v63, %v9929_v54  ;;  %v9930_v51 = vmul.f32 %v17914_v55, %v9667_v37  ;;  %9410 = vst.msk [vmem:[#allocation2 + $0x5d8] sm:$0xff] %vm290_vm0, %v9153_v58  ;;  %v7639_v9 = vadd.f32 %v7638_v48, %v18919_v47  ;;  %v7640_v30 = vpop.f32.mrb[121].mxu1 }
 0x6df   : > { %11728 = vst.msk [vmem:[%s16578_s15 + $0x2dc] sm:$0xf] %vm11544_vm1, %v13188_v46  ;;  %v8697_v42 = vpop.f32.mrb[121].mxu0  ;;  %v7641_v36 = vpop.f32.mrb[122].mxu1 }
 0x6e0   : > { %v8698_v21 = vpop.f32.mrb[122].mxu0  ;;  %v10448_v53 = vmax.f32 %v10192_v50, 0.0  ;;  %v10193_v14 = vadd.f32 %v17921_v63, %v9930_v51  ;;  %v8696_v29 = vadd.f32 %v8695_v11, %v7639_v9  ;;  %v7642_v8 = vadd.f32 %v7641_v36, %v18920_v38  ;;  %v7643_v28 = vpop.f32.mrb[123].mxu1  ;;  %v14546_v51 = vld [vmem:[%s14921_s14 + $0x1718] ss:$24 sps:$4 sm:$0xff]   ;;  %v739_v42 = vld [vmem:[#allocation2 + $0x600] sm:$0xff] }
 0x6e1   : > { %v8700_v1 = vpop.f32.mrb[123].mxu0  ;;  %v18924_v28 = vld [vmem:[#allocation96_spill] sm:$0xff] }
 0x6e2   : > { %v13189_v43 = vpack.c.bf16 %v10448_v53, %v10448_v53  ;;  %v10449_v22 = vmax.f32 %v10193_v14, 0.0  ;;  %v9154_v3 = vadd.f32 %v8696_v29, %v735_v56  ;;  %v8699_v10 = vadd.f32 %v8698_v21, %v7642_v8  ;;  %7853 = vmatmul.mubr.bf16.gmra.mrb[228].mxu1 %v14534_v41  ;;  %v18923_v56 = vld [vmem:[#allocation94_spill] sm:$0xff]  ;;  %v14549_v21 = vld [vmem:[%s14921_s14 + $0x1720] ss:$24 sps:$4 sm:$0xff]   ;;  %v14557_v14 = vld [vmem:[%s14921_s14 + $0x1754] ss:$24 sps:$4 sm:$0xff]  }
 0x6e3   : > { %8910 = vmatmul.mubr.bf16.gmra.mrb[228].mxu0 %v14537_v26  ;;  %v9668_v59 = vld [vmem:[#allocation2 + $0x5d0] sm:$0xff]  ;;  %7860 = vmatprep.mubr.bf16.mxu1 %v14542_v18  ;;  %v14554_v53 = vld [vmem:[%s14921_s14 + $0x174c] ss:$24 sps:$4 sm:$0xff]  }
 0x6e4   : > { %8917 = vmatprep.mubr.bf16.mxu0 %v14545_v6  ;;  %11729 = vst.msk [vmem:[%s16578_s15 + $0x2e0] sm:$0xf] %vm11544_vm1, %v13189_v43  ;;  %v13190_v49 = vpack.c.bf16 %v10449_v22, %v10449_v22  ;;  %v9931_v61 = vmul.f32 %v17914_v55, %v9668_v59  ;;  %v9155_v25 = vadd.f32 %v8699_v10, %v736_v39  ;;  %v740_v22 = vld [vmem:[#allocation2 + $0x608] sm:$0xff] }
 0x6e5   : > { %9411 = vst.msk [vmem:[#allocation2 + $0x5e0] sm:$0xff] %vm290_vm0, %v9154_v3  ;;  %v9669_v2 = vld [vmem:[#allocation2 + $0x5d8] sm:$0xff]  ;;  %v7646_v12 = vpop.f32.mrb[124].mxu1 }
 0x6e6   : > { %v8703_v4 = vpop.f32.mrb[124].mxu0  ;;  %11730 = vst.msk [vmem:[%s16578_s15 + $0x2e4] sm:$0xf] %vm11544_vm1, %v13190_v49  ;;  %v10194_v33 = vadd.f32 %v17921_v63, %v9931_v61  ;;  %v9932_v60 = vmul.f32 %v17914_v55, %v9669_v2  ;;  %v7647_v19 = vadd.f32 %v7646_v12, %v18921_v62  ;;  %v7648_v34 = vpop.f32.mrb[125].mxu1 }
 0x6e7   : > { %9412 = vst.msk [vmem:[#allocation2 + $0x5e8] sm:$0xff] %vm290_vm0, %v9155_v25  ;;  %v8705_v35 = vpop.f32.mrb[125].mxu0  ;;  %v7649_v13 = vpop.f32.mrb[126].mxu1 }
 0x6e8   : > { %v8706_v23 = vpop.f32.mrb[126].mxu0  ;;  %v10450_v20 = vmax.f32 %v10194_v33, 0.0  ;;  %v10195_v7 = vadd.f32 %v17921_v63, %v9932_v60  ;;  %v8704_v16 = vadd.f32 %v8703_v4, %v7647_v19  ;;  %v7650_v27 = vadd.f32 %v7649_v13, %v18922_v5  ;;  %v7651_v57 = vpop.f32.mrb[127].mxu1  ;;  %v14552_v60 = vld [vmem:[%s14921_s14 + $0x1748] ss:$24 sps:$4 sm:$0xff]   ;;  %v741_v35 = vld [vmem:[#allocation2 + $0x610] sm:$0xff] }
 0x6e9   : > { %v8708_v52 = vpop.f32.mrb[127].mxu0  ;;  %v18926_v57 = vld [vmem:[#allocation100_spill] sm:$0xff] }
 0x6ea   : > { %v13191_v32 = vpack.c.bf16 %v10450_v20, %v10450_v20  ;;  %v10451_v0 = vmax.f32 %v10195_v7, 0.0  ;;  %v9156_v17 = vadd.f32 %v8704_v16, %v737_v24  ;;  %v8707_v46 = vadd.f32 %v8706_v23, %v7650_v27  ;;  %7861 = vmatmul.mubr.bf16.gmra.mrb[232].mxu1 %v14540_v15  ;;  %v18925_v24 = vld [vmem:[#allocation98_spill] sm:$0xff]  ;;  %v14560_v20 = vld [vmem:[%s14921_s14 + $0x177c] ss:$24 sps:$4 sm:$0xff]  }
 0x6eb   : > { %8918 = vmatmul.mubr.bf16.gmra.mrb[232].mxu0 %v14543_v45  ;;  %7868 = vmatprep.mubr.bf16.mxu1 %v14548_v44  ;;  %v14555_v23 = vld [vmem:[%s14921_s14 + $0x1750] ss:$24 sps:$4 sm:$0xff]   ;;  %v14563_v7 = vld [vmem:[%s14921_s14 + $0x1784] ss:$24 sps:$4 sm:$0xff]  }
 0x6ec   : > { %v9670_v54 = vld [vmem:[#allocation2 + $0x5e0] sm:$0xff]  ;;  %8925 = vmatprep.mubr.bf16.mxu0 %v14551_v31  ;;  %11731 = vst.msk [vmem:[%s16578_s15 + $0x2e8] sm:$0xf] %vm11544_vm1, %v13191_v32  ;;  %v13192_v58 = vpack.c.bf16 %v10451_v0, %v10451_v0  ;;  %v9157_v48 = vadd.f32 %v8707_v46, %v738_v40  ;;  %v742_v0 = vld [vmem:[#allocation2 + $0x618] sm:$0xff] }
 0x6ed   : > { %v9933_v37 = vmul.f32 %v17914_v55, %v9670_v54  ;;  %9413 = vst.msk [vmem:[#allocation2 + $0x5f0] sm:$0xff] %vm290_vm0, %v9156_v17  ;;  %v7654_v41 = vpop.f32.mrb[128].mxu1 }
 0x6ee   : > { %v9671_v11 = vld [vmem:[#allocation2 + $0x5e8] sm:$0xff]  ;;  %v8711_v50 = vpop.f32.mrb[128].mxu0  ;;  %11732 = vst.msk [vmem:[%s16578_s15 + $0x2ec] sm:$0xf] %vm11544_vm1, %v13192_v58  ;;  %v7655_v30 = vadd.f32 %v7654_v41, %v18923_v56  ;;  %v7656_v26 = vpop.f32.mrb[129].mxu1 }
 0x6ef   : > { %v10196_v47 = vadd.f32 %v17921_v63, %v9933_v37  ;;  %v9934_v9 = vmul.f32 %v17914_v55, %v9671_v11  ;;  %9414 = vst.msk [vmem:[#allocation2 + $0x5f8] sm:$0xff] %vm290_vm0, %v9157_v48  ;;  %v8713_v36 = vpop.f32.mrb[129].mxu0  ;;  %v7657_v18 = vpop.f32.mrb[130].mxu1 }
 0x6f0   : > { %v8714_v6 = vpop.f32.mrb[130].mxu0  ;;  %v8712_v8 = vadd.f32 %v8711_v50, %v7655_v30  ;;  %v7658_v1 = vadd.f32 %v7657_v18, %v18924_v28  ;;  %v7659_v39 = vpop.f32.mrb[131].mxu1  ;;  %v743_v36 = vld [vmem:[#allocation2 + $0x620] sm:$0xff] }
 0x6f1   : > { %v10452_v29 = vmax.f32 %v10196_v47, 0.0  ;;  %v10197_v38 = vadd.f32 %v17921_v63, %v9934_v9  ;;  %v8716_v43 = vpop.f32.mrb[131].mxu0  ;;  %v14558_v9 = vld [vmem:[%s14921_s14 + $0x1778] ss:$24 sps:$4 sm:$0xff]  }
 0x6f2   : > { %v9158_v59 = vadd.f32 %v8712_v8, %v739_v42  ;;  %v8715_v49 = vadd.f32 %v8714_v6, %v7658_v1  ;;  %7869 = vmatmul.mubr.bf16.gmra.mrb[236].mxu1 %v14546_v51  ;;  %v18927_v42 = vld [vmem:[#allocation102_spill] sm:$0xff]  ;;  %v14561_v6 = vld [vmem:[%s14921_s14 + $0x1780] ss:$24 sps:$4 sm:$0xff]  }
 0x6f3   : > { %v13193_v3 = vpack.c.bf16 %v10452_v29, %v10452_v29  ;;  %v10453_v10 = vmax.f32 %v10197_v38, 0.0  ;;  %8926 = vmatmul.mubr.bf16.gmra.mrb[236].mxu0 %v14549_v21  ;;  %7876 = vmatprep.mubr.bf16.mxu1 %v14554_v53  ;;  %v14566_v29 = vld [vmem:[%s14921_s14 + $0x17ac] ss:$24 sps:$4 sm:$0xff]   ;;  %v18928_v39 = vld [vmem:[#allocation104_spill] sm:$0xff] }
 0x6f4   : > { %v9672_v61 = vld [vmem:[#allocation2 + $0x5f0] sm:$0xff]  ;;  %8933 = vmatprep.mubr.bf16.mxu0 %v14557_v14  ;;  %9415 = vst.msk [vmem:[#allocation2 + $0x600] sm:$0xff] %vm290_vm0, %v9158_v59  ;;  %v9159_v12 = vadd.f32 %v8715_v49, %v740_v22 }
 0x6f5   : > { %11733 = vst.msk [vmem:[%s16578_s15 + $0x2f0] sm:$0xf] %vm11544_vm1, %v13193_v3  ;;  %v13194_v25 = vpack.c.bf16 %v10453_v10, %v10453_v10  ;;  %v9935_v2 = vmul.f32 %v17914_v55, %v9672_v61  ;;  %v7662_v15 = vpop.f32.mrb[132].mxu1  ;;  %v14569_v38 = vld [vmem:[%s14921_s14 + $0x17b4] ss:$24 sps:$4 sm:$0xff]  }
 0x6f6   : > { %v9673_v4 = vld [vmem:[#allocation2 + $0x5f8] sm:$0xff]  ;;  %v8719_v33 = vpop.f32.mrb[132].mxu0  ;;  %9416 = vst.msk [vmem:[#allocation2 + $0x608] sm:$0xff] %vm290_vm0, %v9159_v12  ;;  %v7663_v34 = vadd.f32 %v7662_v15, %v18925_v24  ;;  %v7664_v45 = vpop.f32.mrb[133].mxu1  ;;  %v744_v3 = vld [vmem:[#allocation2 + $0x628] sm:$0xff] }
 0x6f7   : > { %11734 = vst.msk [vmem:[%s16578_s15 + $0x2f4] sm:$0xf] %vm11544_vm1, %v13194_v25  ;;  %v10198_v62 = vadd.f32 %v17921_v63, %v9935_v2  ;;  %v9936_v19 = vmul.f32 %v17914_v55, %v9673_v4  ;;  %v8721_v13 = vpop.f32.mrb[133].mxu0  ;;  %v7665_v44 = vpop.f32.mrb[134].mxu1  ;;  %v18142_v2 = vld [vmem:[#allocation5] ss:$0 sm:$0xff] }
 0x6f8   : > { %v8722_v31 = vpop.f32.mrb[134].mxu0  ;;  %v8720_v27 = vadd.f32 %v8719_v33, %v7663_v34  ;;  %v7666_v52 = vadd.f32 %v7665_v44, %v18926_v57  ;;  %v7667_v40 = vpop.f32.mrb[135].mxu1  ;;  %v745_v13 = vld [vmem:[#allocation2 + $0x630] sm:$0xff] }
 0x6f9   : > { %v10454_v16 = vmax.f32 %v10198_v62, 0.0  ;;  %v10199_v5 = vadd.f32 %v17921_v63, %v9936_v19  ;;  %v8724_v32 = vpop.f32.mrb[135].mxu0  ;;  %v14564_v62 = vld [vmem:[%s14921_s14 + $0x17a8] ss:$24 sps:$4 sm:$0xff]   ;;  %v18930_v40 = vld [vmem:[#allocation108_spill] sm:$0xff] }
 0x6fa   : > { %v9160_v54 = vadd.f32 %v8720_v27, %v741_v35  ;;  %v8723_v58 = vadd.f32 %v8722_v31, %v7666_v52  ;;  %7877 = vmatmul.mubr.bf16.gmra.mrb[240].mxu1 %v14552_v60  ;;  %v18149_v19 = vld [vmem:[#allocation7] ss:$0 sm:$0xff]  ;;  %v18929_v35 = vld [vmem:[#allocation106_spill] sm:$0xff] }
 0x6fb   : > { %v13195_v17 = vpack.c.bf16 %v10454_v16, %v10454_v16  ;;  %v10455_v46 = vmax.f32 %v10199_v5, 0.0  ;;  %8934 = vmatmul.mubr.bf16.gmra.mrb[240].mxu0 %v14555_v23  ;;  %v9674_v37 = vld [vmem:[#allocation2 + $0x600] sm:$0xff]  ;;  %7884 = vmatprep.mubr.bf16.mxu1 %v14560_v20  ;;  %v14567_v31 = vld [vmem:[%s14921_s14 + $0x17b0] ss:$24 sps:$4 sm:$0xff]   ;;  %v14572_v16 = vld [vmem:[%s14921_s14 + $0x17dc] ss:$24 sps:$4 sm:$0xff]  }
 0x6fc   : > { %8941 = vmatprep.mubr.bf16.mxu0 %v14563_v7  ;;  %v9937_v11 = vmul.f32 %v17914_v55, %v9674_v37  ;;  %9417 = vst.msk [vmem:[#allocation2 + $0x610] sm:$0xff] %vm290_vm0, %v9160_v54  ;;  %v9161_v41 = vadd.f32 %v8723_v58, %v742_v0  ;;  %v14575_v5 = vld [vmem:[%s14921_s14 + $0x17e4] ss:$24 sps:$4 sm:$0xff]  }
 0x6fd   : > { %11735 = vst.msk [vmem:[%s16578_s15 + $0x2f8] sm:$0xf] %vm11544_vm1, %v13195_v17  ;;  %v13196_v48 = vpack.c.bf16 %v10455_v46, %v10455_v46  ;;  %v9675_v50 = vld [vmem:[#allocation2 + $0x608] sm:$0xff]  ;;  %v7670_v51 = vpop.f32.mrb[136].mxu1  ;;  %v746_v46 = vld [vmem:[#allocation2 + $0x638] sm:$0xff] }
 0x6fe   : > { %v8727_v47 = vpop.f32.mrb[136].mxu0  ;;  %v10200_v56 = vadd.f32 %v17921_v63, %v9937_v11  ;;  %v9938_v30 = vmul.f32 %v17914_v55, %v9675_v50  ;;  %9418 = vst.msk [vmem:[#allocation2 + $0x618] sm:$0xff] %vm290_vm0, %v9161_v41  ;;  %v7671_v26 = vadd.f32 %v7670_v51, %v18927_v42  ;;  %v7672_v21 = vpop.f32.mrb[137].mxu1 }
 0x6ff   : > { %11736 = vst.msk [vmem:[%s16578_s15 + $0x2fc] sm:$0xf] %vm11544_vm1, %v13196_v48  ;;  %v8729_v18 = vpop.f32.mrb[137].mxu0  ;;  %v7673_v53 = vpop.f32.mrb[138].mxu1 }
 0x700   : > { %v8730_v14 = vpop.f32.mrb[138].mxu0  ;;  %v10456_v8 = vmax.f32 %v10200_v56, 0.0  ;;  %v10201_v28 = vadd.f32 %v17921_v63, %v9938_v30  ;;  %v8728_v1 = vadd.f32 %v8727_v47, %v7671_v26  ;;  %v7674_v43 = vadd.f32 %v7673_v53, %v18928_v39  ;;  %v7675_v55 = vpop.f32.mrb[139].mxu1  ;;  %v18931_v26 = vld [vmem:[#allocation110_spill] sm:$0xff]  ;;  %v14573_v53 = vld [vmem:[%s14921_s14 + $0x17e0] ss:$24 sps:$4 sm:$0xff]  }
 0x701   : > { %v8732_v22 = vpop.f32.mrb[139].mxu0  ;;  %v18932_v39 = vld [vmem:[#allocation112_spill] sm:$0xff] }
 0x702   : > { %v13197_v10 = vpack.c.bf16 %v10456_v8, %v10456_v8  ;;  %v10457_v59 = vmax.f32 %v10201_v28, 0.0  ;;  %v9162_v49 = vadd.f32 %v8728_v1, %v743_v36  ;;  %v8731_v61 = vadd.f32 %v8730_v14, %v7674_v43  ;;  %7885 = vmatmul.mubr.bf16.gmra.mrb[244].mxu1 %v14558_v9  ;;  %v747_v14 = vld [vmem:[#allocation2 + $0x640] sm:$0xff] }
 0x703   : > { %8942 = vmatmul.mubr.bf16.gmra.mrb[244].mxu0 %v14561_v6  ;;  %v9676_v25 = vld [vmem:[#allocation2 + $0x610] sm:$0xff]  ;;  %7892 = vmatprep.mubr.bf16.mxu1 %v14566_v29 }
 0x704   : > { %8949 = vmatprep.mubr.bf16.mxu0 %v14569_v38  ;;  %11737 = vst.msk [vmem:[%s16578_s15 + $0x300] sm:$0xf] %vm11544_vm1, %v13197_v10  ;;  %v13198_v63 = vpack.c.bf16 %v10457_v59, %v10457_v59  ;;  %v9939_v12 = vmul.f32 %v18142_v2, %v9676_v25  ;;  %v9163_v4 = vadd.f32 %v8731_v61, %v744_v3  ;;  %v14570_v6 = vld [vmem:[%s14921_s14 + $0x17d8] ss:$24 sps:$4 sm:$0xff]   ;;  %v748_v3 = vld [vmem:[#allocation2 + $0x648] sm:$0xff] }
 0x705   : > { %9419 = vst.msk [vmem:[#allocation2 + $0x620] sm:$0xff] %vm290_vm0, %v9162_v49  ;;  %v9677_v15 = vld [vmem:[#allocation2 + $0x618] sm:$0xff]  ;;  %v7678_v33 = vpop.f32.mrb[140].mxu1 }
 0x706   : > { %v8735_v60 = vpop.f32.mrb[140].mxu0  ;;  %11738 = vst.msk [vmem:[%s16578_s15 + $0x304] sm:$0xf] %vm11544_vm1, %v13198_v63  ;;  %v10202_v24 = vadd.f32 %v18149_v19, %v9939_v12  ;;  %v9940_v34 = vmul.f32 %v18142_v2, %v9677_v15  ;;  %v7679_v45 = vadd.f32 %v7678_v33, %v18929_v35  ;;  %v7680_v23 = vpop.f32.mrb[141].mxu1 }
 0x707   : > { %9420 = vst.msk [vmem:[#allocation2 + $0x628] sm:$0xff] %vm290_vm0, %v9163_v4  ;;  %v8737_v44 = vpop.f32.mrb[141].mxu0  ;;  %v7681_v20 = vpop.f32.mrb[142].mxu1  ;;  %v749_v23 = vld [vmem:[#allocation2 + $0x650] sm:$0xff] }
 0x708   : > { %v8738_v7 = vpop.f32.mrb[142].mxu0  ;;  %v10458_v27 = vmax.f32 %v10202_v24, 0.0  ;;  %v10203_v57 = vadd.f32 %v18149_v19, %v9940_v34  ;;  %v8736_v52 = vadd.f32 %v8735_v60, %v7679_v45  ;;  %v7682_v32 = vadd.f32 %v7681_v20, %v18930_v40  ;;  %v7683_v0 = vpop.f32.mrb[143].mxu1  ;;  %v18933_v34 = vld [vmem:[#allocation114_spill] sm:$0xff]  ;;  %v750_v40 = vld [vmem:[#allocation2 + $0x658] sm:$0xff] }
 0x709   : > { %v8740_v17 = vpop.f32.mrb[143].mxu0 }
 0x70a   : > { %v13199_v54 = vpack.c.bf16 %v10458_v27, %v10458_v27  ;;  %v10459_v58 = vmax.f32 %v10203_v57, 0.0  ;;  %v9164_v37 = vadd.f32 %v8736_v52, %v745_v13  ;;  %v8739_v48 = vadd.f32 %v8738_v7, %v7682_v32  ;;  %7893 = vmatmul.mubr.bf16.gmra.mrb[248].mxu1 %v14564_v62 }
 0x70b   : > { %8950 = vmatmul.mubr.bf16.gmra.mrb[248].mxu0 %v14567_v31  ;;  %7900 = vmatprep.mubr.bf16.mxu1 %v14572_v16 }
 0x70c   : > { %v9678_v11 = vld [vmem:[#allocation2 + $0x620] sm:$0xff]  ;;  %8957 = vmatprep.mubr.bf16.mxu0 %v14575_v5  ;;  %11739 = vst.msk [vmem:[%s16578_s15 + $0x308] sm:$0xf] %vm11544_vm1, %v13199_v54  ;;  %v13200_v41 = vpack.c.bf16 %v10459_v58, %v10459_v58  ;;  %v9165_v51 = vadd.f32 %v8739_v48, %v746_v46  ;;  %v18934_v5 = vld [vmem:[#allocation116_spill] sm:$0xff] }
 0x70d   : > { %v9941_v50 = vmul.f32 %v18142_v2, %v9678_v11  ;;  %9421 = vst.msk [vmem:[#allocation2 + $0x630] sm:$0xff] %vm290_vm0, %v9164_v37  ;;  %v7686_v9 = vpop.f32.mrb[144].mxu1 }
 0x70e   : > { %v9679_v47 = vld [vmem:[#allocation2 + $0x628] sm:$0xff]  ;;  %v8743_v56 = vpop.f32.mrb[144].mxu0  ;;  %11740 = vst.msk [vmem:[%s16578_s15 + $0x30c] sm:$0xf] %vm11544_vm1, %v13200_v41  ;;  %v7687_v36 = vadd.f32 %v7686_v9, %v18931_v26  ;;  %v7688_v21 = vpop.f32.mrb[145].mxu1  ;;  %v751_v26 = vld [vmem:[#allocation2 + $0x660] sm:$0xff] }
 0x70f   : > { %v10204_v30 = vadd.f32 %v18149_v19, %v9941_v50  ;;  %v9942_v42 = vmul.f32 %v18142_v2, %v9679_v47  ;;  %9422 = vst.msk [vmem:[#allocation2 + $0x638] sm:$0xff] %vm290_vm0, %v9165_v51  ;;  %v8745_v18 = vpop.f32.mrb[145].mxu0  ;;  %v7689_v29 = vpop.f32.mrb[146].mxu1  ;;  %v18935_v9 = vld [vmem:[#allocation118_spill] sm:$0xff] }
 0x710   : > { %v8746_v38 = vpop.f32.mrb[146].mxu0  ;;  %v8744_v1 = vadd.f32 %v8743_v56, %v7687_v36  ;;  %v7690_v43 = vadd.f32 %v7689_v29, %v18932_v39  ;;  %v7691_v55 = vpop.f32.mrb[147].mxu1 }
 0x711   : > { %v10460_v8 = vmax.f32 %v10204_v30, 0.0  ;;  %v10205_v28 = vadd.f32 %v18149_v19, %v9942_v42  ;;  %v8748_v22 = vpop.f32.mrb[147].mxu0 }
 0x712   : > { %v9166_v49 = vadd.f32 %v8744_v1, %v747_v14  ;;  %v8747_v61 = vadd.f32 %v8746_v38, %v7690_v43  ;;  %7901 = vmatmul.mubr.bf16.gmra.mrb[252].mxu1 %v14570_v6  ;;  %v18936_v14 = vld [vmem:[#allocation120_spill] sm:$0xff] }
 0x713   : > { %v13201_v10 = vpack.c.bf16 %v10460_v8, %v10460_v8  ;;  %v10461_v59 = vmax.f32 %v10205_v28, 0.0  ;;  %8958 = vmatmul.mubr.bf16.gmra.mrb[252].mxu0 %v14573_v53  ;;  %v752_v28 = vld [vmem:[#allocation2 + $0x668] sm:$0xff] }
 0x714   : > { %v9680_v25 = vld [vmem:[#allocation2 + $0x630] sm:$0xff]  ;;  %9423 = vst.msk [vmem:[#allocation2 + $0x640] sm:$0xff] %vm290_vm0, %v9166_v49  ;;  %v9167_v4 = vadd.f32 %v8747_v61, %v748_v3 }
 0x715   : > { %11741 = vst.msk [vmem:[%s16578_s15 + $0x310] sm:$0xf] %vm11544_vm1, %v13201_v10  ;;  %v13202_v63 = vpack.c.bf16 %v10461_v59, %v10461_v59  ;;  %v9943_v12 = vmul.f32 %v18142_v2, %v9680_v25  ;;  %v7694_v33 = vpop.f32.mrb[148].mxu1 }
 0x716   : > { %v9681_v15 = vld [vmem:[#allocation2 + $0x638] sm:$0xff]  ;;  %v8751_v60 = vpop.f32.mrb[148].mxu0  ;;  %9424 = vst.msk [vmem:[#allocation2 + $0x648] sm:$0xff] %vm290_vm0, %v9167_v4  ;;  %v7695_v35 = vadd.f32 %v7694_v33, %v18933_v34  ;;  %v7696_v45 = vpop.f32.mrb[149].mxu1  ;;  %v18937_v4 = vld [vmem:[#allocation122_spill] sm:$0xff] }
 0x717   : > { %11742 = vst.msk [vmem:[%s16578_s15 + $0x314] sm:$0xf] %vm11544_vm1, %v13202_v63  ;;  %v10206_v62 = vadd.f32 %v18149_v19, %v9943_v12  ;;  %v9944_v24 = vmul.f32 %v18142_v2, %v9681_v15  ;;  %v8753_v13 = vpop.f32.mrb[149].mxu0  ;;  %v7697_v44 = vpop.f32.mrb[150].mxu1 }
 0x718   : > { %v8754_v31 = vpop.f32.mrb[150].mxu0  ;;  %v8752_v16 = vadd.f32 %v8751_v60, %v7695_v35  ;;  %v7698_v27 = vadd.f32 %v7697_v44, %v18934_v5  ;;  %v7699_v57 = vpop.f32.mrb[151].mxu1 }
 0x719   : > { %v10462_v20 = vmax.f32 %v10206_v62, 0.0  ;;  %v10207_v7 = vadd.f32 %v18149_v19, %v9944_v24  ;;  %v8756_v52 = vpop.f32.mrb[151].mxu0  ;;  %v753_v62 = vld [vmem:[#allocation2 + $0x670] sm:$0xff] }
 0x71a   : > { %v9168_v17 = vadd.f32 %v8752_v16, %v749_v23  ;;  %v8755_v46 = vadd.f32 %v8754_v31, %v7698_v27  ;;  %v18938_v23 = vld [vmem:[#allocation124_spill] sm:$0xff] }
 0x71b   : > { %v13203_v32 = vpack.c.bf16 %v10462_v20, %v10462_v20  ;;  %v10463_v0 = vmax.f32 %v10207_v7, 0.0  ;;  %v9682_v54 = vld [vmem:[#allocation2 + $0x640] sm:$0xff]  ;;  %v754_v7 = vld [vmem:[#allocation2 + $0x678] sm:$0xff] }
 0x71c   : > { %v9945_v37 = vmul.f32 %v18142_v2, %v9682_v54  ;;  %9425 = vst.msk [vmem:[#allocation2 + $0x650] sm:$0xff] %vm290_vm0, %v9168_v17  ;;  %v9169_v48 = vadd.f32 %v8755_v46, %v750_v40 }
 0x71d   : > { %11743 = vst.msk [vmem:[%s16578_s15 + $0x318] sm:$0xf] %vm11544_vm1, %v13203_v32  ;;  %v13204_v58 = vpack.c.bf16 %v10463_v0, %v10463_v0  ;;  %v9683_v11 = vld [vmem:[#allocation2 + $0x648] sm:$0xff]  ;;  %v7702_v41 = vpop.f32.mrb[152].mxu1 }
 0x71e   : > { %v8759_v50 = vpop.f32.mrb[152].mxu0  ;;  %v10208_v51 = vadd.f32 %v18149_v19, %v9945_v37  ;;  %v9946_v47 = vmul.f32 %v18142_v2, %v9683_v11  ;;  %9426 = vst.msk [vmem:[#allocation2 + $0x658] sm:$0xff] %vm290_vm0, %v9169_v48  ;;  %v7703_v56 = vadd.f32 %v7702_v41, %v18935_v9  ;;  %v7704_v30 = vpop.f32.mrb[153].mxu1  ;;  %v18939_v48 = vld [vmem:[#allocation126_spill] sm:$0xff] }
 0x71f   : > { %11744 = vst.msk [vmem:[%s16578_s15 + $0x31c] sm:$0xf] %vm11544_vm1, %v13204_v58  ;;  %v8761_v42 = vpop.f32.mrb[153].mxu0  ;;  %v7705_v36 = vpop.f32.mrb[154].mxu1 }
 0x720   : > { %v8762_v21 = vpop.f32.mrb[154].mxu0  ;;  %v10464_v18 = vmax.f32 %v10208_v51, 0.0  ;;  %v10209_v6 = vadd.f32 %v18149_v19, %v9946_v47  ;;  %v8760_v53 = vadd.f32 %v8759_v50, %v7703_v56  ;;  %v7706_v29 = vadd.f32 %v7705_v36, %v18936_v14  ;;  %v7707_v38 = vpop.f32.mrb[155].mxu1  ;;  %v755_v51 = vld [vmem:[#allocation2 + $0x680] sm:$0xff] }
 0x721   : > { %v8764_v8 = vpop.f32.mrb[155].mxu0 }
 0x722   : > { %v13205_v1 = vpack.c.bf16 %v10464_v18, %v10464_v18  ;;  %v10465_v39 = vmax.f32 %v10209_v6, 0.0  ;;  %v9170_v43 = vadd.f32 %v8760_v53, %v751_v26  ;;  %v8763_v55 = vadd.f32 %v8762_v21, %v7706_v29  ;;  %v18940_v26 = vld [vmem:[#allocation128_spill] sm:$0xff]  ;;  %v756_v6 = vld [vmem:[#allocation2 + $0x688] sm:$0xff] }
 0x723   : > { %v9684_v22 = vld [vmem:[#allocation2 + $0x650] sm:$0xff] }
 0x724   : > { %11745 = vst.msk [vmem:[%s16578_s15 + $0x320] sm:$0xf] %vm11544_vm1, %v13205_v1  ;;  %v13206_v3 = vpack.c.bf16 %v10465_v39, %v10465_v39  ;;  %v9947_v10 = vmul.f32 %v18142_v2, %v9684_v22  ;;  %v9171_v59 = vadd.f32 %v8763_v55, %v752_v28 }
 0x725   : > { %9427 = vst.msk [vmem:[#allocation2 + $0x660] sm:$0xff] %vm290_vm0, %v9170_v43  ;;  %v9685_v49 = vld [vmem:[#allocation2 + $0x658] sm:$0xff]  ;;  %v7710_v61 = vpop.f32.mrb[156].mxu1 }
 0x726   : > { %v8767_v25 = vpop.f32.mrb[156].mxu0  ;;  %11746 = vst.msk [vmem:[%s16578_s15 + $0x324] sm:$0xf] %vm11544_vm1, %v13206_v3  ;;  %v10210_v63 = vadd.f32 %v18149_v19, %v9947_v10  ;;  %v9948_v12 = vmul.f32 %v18142_v2, %v9685_v49  ;;  %v7711_v15 = vadd.f32 %v7710_v61, %v18937_v4  ;;  %v7712_v33 = vpop.f32.mrb[157].mxu1 }
 0x727   : > { %9428 = vst.msk [vmem:[#allocation2 + $0x668] sm:$0xff] %vm290_vm0, %v9171_v59  ;;  %v8769_v60 = vpop.f32.mrb[157].mxu0  ;;  %v7713_v24 = vpop.f32.mrb[158].mxu1  ;;  %v18941_v59 = vld [vmem:[#allocation130_spill] sm:$0xff] }
 0x728   : > { %v8770_v34 = vpop.f32.mrb[158].mxu0  ;;  %v10466_v35 = vmax.f32 %v10210_v63, 0.0  ;;  %v10211_v45 = vadd.f32 %v18149_v19, %v9948_v12  ;;  %v8768_v13 = vadd.f32 %v8767_v25, %v7711_v15  ;;  %v7714_v44 = vadd.f32 %v7713_v24, %v18938_v23  ;;  %v7715_v31 = vpop.f32.mrb[159].mxu1  ;;  %v757_v63 = vld [vmem:[#allocation2 + $0x690] sm:$0xff] }
 0x729   : > { %v8772_v20 = vpop.f32.mrb[159].mxu0 }
 0x72a   : > { %v13207_v16 = vpack.c.bf16 %v10466_v35, %v10466_v35  ;;  %v10467_v5 = vmax.f32 %v10211_v45, 0.0  ;;  %v9172_v27 = vadd.f32 %v8768_v13, %v753_v62  ;;  %v8771_v57 = vadd.f32 %v8770_v34, %v7714_v44  ;;  %v18942_v62 = vld [vmem:[#allocation132_spill] sm:$0xff] }
 0x72b   : > { %v758_v45 = vld [vmem:[#allocation2 + $0x698] sm:$0xff] }
 0x72c   : > { %v9686_v52 = vld [vmem:[#allocation2 + $0x660] sm:$0xff]  ;;  %11747 = vst.msk [vmem:[%s16578_s15 + $0x328] sm:$0xf] %vm11544_vm1, %v13207_v16  ;;  %v13208_v40 = vpack.c.bf16 %v10467_v5, %v10467_v5  ;;  %v9173_v0 = vadd.f32 %v8771_v57, %v754_v7 }
 0x72d   : > { %v9949_v32 = vmul.f32 %v18142_v2, %v9686_v52  ;;  %9429 = vst.msk [vmem:[#allocation2 + $0x670] sm:$0xff] %vm290_vm0, %v9172_v27  ;;  %v7718_v46 = vpop.f32.mrb[160].mxu1 }
 0x72e   : > { %v9687_v17 = vld [vmem:[#allocation2 + $0x668] sm:$0xff]  ;;  %v8775_v54 = vpop.f32.mrb[160].mxu0  ;;  %11748 = vst.msk [vmem:[%s16578_s15 + $0x32c] sm:$0xf] %vm11544_vm1, %v13208_v40  ;;  %v7719_v11 = vadd.f32 %v7718_v46, %v18939_v48  ;;  %v7720_v41 = vpop.f32.mrb[161].mxu1 }
 0x72f   : > { %v10212_v58 = vadd.f32 %v18149_v19, %v9949_v32  ;;  %v9950_v37 = vmul.f32 %v18142_v2, %v9687_v17  ;;  %9430 = vst.msk [vmem:[#allocation2 + $0x678] sm:$0xff] %vm290_vm0, %v9173_v0  ;;  %v8777_v50 = vpop.f32.mrb[161].mxu0  ;;  %v7721_v47 = vpop.f32.mrb[162].mxu1  ;;  %v18943_v0 = vld [vmem:[#allocation134_spill] sm:$0xff] }
 0x730   : > { %v8778_v9 = vpop.f32.mrb[162].mxu0  ;;  %v8776_v42 = vadd.f32 %v8775_v54, %v7719_v11  ;;  %v7722_v36 = vadd.f32 %v7721_v47, %v18940_v26  ;;  %v7723_v21 = vpop.f32.mrb[163].mxu1 }
 0x731   : > { %v10468_v56 = vmax.f32 %v10212_v58, 0.0  ;;  %v10213_v30 = vadd.f32 %v18149_v19, %v9950_v37  ;;  %v8780_v18 = vpop.f32.mrb[163].mxu0  ;;  %v759_v58 = vld [vmem:[#allocation2 + $0x6a0] sm:$0xff] }
 0x732   : > { %v9174_v29 = vadd.f32 %v8776_v42, %v755_v51  ;;  %v8779_v38 = vadd.f32 %v8778_v9, %v7722_v36  ;;  %v18944_v51 = vld [vmem:[#allocation136_spill] sm:$0xff] }
 0x733   : > { %v13209_v53 = vpack.c.bf16 %v10468_v56, %v10468_v56  ;;  %v10469_v14 = vmax.f32 %v10213_v30, 0.0  ;;  %v760_v30 = vld [vmem:[#allocation2 + $0x6a8] sm:$0xff] }
 0x734   : > { %v9688_v8 = vld [vmem:[#allocation2 + $0x670] sm:$0xff]  ;;  %9431 = vst.msk [vmem:[#allocation2 + $0x680] sm:$0xff] %vm290_vm0, %v9174_v29  ;;  %v9175_v39 = vadd.f32 %v8779_v38, %v756_v6 }
 0x735   : > { %11749 = vst.msk [vmem:[%s16578_s15 + $0x330] sm:$0xf] %vm11544_vm1, %v13209_v53  ;;  %v13210_v28 = vpack.c.bf16 %v10469_v14, %v10469_v14  ;;  %v9951_v1 = vmul.f32 %v18142_v2, %v9688_v8  ;;  %v7726_v55 = vpop.f32.mrb[164].mxu1 }
 0x736   : > { %v9689_v43 = vld [vmem:[#allocation2 + $0x678] sm:$0xff]  ;;  %v8783_v22 = vpop.f32.mrb[164].mxu0  ;;  %9432 = vst.msk [vmem:[#allocation2 + $0x688] sm:$0xff] %vm290_vm0, %v9175_v39  ;;  %v7727_v49 = vadd.f32 %v7726_v55, %v18941_v59  ;;  %v7728_v61 = vpop.f32.mrb[165].mxu1  ;;  %v18945_v39 = vld [vmem:[#allocation138_spill] sm:$0xff] }
 0x737   : > { %11750 = vst.msk [vmem:[%s16578_s15 + $0x334] sm:$0xf] %vm11544_vm1, %v13210_v28  ;;  %v10214_v3 = vadd.f32 %v18149_v19, %v9951_v1  ;;  %v9952_v10 = vmul.f32 %v18142_v2, %v9689_v43  ;;  %v8785_v25 = vpop.f32.mrb[165].mxu0  ;;  %v7729_v12 = vpop.f32.mrb[166].mxu1 }
 0x738   : > { %v8786_v4 = vpop.f32.mrb[166].mxu0  ;;  %v8784_v60 = vadd.f32 %v8783_v22, %v7727_v49  ;;  %v7730_v24 = vadd.f32 %v7729_v12, %v18942_v62  ;;  %v7731_v34 = vpop.f32.mrb[167].mxu1 }
 0x739   : > { %v10470_v15 = vmax.f32 %v10214_v3, 0.0  ;;  %v10215_v33 = vadd.f32 %v18149_v19, %v9952_v10  ;;  %v8788_v35 = vpop.f32.mrb[167].mxu0  ;;  %v761_v3 = vld [vmem:[#allocation2 + $0x6b0] sm:$0xff] }
 0x73a   : > { %v9176_v44 = vadd.f32 %v8784_v60, %v757_v63  ;;  %v8787_v31 = vadd.f32 %v8786_v4, %v7730_v24  ;;  %v18946_v63 = vld [vmem:[#allocation140_spill] sm:$0xff] }
 0x73b   : > { %v13211_v13 = vpack.c.bf16 %v10470_v15, %v10470_v15  ;;  %v10471_v23 = vmax.f32 %v10215_v33, 0.0  ;;  %v9690_v20 = vld [vmem:[#allocation2 + $0x680] sm:$0xff]  ;;  %v762_v33 = vld [vmem:[#allocation2 + $0x6b8] sm:$0xff] }
 0x73c   : > { %v9953_v16 = vmul.f32 %v18142_v2, %v9690_v20  ;;  %9433 = vst.msk [vmem:[#allocation2 + $0x690] sm:$0xff] %vm290_vm0, %v9176_v44  ;;  %v9177_v5 = vadd.f32 %v8787_v31, %v758_v45 }
 0x73d   : > { %11751 = vst.msk [vmem:[%s16578_s15 + $0x338] sm:$0xf] %vm11544_vm1, %v13211_v13  ;;  %v13212_v7 = vpack.c.bf16 %v10471_v23, %v10471_v23  ;;  %v9691_v27 = vld [vmem:[#allocation2 + $0x688] sm:$0xff]  ;;  %v7734_v57 = vpop.f32.mrb[168].mxu1 }
 0x73e   : > { %v8791_v52 = vpop.f32.mrb[168].mxu0  ;;  %v10216_v40 = vadd.f32 %v18149_v19, %v9953_v16  ;;  %v9954_v32 = vmul.f32 %v18142_v2, %v9691_v27  ;;  %9434 = vst.msk [vmem:[#allocation2 + $0x698] sm:$0xff] %vm290_vm0, %v9177_v5  ;;  %v7735_v17 = vadd.f32 %v7734_v57, %v18943_v0  ;;  %v7736_v46 = vpop.f32.mrb[169].mxu1  ;;  %v18947_v5 = vld [vmem:[#allocation142_spill] sm:$0xff] }
 0x73f   : > { %11752 = vst.msk [vmem:[%s16578_s15 + $0x33c] sm:$0xf] %vm11544_vm1, %v13212_v7  ;;  %v8793_v54 = vpop.f32.mrb[169].mxu0  ;;  %v7737_v37 = vpop.f32.mrb[170].mxu1 }
 0x740   : > { %v8794_v48 = vpop.f32.mrb[170].mxu0  ;;  %v10472_v11 = vmax.f32 %v10216_v40, 0.0  ;;  %v10217_v41 = vadd.f32 %v18149_v19, %v9954_v32  ;;  %v8792_v50 = vadd.f32 %v8791_v52, %v7735_v17  ;;  %v7738_v47 = vadd.f32 %v7737_v37, %v18944_v51  ;;  %v7739_v9 = vpop.f32.mrb[171].mxu1  ;;  %v763_v40 = vld [vmem:[#allocation2 + $0x6c0] sm:$0xff] }
 0x741   : > { %v8796_v56 = vpop.f32.mrb[171].mxu0 }
 0x742   : > { %v13213_v42 = vpack.c.bf16 %v10472_v11, %v10472_v11  ;;  %v10473_v26 = vmax.f32 %v10217_v41, 0.0  ;;  %v9178_v36 = vadd.f32 %v8792_v50, %v759_v58  ;;  %v8795_v21 = vadd.f32 %v8794_v48, %v7738_v47  ;;  %v18948_v58 = vld [vmem:[#allocation144_spill] sm:$0xff]  ;;  %v764_v41 = vld [vmem:[#allocation2 + $0x6c8] sm:$0xff] }
 0x743   : > { %v9692_v18 = vld [vmem:[#allocation2 + $0x690] sm:$0xff] }
 0x744   : > { %11753 = vst.msk [vmem:[%s16578_s15 + $0x340] sm:$0xf] %vm11544_vm1, %v13213_v42  ;;  %v13214_v6 = vpack.c.bf16 %v10473_v26, %v10473_v26  ;;  %v9955_v53 = vmul.f32 %v18142_v2, %v9692_v18  ;;  %v9179_v14 = vadd.f32 %v8795_v21, %v760_v30 }
 0x745   : > { %9435 = vst.msk [vmem:[#allocation2 + $0x6a0] sm:$0xff] %vm290_vm0, %v9178_v36  ;;  %v9693_v29 = vld [vmem:[#allocation2 + $0x698] sm:$0xff]  ;;  %v7742_v38 = vpop.f32.mrb[172].mxu1 }
 0x746   : > { %v8799_v8 = vpop.f32.mrb[172].mxu0  ;;  %11754 = vst.msk [vmem:[%s16578_s15 + $0x344] sm:$0xf] %vm11544_vm1, %v13214_v6  ;;  %v10218_v28 = vadd.f32 %v18149_v19, %v9955_v53  ;;  %v9956_v1 = vmul.f32 %v18142_v2, %v9693_v29  ;;  %v7743_v43 = vadd.f32 %v7742_v38, %v18945_v39  ;;  %v7744_v55 = vpop.f32.mrb[173].mxu1 }
 0x747   : > { %9436 = vst.msk [vmem:[#allocation2 + $0x6a8] sm:$0xff] %vm290_vm0, %v9179_v14  ;;  %v8801_v22 = vpop.f32.mrb[173].mxu0  ;;  %v7745_v10 = vpop.f32.mrb[174].mxu1  ;;  %v18949_v14 = vld [vmem:[#allocation146_spill] sm:$0xff] }
 0x748   : > { %v8802_v59 = vpop.f32.mrb[174].mxu0  ;;  %v10474_v49 = vmax.f32 %v10218_v28, 0.0  ;;  %v10219_v61 = vadd.f32 %v18149_v19, %v9956_v1  ;;  %v8800_v25 = vadd.f32 %v8799_v8, %v7743_v43  ;;  %v7746_v12 = vadd.f32 %v7745_v10, %v18946_v63  ;;  %v7747_v4 = vpop.f32.mrb[175].mxu1  ;;  %v765_v28 = vld [vmem:[#allocation2 + $0x6d0] sm:$0xff] }
 0x749   : > { %v8804_v15 = vpop.f32.mrb[175].mxu0 }
 0x74a   : > { %v13215_v60 = vpack.c.bf16 %v10474_v49, %v10474_v49  ;;  %v10475_v62 = vmax.f32 %v10219_v61, 0.0  ;;  %v9180_v24 = vadd.f32 %v8800_v25, %v761_v3  ;;  %v8803_v34 = vadd.f32 %v8802_v59, %v7746_v12  ;;  %v18950_v3 = vld [vmem:[#allocation148_spill] sm:$0xff] }
 0x74b   : > { %v766_v61 = vld [vmem:[#allocation2 + $0x6d8] sm:$0xff] }
 0x74c   : > { %v9694_v35 = vld [vmem:[#allocation2 + $0x6a0] sm:$0xff]  ;;  %11755 = vst.msk [vmem:[%s16578_s15 + $0x348] sm:$0xf] %vm11544_vm1, %v13215_v60  ;;  %v13216_v45 = vpack.c.bf16 %v10475_v62, %v10475_v62  ;;  %v9181_v23 = vadd.f32 %v8803_v34, %v762_v33 }
 0x74d   : > { %v9957_v13 = vmul.f32 %v18142_v2, %v9694_v35  ;;  %9437 = vst.msk [vmem:[#allocation2 + $0x6b0] sm:$0xff] %vm290_vm0, %v9180_v24  ;;  %v7750_v31 = vpop.f32.mrb[176].mxu1 }
 0x74e   : > { %v9695_v44 = vld [vmem:[#allocation2 + $0x6a8] sm:$0xff]  ;;  %v8807_v20 = vpop.f32.mrb[176].mxu0  ;;  %11756 = vst.msk [vmem:[%s16578_s15 + $0x34c] sm:$0xf] %vm11544_vm1, %v13216_v45  ;;  %v7751_v27 = vadd.f32 %v7750_v31, %v18947_v5  ;;  %v7752_v57 = vpop.f32.mrb[177].mxu1 }
 0x74f   : > { %v10220_v7 = vadd.f32 %v18149_v19, %v9957_v13  ;;  %v9958_v16 = vmul.f32 %v18142_v2, %v9695_v44  ;;  %9438 = vst.msk [vmem:[#allocation2 + $0x6b8] sm:$0xff] %vm290_vm0, %v9181_v23  ;;  %v8809_v52 = vpop.f32.mrb[177].mxu0  ;;  %v7753_v32 = vpop.f32.mrb[178].mxu1  ;;  %v18951_v23 = vld [vmem:[#allocation150_spill] sm:$0xff] }
 0x750   : > { %v8810_v0 = vpop.f32.mrb[178].mxu0  ;;  %v8808_v54 = vadd.f32 %v8807_v20, %v7751_v27  ;;  %v7754_v37 = vadd.f32 %v7753_v32, %v18948_v58  ;;  %v7755_v48 = vpop.f32.mrb[179].mxu1 }
 0x751   : > { %v10476_v17 = vmax.f32 %v10220_v7, 0.0  ;;  %v10221_v46 = vadd.f32 %v18149_v19, %v9958_v16  ;;  %v8812_v11 = vpop.f32.mrb[179].mxu0  ;;  %v767_v7 = vld [vmem:[#allocation2 + $0x6e0] sm:$0xff] }
 0x752   : > { %v9182_v47 = vadd.f32 %v8808_v54, %v763_v40  ;;  %v8811_v9 = vadd.f32 %v8810_v0, %v7754_v37  ;;  %v18952_v40 = vld [vmem:[#allocation152_spill] sm:$0xff] }
 0x753   : > { %v13217_v50 = vpack.c.bf16 %v10476_v17, %v10476_v17  ;;  %v10477_v51 = vmax.f32 %v10221_v46, 0.0  ;;  %v768_v46 = vld [vmem:[#allocation2 + $0x6e8] sm:$0xff] }
 0x754   : > { %v9696_v56 = vld [vmem:[#allocation2 + $0x6b0] sm:$0xff]  ;;  %9439 = vst.msk [vmem:[#allocation2 + $0x6c0] sm:$0xff] %vm290_vm0, %v9182_v47  ;;  %v9183_v26 = vadd.f32 %v8811_v9, %v764_v41 }
 0x755   : > { %11757 = vst.msk [vmem:[%s16578_s15 + $0x350] sm:$0xf] %vm11544_vm1, %v13217_v50  ;;  %v13218_v30 = vpack.c.bf16 %v10477_v51, %v10477_v51  ;;  %v9959_v42 = vmul.f32 %v18142_v2, %v9696_v56  ;;  %v7758_v21 = vpop.f32.mrb[180].mxu1 }
 0x756   : > { %v9697_v36 = vld [vmem:[#allocation2 + $0x6b8] sm:$0xff]  ;;  %v8815_v18 = vpop.f32.mrb[180].mxu0  ;;  %9440 = vst.msk [vmem:[#allocation2 + $0x6c8] sm:$0xff] %vm290_vm0, %v9183_v26  ;;  %v7759_v29 = vadd.f32 %v7758_v21, %v18949_v14  ;;  %v7760_v38 = vpop.f32.mrb[181].mxu1  ;;  %v18953_v26 = vld [vmem:[#allocation154_spill] sm:$0xff] }
 0x757   : > { %11758 = vst.msk [vmem:[%s16578_s15 + $0x354] sm:$0xf] %vm11544_vm1, %v13218_v30  ;;  %v10222_v6 = vadd.f32 %v18149_v19, %v9959_v42  ;;  %v9960_v53 = vmul.f32 %v18142_v2, %v9697_v36  ;;  %v8817_v8 = vpop.f32.mrb[181].mxu0  ;;  %v7761_v1 = vpop.f32.mrb[182].mxu1 }
 0x758   : > { %v8818_v39 = vpop.f32.mrb[182].mxu0  ;;  %v8816_v22 = vadd.f32 %v8815_v18, %v7759_v29  ;;  %v7762_v10 = vadd.f32 %v7761_v1, %v18950_v3  ;;  %v7763_v59 = vpop.f32.mrb[183].mxu1 }
 0x759   : > { %v10478_v43 = vmax.f32 %v10222_v6, 0.0  ;;  %v10223_v55 = vadd.f32 %v18149_v19, %v9960_v53  ;;  %v8820_v49 = vpop.f32.mrb[183].mxu0  ;;  %v769_v6 = vld [vmem:[#allocation2 + $0x6f0] sm:$0xff] }
 0x75a   : > { %v9184_v12 = vadd.f32 %v8816_v22, %v765_v28  ;;  %v8819_v4 = vadd.f32 %v8818_v39, %v7762_v10  ;;  %v18954_v28 = vld [vmem:[#allocation156_spill] sm:$0xff] }
 0x75b   : > { %v13219_v25 = vpack.c.bf16 %v10478_v43, %v10478_v43  ;;  %v10479_v63 = vmax.f32 %v10223_v55, 0.0  ;;  %v9698_v15 = vld [vmem:[#allocation2 + $0x6c0] sm:$0xff]  ;;  %v770_v55 = vld [vmem:[#allocation2 + $0x6f8] sm:$0xff] }
 0x75c   : > { %v9961_v60 = vmul.f32 %v18142_v2, %v9698_v15  ;;  %9441 = vst.msk [vmem:[#allocation2 + $0x6d0] sm:$0xff] %vm290_vm0, %v9184_v12  ;;  %v9185_v62 = vadd.f32 %v8819_v4, %v766_v61 }
 0x75d   : > { %11759 = vst.msk [vmem:[%s16578_s15 + $0x358] sm:$0xf] %vm11544_vm1, %v13219_v25  ;;  %v13220_v33 = vpack.c.bf16 %v10479_v63, %v10479_v63  ;;  %v9699_v24 = vld [vmem:[#allocation2 + $0x6c8] sm:$0xff]  ;;  %v7766_v34 = vpop.f32.mrb[184].mxu1 }
 0x75e   : > { %v8823_v35 = vpop.f32.mrb[184].mxu0  ;;  %v10224_v45 = vadd.f32 %v18149_v19, %v9961_v60  ;;  %v9962_v13 = vmul.f32 %v18142_v2, %v9699_v24  ;;  %9442 = vst.msk [vmem:[#allocation2 + $0x6d8] sm:$0xff] %vm290_vm0, %v9185_v62  ;;  %v7767_v44 = vadd.f32 %v7766_v34, %v18951_v23  ;;  %v7768_v31 = vpop.f32.mrb[185].mxu1  ;;  %v18955_v62 = vld [vmem:[#allocation158_spill] sm:$0xff] }
 0x75f   : > { %11760 = vst.msk [vmem:[%s16578_s15 + $0x35c] sm:$0xf] %vm11544_vm1, %v13220_v33  ;;  %v8825_v20 = vpop.f32.mrb[185].mxu0  ;;  %v7769_v16 = vpop.f32.mrb[186].mxu1 }
 0x760   : > { %v8826_v5 = vpop.f32.mrb[186].mxu0  ;;  %v10480_v27 = vmax.f32 %v10224_v45, 0.0  ;;  %v10225_v57 = vadd.f32 %v18149_v19, %v9962_v13  ;;  %v8824_v52 = vadd.f32 %v8823_v35, %v7767_v44  ;;  %v7770_v32 = vadd.f32 %v7769_v16, %v18952_v40  ;;  %v7771_v0 = vpop.f32.mrb[187].mxu1  ;;  %v771_v45 = vld [vmem:[#allocation2 + $0x700] sm:$0xff] }
 0x761   : > { %v8828_v17 = vpop.f32.mrb[187].mxu0 }
 0x762   : > { %v13221_v54 = vpack.c.bf16 %v10480_v27, %v10480_v27  ;;  %v10481_v58 = vmax.f32 %v10225_v57, 0.0  ;;  %v9186_v37 = vadd.f32 %v8824_v52, %v767_v7  ;;  %v8827_v48 = vadd.f32 %v8826_v5, %v7770_v32  ;;  %v18956_v7 = vld [vmem:[#allocation160_spill] sm:$0xff]  ;;  %v772_v57 = vld [vmem:[#allocation2 + $0x708] sm:$0xff] }
 0x763   : > { %v9700_v11 = vld [vmem:[#allocation2 + $0x6d0] sm:$0xff] }
 0x764   : > { %11761 = vst.msk [vmem:[%s16578_s15 + $0x360] sm:$0xf] %vm11544_vm1, %v13221_v54  ;;  %v13222_v41 = vpack.c.bf16 %v10481_v58, %v10481_v58  ;;  %v9963_v50 = vmul.f32 %v18142_v2, %v9700_v11  ;;  %v9187_v51 = vadd.f32 %v8827_v48, %v768_v46 }
 0x765   : > { %9443 = vst.msk [vmem:[#allocation2 + $0x6e0] sm:$0xff] %vm290_vm0, %v9186_v37  ;;  %v9701_v47 = vld [vmem:[#allocation2 + $0x6d8] sm:$0xff]  ;;  %v7774_v9 = vpop.f32.mrb[188].mxu1 }
 0x766   : > { %v8831_v56 = vpop.f32.mrb[188].mxu0  ;;  %11762 = vst.msk [vmem:[%s16578_s15 + $0x364] sm:$0xf] %vm11544_vm1, %v13222_v41  ;;  %v10226_v30 = vadd.f32 %v18149_v19, %v9963_v50  ;;  %v9964_v42 = vmul.f32 %v18142_v2, %v9701_v47  ;;  %v7775_v36 = vadd.f32 %v7774_v9, %v18953_v26  ;;  %v7776_v21 = vpop.f32.mrb[189].mxu1 }
 0x767   : > { %9444 = vst.msk [vmem:[#allocation2 + $0x6e8] sm:$0xff] %vm290_vm0, %v9187_v51  ;;  %v8833_v18 = vpop.f32.mrb[189].mxu0  ;;  %v7777_v53 = vpop.f32.mrb[190].mxu1  ;;  %v18957_v51 = vld [vmem:[#allocation162_spill] sm:$0xff] }
 0x768   : > { %v8834_v14 = vpop.f32.mrb[190].mxu0  ;;  %v10482_v29 = vmax.f32 %v10226_v30, 0.0  ;;  %v10227_v38 = vadd.f32 %v18149_v19, %v9964_v42  ;;  %v8832_v8 = vadd.f32 %v8831_v56, %v7775_v36  ;;  %v7778_v1 = vadd.f32 %v7777_v53, %v18954_v28  ;;  %v7779_v39 = vpop.f32.mrb[191].mxu1  ;;  %v773_v30 = vld [vmem:[#allocation2 + $0x710] sm:$0xff] }
 0x769   : > { %v8836_v43 = vpop.f32.mrb[191].mxu0 }
 0x76a   : > { %v13223_v22 = vpack.c.bf16 %v10482_v29, %v10482_v29  ;;  %v10483_v3 = vmax.f32 %v10227_v38, 0.0  ;;  %v9188_v10 = vadd.f32 %v8832_v8, %v769_v6  ;;  %v8835_v59 = vadd.f32 %v8834_v14, %v7778_v1  ;;  %v18958_v6 = vld [vmem:[#allocation164_spill] sm:$0xff] }
 0x76b   : > { %v774_v38 = vld [vmem:[#allocation2 + $0x718] sm:$0xff] }
 0x76c   : > { %v9702_v49 = vld [vmem:[#allocation2 + $0x6e0] sm:$0xff]  ;;  %11763 = vst.msk [vmem:[%s16578_s15 + $0x368] sm:$0xf] %vm11544_vm1, %v13223_v22  ;;  %v13224_v61 = vpack.c.bf16 %v10483_v3, %v10483_v3  ;;  %v9189_v63 = vadd.f32 %v8835_v59, %v770_v55 }
 0x76d   : > { %v9965_v25 = vmul.f32 %v18142_v2, %v9702_v49  ;;  %9445 = vst.msk [vmem:[#allocation2 + $0x6f0] sm:$0xff] %vm290_vm0, %v9188_v10  ;;  %v7782_v4 = vpop.f32.mrb[192].mxu1 }
 0x76e   : > { %v9703_v12 = vld [vmem:[#allocation2 + $0x6e8] sm:$0xff]  ;;  %v8839_v15 = vpop.f32.mrb[192].mxu0  ;;  %11764 = vst.msk [vmem:[%s16578_s15 + $0x36c] sm:$0xf] %vm11544_vm1, %v13224_v61  ;;  %v7783_v24 = vadd.f32 %v7782_v4, %v18955_v62  ;;  %v7784_v34 = vpop.f32.mrb[193].mxu1 }
 0x76f   : > { %v10228_v33 = vadd.f32 %v18149_v19, %v9965_v25  ;;  %v9966_v60 = vmul.f32 %v18142_v2, %v9703_v12  ;;  %9446 = vst.msk [vmem:[#allocation2 + $0x6f8] sm:$0xff] %vm290_vm0, %v9189_v63  ;;  %v8841_v35 = vpop.f32.mrb[193].mxu0  ;;  %v7785_v13 = vpop.f32.mrb[194].mxu1  ;;  %v18959_v63 = vld [vmem:[#allocation166_spill] sm:$0xff] }
 0x770   : > { %v8842_v23 = vpop.f32.mrb[194].mxu0  ;;  %v8840_v20 = vadd.f32 %v8839_v15, %v7783_v24  ;;  %v7786_v16 = vadd.f32 %v7785_v13, %v18956_v7  ;;  %v7787_v5 = vpop.f32.mrb[195].mxu1 }
 0x771   : > { %v10484_v44 = vmax.f32 %v10228_v33, 0.0  ;;  %v10229_v31 = vadd.f32 %v18149_v19, %v9966_v60  ;;  %v8844_v27 = vpop.f32.mrb[195].mxu0  ;;  %v775_v33 = vld [vmem:[#allocation2 + $0x720] sm:$0xff] }
 0x772   : > { %v9190_v32 = vadd.f32 %v8840_v20, %v771_v45  ;;  %v8843_v0 = vadd.f32 %v8842_v23, %v7786_v16  ;;  %v18960_v45 = vld [vmem:[#allocation168_spill] sm:$0xff] }
 0x773   : > { %v13225_v52 = vpack.c.bf16 %v10484_v44, %v10484_v44  ;;  %v10485_v40 = vmax.f32 %v10229_v31, 0.0  ;;  %v776_v31 = vld [vmem:[#allocation2 + $0x728] sm:$0xff] }
 0x774   : > { %v9704_v17 = vld [vmem:[#allocation2 + $0x6f0] sm:$0xff]  ;;  %9447 = vst.msk [vmem:[#allocation2 + $0x700] sm:$0xff] %vm290_vm0, %v9190_v32  ;;  %v9191_v58 = vadd.f32 %v8843_v0, %v772_v57 }
 0x775   : > { %11765 = vst.msk [vmem:[%s16578_s15 + $0x370] sm:$0xf] %vm11544_vm1, %v13225_v52  ;;  %v13226_v46 = vpack.c.bf16 %v10485_v40, %v10485_v40  ;;  %v9967_v54 = vmul.f32 %v18142_v2, %v9704_v17  ;;  %v7790_v48 = vpop.f32.mrb[196].mxu1 }
 0x776   : > { %v9705_v37 = vld [vmem:[#allocation2 + $0x6f8] sm:$0xff]  ;;  %v8847_v11 = vpop.f32.mrb[196].mxu0  ;;  %9448 = vst.msk [vmem:[#allocation2 + $0x708] sm:$0xff] %vm290_vm0, %v9191_v58  ;;  %v7791_v47 = vadd.f32 %v7790_v48, %v18957_v51  ;;  %v7792_v9 = vpop.f32.mrb[197].mxu1  ;;  %v18961_v58 = vld [vmem:[#allocation170_spill] sm:$0xff] }
 0x777   : > { %11766 = vst.msk [vmem:[%s16578_s15 + $0x374] sm:$0xf] %vm11544_vm1, %v13226_v46  ;;  %v10230_v41 = vadd.f32 %v18149_v19, %v9967_v54  ;;  %v9968_v50 = vmul.f32 %v18142_v2, %v9705_v37  ;;  %v8849_v56 = vpop.f32.mrb[197].mxu0  ;;  %v7793_v42 = vpop.f32.mrb[198].mxu1 }
 0x778   : > { %v8850_v26 = vpop.f32.mrb[198].mxu0  ;;  %v8848_v18 = vadd.f32 %v8847_v11, %v7791_v47  ;;  %v7794_v53 = vadd.f32 %v7793_v42, %v18958_v6  ;;  %v7795_v14 = vpop.f32.mrb[199].mxu1 }
 0x779   : > { %v10486_v36 = vmax.f32 %v10230_v41, 0.0  ;;  %v10231_v21 = vadd.f32 %v18149_v19, %v9968_v50  ;;  %v8852_v29 = vpop.f32.mrb[199].mxu0  ;;  %v777_v41 = vld [vmem:[#allocation2 + $0x730] sm:$0xff] }
 0x77a   : > { %v9192_v1 = vadd.f32 %v8848_v18, %v773_v30  ;;  %v8851_v39 = vadd.f32 %v8850_v26, %v7794_v53  ;;  %v18962_v30 = vld [vmem:[#allocation172_spill] sm:$0xff] }
 0x77b   : > { %v13227_v8 = vpack.c.bf16 %v10486_v36, %v10486_v36  ;;  %v10487_v28 = vmax.f32 %v10231_v21, 0.0  ;;  %v9706_v43 = vld [vmem:[#allocation2 + $0x700] sm:$0xff] }
 0x77c   : > { %v9969_v22 = vmul.f32 %v18142_v2, %v9706_v43  ;;  %9449 = vst.msk [vmem:[#allocation2 + $0x710] sm:$0xff] %vm290_vm0, %v9192_v1  ;;  %v9193_v3 = vadd.f32 %v8851_v39, %v774_v38  ;;  %v18356_v38 = vld [vmem:[#allocation5] ss:$0 sm:$0xff]  ;;  %v18362_v43 = vld [vmem:[#allocation7] ss:$0 sm:$0xff] }
 0x77d   : > { %11767 = vst.msk [vmem:[%s16578_s15 + $0x378] sm:$0xf] %vm11544_vm1, %v13227_v8  ;;  %v13228_v55 = vpack.c.bf16 %v10487_v28, %v10487_v28  ;;  %v9707_v10 = vld [vmem:[#allocation2 + $0x708] sm:$0xff]  ;;  %v7798_v59 = vpop.f32.mrb[200].mxu1 }
 0x77e   : > { %v8855_v49 = vpop.f32.mrb[200].mxu0  ;;  %v10232_v61 = vadd.f32 %v18149_v19, %v9969_v22  ;;  %v9970_v25 = vmul.f32 %v18142_v2, %v9707_v10  ;;  %9450 = vst.msk [vmem:[#allocation2 + $0x718] sm:$0xff] %vm290_vm0, %v9193_v3  ;;  %v7799_v12 = vadd.f32 %v7798_v59, %v18959_v63  ;;  %v7800_v4 = vpop.f32.mrb[201].mxu1  ;;  %v18963_v3 = vld [vmem:[#allocation174_spill] sm:$0xff] }
 0x77f   : > { %11768 = vst.msk [vmem:[%s16578_s15 + $0x37c] sm:$0xf] %vm11544_vm1, %v13228_v55  ;;  %v8857_v15 = vpop.f32.mrb[201].mxu0  ;;  %v7801_v60 = vpop.f32.mrb[202].mxu1 }
 0x780   : > { %v8858_v62 = vpop.f32.mrb[202].mxu0  ;;  %v10488_v24 = vmax.f32 %v10232_v61, 0.0  ;;  %v10233_v34 = vadd.f32 %v18149_v19, %v9970_v25  ;;  %v8856_v35 = vadd.f32 %v8855_v49, %v7799_v12  ;;  %v7802_v13 = vadd.f32 %v7801_v60, %v18960_v45  ;;  %v7803_v23 = vpop.f32.mrb[203].mxu1  ;;  %v779_v61 = vld [vmem:[#allocation2 + $0x740] sm:$0xff] }
 0x781   : > { %v8860_v44 = vpop.f32.mrb[203].mxu0 }
 0x782   : > { %v13229_v20 = vpack.c.bf16 %v10488_v24, %v10488_v24  ;;  %v10489_v7 = vmax.f32 %v10233_v34, 0.0  ;;  %v9194_v16 = vadd.f32 %v8856_v35, %v775_v33  ;;  %v8859_v5 = vadd.f32 %v8858_v62, %v7802_v13  ;;  %v18964_v33 = vld [vmem:[#allocation176_spill] sm:$0xff]  ;;  %v780_v34 = vld [vmem:[#allocation2 + $0x748] sm:$0xff] }
 0x783   : > { %v9708_v27 = vld [vmem:[#allocation2 + $0x710] sm:$0xff] }
 0x784   : > { %11769 = vst.msk [vmem:[%s16578_s15 + $0x380] sm:$0xf] %vm11544_vm1, %v13229_v20  ;;  %v13230_v57 = vpack.c.bf16 %v10489_v7, %v10489_v7  ;;  %v9971_v52 = vmul.f32 %v18142_v2, %v9708_v27  ;;  %v9195_v40 = vadd.f32 %v8859_v5, %v776_v31 }
 0x785   : > { %9451 = vst.msk [vmem:[#allocation2 + $0x720] sm:$0xff] %vm290_vm0, %v9194_v16  ;;  %v9709_v32 = vld [vmem:[#allocation2 + $0x718] sm:$0xff]  ;;  %v7806_v0 = vpop.f32.mrb[204].mxu1 }
 0x786   : > { %v8863_v17 = vpop.f32.mrb[204].mxu0  ;;  %11770 = vst.msk [vmem:[%s16578_s15 + $0x384] sm:$0xf] %vm11544_vm1, %v13230_v57  ;;  %v10234_v46 = vadd.f32 %v18149_v19, %v9971_v52  ;;  %v9972_v54 = vmul.f32 %v18142_v2, %v9709_v32  ;;  %v7807_v37 = vadd.f32 %v7806_v0, %v18961_v58  ;;  %v7808_v48 = vpop.f32.mrb[205].mxu1  ;;  %v778_v2 = vld [vmem:[#allocation2 + $0x738] sm:$0xff] }
 0x787   : > { %9452 = vst.msk [vmem:[#allocation2 + $0x728] sm:$0xff] %vm290_vm0, %v9195_v40  ;;  %v8865_v11 = vpop.f32.mrb[205].mxu0  ;;  %v7809_v50 = vpop.f32.mrb[206].mxu1  ;;  %v18965_v40 = vld [vmem:[#allocation178_spill] sm:$0xff] }
 0x788   : > { %v8866_v51 = vpop.f32.mrb[206].mxu0  ;;  %v10490_v47 = vmax.f32 %v10234_v46, 0.0  ;;  %v10235_v9 = vadd.f32 %v18149_v19, %v9972_v54  ;;  %v8864_v56 = vadd.f32 %v8863_v17, %v7807_v37  ;;  %v7810_v42 = vadd.f32 %v7809_v50, %v18962_v30  ;;  %v7811_v26 = vpop.f32.mrb[207].mxu1  ;;  %v781_v46 = vld [vmem:[#allocation2 + $0x750] sm:$0xff] }
 0x789   : > { %v8868_v36 = vpop.f32.mrb[207].mxu0 }
 0x78a   : > { %v13231_v21 = vpack.c.bf16 %v10490_v47, %v10490_v47  ;;  %v10491_v18 = vmax.f32 %v10235_v9, 0.0  ;;  %v9196_v6 = vadd.f32 %v8864_v56, %v777_v41  ;;  %v8867_v53 = vadd.f32 %v8866_v51, %v7810_v42  ;;  %v18966_v41 = vld [vmem:[#allocation180_spill] sm:$0xff] }
 0x78b   : > { %v782_v9 = vld [vmem:[#allocation2 + $0x758] sm:$0xff] }
 0x78c   : > { %v9710_v14 = vld [vmem:[#allocation2 + $0x720] sm:$0xff]  ;;  %11771 = vst.msk [vmem:[%s16578_s15 + $0x388] sm:$0xf] %vm11544_vm1, %v13231_v21  ;;  %v13232_v29 = vpack.c.bf16 %v10491_v18, %v10491_v18  ;;  %v9197_v19 = vadd.f32 %v8867_v53, %v778_v2 }
 0x78d   : > { %v9973_v8 = vmul.f32 %v18356_v38, %v9710_v14  ;;  %9453 = vst.msk [vmem:[#allocation2 + $0x730] sm:$0xff] %vm290_vm0, %v9196_v6  ;;  %v7814_v1 = vpop.f32.mrb[208].mxu1 }
 0x78e   : > { %v9711_v28 = vld [vmem:[#allocation2 + $0x728] sm:$0xff]  ;;  %v8871_v39 = vpop.f32.mrb[208].mxu0  ;;  %11772 = vst.msk [vmem:[%s16578_s15 + $0x38c] sm:$0xf] %vm11544_vm1, %v13232_v29  ;;  %v7815_v10 = vadd.f32 %v7814_v1, %v18963_v3  ;;  %v7816_v59 = vpop.f32.mrb[209].mxu1 }
 0x78f   : > { %v10236_v55 = vadd.f32 %v18362_v43, %v9973_v8  ;;  %v9974_v22 = vmul.f32 %v18356_v38, %v9711_v28  ;;  %9454 = vst.msk [vmem:[#allocation2 + $0x738] sm:$0xff] %vm290_vm0, %v9197_v19  ;;  %v8873_v49 = vpop.f32.mrb[209].mxu0  ;;  %v7817_v25 = vpop.f32.mrb[210].mxu1  ;;  %v18967_v19 = vld [vmem:[#allocation182_spill] sm:$0xff] }
 0x790   : > { %v8874_v63 = vpop.f32.mrb[210].mxu0  ;;  %v8872_v15 = vadd.f32 %v8871_v39, %v7815_v10  ;;  %v7818_v60 = vadd.f32 %v7817_v25, %v18964_v33  ;;  %v7819_v62 = vpop.f32.mrb[211].mxu1 }
 0x791   : > { %v10492_v12 = vmax.f32 %v10236_v55, 0.0  ;;  %v10237_v4 = vadd.f32 %v18362_v43, %v9974_v22  ;;  %v8876_v24 = vpop.f32.mrb[211].mxu0  ;;  %v783_v55 = vld [vmem:[#allocation2 + $0x760] sm:$0xff] }
 0x792   : > { %v9198_v13 = vadd.f32 %v8872_v15, %v779_v61  ;;  %v8875_v23 = vadd.f32 %v8874_v63, %v7818_v60  ;;  %v18968_v61 = vld [vmem:[#allocation184_spill] sm:$0xff] }
 0x793   : > { %v13233_v35 = vpack.c.bf16 %v10492_v12, %v10492_v12  ;;  %v10493_v45 = vmax.f32 %v10237_v4, 0.0  ;;  %v784_v4 = vld [vmem:[#allocation2 + $0x768] sm:$0xff] }
 0x794   : > { %v9712_v44 = vld [vmem:[#allocation2 + $0x730] sm:$0xff]  ;;  %9455 = vst.msk [vmem:[#allocation2 + $0x740] sm:$0xff] %vm290_vm0, %v9198_v13  ;;  %v9199_v7 = vadd.f32 %v8875_v23, %v780_v34 }
 0x795   : > { %11773 = vst.msk [vmem:[%s16578_s15 + $0x390] sm:$0xf] %vm11544_vm1, %v13233_v35  ;;  %v13234_v31 = vpack.c.bf16 %v10493_v45, %v10493_v45  ;;  %v9975_v20 = vmul.f32 %v18356_v38, %v9712_v44  ;;  %v7822_v5 = vpop.f32.mrb[212].mxu1 }
 0x796   : > { %v9713_v16 = vld [vmem:[#allocation2 + $0x738] sm:$0xff]  ;;  %v8879_v27 = vpop.f32.mrb[212].mxu0  ;;  %9456 = vst.msk [vmem:[#allocation2 + $0x748] sm:$0xff] %vm290_vm0, %v9199_v7  ;;  %v7823_v32 = vadd.f32 %v7822_v5, %v18965_v40  ;;  %v7824_v0 = vpop.f32.mrb[213].mxu1  ;;  %v18969_v7 = vld [vmem:[#allocation186_spill] sm:$0xff] }
 0x797   : > { %11774 = vst.msk [vmem:[%s16578_s15 + $0x394] sm:$0xf] %vm11544_vm1, %v13234_v31  ;;  %v10238_v57 = vadd.f32 %v18362_v43, %v9975_v20  ;;  %v9976_v52 = vmul.f32 %v18356_v38, %v9713_v16  ;;  %v8881_v17 = vpop.f32.mrb[213].mxu0  ;;  %v7825_v54 = vpop.f32.mrb[214].mxu1 }
 0x798   : > { %v8882_v58 = vpop.f32.mrb[214].mxu0  ;;  %v8880_v11 = vadd.f32 %v8879_v27, %v7823_v32  ;;  %v7826_v50 = vadd.f32 %v7825_v54, %v18966_v41  ;;  %v7827_v51 = vpop.f32.mrb[215].mxu1 }
 0x799   : > { %v10494_v37 = vmax.f32 %v10238_v57, 0.0  ;;  %v10239_v48 = vadd.f32 %v18362_v43, %v9976_v52  ;;  %v8884_v47 = vpop.f32.mrb[215].mxu0  ;;  %v785_v57 = vld [vmem:[#allocation2 + $0x770] sm:$0xff] }
 0x79a   : > { %v9200_v42 = vadd.f32 %v8880_v11, %v781_v46  ;;  %v8883_v26 = vadd.f32 %v8882_v58, %v7826_v50  ;;  %v18970_v46 = vld [vmem:[#allocation188_spill] sm:$0xff] }
 0x79b   : > { %v13235_v56 = vpack.c.bf16 %v10494_v37, %v10494_v37  ;;  %v10495_v30 = vmax.f32 %v10239_v48, 0.0  ;;  %v9714_v36 = vld [vmem:[#allocation2 + $0x740] sm:$0xff]  ;;  %v786_v48 = vld [vmem:[#allocation2 + $0x778] sm:$0xff] }
 0x79c   : > { %v9977_v21 = vmul.f32 %v18356_v38, %v9714_v36  ;;  %9457 = vst.msk [vmem:[#allocation2 + $0x750] sm:$0xff] %vm290_vm0, %v9200_v42  ;;  %v9201_v18 = vadd.f32 %v8883_v26, %v782_v9 }
 0x79d   : > { %11775 = vst.msk [vmem:[%s16578_s15 + $0x398] sm:$0xf] %vm11544_vm1, %v13235_v56  ;;  %v13236_v2 = vpack.c.bf16 %v10495_v30, %v10495_v30  ;;  %v9715_v6 = vld [vmem:[#allocation2 + $0x748] sm:$0xff]  ;;  %v7830_v53 = vpop.f32.mrb[216].mxu1 }
 0x79e   : > { %v8887_v14 = vpop.f32.mrb[216].mxu0  ;;  %v10240_v29 = vadd.f32 %v18362_v43, %v9977_v21  ;;  %v9978_v8 = vmul.f32 %v18356_v38, %v9715_v6  ;;  %9458 = vst.msk [vmem:[#allocation2 + $0x758] sm:$0xff] %vm290_vm0, %v9201_v18  ;;  %v7831_v28 = vadd.f32 %v7830_v53, %v18967_v19  ;;  %v7832_v1 = vpop.f32.mrb[217].mxu1  ;;  %v18971_v18 = vld [vmem:[#allocation190_spill] sm:$0xff] }
 0x79f   : > { %11776 = vst.msk [vmem:[%s16578_s15 + $0x39c] sm:$0xf] %vm11544_vm1, %v13236_v2  ;;  %v8889_v39 = vpop.f32.mrb[217].mxu0  ;;  %v7833_v22 = vpop.f32.mrb[218].mxu1 }
 0x7a0   : > { %v8890_v3 = vpop.f32.mrb[218].mxu0  ;;  %v10496_v10 = vmax.f32 %v10240_v29, 0.0  ;;  %v10241_v59 = vadd.f32 %v18362_v43, %v9978_v8  ;;  %v8888_v49 = vadd.f32 %v8887_v14, %v7831_v28  ;;  %v7834_v25 = vadd.f32 %v7833_v22, %v18968_v61  ;;  %v7835_v63 = vpop.f32.mrb[219].mxu1  ;;  %v787_v29 = vld [vmem:[#allocation2 + $0x780] sm:$0xff] }
 0x7a1   : > { %v8892_v12 = vpop.f32.mrb[219].mxu0 }
 0x7a2   : > { %v13237_v15 = vpack.c.bf16 %v10496_v10, %v10496_v10  ;;  %v10497_v33 = vmax.f32 %v10241_v59, 0.0  ;;  %v9202_v60 = vadd.f32 %v8888_v49, %v783_v55  ;;  %v8891_v62 = vadd.f32 %v8890_v3, %v7834_v25  ;;  %v18972_v55 = vld [vmem:[#allocation192_spill] sm:$0xff]  ;;  %v788_v59 = vld [vmem:[#allocation2 + $0x788] sm:$0xff] }
 0x7a3   : > { %v9716_v24 = vld [vmem:[#allocation2 + $0x750] sm:$0xff] }
 0x7a4   : > { %11777 = vst.msk [vmem:[%s16578_s15 + $0x3a0] sm:$0xf] %vm11544_vm1, %v13237_v15  ;;  %v13238_v34 = vpack.c.bf16 %v10497_v33, %v10497_v33  ;;  %v9979_v35 = vmul.f32 %v18356_v38, %v9716_v24  ;;  %v9203_v45 = vadd.f32 %v8891_v62, %v784_v4 }
 0x7a5   : > { %9459 = vst.msk [vmem:[#allocation2 + $0x760] sm:$0xff] %vm290_vm0, %v9202_v60  ;;  %v9717_v13 = vld [vmem:[#allocation2 + $0x758] sm:$0xff]  ;;  %v7838_v23 = vpop.f32.mrb[220].mxu1 }
 0x7a6   : > { %v8895_v44 = vpop.f32.mrb[220].mxu0  ;;  %11778 = vst.msk [vmem:[%s16578_s15 + $0x3a4] sm:$0xf] %vm11544_vm1, %v13238_v34  ;;  %v10242_v31 = vadd.f32 %v18362_v43, %v9979_v35  ;;  %v9980_v20 = vmul.f32 %v18356_v38, %v9717_v13  ;;  %v7839_v16 = vadd.f32 %v7838_v23, %v18969_v7  ;;  %v7840_v5 = vpop.f32.mrb[221].mxu1 }
 0x7a7   : > { %9460 = vst.msk [vmem:[#allocation2 + $0x768] sm:$0xff] %vm290_vm0, %v9203_v45  ;;  %v8897_v27 = vpop.f32.mrb[221].mxu0  ;;  %v7841_v52 = vpop.f32.mrb[222].mxu1  ;;  %v18973_v45 = vld [vmem:[#allocation194_spill] sm:$0xff] }
 0x7a8   : > { %v8898_v40 = vpop.f32.mrb[222].mxu0  ;;  %v10498_v32 = vmax.f32 %v10242_v31, 0.0  ;;  %v10243_v0 = vadd.f32 %v18362_v43, %v9980_v20  ;;  %v8896_v17 = vadd.f32 %v8895_v44, %v7839_v16  ;;  %v7842_v54 = vadd.f32 %v7841_v52, %v18970_v46  ;;  %v7843_v58 = vpop.f32.mrb[223].mxu1  ;;  %v789_v31 = vld [vmem:[#allocation2 + $0x790] sm:$0xff] }
 0x7a9   : > { %v8900_v37 = vpop.f32.mrb[223].mxu0 }
 0x7aa   : > { %v13239_v11 = vpack.c.bf16 %v10498_v32, %v10498_v32  ;;  %v10499_v41 = vmax.f32 %v10243_v0, 0.0  ;;  %v9204_v50 = vadd.f32 %v8896_v17, %v785_v57  ;;  %v8899_v51 = vadd.f32 %v8898_v40, %v7842_v54  ;;  %v18974_v57 = vld [vmem:[#allocation196_spill] sm:$0xff] }
 0x7ab   : > { %v790_v0 = vld [vmem:[#allocation2 + $0x798] sm:$0xff] }
 0x7ac   : > { %v9718_v47 = vld [vmem:[#allocation2 + $0x760] sm:$0xff]  ;;  %11779 = vst.msk [vmem:[%s16578_s15 + $0x3a8] sm:$0xf] %vm11544_vm1, %v13239_v11  ;;  %v13240_v9 = vpack.c.bf16 %v10499_v41, %v10499_v41  ;;  %v9205_v30 = vadd.f32 %v8899_v51, %v786_v48 }
 0x7ad   : > { %v9981_v56 = vmul.f32 %v18356_v38, %v9718_v47  ;;  %9461 = vst.msk [vmem:[#allocation2 + $0x770] sm:$0xff] %vm290_vm0, %v9204_v50  ;;  %v7846_v26 = vpop.f32.mrb[224].mxu1 }
 0x7ae   : > { %v9719_v42 = vld [vmem:[#allocation2 + $0x768] sm:$0xff]  ;;  %v8903_v36 = vpop.f32.mrb[224].mxu0  ;;  %11780 = vst.msk [vmem:[%s16578_s15 + $0x3ac] sm:$0xf] %vm11544_vm1, %v13240_v9  ;;  %v7847_v6 = vadd.f32 %v7846_v26, %v18971_v18  ;;  %v7848_v53 = vpop.f32.mrb[225].mxu1 }
 0x7af   : > { %v10244_v2 = vadd.f32 %v18362_v43, %v9981_v56  ;;  %v9982_v21 = vmul.f32 %v18356_v38, %v9719_v42  ;;  %9462 = vst.msk [vmem:[#allocation2 + $0x778] sm:$0xff] %vm290_vm0, %v9205_v30  ;;  %v8905_v14 = vpop.f32.mrb[225].mxu0  ;;  %v7849_v8 = vpop.f32.mrb[226].mxu1  ;;  %v18975_v30 = vld [vmem:[#allocation198_spill] sm:$0xff] }
 0x7b0   : > { %v8906_v19 = vpop.f32.mrb[226].mxu0  ;;  %v8904_v39 = vadd.f32 %v8903_v36, %v7847_v6  ;;  %v7850_v22 = vadd.f32 %v7849_v8, %v18972_v55  ;;  %v7851_v3 = vpop.f32.mrb[227].mxu1 }
 0x7b1   : > { %v10500_v28 = vmax.f32 %v10244_v2, 0.0  ;;  %v10245_v1 = vadd.f32 %v18362_v43, %v9982_v21  ;;  %v8908_v10 = vpop.f32.mrb[227].mxu0  ;;  %v791_v2 = vld [vmem:[#allocation2 + $0x7a0] sm:$0xff] }
 0x7b2   : > { %v9206_v25 = vadd.f32 %v8904_v39, %v787_v29  ;;  %v8907_v63 = vadd.f32 %v8906_v19, %v7850_v22  ;;  %v18976_v29 = vld [vmem:[#allocation200_spill] sm:$0xff] }
 0x7b3   : > { %v13241_v49 = vpack.c.bf16 %v10500_v28, %v10500_v28  ;;  %v10501_v61 = vmax.f32 %v10245_v1, 0.0  ;;  %v792_v1 = vld [vmem:[#allocation2 + $0x7a8] sm:$0xff] }
 0x7b4   : > { %v9720_v12 = vld [vmem:[#allocation2 + $0x770] sm:$0xff]  ;;  %9463 = vst.msk [vmem:[#allocation2 + $0x780] sm:$0xff] %vm290_vm0, %v9206_v25  ;;  %v9207_v33 = vadd.f32 %v8907_v63, %v788_v59 }
 0x7b5   : > { %11781 = vst.msk [vmem:[%s16578_s15 + $0x3b0] sm:$0xf] %vm11544_vm1, %v13241_v49  ;;  %v13242_v4 = vpack.c.bf16 %v10501_v61, %v10501_v61  ;;  %v9983_v15 = vmul.f32 %v18356_v38, %v9720_v12  ;;  %v7854_v62 = vpop.f32.mrb[228].mxu1 }
 0x7b6   : > { %v9721_v60 = vld [vmem:[#allocation2 + $0x778] sm:$0xff]  ;;  %v8911_v24 = vpop.f32.mrb[228].mxu0  ;;  %9464 = vst.msk [vmem:[#allocation2 + $0x788] sm:$0xff] %vm290_vm0, %v9207_v33  ;;  %v7855_v13 = vadd.f32 %v7854_v62, %v18973_v45  ;;  %v7856_v23 = vpop.f32.mrb[229].mxu1  ;;  %v18977_v33 = vld [vmem:[#allocation202_spill] sm:$0xff] }
 0x7b7   : > { %11782 = vst.msk [vmem:[%s16578_s15 + $0x3b4] sm:$0xf] %vm11544_vm1, %v13242_v4  ;;  %v10246_v34 = vadd.f32 %v18362_v43, %v9983_v15  ;;  %v9984_v35 = vmul.f32 %v18356_v38, %v9721_v60  ;;  %v8913_v44 = vpop.f32.mrb[229].mxu0  ;;  %v7857_v20 = vpop.f32.mrb[230].mxu1 }
 0x7b8   : > { %v8914_v7 = vpop.f32.mrb[230].mxu0  ;;  %v8912_v27 = vadd.f32 %v8911_v24, %v7855_v13  ;;  %v7858_v52 = vadd.f32 %v7857_v20, %v18974_v57  ;;  %v7859_v40 = vpop.f32.mrb[231].mxu1 }
 0x7b9   : > { %v10502_v16 = vmax.f32 %v10246_v34, 0.0  ;;  %v10247_v5 = vadd.f32 %v18362_v43, %v9984_v35  ;;  %v8916_v32 = vpop.f32.mrb[231].mxu0  ;;  %v793_v34 = vld [vmem:[#allocation2 + $0x7b0] sm:$0xff] }
 0x7ba   : > { %v9208_v54 = vadd.f32 %v8912_v27, %v789_v31  ;;  %v8915_v58 = vadd.f32 %v8914_v7, %v7858_v52  ;;  %v18978_v31 = vld [vmem:[#allocation204_spill] sm:$0xff] }
 0x7bb   : > { %v13243_v17 = vpack.c.bf16 %v10502_v16, %v10502_v16  ;;  %v10503_v46 = vmax.f32 %v10247_v5, 0.0  ;;  %v9722_v37 = vld [vmem:[#allocation2 + $0x780] sm:$0xff]  ;;  %v794_v5 = vld [vmem:[#allocation2 + $0x7b8] sm:$0xff] }
 0x7bc   : > { %v9985_v11 = vmul.f32 %v18356_v38, %v9722_v37  ;;  %9465 = vst.msk [vmem:[#allocation2 + $0x790] sm:$0xff] %vm290_vm0, %v9208_v54  ;;  %v9209_v41 = vadd.f32 %v8915_v58, %v790_v0 }
 0x7bd   : > { %11783 = vst.msk [vmem:[%s16578_s15 + $0x3b8] sm:$0xf] %vm11544_vm1, %v13243_v17  ;;  %v13244_v48 = vpack.c.bf16 %v10503_v46, %v10503_v46  ;;  %v9723_v50 = vld [vmem:[#allocation2 + $0x788] sm:$0xff]  ;;  %v7862_v51 = vpop.f32.mrb[232].mxu1 }
 0x7be   : > { %v8919_v47 = vpop.f32.mrb[232].mxu0  ;;  %v10248_v9 = vadd.f32 %v18362_v43, %v9985_v11  ;;  %v9986_v56 = vmul.f32 %v18356_v38, %v9723_v50  ;;  %9466 = vst.msk [vmem:[#allocation2 + $0x798] sm:$0xff] %vm290_vm0, %v9209_v41  ;;  %v7863_v42 = vadd.f32 %v7862_v51, %v18975_v30  ;;  %v7864_v26 = vpop.f32.mrb[233].mxu1  ;;  %v18979_v41 = vld [vmem:[#allocation206_spill] sm:$0xff] }
 0x7bf   : > { %11784 = vst.msk [vmem:[%s16578_s15 + $0x3bc] sm:$0xf] %vm11544_vm1, %v13244_v48  ;;  %v8921_v36 = vpop.f32.mrb[233].mxu0  ;;  %v7865_v21 = vpop.f32.mrb[234].mxu1 }
 0x7c0   : > { %v8922_v18 = vpop.f32.mrb[234].mxu0  ;;  %v10504_v6 = vmax.f32 %v10248_v9, 0.0  ;;  %v10249_v53 = vadd.f32 %v18362_v43, %v9986_v56  ;;  %v8920_v14 = vadd.f32 %v8919_v47, %v7863_v42  ;;  %v7866_v8 = vadd.f32 %v7865_v21, %v18976_v29  ;;  %v7867_v19 = vpop.f32.mrb[235].mxu1  ;;  %v795_v9 = vld [vmem:[#allocation2 + $0x7c0] sm:$0xff] }
 0x7c1   : > { %v8924_v28 = vpop.f32.mrb[235].mxu0 }
 0x7c2   : > { %v13245_v39 = vpack.c.bf16 %v10504_v6, %v10504_v6  ;;  %v10505_v55 = vmax.f32 %v10249_v53, 0.0  ;;  %v9210_v22 = vadd.f32 %v8920_v14, %v791_v2  ;;  %v8923_v3 = vadd.f32 %v8922_v18, %v7866_v8  ;;  %v18980_v2 = vld [vmem:[#allocation208_spill] sm:$0xff]  ;;  %v796_v53 = vld [vmem:[#allocation2 + $0x7c8] sm:$0xff] }
 0x7c3   : > { %v9724_v10 = vld [vmem:[#allocation2 + $0x790] sm:$0xff] }
 0x7c4   : > { %11785 = vst.msk [vmem:[%s16578_s15 + $0x3c0] sm:$0xf] %vm11544_vm1, %v13245_v39  ;;  %v13246_v59 = vpack.c.bf16 %v10505_v55, %v10505_v55  ;;  %v9987_v49 = vmul.f32 %v18356_v38, %v9724_v10  ;;  %v9211_v61 = vadd.f32 %v8923_v3, %v792_v1 }
 0x7c5   : > { %9467 = vst.msk [vmem:[#allocation2 + $0x7a0] sm:$0xff] %vm290_vm0, %v9210_v22  ;;  %v9725_v25 = vld [vmem:[#allocation2 + $0x798] sm:$0xff]  ;;  %v7870_v63 = vpop.f32.mrb[236].mxu1 }
 0x7c6   : > { %v8927_v12 = vpop.f32.mrb[236].mxu0  ;;  %11786 = vst.msk [vmem:[%s16578_s15 + $0x3c4] sm:$0xf] %vm11544_vm1, %v13246_v59  ;;  %v10250_v4 = vadd.f32 %v18362_v43, %v9987_v49  ;;  %v9988_v15 = vmul.f32 %v18356_v38, %v9725_v25  ;;  %v7871_v60 = vadd.f32 %v7870_v63, %v18977_v33  ;;  %v7872_v62 = vpop.f32.mrb[237].mxu1 }
 0x7c7   : > { %9468 = vst.msk [vmem:[#allocation2 + $0x7a8] sm:$0xff] %vm290_vm0, %v9211_v61  ;;  %v8929_v24 = vpop.f32.mrb[237].mxu0  ;;  %v7873_v35 = vpop.f32.mrb[238].mxu1  ;;  %v18981_v61 = vld [vmem:[#allocation210_spill] sm:$0xff] }
 0x7c8   : > { %v8930_v45 = vpop.f32.mrb[238].mxu0  ;;  %v10506_v13 = vmax.f32 %v10250_v4, 0.0  ;;  %v10251_v23 = vadd.f32 %v18362_v43, %v9988_v15  ;;  %v8928_v44 = vadd.f32 %v8927_v12, %v7871_v60  ;;  %v7874_v20 = vadd.f32 %v7873_v35, %v18978_v31  ;;  %v7875_v7 = vpop.f32.mrb[239].mxu1  ;;  %v797_v4 = vld [vmem:[#allocation2 + $0x7d0] sm:$0xff] }
 0x7c9   : > { %v8932_v16 = vpop.f32.mrb[239].mxu0 }
 0x7ca   : > { %v13247_v27 = vpack.c.bf16 %v10506_v13, %v10506_v13  ;;  %v10507_v57 = vmax.f32 %v10251_v23, 0.0  ;;  %v9212_v52 = vadd.f32 %v8928_v44, %v793_v34  ;;  %v8931_v40 = vadd.f32 %v8930_v45, %v7874_v20  ;;  %v18982_v34 = vld [vmem:[#allocation212_spill] sm:$0xff] }
 0x7cb   : > { %v798_v23 = vld [vmem:[#allocation2 + $0x7d8] sm:$0xff] }
 0x7cc   : > { %v9726_v32 = vld [vmem:[#allocation2 + $0x7a0] sm:$0xff]  ;;  %11787 = vst.msk [vmem:[%s16578_s15 + $0x3c8] sm:$0xf] %vm11544_vm1, %v13247_v27  ;;  %v13248_v0 = vpack.c.bf16 %v10507_v57, %v10507_v57  ;;  %v9213_v46 = vadd.f32 %v8931_v40, %v794_v5 }
 0x7cd   : > { %v9989_v17 = vmul.f32 %v18356_v38, %v9726_v32  ;;  %9469 = vst.msk [vmem:[#allocation2 + $0x7b0] sm:$0xff] %vm290_vm0, %v9212_v52  ;;  %v7878_v58 = vpop.f32.mrb[240].mxu1 }
 0x7ce   : > { %v9727_v54 = vld [vmem:[#allocation2 + $0x7a8] sm:$0xff]  ;;  %v8935_v37 = vpop.f32.mrb[240].mxu0  ;;  %11788 = vst.msk [vmem:[%s16578_s15 + $0x3cc] sm:$0xf] %vm11544_vm1, %v13248_v0  ;;  %v7879_v50 = vadd.f32 %v7878_v58, %v18979_v41  ;;  %v7880_v51 = vpop.f32.mrb[241].mxu1 }
 0x7cf   : > { %v10252_v48 = vadd.f32 %v18362_v43, %v9989_v17  ;;  %v9990_v11 = vmul.f32 %v18356_v38, %v9727_v54  ;;  %9470 = vst.msk [vmem:[#allocation2 + $0x7b8] sm:$0xff] %vm290_vm0, %v9213_v46  ;;  %v8937_v47 = vpop.f32.mrb[241].mxu0  ;;  %v7881_v56 = vpop.f32.mrb[242].mxu1  ;;  %v18983_v46 = vld [vmem:[#allocation214_spill] sm:$0xff] }
 0x7d0   : > { %v8938_v30 = vpop.f32.mrb[242].mxu0  ;;  %v8936_v36 = vadd.f32 %v8935_v37, %v7879_v50  ;;  %v7882_v21 = vadd.f32 %v7881_v56, %v18980_v2  ;;  %v7883_v18 = vpop.f32.mrb[243].mxu1 }
 0x7d1   : > { %v10508_v42 = vmax.f32 %v10252_v48, 0.0  ;;  %v10253_v26 = vadd.f32 %v18362_v43, %v9990_v11  ;;  %v8940_v6 = vpop.f32.mrb[243].mxu0  ;;  %v799_v48 = vld [vmem:[#allocation2 + $0x7e0] sm:$0xff] }
 0x7d2   : > { %v9214_v8 = vadd.f32 %v8936_v36, %v795_v9  ;;  %v8939_v19 = vadd.f32 %v8938_v30, %v7882_v21  ;;  %v18984_v9 = vld [vmem:[#allocation216_spill] sm:$0xff] }
 0x7d3   : > { %v13249_v14 = vpack.c.bf16 %v10508_v42, %v10508_v42  ;;  %v10509_v29 = vmax.f32 %v10253_v26, 0.0  ;;  %v800_v26 = vld [vmem:[#allocation2 + $0x7e8] sm:$0xff] }
 0x7d4   : > { %v9728_v28 = vld [vmem:[#allocation2 + $0x7b0] sm:$0xff]  ;;  %9471 = vst.msk [vmem:[#allocation2 + $0x7c0] sm:$0xff] %vm290_vm0, %v9214_v8  ;;  %v9215_v55 = vadd.f32 %v8939_v19, %v796_v53 }
 0x7d5   : > { %11789 = vst.msk [vmem:[%s16578_s15 + $0x3d0] sm:$0xf] %vm11544_vm1, %v13249_v14  ;;  %v13250_v1 = vpack.c.bf16 %v10509_v29, %v10509_v29  ;;  %v9991_v39 = vmul.f32 %v18356_v38, %v9728_v28  ;;  %v7886_v3 = vpop.f32.mrb[244].mxu1 }
 0x7d6   : > { %v9729_v22 = vld [vmem:[#allocation2 + $0x7b8] sm:$0xff]  ;;  %v8943_v10 = vpop.f32.mrb[244].mxu0  ;;  %9472 = vst.msk [vmem:[#allocation2 + $0x7c8] sm:$0xff] %vm290_vm0, %v9215_v55  ;;  %v7887_v25 = vadd.f32 %v7886_v3, %v18981_v61  ;;  %v7888_v63 = vpop.f32.mrb[245].mxu1  ;;  %v18985_v55 = vld [vmem:[#allocation218_spill] sm:$0xff] }
 0x7d7   : > { %11790 = vst.msk [vmem:[%s16578_s15 + $0x3d4] sm:$0xf] %vm11544_vm1, %v13250_v1  ;;  %v10254_v59 = vadd.f32 %v18362_v43, %v9991_v39  ;;  %v9992_v49 = vmul.f32 %v18356_v38, %v9729_v22  ;;  %v8945_v12 = vpop.f32.mrb[245].mxu0  ;;  %v7889_v15 = vpop.f32.mrb[246].mxu1 }
 0x7d8   : > { %v8946_v33 = vpop.f32.mrb[246].mxu0  ;;  %v8944_v24 = vadd.f32 %v8943_v10, %v7887_v25  ;;  %v7890_v35 = vadd.f32 %v7889_v15, %v18982_v34  ;;  %v7891_v45 = vpop.f32.mrb[247].mxu1 }
 0x7d9   : > { %v10510_v60 = vmax.f32 %v10254_v59, 0.0  ;;  %v10255_v62 = vadd.f32 %v18362_v43, %v9992_v49  ;;  %v8948_v13 = vpop.f32.mrb[247].mxu0  ;;  %v801_v59 = vld [vmem:[#allocation2 + $0x7f0] sm:$0xff] }
 0x7da   : > { %v9216_v20 = vadd.f32 %v8944_v24, %v797_v4  ;;  %v8947_v7 = vadd.f32 %v8946_v33, %v7890_v35  ;;  %v18986_v4 = vld [vmem:[#allocation220_spill] sm:$0xff] }
 0x7db   : > { %v13251_v44 = vpack.c.bf16 %v10510_v60, %v10510_v60  ;;  %v10511_v31 = vmax.f32 %v10255_v62, 0.0  ;;  %v9730_v16 = vld [vmem:[#allocation2 + $0x7c0] sm:$0xff]  ;;  %v802_v62 = vld [vmem:[#allocation2 + $0x7f8] sm:$0xff] }
 0x7dc   : > { %v9993_v27 = vmul.f32 %v18356_v38, %v9730_v16  ;;  %9473 = vst.msk [vmem:[#allocation2 + $0x7d0] sm:$0xff] %vm290_vm0, %v9216_v20  ;;  %v9217_v57 = vadd.f32 %v8947_v7, %v798_v23 }
 0x7dd   : > { %11791 = vst.msk [vmem:[%s16578_s15 + $0x3d8] sm:$0xf] %vm11544_vm1, %v13251_v44  ;;  %v13252_v5 = vpack.c.bf16 %v10511_v31, %v10511_v31  ;;  %v9731_v52 = vld [vmem:[#allocation2 + $0x7c8] sm:$0xff]  ;;  %v7894_v40 = vpop.f32.mrb[248].mxu1 }
 0x7de   : > { %v8951_v32 = vpop.f32.mrb[248].mxu0  ;;  %v10256_v0 = vadd.f32 %v18362_v43, %v9993_v27  ;;  %v9994_v17 = vmul.f32 %v18356_v38, %v9731_v52  ;;  %9474 = vst.msk [vmem:[#allocation2 + $0x7d8] sm:$0xff] %vm290_vm0, %v9217_v57  ;;  %v7895_v54 = vadd.f32 %v7894_v40, %v18983_v46  ;;  %v7896_v58 = vpop.f32.mrb[249].mxu1 }
 0x7df   : > { %11792 = vst.msk [vmem:[%s16578_s15 + $0x3dc] sm:$0xf] %vm11544_vm1, %v13252_v5  ;;  %v8953_v37 = vpop.f32.mrb[249].mxu0  ;;  %v7897_v11 = vpop.f32.mrb[250].mxu1 }
 0x7e0   : > { %v8954_v41 = vpop.f32.mrb[250].mxu0  ;;  %v10512_v50 = vmax.f32 %v10256_v0, 0.0  ;;  %v10257_v51 = vadd.f32 %v18362_v43, %v9994_v17  ;;  %v8952_v47 = vadd.f32 %v8951_v32, %v7895_v54  ;;  %v7898_v56 = vadd.f32 %v7897_v11, %v18984_v9  ;;  %v7899_v30 = vpop.f32.mrb[251].mxu1 }
 0x7e1   : > { %v8956_v42 = vpop.f32.mrb[251].mxu0 }
 0x7e2   : > { %v13253_v36 = vpack.c.bf16 %v10512_v50, %v10512_v50  ;;  %v10513_v2 = vmax.f32 %v10257_v51, 0.0  ;;  %v9218_v21 = vadd.f32 %v8952_v47, %v799_v48  ;;  %v8955_v18 = vadd.f32 %v8954_v41, %v7898_v56 }
 0x7e3   : > { %v9732_v6 = vld [vmem:[#allocation2 + $0x7d0] sm:$0xff] }
 0x7e4   : > { %11793 = vst.msk [vmem:[%s16578_s15 + $0x3e0] sm:$0xf] %vm11544_vm1, %v13253_v36  ;;  %v13254_v53 = vpack.c.bf16 %v10513_v2, %v10513_v2  ;;  %v9995_v14 = vmul.f32 %v18356_v38, %v9732_v6  ;;  %v9219_v29 = vadd.f32 %v8955_v18, %v800_v26 }
 0x7e5   : > { %9475 = vst.msk [vmem:[#allocation2 + $0x7e0] sm:$0xff] %vm290_vm0, %v9218_v21  ;;  %v9733_v8 = vld [vmem:[#allocation2 + $0x7d8] sm:$0xff]  ;;  %v7902_v19 = vpop.f32.mrb[252].mxu1 }
 0x7e6   : > { %v8959_v28 = vpop.f32.mrb[252].mxu0  ;;  %11794 = vst.msk [vmem:[%s16578_s15 + $0x3e4] sm:$0xf] %vm11544_vm1, %v13254_v53  ;;  %v10258_v1 = vadd.f32 %v18362_v43, %v9995_v14  ;;  %v9996_v39 = vmul.f32 %v18356_v38, %v9733_v8  ;;  %v7903_v22 = vadd.f32 %v7902_v19, %v18985_v55  ;;  %v7904_v3 = vpop.f32.mrb[253].mxu1 }
 0x7e7   : > { %9476 = vst.msk [vmem:[#allocation2 + $0x7e8] sm:$0xff] %vm290_vm0, %v9219_v29  ;;  %v8961_v10 = vpop.f32.mrb[253].mxu0  ;;  %v7905_v49 = vpop.f32.mrb[254].mxu1 }
 0x7e8   : > { %v8962_v61 = vpop.f32.mrb[254].mxu0  ;;  %v10514_v25 = vmax.f32 %v10258_v1, 0.0  ;;  %v10259_v63 = vadd.f32 %v18362_v43, %v9996_v39  ;;  %v8960_v12 = vadd.f32 %v8959_v28, %v7903_v22  ;;  %v7906_v15 = vadd.f32 %v7905_v49, %v18986_v4  ;;  %v7907_v33 = vpop.f32.mrb[255].mxu1 }
 0x7e9   : > { %v8964_v60 = vpop.f32.mrb[255].mxu0 }
 0x7ea   : > { %v13255_v24 = vpack.c.bf16 %v10514_v25, %v10514_v25  ;;  %v10515_v34 = vmax.f32 %v10259_v63, 0.0  ;;  %v9220_v35 = vadd.f32 %v8960_v12, %v801_v59  ;;  %v8963_v45 = vadd.f32 %v8962_v61, %v7906_v15 }
 0x7ec   : > { %v9734_v13 = vld [vmem:[#allocation2 + $0x7e0] sm:$0xff]  ;;  %11795 = vst.msk [vmem:[%s16578_s15 + $0x3e8] sm:$0xf] %vm11544_vm1, %v13255_v24  ;;  %v13256_v23 = vpack.c.bf16 %v10515_v34, %v10515_v34  ;;  %v9221_v31 = vadd.f32 %v8963_v45, %v802_v62 }
 0x7ed   : > { %v9997_v44 = vmul.f32 %v18356_v38, %v9734_v13  ;;  %9477 = vst.msk [vmem:[#allocation2 + $0x7f0] sm:$0xff] %vm290_vm0, %v9220_v35 }
 0x7ee   : > { %v9735_v20 = vld [vmem:[#allocation2 + $0x7e8] sm:$0xff]  ;;  %11796 = vst.msk [vmem:[%s16578_s15 + $0x3ec] sm:$0xf] %vm11544_vm1, %v13256_v23 }
 0x7ef   : > { %v10260_v7 = vadd.f32 %v18362_v43, %v9997_v44  ;;  %v9998_v16 = vmul.f32 %v18356_v38, %v9735_v20  ;;  %9478 = vst.msk [vmem:[#allocation2 + $0x7f8] sm:$0xff] %vm290_vm0, %v9221_v31 }
 0x7f1   : > { %v10516_v5 = vmax.f32 %v10260_v7, 0.0  ;;  %v10261_v27 = vadd.f32 %v18362_v43, %v9998_v16 }
 0x7f3   : > { %v13257_v57 = vpack.c.bf16 %v10516_v5, %v10516_v5  ;;  %v10517_v52 = vmax.f32 %v10261_v27, 0.0 }
 0x7f4   : > { %v9736_v40 = vld [vmem:[#allocation2 + $0x7f0] sm:$0xff] }
 0x7f5   : > { %11797 = vst.msk [vmem:[%s16578_s15 + $0x3f0] sm:$0xf] %vm11544_vm1, %v13257_v57  ;;  %v13258_v32 = vpack.c.bf16 %v10517_v52, %v10517_v52  ;;  %v9999_v0 = vmul.f32 %v18356_v38, %v9736_v40 }
 0x7f6   : > { %v9737_v17 = vld [vmem:[#allocation2 + $0x7f8] sm:$0xff] }
 0x7f7   : > { %11798 = vst.msk [vmem:[%s16578_s15 + $0x3f4] sm:$0xf] %vm11544_vm1, %v13258_v32  ;;  %v10262_v46 = vadd.f32 %v18362_v43, %v9999_v0  ;;  %v10000_v54 = vmul.f32 %v18356_v38, %v9737_v17 }
 0x7f9   : > { %v10518_v58 = vmax.f32 %v10262_v46, 0.0  ;;  %v10263_v37 = vadd.f32 %v18362_v43, %v10000_v54 }
 0x7fb   : > { %v13259_v48 = vpack.c.bf16 %v10518_v58, %v10518_v58  ;;  %v10519_v11 = vmax.f32 %v10263_v37, 0.0 }
 0x7fd   : > { %11799 = vst.msk [vmem:[%s16578_s15 + $0x3f8] sm:$0xf] %vm11544_vm1, %v13259_v48  ;;  %v13260_v41 = vpack.c.bf16 %v10519_v11, %v10519_v11 }
 0x7ff   : > { %11800 = vst.msk [vmem:[%s16578_s15 + $0x3fc] sm:$0xf] %vm11544_vm1, %v13260_v41 }
 0x800 PF: > { %s18_s20 = sadd.s32 1, %s14732_s20   ;;  %s18987_s15 = smov %s14716_s16 }
 0x801   : > { %p15_p5 = scmp.ge.s32.totalorder %s18_s20, 4   ;;  %s18988_s16 = smov %s14720_s17 }
 0x802   : > { %s18989_s17 = smov %s14888_s5  ;;  %s18990_s18 = smov %s14728_s19 }
 0x803   : > { %s18991_s19 = smov %s18993_s26  ;;  %17 = sbr.rel (!%p15_p5) target bundleno = 5 (0x5), region = 95 }
 0x80a   :  { %11823 = vsyncpa [#allocation4], 1 }
 0x80b   :  { %11825 = vsyncpa [#allocation4 + $0x1], 1 }
 0x80c   :  { %11826 = vsyncpa [#allocation6], 1 }

</bundles_post_ra>
